<compile_context>
chip_gen: v5e
topology: v5e:2x2
jax: 0.10.0
libtpu: 0.0.40
codegen_flags: <defaults>
</compile_context>

<pallas_src>
import numpy as np
import jax
import jax.numpy as jnp
from jax import lax
from jax.experimental import pallas as pl
from jax.experimental.pallas import tpu as pltpu


# ---------------------------------------------------------------------------
# Static network dimensions (Linear(1600=64*5*5, ...) implies 28x28x1 input).
# ---------------------------------------------------------------------------
IMG = 28
K1, C1 = 5, 32
CONV1_HW = IMG - K1 + 1          # 24
POOL1_HW = CONV1_HW // 2         # 12
K2, C2 = 3, 64
CONV2_HW = POOL1_HW - K2 + 1     # 10
POOL2_HW = CONV2_HW // 2         # 5
HIDDEN = 512
NUM_CLASSES = 10

W_COLS1 = 2 * POOL1_HW * C1      # 768  = conv1 lane-dense width (dw, qw, c)
W_ROWS2 = POOL1_HW * C1          # 384  = pool1 lane-dense width (qw, c)
W_COLS2 = 2 * POOL2_HW * C2      # 640  = conv2 lane-dense width (dw, qw, co)
P2_COLS = POOL2_HW * C2          # 320  = pool2 lane-dense width (qw, co)


# ---------------------------------------------------------------------------
# Fused Pallas kernel: whole forward pass for one batch element per grid step.
# ---------------------------------------------------------------------------
def _even_row_selector(num_out, num_in):
    """Exact 0/1 matrix selecting rows 0,2,4,... (row gather as an MXU dot)."""
    r = lax.broadcasted_iota(jnp.int32, (num_out, num_in), 0)
    c = lax.broadcasted_iota(jnp.int32, (num_out, num_in), 1)
    return (c == 2 * r).astype(jnp.float32)


def fused_cnn_kernel(x_ref, w1b_ref, b1_ref, w2b_ref, b2_ref,
                     fc1w_ref, fc1b_ref, fc2w_ref, fc2b_ref,
                     fc3w_ref, fc3b_ref, o_ref):
    f32 = jnp.float32
    bf16 = jnp.bfloat16
    x = x_ref[0]                                                   # (28, 28)

    # ---- conv1 (MXU, banded weights). Columns ordered (dw, qw, c) so that the
    #      horizontal half of maxpool1 is a single contiguous halves-max. ------
    y1 = jnp.zeros((CONV1_HW, W_COLS1), f32)                       # (24, 768)
    for kh in range(K1):
        y1 = y1 + jnp.dot(x[kh:kh + CONV1_HW, :], w1b_ref[kh],
                          preferred_element_type=f32)
    y1 = y1 + b1_ref[...]

    # ---- maxpool1 -> p1[po, qw*32 + c], shape (12, 384) ----------------------
    ya = jnp.maximum(y1[0:CONV1_HW - 1, :], y1[1:CONV1_HW, :])     # (23, 768)
    half = POOL1_HW * C1                                           # 384
    yb = jnp.maximum(ya[:, 0:half], ya[:, half:2 * half])          # (23, 384)
    p1 = jnp.dot(_even_row_selector(POOL1_HW, CONV1_HW - 1), yb,
                 preferred_element_type=f32)                       # (12, 384)

    # ---- conv2 (MXU, banded weights (3, 384, 640)): 3 dots of (10,384)@(384,640),
    #      output columns ordered (dw, qw, co) so maxpool2's horizontal half is
    #      again a contiguous halves-max.  No lane slices, no concatenate. ------
    y2 = jnp.zeros((CONV2_HW, W_COLS2), f32)                       # (10, 640)
    for kh in range(K2):
        y2 = y2 + jnp.dot(p1[kh:kh + CONV2_HW, :], w2b_ref[kh],
                          preferred_element_type=f32)
    y2 = y2 + b2_ref[...]

    # ---- maxpool2 -> p2[qo, qw*64 + co], shape (5, 320) ----------------------
    ya2 = jnp.maximum(y2[0:CONV2_HW - 1, :], y2[1:CONV2_HW, :])    # (9, 640)
    half2 = POOL2_HW * C2                                          # 320
    yb2 = jnp.maximum(ya2[:, 0:half2], ya2[:, half2:2 * half2])    # (9, 320)
    p2 = jnp.dot(_even_row_selector(POOL2_HW, CONV2_HW - 1), yb2,
                 preferred_element_type=f32)                       # (5, 320)

    # ---- dense stack: bf16 weights, f32 accumulation on the MXU. fc1_w rows
    #      were pre-permuted host-side to match the (qo, qw, co) flatten order. -
    p2b = p2.astype(bf16)
    acc1 = jnp.zeros((1, HIDDEN), f32)
    for qo in range(POOL2_HW):
        acc1 = acc1 + jnp.dot(p2b[qo:qo + 1, :], fc1w_ref[qo],
                              preferred_element_type=f32)
    h1 = jnp.maximum(acc1 + fc1b_ref[...], 0.0)
    h2 = jnp.dot(h1.astype(bf16), fc2w_ref[...], preferred_element_type=f32)
    h2 = jnp.maximum(h2 + fc2b_ref[...], 0.0)
    logits = jnp.dot(h2.astype(bf16), fc3w_ref[...], preferred_element_type=f32)
    o_ref[0] = logits + fc3b_ref[...]


# ---------------------------------------------------------------------------
# Wrapper: one pallas_call for the whole network.
# ---------------------------------------------------------------------------
@jax.jit
def neural_network2_forward(x_nchw, prep):
    n = x_nchw.shape[0]
    x2 = x_nchw[:, 0, :, :]                                        # (N, 28, 28)

    out = pl.pallas_call(
        fused_cnn_kernel,
        out_shape=jax.ShapeDtypeStruct((n, 1, NUM_CLASSES), jnp.float32),
        grid=(n,),
        in_specs=[
            pl.BlockSpec((1, IMG, IMG), lambda i: (i, 0, 0)),              # x
            pl.BlockSpec((K1, IMG, W_COLS1), lambda i: (0, 0, 0)),         # w1 banded
            pl.BlockSpec((1, W_COLS1), lambda i: (0, 0)),                  # b1 (tiled)
            pl.BlockSpec((K2, W_ROWS2, W_COLS2), lambda i: (0, 0, 0)),     # w2 banded
            pl.BlockSpec((1, W_COLS2), lambda i: (0, 0)),                  # b2 (tiled)
            pl.BlockSpec((POOL2_HW, P2_COLS, HIDDEN), lambda i: (0, 0, 0)),  # fc1 (bf16)
            pl.BlockSpec((1, HIDDEN), lambda i: (0, 0)),                   # fc1 b
            pl.BlockSpec((HIDDEN, HIDDEN), lambda i: (0, 0)),              # fc2 (bf16)
            pl.BlockSpec((1, HIDDEN), lambda i: (0, 0)),                   # fc2 b
            pl.BlockSpec((HIDDEN, NUM_CLASSES), lambda i: (0, 0)),         # fc3 (bf16)
            pl.BlockSpec((1, NUM_CLASSES), lambda i: (0, 0)),              # fc3 b
        ],
        out_specs=pl.BlockSpec((1, 1, NUM_CLASSES), lambda i: (i, 0, 0)),
        compiler_params=pltpu.CompilerParams(
            dimension_semantics=("parallel",),
            vmem_limit_bytes=32 * 1024 * 1024),
    )(x2, prep["w1b"], prep["b1r"], prep["w2b"], prep["b2r"],
      prep["fc1_w"], prep["fc1_b"], prep["fc2_w"], prep["fc2_b"],
      prep["fc3_w"], prep["fc3_b"])
    return out.reshape(n, NUM_CLASSES)


# ---------------------------------------------------------------------------
# One-time host-side weight preparation (banded convs, permuted fc1, bf16 FC).
# ---------------------------------------------------------------------------
def prepare_params(params):
    w1 = np.asarray(params["conv1_w"], np.float32)        # (5,5,1,32) HWIO
    b1 = np.asarray(params["conv1_b"], np.float32).reshape(-1)
    w2 = np.asarray(params["conv2_w"], np.float32)        # (3,3,32,64)
    b2 = np.asarray(params["conv2_b"], np.float32).reshape(-1)

    # Banded conv1 weight:
    #   y1[ho, dw*384 + qw*32 + c] = sum_{kh, w'} x[ho+kh, w'] * w1b[kh][w', col]
    w1b = np.zeros((K1, IMG, W_COLS1), np.float32)
    for kh in range(K1):
        for wo in range(CONV1_HW):
            qw, dw = wo // 2, wo % 2
            col = dw * (POOL1_HW * C1) + qw * C1
            for kw in range(K1):
                w1b[kh, wo + kw, col:col + C1] = w1[kh, kw, 0, :]
    b1r = np.tile(b1, 2 * POOL1_HW)[None, :]               # (1, 768), depends only on c

    # Banded conv2 weight (rows indexed by p1's (qw_in, ci) layout):
    #   y2[ho, dw*320 + qw*64 + co] = sum_{kh, r} p1[ho+kh, r] * w2b[kh][r, col]
    w2b = np.zeros((K2, W_ROWS2, W_COLS2), np.float32)     # (3, 384, 640)
    for kh in range(K2):
        for wo in range(CONV2_HW):
            qw, dw = wo // 2, wo % 2
            col = dw * (POOL2_HW * C2) + qw * C2
            for kw in range(K2):
                r0 = (wo + kw) * C1
                w2b[kh, r0:r0 + C1, col:col + C2] = w2[kh, kw, :, :]
    b2r = np.tile(b2, 2 * POOL2_HW)[None, :]               # (1, 640), depends only on co

    # fc1: torch flatten order is (co, qo, qw); the kernel produces (qo, qw*64+co).
    fc1_w = np.asarray(params["fc1_w"], np.float32)        # (1600, 512), rows (co,qo,qw)
    fc1_wp = (fc1_w.reshape(C2, POOL2_HW, POOL2_HW, HIDDEN)
                    .transpose(1, 2, 0, 3)
                    .reshape(POOL2_HW, P2_COLS, HIDDEN))

    return {
        "w1b": jnp.asarray(w1b),
        "b1r": jnp.asarray(b1r),
        "w2b": jnp.asarray(w2b),
        "b2r": jnp.asarray(b2r),
        "fc1_w": jnp.asarray(fc1_wp, dtype=jnp.bfloat16),
        "fc1_b": jnp.asarray(params["fc1_b"]),
        "fc2_w": jnp.asarray(params["fc2_w"], dtype=jnp.bfloat16),
        "fc2_b": jnp.asarray(params["fc2_b"]),
        "fc3_w": jnp.asarray(params["fc3_w"], dtype=jnp.bfloat16),
        "fc3_b": jnp.asarray(params["fc3_b"]),
    }


# ---------------------------------------------------------------------------
# Deterministic init (PyTorch-equivalent shapes) + reference forward.
# ---------------------------------------------------------------------------
def init_params(key):
    ks = jax.random.split(key, 10)

    def u(k, shape, fan_in):
        bound = 1.0 / np.sqrt(fan_in)
        return jax.random.uniform(k, shape, jnp.float32, -bound, bound)

    return {
        "conv1_w": u(ks[0], (5, 5, 1, 32), 5 * 5 * 1),
        "conv1_b": u(ks[1], (1, 32), 5 * 5 * 1),
        "conv2_w": u(ks[2], (3, 3, 32, 64), 3 * 3 * 32),
        "conv2_b": u(ks[3], (1, 64), 3 * 3 * 32),
        "fc1_w": u(ks[4], (1600, 512), 1600),
        "fc1_b": u(ks[5], (1, 512), 1600),
        "fc2_w": u(ks[6], (512, 512), 512),
        "fc2_b": u(ks[7], (1, 512), 512),
        "fc3_w": u(ks[8], (512, 10), 512),
        "fc3_b": u(ks[9], (1, 10), 512),
    }


def reference_forward(x_nchw, params):
    """f32 conv path (lax), NCHW flatten, FC with bf16 weights/activations to
    mirror the kernel's inference precision."""
    x = jnp.transpose(x_nchw, (0, 2, 3, 1))
    y = lax.conv_general_dilated(x, params["conv1_w"], (1, 1), "VALID",
                                 dimension_numbers=("NHWC", "HWIO", "NHWC"))
    y = y + params["conv1_b"].reshape(1, 1, 1, -1)
    y = lax.reduce_window(y, -jnp.inf, lax.max, (1, 2, 2, 1), (1, 2, 2, 1), "VALID")
    y = lax.conv_general_dilated(y, params["conv2_w"], (1, 1), "VALID",
                                 dimension_numbers=("NHWC", "HWIO", "NHWC"))
    y = y + params["conv2_b"].reshape(1, 1, 1, -1)
    y = lax.reduce_window(y, -jnp.inf, lax.max, (1, 2, 2, 1), (1, 2, 2, 1), "VALID")
    y = jnp.transpose(y, (0, 3, 1, 2)).reshape(y.shape[0], -1)    # torch NCHW flatten

    def dense(h, w, b, relu):
        o = jnp.dot(h.astype(jnp.bfloat16), w.astype(jnp.bfloat16),
                    preferred_element_type=jnp.float32) + b
        return jnp.maximum(o, 0.0) if relu else o

    y = dense(y, params["fc1_w"], params["fc1_b"], True)
    y = dense(y, params["fc2_w"], params["fc2_b"], True)
    return dense(y, params["fc3_w"], params["fc3_b"], False)


if __name__ == "__main__":
    key = jax.random.PRNGKey(0)
    pkey, xkey = jax.random.split(key)
    params = init_params(pkey)
    prep = prepare_params(params)

    # Linear(1600, 512) = 64*5*5 implies a 28x28, 1-channel input (MNIST-like).
    x = jax.random.normal(xkey, (2, 1, 28, 28), jnp.float32)

    out = jax.block_until_ready(neural_network2_forward(x, prep))
    ref = jax.block_until_ready(reference_forward(x, params))

    assert out.shape == (2, 10) and out.dtype == jnp.float32
    max_err = float(np.max(np.abs(np.asarray(out) - np.asarray(ref))))
    assert np.allclose(np.asarray(out), np.asarray(ref), atol=5e-2, rtol=5e-2), max_err
    print("KERNEL_OK")
</pallas_src>

<mosaic_0001>
module attributes {stable_mosaic.version = 11 : i64} {
  func.func @fused_cnn_kernel(%arg0: i32, %arg1: memref<1x28x28xf32, #tpu.memory_space<vmem>>, %arg2: memref<5x28x768xf32, #tpu.memory_space<vmem>>, %arg3: memref<1x768xf32, #tpu.memory_space<vmem>>, %arg4: memref<3x384x640xf32, #tpu.memory_space<vmem>>, %arg5: memref<1x640xf32, #tpu.memory_space<vmem>>, %arg6: memref<5x320x512xbf16, #tpu.memory_space<vmem>>, %arg7: memref<1x512xf32, #tpu.memory_space<vmem>>, %arg8: memref<512x512xbf16, #tpu.memory_space<vmem>>, %arg9: memref<1x512xf32, #tpu.memory_space<vmem>>, %arg10: memref<512x10xbf16, #tpu.memory_space<vmem>>, %arg11: memref<1x10xf32, #tpu.memory_space<vmem>>, %arg12: memref<1x1x10xf32, #tpu.memory_space<vmem>>) attributes {dimension_semantics = [#tpu.dimension_semantics<parallel>], iteration_bounds = array<i64: 2>, scalar_prefetch = 0 : i64, scratch_operands = 0 : i64, tpu.core_type = #tpu.core_type<tc>, window_params = [{transform_indices = @transform_0, window_bounds = array<i64: 1, 28, 28>}, {pipeline_mode = #tpu.pipeline_mode<synchronous>, transform_indices = @transform_1, window_bounds = array<i64: 5, 28, 768>}, {pipeline_mode = #tpu.pipeline_mode<synchronous>, transform_indices = @transform_2, window_bounds = array<i64: 1, 768>}, {pipeline_mode = #tpu.pipeline_mode<synchronous>, transform_indices = @transform_3, window_bounds = array<i64: 3, 384, 640>}, {pipeline_mode = #tpu.pipeline_mode<synchronous>, transform_indices = @transform_4, window_bounds = array<i64: 1, 640>}, {pipeline_mode = #tpu.pipeline_mode<synchronous>, transform_indices = @transform_5, window_bounds = array<i64: 5, 320, 512>}, {pipeline_mode = #tpu.pipeline_mode<synchronous>, transform_indices = @transform_6, window_bounds = array<i64: 1, 512>}, {pipeline_mode = #tpu.pipeline_mode<synchronous>, transform_indices = @transform_7, window_bounds = array<i64: 512, 512>}, {pipeline_mode = #tpu.pipeline_mode<synchronous>, transform_indices = @transform_8, window_bounds = array<i64: 1, 512>}, {pipeline_mode = #tpu.pipeline_mode<synchronous>, transform_indices = @transform_9, window_bounds = array<i64: 512, 10>}, {pipeline_mode = #tpu.pipeline_mode<synchronous>, transform_indices = @transform_10, window_bounds = array<i64: 1, 10>}, {transform_indices = @transform_11, window_bounds = array<i64: 1, 1, 10>}]} {
    %c0 = arith.constant 0 : index
    %c0_0 = arith.constant 0 : index
    %c0_1 = arith.constant 0 : index
    %0 = vector.load %arg1[%c0, %c0_0, %c0_1] : memref<1x28x28xf32, #tpu.memory_space<vmem>>, vector<1x28x28xf32>
    %1 = vector.shape_cast %0 : vector<1x28x28xf32> to vector<28x28xf32>
    %cst = arith.constant 0.000000e+00 : f32
    %2 = vector.broadcast %cst : f32 to vector<24x768xf32>
    %3 = vector.extract_strided_slice %1 {offsets = [0, 0], sizes = [24, 28], strides = [1, 1]} : vector<28x28xf32> to vector<24x28xf32>
    %c0_2 = arith.constant 0 : index
    %c0_3 = arith.constant 0 : index
    %c0_4 = arith.constant 0 : index
    %4 = vector.load %arg2[%c0_2, %c0_3, %c0_4] : memref<5x28x768xf32, #tpu.memory_space<vmem>>, vector<1x28x768xf32>
    %5 = vector.shape_cast %4 : vector<1x28x768xf32> to vector<28x768xf32>
    %cst_5 = arith.constant dense<0.000000e+00> : vector<24x768xf32>
    %6 = tpu.matmul %3, %5, %cst_5 {dimension_numbers = #tpu.dot_dimension_numbers<[1], [0], [0], [1], [0, 0, 1, 1], [], []>} : vector<24x28xf32>, vector<28x768xf32>, vector<24x768xf32> -> vector<24x768xf32>
    %7 = arith.addf %2, %6 : vector<24x768xf32>
    %8 = vector.extract_strided_slice %1 {offsets = [1, 0], sizes = [24, 28], strides = [1, 1]} : vector<28x28xf32> to vector<24x28xf32>
    %c1 = arith.constant 1 : index
    %c0_6 = arith.constant 0 : index
    %c0_7 = arith.constant 0 : index
    %9 = vector.load %arg2[%c1, %c0_6, %c0_7] : memref<5x28x768xf32, #tpu.memory_space<vmem>>, vector<1x28x768xf32>
    %10 = vector.shape_cast %9 : vector<1x28x768xf32> to vector<28x768xf32>
    %cst_8 = arith.constant dense<0.000000e+00> : vector<24x768xf32>
    %11 = tpu.matmul %8, %10, %cst_8 {dimension_numbers = #tpu.dot_dimension_numbers<[1], [0], [0], [1], [0, 0, 1, 1], [], []>} : vector<24x28xf32>, vector<28x768xf32>, vector<24x768xf32> -> vector<24x768xf32>
    %12 = arith.addf %7, %11 : vector<24x768xf32>
    %13 = vector.extract_strided_slice %1 {offsets = [2, 0], sizes = [24, 28], strides = [1, 1]} : vector<28x28xf32> to vector<24x28xf32>
    %c2 = arith.constant 2 : index
    %c0_9 = arith.constant 0 : index
    %c0_10 = arith.constant 0 : index
    %14 = vector.load %arg2[%c2, %c0_9, %c0_10] : memref<5x28x768xf32, #tpu.memory_space<vmem>>, vector<1x28x768xf32>
    %15 = vector.shape_cast %14 : vector<1x28x768xf32> to vector<28x768xf32>
    %cst_11 = arith.constant dense<0.000000e+00> : vector<24x768xf32>
    %16 = tpu.matmul %13, %15, %cst_11 {dimension_numbers = #tpu.dot_dimension_numbers<[1], [0], [0], [1], [0, 0, 1, 1], [], []>} : vector<24x28xf32>, vector<28x768xf32>, vector<24x768xf32> -> vector<24x768xf32>
    %17 = arith.addf %12, %16 : vector<24x768xf32>
    %18 = vector.extract_strided_slice %1 {offsets = [3, 0], sizes = [24, 28], strides = [1, 1]} : vector<28x28xf32> to vector<24x28xf32>
    %c3 = arith.constant 3 : index
    %c0_12 = arith.constant 0 : index
    %c0_13 = arith.constant 0 : index
    %19 = vector.load %arg2[%c3, %c0_12, %c0_13] : memref<5x28x768xf32, #tpu.memory_space<vmem>>, vector<1x28x768xf32>
    %20 = vector.shape_cast %19 : vector<1x28x768xf32> to vector<28x768xf32>
    %cst_14 = arith.constant dense<0.000000e+00> : vector<24x768xf32>
    %21 = tpu.matmul %18, %20, %cst_14 {dimension_numbers = #tpu.dot_dimension_numbers<[1], [0], [0], [1], [0, 0, 1, 1], [], []>} : vector<24x28xf32>, vector<28x768xf32>, vector<24x768xf32> -> vector<24x768xf32>
    %22 = arith.addf %17, %21 : vector<24x768xf32>
    %23 = vector.extract_strided_slice %1 {offsets = [4, 0], sizes = [24, 28], strides = [1, 1]} : vector<28x28xf32> to vector<24x28xf32>
    %c4 = arith.constant 4 : index
    %c0_15 = arith.constant 0 : index
    %c0_16 = arith.constant 0 : index
    %24 = vector.load %arg2[%c4, %c0_15, %c0_16] : memref<5x28x768xf32, #tpu.memory_space<vmem>>, vector<1x28x768xf32>
    %25 = vector.shape_cast %24 : vector<1x28x768xf32> to vector<28x768xf32>
    %cst_17 = arith.constant dense<0.000000e+00> : vector<24x768xf32>
    %26 = tpu.matmul %23, %25, %cst_17 {dimension_numbers = #tpu.dot_dimension_numbers<[1], [0], [0], [1], [0, 0, 1, 1], [], []>} : vector<24x28xf32>, vector<28x768xf32>, vector<24x768xf32> -> vector<24x768xf32>
    %27 = arith.addf %22, %26 : vector<24x768xf32>
    %c0_18 = arith.constant 0 : index
    %c0_19 = arith.constant 0 : index
    %28 = vector.load %arg3[%c0_18, %c0_19] : memref<1x768xf32, #tpu.memory_space<vmem>>, vector<1x768xf32>
    %29 = vector.broadcast %28 : vector<1x768xf32> to vector<24x768xf32>
    %30 = arith.addf %27, %29 : vector<24x768xf32>
    %31 = vector.extract_strided_slice %30 {offsets = [0, 0], sizes = [23, 768], strides = [1, 1]} : vector<24x768xf32> to vector<23x768xf32>
    %32 = vector.extract_strided_slice %30 {offsets = [1, 0], sizes = [23, 768], strides = [1, 1]} : vector<24x768xf32> to vector<23x768xf32>
    %33 = arith.maximumf %31, %32 : vector<23x768xf32>
    %34 = vector.extract_strided_slice %33 {offsets = [0, 0], sizes = [23, 384], strides = [1, 1]} : vector<23x768xf32> to vector<23x384xf32>
    %35 = vector.extract_strided_slice %33 {offsets = [0, 384], sizes = [23, 384], strides = [1, 1]} : vector<23x768xf32> to vector<23x384xf32>
    %36 = arith.maximumf %34, %35 : vector<23x384xf32>
    %37 = tpu.iota {dimensions = array<i32: 0>} : vector<12x23xi32>
    %38 = tpu.iota {dimensions = array<i32: 1>} : vector<12x23xi32>
    %c2_i32 = arith.constant 2 : i32
    %39 = vector.broadcast %c2_i32 : i32 to vector<12x23xi32>
    %40 = arith.muli %39, %37 : vector<12x23xi32>
    %41 = arith.cmpi eq, %38, %40 : vector<12x23xi32>
    %42 = arith.extui %41 : vector<12x23xi1> to vector<12x23xi32>
    %43 = arith.sitofp %42 : vector<12x23xi32> to vector<12x23xf32>
    %cst_20 = arith.constant dense<0.000000e+00> : vector<12x384xf32>
    %44 = tpu.matmul %43, %36, %cst_20 {dimension_numbers = #tpu.dot_dimension_numbers<[1], [0], [0], [1], [0, 0, 1, 1], [], []>} : vector<12x23xf32>, vector<23x384xf32>, vector<12x384xf32> -> vector<12x384xf32>
    %cst_21 = arith.constant 0.000000e+00 : f32
    %45 = vector.broadcast %cst_21 : f32 to vector<10x640xf32>
    %46 = vector.extract_strided_slice %44 {offsets = [0, 0], sizes = [10, 384], strides = [1, 1]} : vector<12x384xf32> to vector<10x384xf32>
    %c0_22 = arith.constant 0 : index
    %c0_23 = arith.constant 0 : index
    %c0_24 = arith.constant 0 : index
    %47 = vector.load %arg4[%c0_22, %c0_23, %c0_24] : memref<3x384x640xf32, #tpu.memory_space<vmem>>, vector<1x384x640xf32>
    %48 = vector.shape_cast %47 : vector<1x384x640xf32> to vector<384x640xf32>
    %cst_25 = arith.constant dense<0.000000e+00> : vector<10x640xf32>
    %49 = tpu.matmul %46, %48, %cst_25 {dimension_numbers = #tpu.dot_dimension_numbers<[1], [0], [0], [1], [0, 0, 1, 1], [], []>} : vector<10x384xf32>, vector<384x640xf32>, vector<10x640xf32> -> vector<10x640xf32>
    %50 = arith.addf %45, %49 : vector<10x640xf32>
    %51 = vector.extract_strided_slice %44 {offsets = [1, 0], sizes = [10, 384], strides = [1, 1]} : vector<12x384xf32> to vector<10x384xf32>
    %c1_26 = arith.constant 1 : index
    %c0_27 = arith.constant 0 : index
    %c0_28 = arith.constant 0 : index
    %52 = vector.load %arg4[%c1_26, %c0_27, %c0_28] : memref<3x384x640xf32, #tpu.memory_space<vmem>>, vector<1x384x640xf32>
    %53 = vector.shape_cast %52 : vector<1x384x640xf32> to vector<384x640xf32>
    %cst_29 = arith.constant dense<0.000000e+00> : vector<10x640xf32>
    %54 = tpu.matmul %51, %53, %cst_29 {dimension_numbers = #tpu.dot_dimension_numbers<[1], [0], [0], [1], [0, 0, 1, 1], [], []>} : vector<10x384xf32>, vector<384x640xf32>, vector<10x640xf32> -> vector<10x640xf32>
    %55 = arith.addf %50, %54 : vector<10x640xf32>
    %56 = vector.extract_strided_slice %44 {offsets = [2, 0], sizes = [10, 384], strides = [1, 1]} : vector<12x384xf32> to vector<10x384xf32>
    %c2_30 = arith.constant 2 : index
    %c0_31 = arith.constant 0 : index
    %c0_32 = arith.constant 0 : index
    %57 = vector.load %arg4[%c2_30, %c0_31, %c0_32] : memref<3x384x640xf32, #tpu.memory_space<vmem>>, vector<1x384x640xf32>
    %58 = vector.shape_cast %57 : vector<1x384x640xf32> to vector<384x640xf32>
    %cst_33 = arith.constant dense<0.000000e+00> : vector<10x640xf32>
    %59 = tpu.matmul %56, %58, %cst_33 {dimension_numbers = #tpu.dot_dimension_numbers<[1], [0], [0], [1], [0, 0, 1, 1], [], []>} : vector<10x384xf32>, vector<384x640xf32>, vector<10x640xf32> -> vector<10x640xf32>
    %60 = arith.addf %55, %59 : vector<10x640xf32>
    %c0_34 = arith.constant 0 : index
    %c0_35 = arith.constant 0 : index
    %61 = vector.load %arg5[%c0_34, %c0_35] : memref<1x640xf32, #tpu.memory_space<vmem>>, vector<1x640xf32>
    %62 = vector.broadcast %61 : vector<1x640xf32> to vector<10x640xf32>
    %63 = arith.addf %60, %62 : vector<10x640xf32>
    %64 = vector.extract_strided_slice %63 {offsets = [0, 0], sizes = [9, 640], strides = [1, 1]} : vector<10x640xf32> to vector<9x640xf32>
    %65 = vector.extract_strided_slice %63 {offsets = [1, 0], sizes = [9, 640], strides = [1, 1]} : vector<10x640xf32> to vector<9x640xf32>
    %66 = arith.maximumf %64, %65 : vector<9x640xf32>
    %67 = vector.extract_strided_slice %66 {offsets = [0, 0], sizes = [9, 320], strides = [1, 1]} : vector<9x640xf32> to vector<9x320xf32>
    %68 = vector.extract_strided_slice %66 {offsets = [0, 320], sizes = [9, 320], strides = [1, 1]} : vector<9x640xf32> to vector<9x320xf32>
    %69 = arith.maximumf %67, %68 : vector<9x320xf32>
    %70 = tpu.iota {dimensions = array<i32: 0>} : vector<5x9xi32>
    %71 = tpu.iota {dimensions = array<i32: 1>} : vector<5x9xi32>
    %c2_i32_36 = arith.constant 2 : i32
    %72 = vector.broadcast %c2_i32_36 : i32 to vector<5x9xi32>
    %73 = arith.muli %72, %70 : vector<5x9xi32>
    %74 = arith.cmpi eq, %71, %73 : vector<5x9xi32>
    %75 = arith.extui %74 : vector<5x9xi1> to vector<5x9xi32>
    %76 = arith.sitofp %75 : vector<5x9xi32> to vector<5x9xf32>
    %cst_37 = arith.constant dense<0.000000e+00> : vector<5x320xf32>
    %77 = tpu.matmul %76, %69, %cst_37 {dimension_numbers = #tpu.dot_dimension_numbers<[1], [0], [0], [1], [0, 0, 1, 1], [], []>} : vector<5x9xf32>, vector<9x320xf32>, vector<5x320xf32> -> vector<5x320xf32>
    %78 = arith.truncf %77 : vector<5x320xf32> to vector<5x320xbf16>
    %cst_38 = arith.constant 0.000000e+00 : f32
    %79 = vector.broadcast %cst_38 : f32 to vector<1x512xf32>
    %80 = vector.extract_strided_slice %78 {offsets = [0, 0], sizes = [1, 320], strides = [1, 1]} : vector<5x320xbf16> to vector<1x320xbf16>
    %c0_39 = arith.constant 0 : index
    %c0_40 = arith.constant 0 : index
    %c0_41 = arith.constant 0 : index
    %81 = vector.load %arg6[%c0_39, %c0_40, %c0_41] : memref<5x320x512xbf16, #tpu.memory_space<vmem>>, vector<1x320x512xbf16>
    %82 = vector.shape_cast %81 : vector<1x320x512xbf16> to vector<320x512xbf16>
    %cst_42 = arith.constant dense<0.000000e+00> : vector<1x512xf32>
    %83 = tpu.matmul %80, %82, %cst_42 {dimension_numbers = #tpu.dot_dimension_numbers<[1], [0], [0], [1], [0, 0, 1, 1], [], []>} : vector<1x320xbf16>, vector<320x512xbf16>, vector<1x512xf32> -> vector<1x512xf32>
    %84 = arith.addf %79, %83 : vector<1x512xf32>
    %85 = vector.extract_strided_slice %78 {offsets = [1, 0], sizes = [1, 320], strides = [1, 1]} : vector<5x320xbf16> to vector<1x320xbf16>
    %c1_43 = arith.constant 1 : index
    %c0_44 = arith.constant 0 : index
    %c0_45 = arith.constant 0 : index
    %86 = vector.load %arg6[%c1_43, %c0_44, %c0_45] : memref<5x320x512xbf16, #tpu.memory_space<vmem>>, vector<1x320x512xbf16>
    %87 = vector.shape_cast %86 : vector<1x320x512xbf16> to vector<320x512xbf16>
    %cst_46 = arith.constant dense<0.000000e+00> : vector<1x512xf32>
    %88 = tpu.matmul %85, %87, %cst_46 {dimension_numbers = #tpu.dot_dimension_numbers<[1], [0], [0], [1], [0, 0, 1, 1], [], []>} : vector<1x320xbf16>, vector<320x512xbf16>, vector<1x512xf32> -> vector<1x512xf32>
    %89 = arith.addf %84, %88 : vector<1x512xf32>
    %90 = vector.extract_strided_slice %78 {offsets = [2, 0], sizes = [1, 320], strides = [1, 1]} : vector<5x320xbf16> to vector<1x320xbf16>
    %c2_47 = arith.constant 2 : index
    %c0_48 = arith.constant 0 : index
    %c0_49 = arith.constant 0 : index
    %91 = vector.load %arg6[%c2_47, %c0_48, %c0_49] : memref<5x320x512xbf16, #tpu.memory_space<vmem>>, vector<1x320x512xbf16>
    %92 = vector.shape_cast %91 : vector<1x320x512xbf16> to vector<320x512xbf16>
    %cst_50 = arith.constant dense<0.000000e+00> : vector<1x512xf32>
    %93 = tpu.matmul %90, %92, %cst_50 {dimension_numbers = #tpu.dot_dimension_numbers<[1], [0], [0], [1], [0, 0, 1, 1], [], []>} : vector<1x320xbf16>, vector<320x512xbf16>, vector<1x512xf32> -> vector<1x512xf32>
    %94 = arith.addf %89, %93 : vector<1x512xf32>
    %95 = vector.extract_strided_slice %78 {offsets = [3, 0], sizes = [1, 320], strides = [1, 1]} : vector<5x320xbf16> to vector<1x320xbf16>
    %c3_51 = arith.constant 3 : index
    %c0_52 = arith.constant 0 : index
    %c0_53 = arith.constant 0 : index
    %96 = vector.load %arg6[%c3_51, %c0_52, %c0_53] : memref<5x320x512xbf16, #tpu.memory_space<vmem>>, vector<1x320x512xbf16>
    %97 = vector.shape_cast %96 : vector<1x320x512xbf16> to vector<320x512xbf16>
    %cst_54 = arith.constant dense<0.000000e+00> : vector<1x512xf32>
    %98 = tpu.matmul %95, %97, %cst_54 {dimension_numbers = #tpu.dot_dimension_numbers<[1], [0], [0], [1], [0, 0, 1, 1], [], []>} : vector<1x320xbf16>, vector<320x512xbf16>, vector<1x512xf32> -> vector<1x512xf32>
    %99 = arith.addf %94, %98 : vector<1x512xf32>
    %100 = vector.extract_strided_slice %78 {offsets = [4, 0], sizes = [1, 320], strides = [1, 1]} : vector<5x320xbf16> to vector<1x320xbf16>
    %c4_55 = arith.constant 4 : index
    %c0_56 = arith.constant 0 : index
    %c0_57 = arith.constant 0 : index
    %101 = vector.load %arg6[%c4_55, %c0_56, %c0_57] : memref<5x320x512xbf16, #tpu.memory_space<vmem>>, vector<1x320x512xbf16>
    %102 = vector.shape_cast %101 : vector<1x320x512xbf16> to vector<320x512xbf16>
    %cst_58 = arith.constant dense<0.000000e+00> : vector<1x512xf32>
    %103 = tpu.matmul %100, %102, %cst_58 {dimension_numbers = #tpu.dot_dimension_numbers<[1], [0], [0], [1], [0, 0, 1, 1], [], []>} : vector<1x320xbf16>, vector<320x512xbf16>, vector<1x512xf32> -> vector<1x512xf32>
    %104 = arith.addf %99, %103 : vector<1x512xf32>
    %c0_59 = arith.constant 0 : index
    %c0_60 = arith.constant 0 : index
    %105 = vector.load %arg7[%c0_59, %c0_60] : memref<1x512xf32, #tpu.memory_space<vmem>>, vector<1x512xf32>
    %106 = arith.addf %104, %105 : vector<1x512xf32>
    %cst_61 = arith.constant 0.000000e+00 : f32
    %107 = vector.broadcast %cst_61 : f32 to vector<1x512xf32>
    %108 = arith.maximumf %106, %107 : vector<1x512xf32>
    %109 = arith.truncf %108 : vector<1x512xf32> to vector<1x512xbf16>
    %c0_62 = arith.constant 0 : index
    %c0_63 = arith.constant 0 : index
    %110 = vector.load %arg8[%c0_62, %c0_63] : memref<512x512xbf16, #tpu.memory_space<vmem>>, vector<512x512xbf16>
    %cst_64 = arith.constant dense<0.000000e+00> : vector<1x512xf32>
    %111 = tpu.matmul %109, %110, %cst_64 {dimension_numbers = #tpu.dot_dimension_numbers<[1], [0], [0], [1], [0, 0, 1, 1], [], []>} : vector<1x512xbf16>, vector<512x512xbf16>, vector<1x512xf32> -> vector<1x512xf32>
    %c0_65 = arith.constant 0 : index
    %c0_66 = arith.constant 0 : index
    %112 = vector.load %arg9[%c0_65, %c0_66] : memref<1x512xf32, #tpu.memory_space<vmem>>, vector<1x512xf32>
    %113 = arith.addf %111, %112 : vector<1x512xf32>
    %cst_67 = arith.constant 0.000000e+00 : f32
    %114 = vector.broadcast %cst_67 : f32 to vector<1x512xf32>
    %115 = arith.maximumf %113, %114 : vector<1x512xf32>
    %116 = arith.truncf %115 : vector<1x512xf32> to vector<1x512xbf16>
    %c0_68 = arith.constant 0 : index
    %c0_69 = arith.constant 0 : index
    %117 = vector.load %arg10[%c0_68, %c0_69] : memref<512x10xbf16, #tpu.memory_space<vmem>>, vector<512x10xbf16>
    %cst_70 = arith.constant dense<0.000000e+00> : vector<1x10xf32>
    %118 = tpu.matmul %116, %117, %cst_70 {dimension_numbers = #tpu.dot_dimension_numbers<[1], [0], [0], [1], [0, 0, 1, 1], [], []>} : vector<1x512xbf16>, vector<512x10xbf16>, vector<1x10xf32> -> vector<1x10xf32>
    %c0_71 = arith.constant 0 : index
    %c0_72 = arith.constant 0 : index
    %119 = vector.load %arg11[%c0_71, %c0_72] : memref<1x10xf32, #tpu.memory_space<vmem>>, vector<1x10xf32>
    %120 = arith.addf %118, %119 : vector<1x10xf32>
    %c0_73 = arith.constant 0 : index
    %c0_74 = arith.constant 0 : index
    %c0_75 = arith.constant 0 : index
    %121 = vector.load %arg12[%c0_73, %c0_74, %c0_75] : memref<1x1x10xf32, #tpu.memory_space<vmem>>, vector<1x1x10xf32>
    %122 = vector.shape_cast %121 : vector<1x1x10xf32> to vector<1x10xf32>
    %123 = vector.shape_cast %120 : vector<1x10xf32> to vector<1x1x10xf32>
    tpu.vector_store %arg12[%c0_73, %c0_74, %c0_75], %123 {strides = array<i32>} : memref<1x1x10xf32, #tpu.memory_space<vmem>>, vector<1x1x10xf32>,
    return
  }
  func.func @transform_0(%arg0: i32) -> (i32, i32, i32) {
    %c0_i32 = arith.constant 0 : i32
    %c0_i32_0 = arith.constant 0 : i32
    %c0_i32_1 = arith.constant 0 : i32
    return %arg0, %c0_i32, %c0_i32_0 : i32, i32, i32
  }
  func.func @transform_1(%arg0: i32) -> (i32, i32, i32) {
    %c0_i32 = arith.constant 0 : i32
    %c0_i32_0 = arith.constant 0 : i32
    %c0_i32_1 = arith.constant 0 : i32
    %c0_i32_2 = arith.constant 0 : i32
    return %c0_i32, %c0_i32_0, %c0_i32_1 : i32, i32, i32
  }
  func.func @transform_2(%arg0: i32) -> (i32, i32) {
    %c0_i32 = arith.constant 0 : i32
    %c0_i32_0 = arith.constant 0 : i32
    %c0_i32_1 = arith.constant 0 : i32
    return %c0_i32, %c0_i32_0 : i32, i32
  }
  func.func @transform_3(%arg0: i32) -> (i32, i32, i32) {
    %c0_i32 = arith.constant 0 : i32
    %c0_i32_0 = arith.constant 0 : i32
    %c0_i32_1 = arith.constant 0 : i32
    %c0_i32_2 = arith.constant 0 : i32
    return %c0_i32, %c0_i32_0, %c0_i32_1 : i32, i32, i32
  }
  func.func @transform_4(%arg0: i32) -> (i32, i32) {
    %c0_i32 = arith.constant 0 : i32
    %c0_i32_0 = arith.constant 0 : i32
    %c0_i32_1 = arith.constant 0 : i32
    return %c0_i32, %c0_i32_0 : i32, i32
  }
  func.func @transform_5(%arg0: i32) -> (i32, i32, i32) {
    %c0_i32 = arith.constant 0 : i32
    %c0_i32_0 = arith.constant 0 : i32
    %c0_i32_1 = arith.constant 0 : i32
    %c0_i32_2 = arith.constant 0 : i32
    return %c0_i32, %c0_i32_0, %c0_i32_1 : i32, i32, i32
  }
  func.func @transform_6(%arg0: i32) -> (i32, i32) {
    %c0_i32 = arith.constant 0 : i32
    %c0_i32_0 = arith.constant 0 : i32
    %c0_i32_1 = arith.constant 0 : i32
    return %c0_i32, %c0_i32_0 : i32, i32
  }
  func.func @transform_7(%arg0: i32) -> (i32, i32) {
    %c0_i32 = arith.constant 0 : i32
    %c0_i32_0 = arith.constant 0 : i32
    %c0_i32_1 = arith.constant 0 : i32
    return %c0_i32, %c0_i32_0 : i32, i32
  }
  func.func @transform_8(%arg0: i32) -> (i32, i32) {
    %c0_i32 = arith.constant 0 : i32
    %c0_i32_0 = arith.constant 0 : i32
    %c0_i32_1 = arith.constant 0 : i32
    return %c0_i32, %c0_i32_0 : i32, i32
  }
  func.func @transform_9(%arg0: i32) -> (i32, i32) {
    %c0_i32 = arith.constant 0 : i32
    %c0_i32_0 = arith.constant 0 : i32
    %c0_i32_1 = arith.constant 0 : i32
    return %c0_i32, %c0_i32_0 : i32, i32
  }
  func.func @transform_10(%arg0: i32) -> (i32, i32) {
    %c0_i32 = arith.constant 0 : i32
    %c0_i32_0 = arith.constant 0 : i32
    %c0_i32_1 = arith.constant 0 : i32
    return %c0_i32, %c0_i32_0 : i32, i32
  }
  func.func @transform_11(%arg0: i32) -> (i32, i32, i32) {
    %c0_i32 = arith.constant 0 : i32
    %c0_i32_0 = arith.constant 0 : i32
    %c0_i32_1 = arith.constant 0 : i32
    return %arg0, %c0_i32, %c0_i32_0 : i32, i32, i32
  }
}

</mosaic_0001>

<bundles_post_ra>
// kernel: neural_network2_forward.1
= control target key start
LH: loop header
LB: loop body
LE: loop exit
PB: predicated region body
PF: predicated region fallthrough
CT: control target
= control target key end

     0   :  { %s13572_s0 = inlined_call_operand.vmem [shape: f32[2,28,28], index: 0, kind: input, shape index: {}]   ;;  %s13573_s1 = inlined_call_operand.hbm [shape: f32[5,28,768], index: 1, kind: input, shape index: {}]   ;;  %s13574_s2 = inlined_call_operand.hbm [shape: f32[1,768], index: 2, kind: input, shape index: {}]   ;;  %s13575_s3 = inlined_call_operand.hbm [shape: f32[3,384,640], index: 3, kind: input, shape index: {}]   ;;  %s13576_s4 = inlined_call_operand.hbm [shape: f32[1,640], index: 4, kind: input, shape index: {}]   ;;  %s13577_s5 = inlined_call_operand.hbm [shape: bf16[5,320,512], index: 5, kind: input, shape index: {}]   ;;  %s13578_s6 = inlined_call_operand.hbm [shape: f32[1,512], index: 6, kind: input, shape index: {}]   ;;  %s13579_s7 = inlined_call_operand.hbm [shape: bf16[512,512], index: 7, kind: input, shape index: {}]   ;;  %s13580_s8 = inlined_call_operand.hbm [shape: f32[1,512], index: 8, kind: input, shape index: {}]   ;;  %s13581_s9 = inlined_call_operand.vmem [shape: bf16[512,10], index: 9, kind: input, shape index: {}]   ;;  %s13582_s10 = inlined_call_operand.hbm [shape: f32[1,10], index: 10, kind: input, shape index: {}]   ;;  %s13583_s11 = inlined_call_operand.hbm [shape: f32[2,1,10], index: 11, kind: output, shape index: {}]  }
   0x1   :  { %13587 = sst [smem:[#allocation51_spill]] %s13573_s1 }
   0x2   :  { %13588 = sst [smem:[#allocation52_spill]] %s13574_s2 }
   0x3   :  { %13589 = sst [smem:[#allocation53_spill]] %s13576_s4 }
   0x4   :  { %13590 = sst [smem:[#allocation54_spill]] %s13578_s6 }
   0x5   :  { %16 = vsyncpa [#allocation3], 0 }
   0x6   :  { %17 = vsyncpa [#allocation6], 0 }
   0x7   :  { %18 = vsyncpa [#allocation9], 0 }
   0x8   :  { %19 = vsyncpa [#allocation12], 0 }
   0x9   :  { %20 = vsyncpa [#allocation15], 0 }
   0xa   :  { %21 = vsyncpa [#allocation4], 0 }
   0xb   :  { %23 = vsyncpa [#allocation4 + $0x1], 0  ;;  %s12137_s17 = smov 0   ;;  %s12139_s18 = smov 0  }
   0xc   :  { %s12141_s19 = smov 0   ;;  %s12143_s20 = smov 0  }
   0xd LB: > { %13591 = sst [smem:[#allocation24_spill]] %s12054_s19  ;;  %s12158_s21 = sadd.s32 4294967295, %s12058_s20   ;;  %s12058_s20 = sphi %s12143_s20, %s13652_s20   ;;  %s12054_s19 = sphi %s12141_s19, %s13654_s19   ;;  %s12050_s18 = sphi %s12139_s18, %s13656_s18   ;;  %s12046_s17 = sphi %s12137_s17, %s13655_s17  }
   0xe   : > { %s8575_s22 = sadd.s32 4294967294, %s12058_s20   ;;  %s12162_s23 = sadd.s32 1, %s12058_s20  }
   0xf   : > { %13592 = sst [smem:[#allocation25_spill]] %s12162_s23  ;;  %s272_s24 = sadd.s32 1, %s12054_s19 }
  0x10   : > { %s269_s25 = ssub.s32 %s12058_s20, %s12162_s23  ;;  %p282_p0 = scmp.ne.s32.totalorder %s12054_s19, %s12050_s18 }
  0x11   : > { %p270_p1 = scmp.eq.s32.totalorder %s269_s25, 0  ;;  %p283_p2 = scmp.eq.s32.totalorder %s12158_s21, 1 }
  0x12   : > { %p288_p3 = scmp.ne.s32.totalorder %s12050_s18, %s12046_s17  ;;  %p289_p4 = scmp.eq.s32.totalorder %s8575_s22, 1 }
  0x13   : > { %s12173_s26 = scalar_select %p270_p1, %s12054_s19, %s272_s24  }
  0x14   : > { %p12175_p5 = por %p283_p2, %p282_p0  ;;  %p12179_p6 = por %p289_p4, %p288_p3 }
  0x15   : > { %13593 = sst [smem:[#allocation26_spill]] %s12173_s26  ;;  %p8576_p7 = scmp.ge.s32.totalorder %s12058_s20, 1 }
  0x16   : > { %p296_p8 = scmp.lt.s32.totalorder %s12058_s20, 3  ;;  %p11633_p9 = scmp.eq.s32.totalorder %s12158_s21, 0 }
  0x17   : > { %s13597_s2 = sld [smem:[#allocation52_spill]]  ;;  %s12060_s14 = smov [#allocation5]  }
  0x18   : > { %p12186_p10 = pnand %p8576_p7, %p296_p8  ;;  %s324_s15 = sshll.u32 %s12060_s14, 4  ;;  %s325_s15 = int_to_ptr.vmem [resolvable:$true] %s324_s15 }
  0x19   : > { %s13598_s4 = sld [smem:[#allocation53_spill]]  ;;  %s12061_s26 = smov [#allocation8]  }
  0x1a   : > { %p11601_p11 = pneg %p12186_p10  ;;  %s13600_s6 = sld [smem:[#allocation54_spill]] }
  0x1b   : > { %s350_s14 = sshll.u32 %s12061_s26, 4  ;;  %s12062_s19 = smov [#allocation11]   ;;  %s351_s14 = int_to_ptr.vmem [resolvable:$true] %s350_s14 }
  0x1c   : > { %p12200_p12 = pnand %p11633_p9, %p11601_p11  ;;  %s376_s23 = sshll.u32 %s12062_s19, 4  ;;  %s377_s23 = int_to_ptr.vmem [resolvable:$true] %s376_s23 }
  0x1d   : > { %s322_s13 = sshll.u32 %s13597_s2, 4  ;;  %s12063_s30 = smov [#allocation14]   ;;  %s323_s13 = int_to_ptr.hbm [resolvable:$true] %s322_s13 }
  0x1e   : > { %11607 = dma.hbm_to_vmem [thread:$0]  (!%p12200_p12), %s323_s13, 96, %s325_s15, [#allocation6]  }
  0x1f   : > { %s348_s24 = sshll.u32 %s13598_s4, 4  ;;  %s400_s4 = sshll.u32 %s13580_s8, 4  ;;  %s349_s24 = int_to_ptr.hbm [resolvable:$true] %s348_s24  ;;  %s401_s4 = int_to_ptr.hbm [resolvable:$true] %s400_s4 }
  0x20   : > { %s374_s2 = sshll.u32 %s13600_s6, 4  ;;  %s402_s26 = sshll.u32 %s12063_s30, 4  ;;  %s375_s2 = int_to_ptr.hbm [resolvable:$true] %s374_s2  ;;  %s403_s26 = int_to_ptr.vmem [resolvable:$true] %s402_s26 }
  0x21   : > { %11613 = dma.hbm_to_vmem [thread:$0]  (!%p12200_p12), %s349_s24, 80, %s351_s14, [#allocation9]  }
  0x22   : > { %11619 = dma.hbm_to_vmem [thread:$0]  (!%p12200_p12), %s375_s2, 64, %s377_s23, [#allocation12]  }
  0x23   : > { %s13601_s1 = sld [smem:[#allocation51_spill]]  ;;  %s12064_s15 = smov [#allocation2]  }
  0x24   : > { %11625 = dma.hbm_to_vmem [thread:$0]  (!%p12200_p12), %s401_s4, 64, %s403_s26, [#allocation15]  }
  0x25   : > { %s309_s24 = sshll.u32 %s12064_s15, 4  ;;  %s333_s16 = sshll.u32 %s13575_s3, 4  ;;  %s310_s24 = int_to_ptr.vmem [resolvable:$true] %s309_s24  ;;  %s334_s16 = int_to_ptr.hbm [resolvable:$true] %s333_s16 }
  0x26   : > { %s12065_s22 = smov 768   ;;  %s12066_s2 = smov 48  }
  0x27   : > { %s12067_s6 = smov [#allocation7]   ;;  %s12068_s30 = smov 640  }
  0x28   : > { %s335_s23 = sshll.u32 %s12067_s6, 4  ;;  %s12069_s12 = smov 40   ;;  %s336_s23 = int_to_ptr.vmem [resolvable:$true] %s335_s23 }
  0x29   : > { %s307_s13 = sshll.u32 %s13601_s1, 4  ;;  %s359_s15 = sshll.u32 %s13577_s5, 4  ;;  %s308_s13 = int_to_ptr.hbm [resolvable:$true] %s307_s13  ;;  %s360_s15 = int_to_ptr.hbm [resolvable:$true] %s359_s15 }
  0x2a   : > { %11604 = dma.hbm_to_vmem [thread:$0]  (!%p12200_p12), %s308_s13, 15360, %s310_s24, [#allocation3], %s12065_s22, %s12065_s22, %s12066_s2  }
  0x2b   : > { %11610 = dma.hbm_to_vmem [thread:$0]  (!%p12200_p12), %s334_s16, 92160, %s336_s23, [#allocation6], %s12068_s30, %s12068_s30, %s12069_s12  }
  0x2c   : > { %s12070_s19 = smov [#allocation10]   ;;  %s385_s22 = sshll.u32 %s13579_s7, 4  ;;  %s386_s22 = int_to_ptr.hbm [resolvable:$true] %s385_s22 }
  0x2d   : > { %s361_s14 = sshll.u32 %s12070_s19, 4  ;;  %s12071_s2 = smov 256   ;;  %s362_s14 = int_to_ptr.vmem [resolvable:$true] %s361_s14 }
  0x2e   : > { %s12072_s6 = smov 16   ;;  %s12073_s1 = smov [#allocation13]  }
  0x2f   : > { %11616 = dma.hbm_to_vmem [thread:$0]  (!%p12200_p12), %s360_s15, 51200, %s362_s14, [#allocation9], %s12071_s2, %s12071_s2, %s12072_s6  }
  0x30   : > { %s387_s16 = sshll.u32 %s12073_s1, 4  ;;  %s415_s12 = sshll.u32 %s13582_s10, 4  ;;  %s388_s16 = int_to_ptr.vmem [resolvable:$true] %s387_s16  ;;  %s416_s12 = int_to_ptr.hbm [resolvable:$true] %s415_s12 }
  0x31   : > { %11622 = dma.hbm_to_vmem [thread:$0]  (!%p12200_p12), %s386_s22, 16384, %s388_s16, [#allocation12], %s12071_s2, %s12071_s2, %s12072_s6  }
  0x32   : > { %s12074_s4 = smov [#allocation16]   ;;  %438 = sbr.rel (%p12186_p10) target bundleno = 2149 (0x865), region = 64 }
  0x33   : > { %s417_s26 = sshll.u32 %s12074_s4, 4  ;;  %s418_s26 = int_to_ptr.vmem [resolvable:$true] %s417_s26 }
  0x34   : > { %11628 = dma.hbm_to_vmem [thread:$0]  (!%p12200_p12), %s416_s12, 16, %s418_s26, [#allocation15]  }
  0x37   : > { %12021 = dma.done.wait (%p11633_p9), [#allocation3], 15360  }
  0x38   : > { %12023 = vsyncadd (%p11633_p9), [#allocation3], 4294951936 }
  0x39   : > { %12025 = dma.done.wait (%p11633_p9), [#allocation6], 92256  }
  0x3a   : > { %12027 = vsyncadd (%p11633_p9), [#allocation6], 4294875040 }
  0x3b   : > { %12029 = dma.done.wait (%p11633_p9), [#allocation9], 51280  }
  0x3c   : > { %12031 = vsyncadd (%p11633_p9), [#allocation9], 4294916016 }
  0x3d   : > { %12033 = dma.done.wait (%p11633_p9), [#allocation12], 16448  }
  0x3e   : > { %12035 = vsyncadd (%p11633_p9), [#allocation12], 4294950848 }
  0x3f   : > { %12037 = dma.done.wait (%p11633_p9), [#allocation15], 80  }
  0x40   : > { %12039 = vsyncadd (%p11633_p9), [#allocation15], 4294967216  ;;  %p518_p13 = scmp.lt.s32.totalorder %s12158_s21, 1  ;;  %vm596_vm0 = vcmask 1043456   ;;  %v571_v0 = vld [vmem:[#allocation2 + $0x150] sm:$0xf] }
  0x41   : > { %v572_v1 = vld [vmem:[#allocation2 + $0x158] sm:$0xf]  ;;  %v573_v2 = vld [vmem:[#allocation2 + $0x160] sm:$0xf]  ;;  %8599 = vmatpush.msk.msra.mxu0 %vm596_vm0, %v571_v0  ;;  %v574_v3 = vld [vmem:[#allocation2 + $0x168] sm:$0xf] }
  0x42   : > { %s519_s1 = scalar_select %p518_p13, %s12158_s21, 1  ;;  %8603 = vmatpush.msk.msra.mxu1 %vm596_vm0, %v572_v1  ;;  %v565_v4 = vld [vmem:[#allocation2 + $0x120] sm:$0xff]  ;;  %v566_v5 = vld [vmem:[#allocation2 + $0x128] sm:$0xff]  ;;  %11559 = vmatpush.msk.msra.mxu2 %vm596_vm0, %v573_v2  ;;  %v567_v6 = vld [vmem:[#allocation2 + $0x130] sm:$0xff]  ;;  %vm581_vm1 = vcmask 1046528   ;;  %vm589_vm2 = vcmask 228352  }
  0x43   : > { %8611 = vmatpush.msk.msra.mxu3 %vm596_vm0, %v574_v3  ;;  %v568_v7 = vld [vmem:[#allocation2 + $0x138] sm:$0xff]  ;;  %v559_v8 = vld [vmem:[#allocation2 + $0xf0] sm:$0xff]  ;;  %628 = vmatpush.msra.mxu0 %v565_v4  ;;  %v561_v10 = vld [vmem:[#allocation2 + $0x100] sm:$0xff]  ;;  %vm976_vm3 = vcmask 1045504   ;;  %vm1207_vm4 = vcmask 1044480   ;;  %vm1781_vm6 = vcmask 187392  }
  0x44   : > { %s10998_s29 = sshll.u32 %s519_s1, 5  ;;  %654 = vmatpush.msra.mxu1 %v566_v5  ;;  %v560_v9 = vld [vmem:[#allocation2 + $0xf8] sm:$0xff]  ;;  %v562_v11 = vld [vmem:[#allocation2 + $0x108] sm:$0xff]  ;;  %11560 = vmatpush.msra.mxu2 %v567_v6  ;;  %v553_v12 = vld [vmem:[#allocation2 + $0xc0] sm:$0xff]  ;;  %s12076_s14 = smov 64   ;;  %vm3754_vm8 = vcmask 523264  }
  0x45   : > { %s522_s19 = scalar_lea.vmem %s13572_s0, %s10998_s29  ;;  %706 = vmatpush.msra.mxu3 %v568_v7  ;;  %v554_v13 = vld [vmem:[#allocation2 + $0xc8] sm:$0xff]  ;;  %v555_v14 = vld [vmem:[#allocation2 + $0xd0] sm:$0xff]  ;;  %629 = vmatpush.msra.mxu0 %v559_v8  ;;  %v556_v15 = vld [vmem:[#allocation2 + $0xd8] sm:$0xff]  ;;  %vm3774_vm9 = vcmask 1040384   ;;  %vm3771_vm10 = vcmask 72704   ;;  %s516_s25 = sand.u32 1, %s12050_s18  }
  0x46   : > { %655 = vmatpush.msra.mxu1 %v560_v9  ;;  %v12274_v16 = vld [vmem:[%s522_s19] sm:$0xff]  ;;  %v12276_v17 = vld [vmem:[%s522_s19 + $0x8] sm:$0xff]  ;;  %11561 = vmatpush.msra.mxu2 %v561_v10  ;;  %v12280_v20 = vld [vmem:[%s522_s19 + $0x10] sm:$0xff]  ;;  %s517_s13 = scalar_lea.vmem [#allocation17], %s516_s25  ;;  %vm8417_vm11 = vcmask 73728   ;;  %s8420_s2 = scalar_lea.sflag [#allocation4], %s516_s25 }
  0x47   : > { %707 = vmatpush.msra.mxu3 %v562_v11  ;;  %v582_v18 = vrot.slane %v12274_v16, 1  ;;  %v583_v19 = vrot.slane %v12276_v17, 1  ;;  %630 = vmatpush.msra.mxu0 %v553_v12  ;;  %v585_v21 = vrot.slane %v12280_v20, 1  ;;  %v12286_v23 = vld [vmem:[%s522_s19 + $0x18] sm:$0xf]  ;;  %v540_v28 = vld [vmem:[#allocation2 + $0x60] sm:$0xff] }
  0x48   : > { %656 = vmatpush.msra.mxu1 %v554_v13  ;;  %11562 = vmatpush.msra.mxu2 %v555_v14  ;;  %v546_v24 = vld [vmem:[#allocation2 + $0x90] sm:$0xf]  ;;  %v576_v26 = vld [vmem:[#allocation2 + $0x178] sm:$0xf]  ;;  %v587_v29 = vrot.slane %v12286_v23, 1  ;;  %v570_v30 = vld [vmem:[#allocation2 + $0x148] sm:$0xff] }
  0x49   : > { %708 = vmatpush.msra.mxu3 %v556_v15  ;;  %v12284_v22 = vsel %vm581_vm1, %v582_v18, %v583_v19  ;;  %v12293_v25 = vsel %vm581_vm1, %v583_v19, %v585_v21  ;;  %v547_v27 = vld [vmem:[#allocation2 + $0x98] sm:$0xf]  ;;  %8607 = vmatpush.msk.msrb.mxu0 %vm596_vm0, %v573_v2  ;;  %v541_v31 = vld [vmem:[#allocation2 + $0x68] sm:$0xff]  ;;  %v534_v32 = vld [vmem:[#allocation2 + $0x30] sm:$0xff]  ;;  %s8430_s24 = sshll.u32 %s517_s13, 4  ;;  %s11996_s30 = scalar_lea.hbm %s13583_s11, 2  ;;  %s8431_s24 = int_to_ptr.vmem [resolvable:$true] %s8430_s24 }
  0x4a   : > { %8600 = vmatmul.msk.f32.vlgmr.msra.gmra.mxu0 %vm589_vm2, %v12284_v22  ;;  %8604 = vmatmul.msk.f32.vlgmr.msra.gmra.mxu1 %vm589_vm2, %v12284_v22  ;;  %v564_v33 = vld [vmem:[#allocation2 + $0x118] sm:$0xff]  ;;  %v12305_v35 = vsel %vm581_vm1, %v585_v21, %v587_v29  ;;  %v528_v36 = vld [vmem:[#allocation2] sm:$0xff]  ;;  %v558_v37 = vld [vmem:[#allocation2 + $0xe8] sm:$0xff]  ;;  %v977_v21 = vrot.slane %v12274_v16, 2 }
  0x4b   : > { %8609 = vmatmul.msk.f32.vlgmr.msra.gmra.mxu2 %vm589_vm2, %v12293_v25  ;;  %8612 = vmatmul.msk.f32.vlgmr.msra.gmra.mxu3 %vm589_vm2, %v12284_v22  ;;  %v535_v34 = vld [vmem:[#allocation2 + $0x38] sm:$0xff]  ;;  %v529_v38 = vld [vmem:[#allocation2 + $0x8] sm:$0xff]  ;;  %v575_v39 = vld [vmem:[#allocation2 + $0x170] sm:$0xf] }
  0x4c   : > { %8623 = vmatpush.msk.msrb.mxu2 %vm596_vm0, %v546_v24  ;;  %8619 = vmatpush.msk.msrb.mxu1 %vm596_vm0, %v576_v26  ;;  %v550_v40 = vld [vmem:[#allocation2 + $0xb0] sm:$0xf]  ;;  %v549_v41 = vld [vmem:[#allocation2 + $0xa8] sm:$0xf]  ;;  %v551_v42 = vld [vmem:[#allocation2 + $0xb8] sm:$0xf] }
  0x4d   : > { %8627 = vmatpush.msk.msrb.mxu3 %vm596_vm0, %v547_v27  ;;  %680 = vmatpush.msrb.mxu0 %v567_v6  ;;  %v569_v43 = vld [vmem:[#allocation2 + $0x140] sm:$0xff]  ;;  %v543_v45 = vld [vmem:[#allocation2 + $0x78] sm:$0xff]  ;;  %v545_v46 = vld [vmem:[#allocation2 + $0x88] sm:$0xff] }
  0x4e   : > { %808 = vmatpush.msrb.mxu2 %v540_v28  ;;  %758 = vmatpush.msrb.mxu1 %v570_v30  ;;  %v544_v44 = vld [vmem:[#allocation2 + $0x80] sm:$0xff]  ;;  %v563_v47 = vld [vmem:[#allocation2 + $0x110] sm:$0xff]  ;;  %v537_v49 = vld [vmem:[#allocation2 + $0x48] sm:$0xff] }
  0x4f   : > { %834 = vmatpush.msrb.mxu3 %v541_v31  ;;  %681 = vmatpush.msrb.mxu0 %v561_v10  ;;  %v538_v48 = vld [vmem:[#allocation2 + $0x50] sm:$0xff]  ;;  %v539_v50 = vld [vmem:[#allocation2 + $0x58] sm:$0xff]  ;;  %v557_v51 = vld [vmem:[#allocation2 + $0xe0] sm:$0xff]  ;;  %v980_v31 = vrot.slane %v12280_v20, 2 }
  0x50   : > { %809 = vmatpush.msrb.mxu2 %v534_v32  ;;  %759 = vmatpush.msrb.mxu1 %v564_v33  ;;  %v532_v52 = vld [vmem:[#allocation2 + $0x20] sm:$0xff]  ;;  %v531_v53 = vld [vmem:[#allocation2 + $0x18] sm:$0xff]  ;;  %v533_v54 = vld [vmem:[#allocation2 + $0x28] sm:$0xff] }
  0x51   : > { %835 = vmatpush.msrb.mxu3 %v535_v34  ;;  %682 = vmatpush.msrb.mxu0 %v555_v14  ;;  %v548_v55 = vld [vmem:[#allocation2 + $0xa0] sm:$0xf]  ;;  %v542_v56 = vld [vmem:[#allocation2 + $0x70] sm:$0xff]  ;;  %v971_v63 = vld [vmem:[#allocation2 + $0x218] sm:$0xf] }
  0x52   : > { %8601 = vmatmul.msk.f32.gmra.mxu0 %vm589_vm2, %v12293_v25  ;;  %8605 = vmatmul.msk.f32.gmra.mxu1 %vm589_vm2, %v12293_v25  ;;  %v972_v57 = vld [vmem:[#allocation2 + $0x220] sm:$0xf]  ;;  %v966_v58 = vld [vmem:[#allocation2 + $0x1f0] sm:$0xff]  ;;  %v973_v0 = vld [vmem:[#allocation2 + $0x228] sm:$0xf] }
  0x53   : > { %8610 = vmatmul.msk.f32.gmra.mxu2 %vm589_vm2, %v12305_v35  ;;  %8613 = vmatmul.msk.f32.gmra.mxu3 %vm589_vm2, %v12293_v25  ;;  %v536_v59 = vld [vmem:[#allocation2 + $0x40] sm:$0xff]  ;;  %v530_v61 = vld [vmem:[#allocation2 + $0x10] sm:$0xff]  ;;  %v965_v1 = vld [vmem:[#allocation2 + $0x1e8] sm:$0xff] }
  0x54   : > { %810 = vmatpush.msrb.mxu2 %v528_v36  ;;  %760 = vmatpush.msrb.mxu1 %v558_v37  ;;  %v960_v60 = vld [vmem:[#allocation2 + $0x1c0] sm:$0xff]  ;;  %v954_v62 = vld [vmem:[#allocation2 + $0x190] sm:$0xff]  ;;  %v967_v2 = vld [vmem:[#allocation2 + $0x1f8] sm:$0xff] }
  0x55   : > { %836 = vmatpush.msrb.mxu3 %v529_v38  ;;  %8615 = vmatpush.msk.msra.mxu0 %vm596_vm0, %v575_v39  ;;  %v959_v3 = vld [vmem:[#allocation2 + $0x1b8] sm:$0xff]  ;;  %v961_v4 = vld [vmem:[#allocation2 + $0x1c8] sm:$0xff]  ;;  %v970_v7 = vld [vmem:[#allocation2 + $0x210] sm:$0xf]  ;;  %v982_v38 = vrot.slane %v12286_v23, 2 }
  0x56   : > { %8639 = vmatpush.msk.msra.mxu2 %vm596_vm0, %v550_v40  ;;  %8635 = vmatpush.msk.msra.mxu1 %vm596_vm0, %v549_v41  ;;  %v953_v5 = vld [vmem:[#allocation2 + $0x188] sm:$0xff]  ;;  %v955_v6 = vld [vmem:[#allocation2 + $0x198] sm:$0xff]  ;;  %v964_v8 = vld [vmem:[#allocation2 + $0x1e0] sm:$0xff] }
  0x57   : > { %8643 = vmatpush.msk.msra.mxu3 %vm596_vm0, %v551_v42  ;;  %732 = vmatpush.msra.mxu0 %v569_v43  ;;  %v958_v9 = vld [vmem:[#allocation2 + $0x1b0] sm:$0xff]  ;;  %v952_v10 = vld [vmem:[#allocation2 + $0x180] sm:$0xff]  ;;  %v975_v15 = vld [vmem:[#allocation2 + $0x238] sm:$0xf]  ;;  %v12404_v40 = vsel %vm976_vm3, %v980_v31, %v982_v38 }
  0x58   : > { %912 = vmatpush.msra.mxu2 %v544_v44  ;;  %886 = vmatpush.msra.mxu1 %v543_v45  ;;  %v1201_v11 = vld [vmem:[#allocation2 + $0x2d0] sm:$0xf]  ;;  %v1195_v12 = vld [vmem:[#allocation2 + $0x2a0] sm:$0xff]  ;;  %v1202_v18 = vld [vmem:[#allocation2 + $0x2d8] sm:$0xf]  ;;  %v1208_v45 = vrot.slane %v12274_v16, 3 }
  0x59   : > { %938 = vmatpush.msra.mxu3 %v545_v46  ;;  %733 = vmatpush.msra.mxu0 %v563_v47  ;;  %v1189_v13 = vld [vmem:[#allocation2 + $0x270] sm:$0xff]  ;;  %v1183_v14 = vld [vmem:[#allocation2 + $0x240] sm:$0xff]  ;;  %v969_v19 = vld [vmem:[#allocation2 + $0x208] sm:$0xff]  ;;  %v1209_v46 = vrot.slane %v12276_v17, 3 }
  0x5a   : > { %8602 = vmatmul.msk.f32.gmra.mxu0 %vm589_vm2, %v12305_v35  ;;  %8606 = vmatmul.msk.f32.gmra.mxu1 %vm589_vm2, %v12305_v35  ;;  %v1196_v24 = vld [vmem:[#allocation2 + $0x2a8] sm:$0xff]  ;;  %v1190_v26 = vld [vmem:[#allocation2 + $0x278] sm:$0xff]  ;;  %v974_v30 = vld [vmem:[#allocation2 + $0x230] sm:$0xf] }
  0x5b   : > { %8614 = vmatmul.msk.f32.gmra.mxu3 %vm589_vm2, %v12305_v35  ;;  %8624 = vmatmul.msk.f32.vlgmr.msrb.gmra.mxu2 %vm589_vm2, %v12274_v16  ;;  %v957_v28 = vld [vmem:[#allocation2 + $0x1a8] sm:$0xff]  ;;  %v968_v32 = vld [vmem:[#allocation2 + $0x200] sm:$0xff]  ;;  %v962_v33 = vld [vmem:[#allocation2 + $0x1d0] sm:$0xff] }
  0x5c   : > { %913 = vmatpush.msra.mxu2 %v538_v48  ;;  %887 = vmatpush.msra.mxu1 %v537_v49  ;;  %v1184_v29 = vld [vmem:[#allocation2 + $0x248] sm:$0xff]  ;;  %v1205_v36 = vld [vmem:[#allocation2 + $0x2f0] sm:$0xf]  ;;  %v1199_v37 = vld [vmem:[#allocation2 + $0x2c0] sm:$0xff] }
  0x5d   : > { %939 = vmatpush.msra.mxu3 %v539_v50  ;;  %734 = vmatpush.msra.mxu0 %v557_v51  ;;  %v1193_v39 = vld [vmem:[#allocation2 + $0x290] sm:$0xff]  ;;  %v1187_v41 = vld [vmem:[#allocation2 + $0x260] sm:$0xff]  ;;  %v1204_v42 = vld [vmem:[#allocation2 + $0x2e8] sm:$0xf]  ;;  %v12419_v50 = vsel %vm1207_vm4, %v1208_v45, %v1209_v46 }
  0x5e   : > { %914 = vmatpush.msra.mxu2 %v532_v52  ;;  %888 = vmatpush.msra.mxu1 %v531_v53  ;;  %v1206_v43 = vld [vmem:[#allocation2 + $0x2f8] sm:$0xf]  ;;  %v1200_v47 = vld [vmem:[#allocation2 + $0x2c8] sm:$0xff]  ;;  %v1203_v53 = vld [vmem:[#allocation2 + $0x2e0] sm:$0xf] }
  0x5f   : > { %940 = vmatpush.msra.mxu3 %v533_v54  ;;  %v1198_v44 = vld [vmem:[#allocation2 + $0x2b8] sm:$0xff]  ;;  %v1192_v48 = vld [vmem:[#allocation2 + $0x288] sm:$0xff]  ;;  %v1211_v54 = vrot.slane %v12280_v20, 3 }
  0x60   : > { %8655 = vmatpush.msk.msrb.mxu2 %vm596_vm0, %v972_v57  ;;  %v1194_v49 = vld [vmem:[#allocation2 + $0x298] sm:$0xff]  ;;  %v1188_v52 = vld [vmem:[#allocation2 + $0x268] sm:$0xff] }
  0x61   : > { %v1186_v51 = vld [vmem:[#allocation2 + $0x258] sm:$0xff]  ;;  %v12432_v57 = vsel %vm1207_vm4, %v1209_v46, %v1211_v54 }
  0x62   : > { %8608 = vmatmul.msk.f32.vlgmr.msrb.gmra.mxu0 %vm589_vm2, %v12284_v22  ;;  %8620 = vmatmul.msk.f32.vlgmr.msrb.gmra.mxu1 %vm589_vm2, %v12284_v22 }
  0x63   : > { %8625 = vmatmul.msk.f32.gmra.mxu2 %vm589_vm2, %v12276_v17  ;;  %8628 = vmatmul.msk.f32.vlgmr.msrb.gmra.mxu3 %vm589_vm2, %v12274_v16 }
  0x64   : > { %8631 = vmatpush.msk.msrb.mxu0 %vm596_vm0, %v548_v55  ;;  %1073 = vmatpush.msrb.mxu2 %v966_v58  ;;  %v1197_v55 = vld [vmem:[#allocation2 + $0x2b0] sm:$0xff] }
  0x65   : > { %8651 = vmatpush.msk.msrb.mxu1 %vm596_vm0, %v971_v63  ;;  %8659 = vmatpush.msk.msrb.mxu3 %vm596_vm0, %v973_v0  ;;  %v1185_v58 = vld [vmem:[#allocation2 + $0x250] sm:$0xff] }
  0x66   : > { %860 = vmatpush.msrb.mxu0 %v542_v56  ;;  %1074 = vmatpush.msrb.mxu2 %v960_v60  ;;  %v1191_v56 = vld [vmem:[#allocation2 + $0x280] sm:$0xff]  ;;  %v1213_v60 = vrot.slane %v12286_v23, 3  ;;  %v1416_v0 = vld [vmem:[#allocation2 + $0x310] sm:$0xff] }
  0x67   : > { %1047 = vmatpush.msrb.mxu1 %v965_v1  ;;  %1099 = vmatpush.msrb.mxu3 %v967_v2  ;;  %v1433_v1 = vld [vmem:[#allocation2 + $0x398] sm:$0xf]  ;;  %v1435_v2 = vld [vmem:[#allocation2 + $0x3a8] sm:$0xf] }
  0x68   : > { %861 = vmatpush.msrb.mxu0 %v536_v59  ;;  %1075 = vmatpush.msrb.mxu2 %v954_v62  ;;  %v1434_v59 = vld [vmem:[#allocation2 + $0x3a0] sm:$0xf]  ;;  %v12445_v63 = vsel %vm1207_vm4, %v1211_v54, %v1213_v60 }
  0x69   : > { %1048 = vmatpush.msrb.mxu1 %v959_v3  ;;  %1100 = vmatpush.msrb.mxu3 %v961_v4  ;;  %v1422_v62 = vld [vmem:[#allocation2 + $0x340] sm:$0xff]  ;;  %v1427_v3 = vld [vmem:[#allocation2 + $0x368] sm:$0xff]  ;;  %v1429_v4 = vld [vmem:[#allocation2 + $0x378] sm:$0xff] }
  0x6a   : > { %8616 = vmatmul.msk.f32.vlgmr.msra.gmra.mxu0 %vm589_vm2, %v12284_v22  ;;  %8621 = vmatmul.msk.f32.gmra.mxu1 %vm589_vm2, %v12293_v25  ;;  %v978_v22 = vrot.slane %v12276_v17, 2 }
  0x6b   : > { %8626 = vmatmul.msk.f32.gmra.mxu2 %vm589_vm2, %v12280_v20  ;;  %8629 = vmatmul.msk.f32.gmra.mxu3 %vm589_vm2, %v12276_v17 }
  0x6c   : > { %862 = vmatpush.msrb.mxu0 %v530_v61  ;;  %1049 = vmatpush.msrb.mxu1 %v953_v5  ;;  %v12378_v27 = vsel %vm976_vm3, %v977_v21, %v978_v22  ;;  %v12391_v34 = vsel %vm976_vm3, %v978_v22, %v980_v31  ;;  %v1428_v61 = vld [vmem:[#allocation2 + $0x370] sm:$0xff]  ;;  %v1421_v5 = vld [vmem:[#allocation2 + $0x338] sm:$0xff]  ;;  %v1431_v21 = vld [vmem:[#allocation2 + $0x388] sm:$0xff] }
  0x6d   : > { %1101 = vmatpush.msrb.mxu3 %v955_v6  ;;  %v1423_v6 = vld [vmem:[#allocation2 + $0x348] sm:$0xff] }
  0x6e   : > { %8647 = vmatpush.msk.msra.mxu0 %vm596_vm0, %v970_v7  ;;  %v1415_v7 = vld [vmem:[#allocation2 + $0x308] sm:$0xff] }
  0x70   : > { %1021 = vmatpush.msra.mxu0 %v964_v8  ;;  %v1417_v8 = vld [vmem:[#allocation2 + $0x318] sm:$0xff] }
  0x72   : > { %8617 = vmatmul.msk.f32.gmra.mxu0 %vm589_vm2, %v12293_v25  ;;  %8622 = vmatmul.msk.f32.gmra.mxu1 %vm589_vm2, %v12305_v35  ;;  %v963_v25 = vld [vmem:[#allocation2 + $0x1d8] sm:$0xff] }
  0x73   : > { %8630 = vmatmul.msk.f32.gmra.mxu3 %vm589_vm2, %v12280_v20  ;;  %8640 = vmatmul.msk.f32.vlgmr.msra.gmra.mxu2 %vm589_vm2, %v12274_v16 }
  0x74   : > { %1022 = vmatpush.msra.mxu0 %v958_v9  ;;  %8671 = vmatpush.msk.msra.mxu2 %vm596_vm0, %v1201_v11  ;;  %v1432_v9 = vld [vmem:[#allocation2 + $0x390] sm:$0xf] }
  0x75   : > { %v1420_v11 = vld [vmem:[#allocation2 + $0x330] sm:$0xff] }
  0x76   : > { %1023 = vmatpush.msra.mxu0 %v952_v10  ;;  %1252 = vmatpush.msra.mxu2 %v1195_v12  ;;  %v1426_v10 = vld [vmem:[#allocation2 + $0x360] sm:$0xff] }
  0x77   : > { %v1414_v12 = vld [vmem:[#allocation2 + $0x300] sm:$0xff] }
  0x78   : > { %1253 = vmatpush.msra.mxu2 %v1189_v13 }
  0x7a   : > { %8618 = vmatmul.msk.f32.gmra.mxu0 %vm589_vm2, %v12305_v35  ;;  %8636 = vmatmul.msk.f32.vlgmr.msra.gmra.mxu1 %vm589_vm2, %v12274_v16  ;;  %v956_v35 = vld [vmem:[#allocation2 + $0x1a0] sm:$0xff] }
  0x7b   : > { %8641 = vmatmul.msk.f32.gmra.mxu2 %vm589_vm2, %v12276_v17  ;;  %8644 = vmatmul.msk.f32.vlgmr.msra.gmra.mxu3 %vm589_vm2, %v12274_v16 }
  0x7c   : > { %1254 = vmatpush.msra.mxu2 %v1183_v14  ;;  %8667 = vmatpush.msk.msra.mxu1 %vm596_vm0, %v975_v15  ;;  %v1437_v15 = vld [vmem:[#allocation2 + $0x3b8] sm:$0xf] }
  0x7d   : > { %8675 = vmatpush.msk.msra.mxu3 %vm596_vm0, %v1202_v18  ;;  %v1438_v18 = vrot.slane %v12274_v16, 4 }
  0x7e   : > { %1151 = vmatpush.msra.mxu1 %v969_v19  ;;  %v1439_v19 = vrot.slane %v12276_v17, 4 }
  0x7f   : > { %1278 = vmatpush.msra.mxu3 %v1196_v24 }
  0x80   : > { %1152 = vmatpush.msra.mxu1 %v963_v25 }
  0x81   : > { %1279 = vmatpush.msra.mxu3 %v1190_v26 }
  0x82   : > { %8632 = vmatmul.msk.f32.vlgmr.msrb.gmra.mxu0 %vm589_vm2, %v12274_v16  ;;  %8637 = vmatmul.msk.f32.gmra.mxu1 %vm589_vm2, %v12276_v17  ;;  %v1436_v16 = vld [vmem:[#allocation2 + $0x3b0] sm:$0xf] }
  0x83   : > { %8642 = vmatmul.msk.f32.gmra.mxu2 %vm589_vm2, %v12280_v20  ;;  %8645 = vmatmul.msk.f32.gmra.mxu3 %vm589_vm2, %v12276_v17 }
  0x84   : > { %1153 = vmatpush.msra.mxu1 %v957_v28  ;;  %1280 = vmatpush.msra.mxu3 %v1184_v29  ;;  %v1440_v28 = vsel %vm596_vm0, %v1438_v18, %v1439_v19  ;;  %v1419_v29 = vld [vmem:[#allocation2 + $0x328] sm:$0xff] }
  0x85   : > { %8663 = vmatpush.msk.msrb.mxu0 %vm596_vm0, %v974_v30  ;;  %v1430_v30 = vld [vmem:[#allocation2 + $0x380] sm:$0xff] }
  0x87   : > { %1125 = vmatpush.msrb.mxu0 %v968_v32 }
  0x89   : > { %1126 = vmatpush.msrb.mxu0 %v962_v33 }
  0x8a   : > { %8633 = vmatmul.msk.f32.gmra.mxu0 %vm589_vm2, %v12276_v17  ;;  %8638 = vmatmul.msk.f32.gmra.mxu1 %vm589_vm2, %v12280_v20  ;;  %v1441_v17 = vrot.slane %v12280_v20, 4 }
  0x8b   : > { %8646 = vmatmul.msk.f32.gmra.mxu3 %vm589_vm2, %v12280_v20  ;;  %8656 = vmatmul.msk.f32.vlgmr.msrb.gmra.mxu2 %vm589_vm2, %v12378_v27 }
  0x8c   : > { %1127 = vmatpush.msrb.mxu0 %v956_v35  ;;  %8687 = vmatpush.msk.msrb.mxu2 %vm596_vm0, %v1205_v36  ;;  %v1424_v35 = vld [vmem:[#allocation2 + $0x350] sm:$0xff]  ;;  %v1442_v36 = vsel %vm596_vm0, %v1439_v19, %v1441_v17 }
  0x8e   : > { %1356 = vmatpush.msrb.mxu2 %v1199_v37  ;;  %v1418_v37 = vld [vmem:[#allocation2 + $0x320] sm:$0xff] }
  0x90   : > { %1357 = vmatpush.msrb.mxu2 %v1193_v39 }
  0x92   : > { %8634 = vmatmul.msk.f32.gmra.mxu0 %vm589_vm2, %v12280_v20  ;;  %8652 = vmatmul.msk.f32.vlgmr.msrb.gmra.mxu1 %vm589_vm2, %v12378_v27  ;;  %v1443_v20 = vrot.slane %v12286_v23, 4 }
  0x93   : > { %8657 = vmatmul.msk.f32.gmra.mxu2 %vm589_vm2, %v12391_v34  ;;  %8660 = vmatmul.msk.f32.vlgmr.msrb.gmra.mxu3 %vm589_vm2, %v12378_v27 }
  0x94   : > { %1358 = vmatpush.msrb.mxu2 %v1187_v41  ;;  %8683 = vmatpush.msk.msrb.mxu1 %vm596_vm0, %v1204_v42  ;;  %v1444_v42 = vsel %vm596_vm0, %v1441_v17, %v1443_v20 }
  0x95   : > { %8691 = vmatpush.msk.msrb.mxu3 %vm596_vm0, %v1206_v43 }
  0x96   : > { %1330 = vmatpush.msrb.mxu1 %v1198_v44 }
  0x97   : > { %1382 = vmatpush.msrb.mxu3 %v1200_v47 }
  0x98   : > { %1331 = vmatpush.msrb.mxu1 %v1192_v48 }
  0x99   : > { %1383 = vmatpush.msrb.mxu3 %v1194_v49 }
  0x9a   : > { %8648 = vmatmul.msk.f32.vlgmr.msra.gmra.mxu0 %vm589_vm2, %v12378_v27  ;;  %8653 = vmatmul.msk.f32.gmra.mxu1 %vm589_vm2, %v12391_v34 }
  0x9b   : > { %8658 = vmatmul.msk.f32.gmra.mxu2 %vm589_vm2, %v12404_v40  ;;  %8661 = vmatmul.msk.f32.gmra.mxu3 %vm589_vm2, %v12391_v34 }
  0x9c   : > { %1332 = vmatpush.msrb.mxu1 %v1186_v51  ;;  %1384 = vmatpush.msrb.mxu3 %v1188_v52 }
  0x9d   : > { %8679 = vmatpush.msk.msra.mxu0 %vm596_vm0, %v1203_v53 }
  0x9f   : > { %1304 = vmatpush.msra.mxu0 %v1197_v55 }
  0xa1   : > { %1305 = vmatpush.msra.mxu0 %v1191_v56 }
  0xa2   : > { %8649 = vmatmul.msk.f32.gmra.mxu0 %vm589_vm2, %v12391_v34  ;;  %8654 = vmatmul.msk.f32.gmra.mxu1 %vm589_vm2, %v12404_v40 }
  0xa3   : > { %8662 = vmatmul.msk.f32.gmra.mxu3 %vm589_vm2, %v12404_v40  ;;  %8672 = vmatmul.msk.f32.vlgmr.msra.gmra.mxu2 %vm589_vm2, %v12419_v50 }
  0xa4   : > { %1306 = vmatpush.msra.mxu0 %v1185_v58  ;;  %8703 = vmatpush.msk.msra.mxu2 %vm596_vm0, %v1434_v59 }
  0xa6   : > { %1534 = vmatpush.msra.mxu2 %v1428_v61 }
  0xa8   : > { %1535 = vmatpush.msra.mxu2 %v1422_v62 }
  0xaa   : > { %8650 = vmatmul.msk.f32.gmra.mxu0 %vm589_vm2, %v12404_v40  ;;  %8668 = vmatmul.msk.f32.vlgmr.msra.gmra.mxu1 %vm589_vm2, %v12378_v27 }
  0xab   : > { %8673 = vmatmul.msk.f32.gmra.mxu2 %vm589_vm2, %v12432_v57  ;;  %8676 = vmatmul.msk.f32.vlgmr.msra.gmra.mxu3 %vm589_vm2, %v12419_v50 }
  0xac   : > { %1536 = vmatpush.msra.mxu2 %v1416_v0  ;;  %8699 = vmatpush.msk.msra.mxu1 %vm596_vm0, %v1433_v1 }
  0xad   : > { %8707 = vmatpush.msk.msra.mxu3 %vm596_vm0, %v1435_v2 }
  0xae   : > { %1508 = vmatpush.msra.mxu1 %v1427_v3 }
  0xaf   : > { %1560 = vmatpush.msra.mxu3 %v1429_v4 }
  0xb0   : > { %1509 = vmatpush.msra.mxu1 %v1421_v5 }
  0xb1   : > { %1561 = vmatpush.msra.mxu3 %v1423_v6 }
  0xb2   : > { %8664 = vmatmul.msk.f32.vlgmr.msrb.gmra.mxu0 %vm589_vm2, %v12378_v27  ;;  %8669 = vmatmul.msk.f32.gmra.mxu1 %vm589_vm2, %v12391_v34  ;;  %v1425_v27 = vld [vmem:[#allocation2 + $0x358] sm:$0xff] }
  0xb3   : > { %8674 = vmatmul.msk.f32.gmra.mxu2 %vm589_vm2, %v12445_v63  ;;  %8677 = vmatmul.msk.f32.gmra.mxu3 %vm589_vm2, %v12432_v57 }
  0xb4   : > { %1510 = vmatpush.msra.mxu1 %v1415_v7  ;;  %1562 = vmatpush.msra.mxu3 %v1417_v8 }
  0xb5   : > { %8695 = vmatpush.msk.msrb.mxu0 %vm596_vm0, %v1432_v9 }
  0xb7   : > { %1482 = vmatpush.msrb.mxu0 %v1426_v10 }
  0xb9   : > { %1483 = vmatpush.msrb.mxu0 %v1420_v11 }
  0xba   : > { %8665 = vmatmul.msk.f32.gmra.mxu0 %vm589_vm2, %v12391_v34  ;;  %8670 = vmatmul.msk.f32.gmra.mxu1 %vm589_vm2, %v12404_v40 }
  0xbb   : > { %8678 = vmatmul.msk.f32.gmra.mxu3 %vm589_vm2, %v12445_v63  ;;  %8688 = vmatmul.msk.f32.vlgmr.msrb.gmra.mxu2 %vm589_vm2, %v12419_v50 }
  0xbc   : > { %1484 = vmatpush.msrb.mxu0 %v1414_v12 }
  0xc2   : > { %8666 = vmatmul.msk.f32.gmra.mxu0 %vm589_vm2, %v12404_v40  ;;  %8684 = vmatmul.msk.f32.vlgmr.msrb.gmra.mxu1 %vm589_vm2, %v12419_v50 }
  0xc3   : > { %8689 = vmatmul.msk.f32.gmra.mxu2 %vm589_vm2, %v12432_v57  ;;  %8692 = vmatmul.msk.f32.vlgmr.msrb.gmra.mxu3 %vm589_vm2, %v12419_v50 }
  0xc4   : > { %8715 = vmatpush.msk.msrb.mxu1 %vm596_vm0, %v1437_v15 }
  0xc6   : > { %1612 = vmatpush.msrb.mxu1 %v1431_v21 }
  0xc7   : > { %v12474_v13 = vpop.f32.mrf.mxu0  ;;  %v12476_v14 = vpop.f32.mrf.mxu1 }
  0xc8   : > { %1613 = vmatpush.msrb.mxu1 %v1425_v27 }
  0xca   : > { %8680 = vmatmul.msk.f32.vlgmr.msra.gmra.mxu0 %vm589_vm2, %v12419_v50  ;;  %8685 = vmatmul.msk.f32.gmra.mxu1 %vm589_vm2, %v12432_v57 }
  0xcb   : > { %8690 = vmatmul.msk.f32.gmra.mxu2 %vm589_vm2, %v12445_v63  ;;  %8693 = vmatmul.msk.f32.gmra.mxu3 %vm589_vm2, %v12432_v57 }
  0xcc   : > { %1614 = vmatpush.msrb.mxu1 %v1419_v29  ;;  %8711 = vmatpush.msk.msra.mxu0 %vm596_vm0, %v1436_v16 }
  0xce   : > { %v12489_v22 = vpop.f32.mrf.mxu2  ;;  %v12491_v24 = vpop.f32.mrf.mxu3  ;;  %1586 = vmatpush.msra.mxu0 %v1430_v30 }
  0xcf   : > { %v12493_v25 = vpop.f32.mrf.mxu0  ;;  %v12495_v26 = vpop.f32.mrf.mxu1 }
  0xd0   : > { %1587 = vmatpush.msra.mxu0 %v1424_v35 }
  0xd2   : > { %8681 = vmatmul.msk.f32.gmra.mxu0 %vm589_vm2, %v12432_v57  ;;  %8686 = vmatmul.msk.f32.gmra.mxu1 %vm589_vm2, %v12445_v63 }
  0xd3   : > { %8694 = vmatmul.msk.f32.gmra.mxu3 %vm589_vm2, %v12445_v63  ;;  %8704 = vmatmul.msk.f32.vlgmr.msra.gmra.mxu2 %vm589_vm2, %v1440_v28 }
  0xd4   : > { %1588 = vmatpush.msra.mxu0 %v1418_v37 }
  0xd6   : > { %v12507_v31 = vpop.f32.mrf.mxu2  ;;  %v12509_v32 = vpop.f32.mrf.mxu3 }
  0xd7   : > { %v12511_v33 = vpop.f32.mrf.mxu0  ;;  %v12513_v34 = vpop.f32.mrf.mxu1 }
  0xda   : > { %8682 = vmatmul.msk.f32.gmra.mxu0 %vm589_vm2, %v12445_v63  ;;  %8700 = vmatmul.msk.f32.vlgmr.msra.gmra.mxu1 %vm589_vm2, %v1440_v28 }
  0xdb   : > { %8705 = vmatmul.msk.f32.gmra.mxu2 %vm589_vm2, %v1442_v36  ;;  %8708 = vmatmul.msk.f32.vlgmr.msra.gmra.mxu3 %vm589_vm2, %v1440_v28 }
  0xde   : > { %v12522_v38 = vpop.f32.mrf.mxu3  ;;  %v12524_v39 = vpop.f32.mrf.mxu2 }
  0xdf   : > { %v12526_v40 = vpop.f32.mrf.mxu0  ;;  %v12528_v41 = vpop.f32.mrf.mxu1 }
  0xe2   : > { %8696 = vmatmul.msk.f32.vlgmr.msrb.gmra.mxu0 %vm589_vm2, %v1440_v28  ;;  %8701 = vmatmul.msk.f32.gmra.mxu1 %vm589_vm2, %v1442_v36 }
  0xe3   : > { %8706 = vmatmul.msk.f32.gmra.mxu2 %vm589_vm2, %v1444_v42  ;;  %8709 = vmatmul.msk.f32.gmra.mxu3 %vm589_vm2, %v1442_v36 }
  0xe6   : > { %v12535_v23 = vpop.f32.mrf.mxu2  ;;  %v12537_v43 = vpop.f32.mrf.mxu3 }
  0xe7   : > { %v12539_v44 = vpop.f32.mrf.mxu0  ;;  %v12541_v45 = vpop.f32.mrf.mxu1 }
  0xea   : > { %8697 = vmatmul.msk.f32.gmra.mxu0 %vm589_vm2, %v1442_v36  ;;  %8702 = vmatmul.msk.f32.gmra.mxu1 %vm589_vm2, %v1444_v42 }
  0xeb   : > { %8710 = vmatmul.msk.f32.gmra.mxu3 %vm589_vm2, %v1444_v42 }
  0xee   : > { %v12546_v46 = vpop.f32.mrf.mxu2  ;;  %v12548_v47 = vpop.f32.mrf.mxu3 }
  0xef   : > { %v12550_v48 = vpop.f32.mrf.mxu0  ;;  %v12552_v49 = vpop.f32.mrf.mxu1 }
  0xf2   : > { %8698 = vmatmul.msk.f32.gmra.mxu0 %vm589_vm2, %v1444_v42  ;;  %8716 = vmatmul.msk.f32.vlgmr.msrb.gmra.mxu1 %vm589_vm2, %v1440_v28 }
  0xf6   : > { %v12556_v50 = vpop.f32.mrf.mxu3  ;;  %v12558_v51 = vpop.f32.mrf.mxu2 }
  0xf7   : > { %v12560_v52 = vpop.f32.mrf.mxu0  ;;  %v12562_v53 = vpop.f32.mrf.mxu1 }
  0xfa   : > { %8712 = vmatmul.msk.f32.vlgmr.msra.gmra.mxu0 %vm589_vm2, %v1440_v28  ;;  %8717 = vmatmul.msk.f32.gmra.mxu1 %vm589_vm2, %v1442_v36 }
  0xfe   : > { %v12566_v54 = vpop.f32.mrf.mxu2  ;;  %v12568_v55 = vpop.f32.mrf.mxu3 }
  0xff   : > { %v12570_v56 = vpop.f32.mrf.mxu0  ;;  %v893_v57 = vpop.f32.mrf.mxu1 }
 0x102   : > { %8713 = vmatmul.msk.f32.gmra.mxu0 %vm589_vm2, %v1442_v36  ;;  %8718 = vmatmul.msk.f32.gmra.mxu1 %vm589_vm2, %v1444_v42 }
 0x106   : > { %v12574_v58 = vpop.f32.mrf.mxu2  ;;  %v12576_v59 = vpop.f32.mrf.mxu3 }
 0x107   : > { %v12578_v60 = vpop.f32.mrf.mxu0  ;;  %v896_v61 = vpop.f32.mrf.mxu1 }
 0x10a   : > { %8714 = vmatmul.msk.f32.gmra.mxu0 %vm589_vm2, %v1444_v42 }
 0x10e   : > { %v12581_v62 = vpop.f32.mrf.mxu3  ;;  %v12583_v63 = vpop.f32.mrf.mxu2 }
 0x10f   : > { %v12585_v0 = vpop.f32.mrf.mxu0  ;;  %v12587_v1 = vpop.f32.mrf.mxu1 }
 0x116   : > { %v12589_v2 = vpop.f32.mrf.mxu2  ;;  %v1103_v3 = vpop.f32.mrf.mxu3 }
 0x117   : > { %v1025_v4 = vpop.f32.mrf.mxu0  ;;  %v12591_v5 = vpop.f32.mrf.mxu1 }
 0x118   : > { %13602 = vst [vmem:[#allocation27_spill] sm:$0xff] %v12591_v5 }
 0x11e   : > { %v12593_v6 = vpop.f32.mrf.mxu2  ;;  %v1106_v7 = vpop.f32.mrf.mxu3 }
 0x11f   : > { %13603 = vst [vmem:[#allocation28_spill] sm:$0xff] %v12593_v6  ;;  %v1028_v8 = vpop.f32.mrf.mxu0  ;;  %v12595_v9 = vpop.f32.mrf.mxu1 }
 0x120   : > { %13604 = vst [vmem:[#allocation29_spill] sm:$0xff] %v12595_v9 }
 0x126   : > { %v1109_v10 = vpop.f32.mrf.mxu3  ;;  %v1256_v11 = vpop.f32.mrf.mxu2 }
 0x127   : > { %v1031_v12 = vpop.f32.mrf.mxu0  ;;  %v12597_v15 = vpop.f32.mrf.mxu1 }
 0x128   : > { %13605 = vst [vmem:[#allocation30_spill] sm:$0xff] %v12597_v15 }
 0x12e   : > { %v1259_v18 = vpop.f32.mrf.mxu2  ;;  %v12599_v19 = vpop.f32.mrf.mxu3 }
 0x12f   : > { %13606 = vst [vmem:[#allocation31_spill] sm:$0xff] %v12599_v19  ;;  %v12601_v21 = vpop.f32.mrf.mxu0  ;;  %v12603_v27 = vpop.f32.mrf.mxu1 }
 0x130   : > { %13607 = vst [vmem:[#allocation32_spill] sm:$0xff] %v12601_v21 }
 0x131   : > { %13608 = vst [vmem:[#allocation33_spill] sm:$0xff] %v12603_v27 }
 0x136   : > { %v12605_v28 = vpop.f32.mrf.mxu3  ;;  %v1262_v17 = vpop.f32.mrf.mxu2 }
 0x137   : > { %13609 = vst [vmem:[#allocation34_spill] sm:$0xff] %v12605_v28  ;;  %v12607_v29 = vpop.f32.mrf.mxu0  ;;  %v12609_v16 = vpop.f32.mrf.mxu1 }
 0x138   : > { %13610 = vst [vmem:[#allocation35_spill] sm:$0xff] %v12607_v29 }
 0x139   : > { %13611 = vst [vmem:[#allocation36_spill] sm:$0xff] %v12609_v16 }
 0x13e   : > { %v12611_v30 = vpop.f32.mrf.mxu3  ;;  %v12615_v37 = vpop.f32.mrf.mxu2 }
 0x13f   : > { %13612 = vst [vmem:[#allocation37_spill] sm:$0xff] %v12611_v30  ;;  %v12613_v35 = vpop.f32.mrf.mxu0  ;;  %v1334_v36 = vpop.f32.mrf.mxu1 }
 0x140   : > { %13613 = vst [vmem:[#allocation38_spill] sm:$0xff] %v12613_v35 }
 0x141   : > { %13614 = vst [vmem:[#allocation39_spill] sm:$0xff] %v12615_v37 }
 0x146   : > { %v12617_v20 = vpop.f32.mrf.mxu3  ;;  %v12621_v21 = vpop.f32.mrf.mxu2 }
 0x147   : > { %13615 = vst [vmem:[#allocation40_spill] sm:$0xff] %v12617_v20  ;;  %v12619_v42 = vpop.f32.mrf.mxu0  ;;  %v1337_v19 = vpop.f32.mrf.mxu1 }
 0x148   : > { %13616 = vst [vmem:[#allocation41_spill] sm:$0xff] %v12619_v42 }
 0x149   : > { %13617 = vst [vmem:[#allocation42_spill] sm:$0xff] %v12621_v21  ;;  %v816_v21 = vadd.f32 %v12535_v23, %v12493_v25 }
 0x14e   : > { %v12623_v28 = vpop.f32.mrf.mxu3  ;;  %v12627_v27 = vpop.f32.mrf.mxu2 }
 0x14f   : > { %13618 = vst [vmem:[#allocation43_spill] sm:$0xff] %v12623_v28  ;;  %v12625_v29 = vpop.f32.mrf.mxu0  ;;  %v1340_v16 = vpop.f32.mrf.mxu1  ;;  %v1170_v28 = vadd.f32 %v1028_v8, %v816_v21  ;;  %v13627_v21 = vld [vmem:[#allocation28_spill] sm:$0xff] }
 0x150   : > { %13619 = vst [vmem:[#allocation44_spill] sm:$0xff] %v12625_v29  ;;  %v813_v29 = vadd.f32 %v12524_v39, %v12474_v13  ;;  %v842_v13 = vadd.f32 %v12548_v47, %v12495_v26  ;;  %v943_v26 = vadd.f32 %v12568_v55, %v12528_v41  ;;  %v946_v41 = vadd.f32 %v12576_v59, %v12541_v45 }
 0x151   : > { %13620 = vst [vmem:[#allocation45_spill] sm:$0xff] %v12627_v27  ;;  %v894_v27 = vadd.f32 %v893_v57, %v12509_v32  ;;  %v1401_v5 = vadd.f32 %v1259_v18, %v1170_v28  ;;  %v845_v32 = vadd.f32 %v12556_v50, %v12513_v34  ;;  %v865_v34 = vadd.f32 %v12570_v56, %v12526_v40  ;;  %v12669_v50 = vld [vmem:[#allocation5] sm:$0x3f]  ;;  %v13626_v18 = vld [vmem:[#allocation27_spill] sm:$0xff]  ;;  %v13628_v28 = vld [vmem:[#allocation29_spill] sm:$0xff] }
 0x152   : > { %v1645_v57 = vperm.slane %v12669_v50, 0  ;;  %v1768_v55 = vlaneseq  ;;  %v871_v45 = vadd.f32 %v12585_v0, %v12507_v31  ;;  %v13629_v0 = vld [vmem:[#allocation30_spill] sm:$0xff] }
 0x153   : > { %v1173_v6 = vadd.f32 %v1106_v7, %v894_v27  ;;  %v1166_v7 = vadd.f32 %v12583_v63, %v865_v34  ;;  %v1177_v31 = vadd.f32 %v13628_v28, %v845_v32 }
 0x154   : > { %v1178_v27 = vadd.f32 %v13627_v21, %v871_v45 }
 0x156   : > { %v12629_v30 = vpop.f32.mrf.mxu3  ;;  %v12637_v42 = vpop.f32.mrf.mxu2 }
 0x157   : > { %13621 = vst [vmem:[#allocation46_spill] sm:$0xff] %v12629_v30  ;;  %v12631_v35 = vpop.f32.mrf.mxu0  ;;  %v12633_v15 = vpop.f32.mrf.mxu1  ;;  %v839_v30 = vadd.f32 %v12537_v43, %v12476_v14  ;;  %v12658_v14 = vadd.f32 %v12558_v51, %v12539_v44  ;;  %v1404_v43 = vadd.f32 %v1337_v19, %v1173_v6  ;;  %v949_v6 = vadd.f32 %v12581_v62, %v12552_v49 }
 0x158   : > { %13622 = vst [vmem:[#allocation47_spill] sm:$0xff] %v12631_v35  ;;  %v1171_v49 = vadd.f32 %v13626_v18, %v842_v13  ;;  %v13632_v13 = vld [vmem:[#allocation43_spill] sm:$0xff]  ;;  %v13638_v18 = vld [vmem:[#allocation36_spill] sm:$0xff] }
 0x159   : > { %13623 = vst [vmem:[#allocation48_spill] sm:$0xff] %v12633_v15  ;;  %v819_v15 = vadd.f32 %v12546_v46, %v12511_v33  ;;  %v897_v33 = vadd.f32 %v896_v61, %v12522_v38 }
 0x15a   : > { %13625 = vst [vmem:[#allocation50_spill] sm:$0xff] %v12637_v42  ;;  %v1164_v42 = vadd.f32 %v1025_v4, %v813_v29  ;;  %v1169_v29 = vadd.f32 %v13629_v0, %v943_v26  ;;  %v12075_v0 = vmov 0.0  }
 0x15b   : > { %v1179_v47 = vadd.f32 %v1109_v10, %v897_v33 }
 0x15d   : > { %v1410_v40 = vadd.f32 %v1340_v16, %v1179_v47 }
 0x15e   : > { %v1564_v37 = vpop.f32.mrf.mxu3  ;;  %v12671_v51 = vpop.f32.mrf.mxu2 }
 0x15f   : > { %v1486_v20 = vpop.f32.mrf.mxu0  ;;  %v12635_v9 = vpop.f32.mrf.mxu1 }
 0x160   : > { %13624 = vst [vmem:[#allocation49_spill] sm:$0xff] %v12635_v9  ;;  %v891_v9 = vadd.f32 %v12562_v53, %v12491_v24  ;;  %v1395_v24 = vadd.f32 %v1256_v11, %v1164_v42  ;;  %v12663_v53 = vadd.f32 %v12566_v54, %v12550_v48  ;;  %v12676_v48 = vadd.f32 %v12574_v58, %v12560_v52 }
 0x161   : > { %v1176_v54 = vadd.f32 %v1031_v12, %v819_v15  ;;  %v1165_v12 = vadd.f32 %v12587_v1, %v839_v30  ;;  %v12696_v42 = vand.u32 127, %v1768_v55 }
 0x162   : > { %v1167_v39 = vadd.f32 %v1103_v3, %v891_v9  ;;  %v1625_v38 = vadd.f32 %v1486_v20, %v1395_v24  ;;  %v1648_v3 = vperm.slane %v12669_v50, 3 }
 0x163   : > { %v1407_v52 = vadd.f32 %v1262_v17, %v1176_v54  ;;  %v13630_v17 = vld [vmem:[#allocation33_spill] sm:$0xff] }
 0x164   : > { %v1398_v44 = vadd.f32 %v1334_v36, %v1167_v39  ;;  %v1657_v59 = vadd.f32 %v1645_v57, %v1625_v38  ;;  %v13634_v38 = vld [vmem:[#allocation44_spill] sm:$0xff] }
 0x166   : > { %v1567_v35 = vpop.f32.mrf.mxu3  ;;  %v1628_v56 = vadd.f32 %v1564_v37, %v1398_v44  ;;  %v1693_v36 = vrot.slane %v1657_v59, 1  ;;  %v1544_v24 = vpop.f32.mrf.mxu2 }
 0x167   : > { %v1489_v25 = vpop.f32.mrf.mxu0  ;;  %v12650_v23 = vpop.f32.mrf.mxu1  ;;  %v1634_v61 = vadd.f32 %v1567_v35, %v1404_v43  ;;  %v1175_v35 = vadd.f32 %v13630_v17, %v946_v41 }
 0x168   : > { %v1631_v46 = vadd.f32 %v1489_v25, %v1401_v5  ;;  %v868_v5 = vadd.f32 %v12578_v60, %v12489_v22  ;;  %v1769_v60 = vshrl.u32 %v1768_v55, 7  ;;  %v1660_v62 = vadd.f32 %v1648_v3, %v1628_v56 }
 0x169   : > { %v1666_v8 = vadd.f32 %v1648_v3, %v1634_v61  ;;  %v1406_v33 = vadd.f32 %v13632_v13, %v1175_v35  ;;  %v13643_v35 = vld [vmem:[#allocation37_spill] sm:$0xff] }
 0x16a   : > { %v1663_v4 = vadd.f32 %v1645_v57, %v1631_v46  ;;  %v1172_v15 = vadd.f32 %v12589_v2, %v868_v5  ;;  %v13631_v2 = vld [vmem:[#allocation40_spill] sm:$0xff]  ;;  %v1773_v25 = vmul.u32 2, %v1769_v60  ;;  %v1702_v39 = vrot.slane %v1660_v62, 1  ;;  %v13633_v46 = vld [vmem:[#allocation47_spill] sm:$0xff] }
 0x16b   : > { %v1703_v1 = vrot.slane %v1666_v8, 1  ;;  %v1400_v37 = vadd.f32 %v13631_v2, %v1169_v29  ;;  %v1409_v26 = vadd.f32 %v13633_v46, %v1178_v27  ;;  %v1650_v27 = vperm.slane %v12669_v50, 5 }
 0x16c   : > { %v1694_v63 = vrot.slane %v1663_v4, 1  ;;  %vm12706_vm5 = vcmp.eq.s32.totalorder %v12696_v42, %v1773_v25  ;;  %v13646_v25 = vld [vmem:[#allocation39_spill] sm:$0xff] }
 0x16d   : > { %v1639_v56 = vadd.f32 %v1544_v24, %v1409_v26 }
 0x16e   : > { %v1570_v58 = vpop.f32.mrf.mxu3  ;;  %v1695_v43 = vsel %vm581_vm1, %v1693_v36, %v1694_v63  ;;  %v1408_v36 = vadd.f32 %v13643_v35, %v1177_v31  ;;  %v13648_v31 = vld [vmem:[#allocation38_spill] sm:$0xff] }
 0x16f   : > { %v1640_v9 = vadd.f32 %v1570_v58, %v1410_v40  ;;  %v1492_v10 = vpop.f32.mrf.mxu0  ;;  %v1616_v11 = vpop.f32.mrf.mxu1  ;;  %v1704_v40 = vsel %vm581_vm1, %v1702_v39, %v1703_v1  ;;  %v1741_v5 = vmax.f32 %v1657_v59, %v1695_v43  ;;  %v1181_v59 = vadd.f32 %v13638_v18, %v949_v6  ;;  %v2177_v43 = vld [vmem:[#allocation7 + $0x9b0] sm:$0xff] }
 0x170   : > { %v1637_v22 = vadd.f32 %v1492_v10, %v1407_v52  ;;  %v13637_v10 = vld [vmem:[#allocation32_spill] sm:$0xff]  ;;  %v1630_v21 = vadd.f32 %v1616_v11, %v1400_v37  ;;  %v13642_v11 = vld [vmem:[#allocation31_spill] sm:$0xff]  ;;  %v13645_v37 = vld [vmem:[#allocation34_spill] sm:$0xff]  ;;  %v1180_v46 = vadd.f32 %v13648_v31, %v12676_v48  ;;  %v1649_v52 = vperm.slane %v12669_v50, 4 }
 0x171   : > { %v1672_v19 = vadd.f32 %v1648_v3, %v1640_v9  ;;  %v1770_v9 = vadd.s32 8, %v1769_v60  ;;  %v1396_v17 = vadd.f32 %v13642_v11, %v1165_v12  ;;  %v2182_v12 = vld [vmem:[#allocation7 + $0x9d8] sm:$0xff]  ;;  %v13650_v48 = vld [vmem:[#allocation45_spill] sm:$0xff] }
 0x172   : > { %v1669_v16 = vadd.f32 %v1645_v57, %v1637_v22  ;;  %v1403_v57 = vadd.f32 %v13634_v38, %v1172_v15  ;;  %v1168_v15 = vadd.f32 %v13637_v10, %v12658_v14  ;;  %v1647_v22 = vperm.slane %v12669_v50, 2  ;;  %2368 = vmatpush.msrb.mxu0 %v2182_v12  ;;  %v2262_v11 = vld [vmem:[#allocation7 + $0xc58] sm:$0xff] }
 0x173   : > { %v1717_v30 = vrot.slane %v1672_v19, 1  ;;  %v12720_v14 = vsel %vm12706_vm5, 1.0, %v12075_v0  ;;  %2391 = vmatpush.msra.mxu1 %v2262_v11  ;;  %v2142_v31 = vld [vmem:[#allocation7 + $0x898] sm:$0xff]  ;;  %v2133_v11 = vld [vmem:[#allocation7 + $0x850] sm:$0xff] }
 0x174   : > { %v1711_v20 = vrot.slane %v1669_v16, 1  ;;  %v1671_v28 = vadd.f32 %v1647_v22, %v1639_v56  ;;  %v1399_v13 = vadd.f32 %v13646_v25, %v1168_v15  ;;  %2369 = vmatpush.msrb.mxu0 %v2177_v43  ;;  %v2147_v25 = vld [vmem:[#allocation7 + $0x8c0] sm:$0xff] }
 0x175   : > { %v1718_v32 = vsel %vm581_vm1, %v1703_v1, %v1717_v30  ;;  %v1756_v34 = vmax.f32 %v1672_v19, %v1717_v30  ;;  %v13644_v1 = vld [vmem:[#allocation46_spill] sm:$0xff]  ;;  %v2183_v43 = vld [vmem:[#allocation7 + $0x9e0] sm:$0xff] }
 0x176   : > { %v1753_v47 = vmax.f32 %v1669_v16, %v1711_v20  ;;  %v1712_v44 = vsel %vm581_vm1, %v1694_v63, %v1711_v20  ;;  %v1750_v55 = vmax.f32 %v1666_v8, %v1718_v32  ;;  %v1744_v8 = vmax.f32 %v1660_v62, %v1704_v40  ;;  %v13639_v63 = vld [vmem:[#allocation41_spill] sm:$0xff]  ;;  %v13641_v62 = vld [vmem:[#allocation50_spill] sm:$0xff] }
 0x177   : > { %v1590_v61 = vpop.f32.mrf.mxu0  ;;  %v1619_v41 = vpop.f32.mrf.mxu1  ;;  %v1747_v54 = vmax.f32 %v1663_v4, %v1712_v44  ;;  %v1633_v4 = vadd.f32 %v12671_v51, %v1403_v57  ;;  %v1397_v19 = vadd.f32 %v13639_v63, %v1166_v7  ;;  %v13640_v51 = vld [vmem:[#allocation35_spill] sm:$0xff]  ;;  %v1774_v7 = vmul.u32 2, %v1770_v9  ;;  %v2172_v57 = vld [vmem:[#allocation7 + $0x988] sm:$0xff] }
 0x178   : > { %v1765_v3 = vmax.f32 %v1753_v47, %v1756_v34  ;;  %v1636_v58 = vadd.f32 %v1619_v41, %v1406_v33  ;;  %v1759_v60 = vmax.f32 %v1741_v5, %v1744_v8  ;;  %v1174_v29 = vadd.f32 %v13640_v51, %v12663_v53  ;;  %v13647_v33 = vld [vmem:[#allocation42_spill] sm:$0xff]  ;;  %2370 = vmatpush.msrb.mxu0 %v2172_v57  ;;  %v2242_v57 = vld [vmem:[#allocation7 + $0xbb8] sm:$0xff] }
 0x179   : > { %v1762_v45 = vmax.f32 %v1747_v54, %v1750_v55  ;;  %v1627_v16 = vadd.f32 %v13641_v62, %v1397_v19  ;;  %v1412_v30 = vadd.f32 %v13644_v1, %v1181_v59  ;;  %v1665_v2 = vadd.f32 %v1647_v22, %v1633_v4  ;;  %v13649_v55 = vld [vmem:[#allocation49_spill] sm:$0xff]  ;;  %v2162_v59 = vld [vmem:[#allocation7 + $0x938] sm:$0xff] }
 0x17a   : > { %8721 = vmatpush.msk.msrb.mxu2 %vm581_vm1, %v1765_v3  ;;  %v12725_v6 = vadd.f32 %v1650_v27, %v1636_v58  ;;  %v1402_v20 = vadd.f32 %v13645_v37, %v1171_v49  ;;  %v1405_v39 = vadd.f32 %v13647_v33, %v1174_v29  ;;  %v12733_v53 = vadd.f32 %v1650_v27, %v1630_v21  ;;  %v2167_v58 = vld [vmem:[#allocation7 + $0x960] sm:$0xff]  ;;  %v2157_v29 = vld [vmem:[#allocation7 + $0x910] sm:$0xff]  ;;  %v2152_v1 = vld [vmem:[#allocation7 + $0x8e8] sm:$0xff] }
 0x17b   : > { %v1715_v26 = vrot.slane %v1671_v28, 1  ;;  %v1638_v34 = vadd.f32 %v12650_v23, %v1408_v36  ;;  %v1659_v47 = vadd.f32 %v1647_v22, %v1627_v16  ;;  %vm1776_vm7 = vcmp.eq.s32.totalorder %v12696_v42, %v1774_v7  ;;  %v13651_v22 = vld [vmem:[#allocation48_spill] sm:$0xff]  ;;  %2371 = vmatpush.msrb.mxu0 %v2167_v58  ;;  %v2257_v37 = vld [vmem:[#allocation7 + $0xc30] sm:$0xff] }
 0x17c   : > { %1811 = vmatpush.msrb.mxu2 %v1762_v45  ;;  %v1709_v44 = vrot.slane %v12725_v6, 1  ;;  %v1646_v41 = vperm.slane %v12669_v50, 1  ;;  %v1700_v54 = vrot.slane %v1665_v2, 1  ;;  %v1632_v40 = vadd.f32 %v13649_v55, %v1402_v20  ;;  %2392 = vmatpush.msra.mxu1 %v2257_v37  ;;  %v2137_v55 = vld [vmem:[#allocation7 + $0x870] sm:$0xff]  ;;  %v2248_v37 = vld [vmem:[#allocation7 + $0xbe8] sm:$0xff] }
 0x17d   : > { %v1411_v3 = vadd.f32 %v13650_v48, %v1180_v46  ;;  %v1708_v23 = vrot.slane %v12733_v53, 1  ;;  %v1629_v5 = vadd.f32 %v1590_v61, %v1399_v13  ;;  %v12747_v10 = vsel %vm1776_vm7, 1.0, %v12075_v0  ;;  %2372 = vmatpush.msrb.mxu0 %v2162_v59  ;;  %v2252_v13 = vld [vmem:[#allocation7 + $0xc08] sm:$0xff]  ;;  %v2237_v48 = vld [vmem:[#allocation7 + $0xb90] sm:$0xff] }
 0x17e   : > { %1812 = vmatpush.msrb.mxu2 %v1759_v60  ;;  %v1670_v45 = vadd.f32 %v1646_v41, %v1638_v34  ;;  %v1716_v42 = vsel %vm581_vm1, %v1700_v54, %v1715_v26  ;;  %v1699_v15 = vrot.slane %v1659_v47, 1  ;;  %v1626_v4 = vadd.f32 %v13651_v22, %v1396_v17  ;;  %2393 = vmatpush.msra.mxu1 %v2252_v13  ;;  %v2158_v22 = vld [vmem:[#allocation7 + $0x918] sm:$0xff]  ;;  %v2153_v59 = vld [vmem:[#allocation7 + $0x8f0] sm:$0xff]  ;;  %v2243_v13 = vld [vmem:[#allocation7 + $0xbc0] sm:$0xff] }
 0x17f   : > { %v1593_v24 = vpop.f32.mrf.mxu0  ;;  %v1622_v32 = vpop.f32.mrf.mxu1  ;;  %8722 = vmatmul.msk.f32.vlgmr.msrb.gmra.mxu2 %vm1781_vm6, %v12720_v14  ;;  %v1710_v18 = vsel %vm581_vm1, %v1708_v23, %v1709_v44  ;;  %v1664_v63 = vadd.f32 %v1646_v41, %v1632_v40  ;;  %v1755_v61 = vmax.f32 %v1671_v28, %v1715_v26  ;;  %v12755_v21 = vadd.f32 %v1649_v52, %v1629_v5  ;;  %v2132_v23 = vld [vmem:[#allocation7 + $0x848] sm:$0xff] }
 0x180   : > { %v1642_v49 = vadd.f32 %v1622_v32, %v1412_v30  ;;  %v1635_v38 = vadd.f32 %v1593_v24, %v1405_v39  ;;  %v1749_v60 = vmax.f32 %v1665_v2, %v1716_v42  ;;  %v1701_v51 = vsel %vm581_vm1, %v1699_v15, %v1700_v54  ;;  %2373 = vmatpush.msrb.mxu0 %v2157_v29  ;;  %v2247_v24 = vld [vmem:[#allocation7 + $0xbe0] sm:$0xff]  ;;  %v2168_v5 = vld [vmem:[#allocation7 + $0x968] sm:$0xff] }
 0x181   : > { %v1713_v62 = vrot.slane %v1670_v45, 1  ;;  %v1746_v28 = vmax.f32 %v12733_v53, %v1710_v18  ;;  %v1658_v17 = vadd.f32 %v1646_v41, %v1626_v4  ;;  %v1697_v30 = vrot.slane %v1664_v63, 1  ;;  %2394 = vmatpush.msra.mxu1 %v2247_v24  ;;  %v2127_v42 = vld [vmem:[#allocation7 + $0x820] sm:$0xff]  ;;  %v2337_v4 = vld [vmem:[#allocation7 + $0xeb0] sm:$0xff]  ;;  %v2222_v18 = vld [vmem:[#allocation7 + $0xb18] sm:$0xff] }
 0x182   : > { %v1674_v56 = vadd.f32 %v1650_v27, %v1642_v49  ;;  %v12751_v8 = vadd.f32 %v1649_v52, %v1635_v38  ;;  %v1705_v20 = vrot.slane %v12755_v21, 1  ;;  %2374 = vmatpush.msrb.mxu0 %v2152_v1  ;;  %v2178_v38 = vld [vmem:[#allocation7 + $0x9b8] sm:$0xff]  ;;  %v2227_v15 = vld [vmem:[#allocation7 + $0xb40] sm:$0xff]  ;;  %v2212_v29 = vld [vmem:[#allocation7 + $0xac8] sm:$0xff] }
 0x183   : > { %v1714_v53 = vsel %vm581_vm1, %v1697_v30, %v1713_v62  ;;  %v1696_v32 = vrot.slane %v1658_v17, 1  ;;  %v1754_v46 = vmax.f32 %v1670_v45, %v1713_v62  ;;  %2395 = vmatpush.msra.mxu1 %v2242_v57  ;;  %v2163_v45 = vld [vmem:[#allocation7 + $0x940] sm:$0xff]  ;;  %v2138_v62 = vld [vmem:[#allocation7 + $0x878] sm:$0xff]  ;;  %v2128_v1 = vld [vmem:[#allocation7 + $0x828] sm:$0xff] }
 0x184   : > { %v1721_v9 = vrot.slane %v1674_v56, 1  ;;  %v1706_v35 = vrot.slane %v12751_v8, 1  ;;  %2375 = vmatpush.msrb.mxu0 %v2147_v25  ;;  %v1748_v49 = vmax.f32 %v1664_v63, %v1714_v53  ;;  %v2332_v63 = vld [vmem:[#allocation7 + $0xe88] sm:$0xff]  ;;  %v2297_v25 = vld [vmem:[#allocation7 + $0xd70] sm:$0xff]  ;;  %v2238_v53 = vld [vmem:[#allocation7 + $0xb98] sm:$0xff] }
 0x185   : > { %2396 = vmatpush.msra.mxu1 %v2237_v48  ;;  %v2108_v24 = vld [vmem:[#allocation7 + $0x788] sm:$0xff]  ;;  %v2218_v57 = vld [vmem:[#allocation7 + $0xaf8] sm:$0xff] }
 0x186   : > { %v1758_v19 = vmax.f32 %v1674_v56, %v1721_v9  ;;  %v1722_v50 = vsel %vm581_vm1, %v1709_v44, %v1721_v9  ;;  %v1707_v12 = vsel %vm581_vm1, %v1705_v20, %v1706_v35  ;;  %v1698_v44 = vsel %vm581_vm1, %v1696_v32, %v1697_v30  ;;  %2376 = vmatpush.msrb.mxu0 %v2142_v31  ;;  %v2173_v56 = vld [vmem:[#allocation7 + $0x990] sm:$0xff]  ;;  %v2342_v9 = vld [vmem:[#allocation7 + $0xed8] sm:$0xff]  ;;  %v2307_v30 = vld [vmem:[#allocation7 + $0xdc0] sm:$0xff] }
 0x187   : > { %v1596_v27 = vpop.f32.mrf.mxu0  ;;  %8723 = vmatmul.msk.f32.gmra.mxu2 %vm1781_vm6, %v12747_v10  ;;  %v1752_v0 = vmax.f32 %v12725_v6, %v1722_v50  ;;  %v1743_v6 = vmax.f32 %v1659_v47, %v1701_v51  ;;  %v1745_v54 = vmax.f32 %v12755_v21, %v1707_v12  ;;  %v2148_v50 = vld [vmem:[#allocation7 + $0x8c8] sm:$0xff]  ;;  %v2327_v21 = vld [vmem:[#allocation7 + $0xe60] sm:$0xff]  ;;  %v2118_v20 = vld [vmem:[#allocation7 + $0x7d8] sm:$0xff] }
 0x188   : > { %v1767_v16 = vmax.f32 %v1755_v61, %v1758_v19  ;;  %v1641_v7 = vadd.f32 %v1596_v27, %v1411_v3  ;;  %v1742_v3 = vmax.f32 %v1658_v17, %v1698_v44  ;;  %2377 = vmatpush.msrb.mxu0 %v2137_v55  ;;  %v2117_v61 = vld [vmem:[#allocation7 + $0x7d0] sm:$0xff]  ;;  %v2112_v27 = vld [vmem:[#allocation7 + $0x7a8] sm:$0xff]  ;;  %v2107_v51 = vld [vmem:[#allocation7 + $0x780] sm:$0xff] }
 0x189   : > { %v1764_v36 = vmax.f32 %v1749_v60, %v1752_v0  ;;  %v1761_v39 = vmax.f32 %v1743_v6, %v1746_v28  ;;  %v2217_v19 = vld [vmem:[#allocation7 + $0xaf0] sm:$0xff]  ;;  %v2143_v60 = vld [vmem:[#allocation7 + $0x8a0] sm:$0xff]  ;;  %v2322_v0 = vld [vmem:[#allocation7 + $0xe38] sm:$0xff] }
 0x18a   : > { %v1673_v2 = vadd.f32 %v1649_v52, %v1641_v7  ;;  %8727 = vmatpush.msk.msra.mxu2 %vm581_vm1, %v1767_v16  ;;  %v2232_v52 = vld [vmem:[#allocation7 + $0xb68] sm:$0xff]  ;;  %v1760_v58 = vmax.f32 %v1742_v3, %v1745_v54  ;;  %2378 = vmatpush.msrb.mxu0 %v2132_v23  ;;  %v2317_v16 = vld [vmem:[#allocation7 + $0xe10] sm:$0xff]  ;;  %v2263_v7 = vld [vmem:[#allocation7 + $0xc60] sm:$0xff] }
 0x18b   : > { %2397 = vmatpush.msra.mxu1 %v2232_v52  ;;  %v2207_v28 = vld [vmem:[#allocation7 + $0xaa0] sm:$0xff]  ;;  %v2312_v17 = vld [vmem:[#allocation7 + $0xde8] sm:$0xff]  ;;  %v2302_v6 = vld [vmem:[#allocation7 + $0xd98] sm:$0xff] }
 0x18c   : > { %v1719_v33 = vrot.slane %v1673_v2, 1  ;;  %1857 = vmatpush.msra.mxu2 %v1764_v36  ;;  %2379 = vmatpush.msrb.mxu0 %v2127_v42  ;;  %v2202_v36 = vld [vmem:[#allocation7 + $0xa78] sm:$0xff]  ;;  %v2287_v32 = vld [vmem:[#allocation7 + $0xd20] sm:$0xff]  ;;  %v2264_v12 = vld [vmem:[#allocation7 + $0xc68] sm:$0xff] }
 0x18d   : > { %2398 = vmatpush.msra.mxu1 %v2227_v15  ;;  %v2282_v31 = vld [vmem:[#allocation7 + $0xcf8] sm:$0xff]  ;;  %v2272_v44 = vld [vmem:[#allocation7 + $0xca8] sm:$0xff]  ;;  %v2229_v3 = vld [vmem:[#allocation7 + $0xb50] sm:$0xff] }
 0x18e   : > { %v1757_v26 = vmax.f32 %v1673_v2, %v1719_v33  ;;  %1858 = vmatpush.msra.mxu2 %v1761_v39  ;;  %v1720_v34 = vsel %vm581_vm1, %v1706_v35, %v1719_v33  ;;  %v2258_v35 = vld [vmem:[#allocation7 + $0xc38] sm:$0xff]  ;;  %v2123_v2 = vld [vmem:[#allocation7 + $0x800] sm:$0xff]  ;;  %v2113_v33 = vld [vmem:[#allocation7 + $0x7b0] sm:$0xff] }
 0x18f   : > { %8728 = vmatmul.msk.f32.vlgmr.msra.gmra.mxu2 %vm1781_vm6, %v12720_v14  ;;  %v1751_v47 = vmax.f32 %v12751_v8, %v1720_v34  ;;  %v2122_v8 = vld [vmem:[#allocation7 + $0x7f8] sm:$0xff]  ;;  %2399 = vmatpush.msra.mxu1 %v2222_v18  ;;  %v2292_v39 = vld [vmem:[#allocation7 + $0xd48] sm:$0xff]  ;;  %v2277_v34 = vld [vmem:[#allocation7 + $0xcd0] sm:$0xff] }
 0x190   : > { %v1766_v41 = vmax.f32 %v1754_v46, %v1757_v26  ;;  %2437 = vmatpush.msrb.mxu2 %v2183_v43  ;;  %2380 = vmatpush.msrb.mxu0 %v2122_v8  ;;  %v2233_v43 = vld [vmem:[#allocation7 + $0xb70] sm:$0xff]  ;;  %v2259_v46 = vld [vmem:[#allocation7 + $0xc40] sm:$0xff]  ;;  %v2228_v26 = vld [vmem:[#allocation7 + $0xb48] sm:$0xff] }
 0x191   : > { %v1763_v40 = vmax.f32 %v1748_v49, %v1751_v47  ;;  %2400 = vmatpush.msra.mxu1 %v2217_v19  ;;  %v2254_v49 = vld [vmem:[#allocation7 + $0xc18] sm:$0xff]  ;;  %v2223_v47 = vld [vmem:[#allocation7 + $0xb20] sm:$0xff]  ;;  %v2244_v54 = vld [vmem:[#allocation7 + $0xbc8] sm:$0xff] }
 0x192   : > { %8724 = vmatpush.msk.msrb.mxu3 %vm581_vm1, %v1766_v41  ;;  %2438 = vmatpush.msrb.mxu2 %v2178_v38  ;;  %v2249_v38 = vld [vmem:[#allocation7 + $0xbf0] sm:$0xff]  ;;  %v2267_v41 = vld [vmem:[#allocation7 + $0xc80] sm:$0xff]  ;;  %v2184_v55 = vld [vmem:[#allocation7 + $0x9e8] sm:$0xff] }
 0x193   : > { %2381 = vmatpush.msrb.mxu0 %v2117_v61  ;;  %2401 = vmatpush.msra.mxu1 %v2212_v29  ;;  %v2234_v48 = vld [vmem:[#allocation7 + $0xb78] sm:$0xff]  ;;  %v2224_v23 = vld [vmem:[#allocation7 + $0xb28] sm:$0xff]  ;;  %v2197_v52 = vld [vmem:[#allocation7 + $0xa50] sm:$0xff] }
 0x194   : > { %1834 = vmatpush.msrb.mxu3 %v1763_v40  ;;  %2439 = vmatpush.msrb.mxu2 %v2173_v56  ;;  %v2239_v40 = vld [vmem:[#allocation7 + $0xba0] sm:$0xff]  ;;  %v2192_v42 = vld [vmem:[#allocation7 + $0xa28] sm:$0xff]  ;;  %v2198_v19 = vld [vmem:[#allocation7 + $0xa58] sm:$0xff] }
 0x195   : > { %2382 = vmatpush.msrb.mxu0 %v2112_v27  ;;  %2402 = vmatpush.msra.mxu1 %v2207_v28  ;;  %v2179_v56 = vld [vmem:[#allocation7 + $0x9c0] sm:$0xff]  ;;  %v2208_v15 = vld [vmem:[#allocation7 + $0xaa8] sm:$0xff]  ;;  %v2194_v29 = vld [vmem:[#allocation7 + $0xa38] sm:$0xff] }
 0x196   : > { %1835 = vmatpush.msrb.mxu3 %v1760_v58  ;;  %2440 = vmatpush.msrb.mxu2 %v2168_v5  ;;  %v2219_v5 = vld [vmem:[#allocation7 + $0xb00] sm:$0xff]  ;;  %v2213_v58 = vld [vmem:[#allocation7 + $0xad0] sm:$0xff]  ;;  %v2204_v61 = vld [vmem:[#allocation7 + $0xa88] sm:$0xff] }
 0x197   : > { %8725 = vmatmul.msk.f32.vlgmr.msrb.gmra.mxu3 %vm1781_vm6, %v12720_v14  ;;  %8729 = vmatmul.msk.f32.gmra.mxu2 %vm1781_vm6, %v12747_v10  ;;  %v2187_v8 = vld [vmem:[#allocation7 + $0xa00] sm:$0xff]  ;;  %v2189_v28 = vld [vmem:[#allocation7 + $0xa10] sm:$0xff] }
 0x198   : > { %2441 = vmatpush.msrb.mxu2 %v2163_v45  ;;  %2414 = vmatpush.msra.mxu3 %v2342_v9  ;;  %v2174_v45 = vld [vmem:[#allocation7 + $0x998] sm:$0xff]  ;;  %v2203_v18 = vld [vmem:[#allocation7 + $0xa80] sm:$0xff] }
 0x199   : > { %2383 = vmatpush.msrb.mxu0 %v2107_v51  ;;  %2403 = vmatpush.msra.mxu1 %v2202_v36  ;;  %v2214_v9 = vld [vmem:[#allocation7 + $0xad8] sm:$0xff]  ;;  %v2199_v27 = vld [vmem:[#allocation7 + $0xa60] sm:$0xff] }
 0x19a   : > { %2442 = vmatpush.msrb.mxu2 %v2158_v22  ;;  %2415 = vmatpush.msra.mxu3 %v2337_v4  ;;  %v2169_v22 = vld [vmem:[#allocation7 + $0x970] sm:$0xff]  ;;  %v2154_v51 = vld [vmem:[#allocation7 + $0x8f8] sm:$0xff]  ;;  %v2139_v36 = vld [vmem:[#allocation7 + $0x880] sm:$0xff] }
 0x19b   : > { %2460 = vmatpush.msra.mxu0 %v2263_v7  ;;  %2404 = vmatpush.msra.mxu1 %v2197_v52  ;;  %v2209_v4 = vld [vmem:[#allocation7 + $0xab0] sm:$0xff]  ;;  %v2314_v52 = vld [vmem:[#allocation7 + $0xdf8] sm:$0xff] }
 0x19c   : > { %2443 = vmatpush.msrb.mxu2 %v2153_v59  ;;  %2416 = vmatpush.msra.mxu3 %v2332_v63  ;;  %v2343_v59 = vld [vmem:[#allocation7 + $0xee0] sm:$0xff]  ;;  %v2164_v63 = vld [vmem:[#allocation7 + $0x948] sm:$0xff]  ;;  %v2149_v7 = vld [vmem:[#allocation7 + $0x8d0] sm:$0xff] }
 0x19d   : > { %2461 = vmatpush.msra.mxu0 %v2258_v35  ;;  %2405 = vmatpush.msra.mxu1 %v2192_v42  ;;  %v2318_v35 = vld [vmem:[#allocation7 + $0xe18] sm:$0xff] }
 0x19e   : > { %2444 = vmatpush.msrb.mxu2 %v2148_v50  ;;  %2417 = vmatpush.msra.mxu3 %v2327_v21  ;;  %v2338_v50 = vld [vmem:[#allocation7 + $0xeb8] sm:$0xff]  ;;  %v2159_v21 = vld [vmem:[#allocation7 + $0x920] sm:$0xff] }
 0x19f   : > { %8726 = vmatmul.msk.f32.gmra.mxu3 %vm1781_vm6, %v12747_v10  ;;  %v2253_v10 = vld [vmem:[#allocation7 + $0xc10] sm:$0xff]  ;;  %2406 = vmatpush.msra.mxu1 %v2187_v8  ;;  %v2304_v8 = vld [vmem:[#allocation7 + $0xda8] sm:$0xff] }
 0x1a0   : > { %2445 = vmatpush.msrb.mxu2 %v2143_v60  ;;  %2418 = vmatpush.msra.mxu3 %v2322_v0  ;;  %v2193_v60 = vld [vmem:[#allocation7 + $0xa30] sm:$0xff] }
 0x1a1   : > { %2462 = vmatpush.msra.mxu0 %v2253_v10  ;;  %2483 = vmatpush.msrb.mxu1 %v2343_v59  ;;  %v2333_v0 = vld [vmem:[#allocation7 + $0xe90] sm:$0xff]  ;;  %v2308_v10 = vld [vmem:[#allocation7 + $0xdc8] sm:$0xff] }
 0x1a2   : > { %2446 = vmatpush.msrb.mxu2 %v2138_v62  ;;  %2419 = vmatpush.msra.mxu3 %v2317_v16  ;;  %v2188_v62 = vld [vmem:[#allocation7 + $0xa08] sm:$0xff] }
 0x1a3   : > { %2463 = vmatpush.msra.mxu0 %v2248_v37  ;;  %2484 = vmatpush.msrb.mxu1 %v2338_v50  ;;  %v2328_v16 = vld [vmem:[#allocation7 + $0xe68] sm:$0xff] }
 0x1a4   : > { %2447 = vmatpush.msrb.mxu2 %v2133_v11  ;;  %2420 = vmatpush.msra.mxu3 %v2312_v17  ;;  %v2323_v11 = vld [vmem:[#allocation7 + $0xe40] sm:$0xff]  ;;  %v2144_v17 = vld [vmem:[#allocation7 + $0x8a8] sm:$0xff] }
 0x1a5   : > { %2464 = vmatpush.msra.mxu0 %v2243_v13  ;;  %2485 = vmatpush.msrb.mxu1 %v2333_v0  ;;  %v2124_v37 = vld [vmem:[#allocation7 + $0x808] sm:$0xff]  ;;  %v2293_v13 = vld [vmem:[#allocation7 + $0xd50] sm:$0xff] }
 0x1a6   : > { %2448 = vmatpush.msrb.mxu2 %v2128_v1  ;;  %2421 = vmatpush.msra.mxu3 %v2307_v30  ;;  %v2313_v1 = vld [vmem:[#allocation7 + $0xdf0] sm:$0xff]  ;;  %v2134_v30 = vld [vmem:[#allocation7 + $0x858] sm:$0xff]  ;;  %v2300_v50 = vld [vmem:[#allocation7 + $0xd88] sm:$0xff] }
 0x1a7   : > { %2465 = vmatpush.msra.mxu0 %v2238_v53  ;;  %2486 = vmatpush.msrb.mxu1 %v2328_v16  ;;  %v2109_v53 = vld [vmem:[#allocation7 + $0x790] sm:$0xff]  ;;  %v2290_v16 = vld [vmem:[#allocation7 + $0xd38] sm:$0xff] }
 0x1a8   : > { %2449 = vmatpush.msrb.mxu2 %v2123_v2  ;;  %2422 = vmatpush.msra.mxu3 %v2302_v6  ;;  %v2129_v2 = vld [vmem:[#allocation7 + $0x830] sm:$0xff]  ;;  %v2303_v6 = vld [vmem:[#allocation7 + $0xda0] sm:$0xff] }
 0x1a9   : > { %2466 = vmatpush.msra.mxu0 %v2233_v43  ;;  %2487 = vmatpush.msrb.mxu1 %v2323_v11  ;;  %v2273_v43 = vld [vmem:[#allocation7 + $0xcb0] sm:$0xff]  ;;  %v2284_v11 = vld [vmem:[#allocation7 + $0xd08] sm:$0xff] }
 0x1aa   : > { %2450 = vmatpush.msrb.mxu2 %v2118_v20  ;;  %2423 = vmatpush.msra.mxu3 %v2297_v25  ;;  %v2298_v20 = vld [vmem:[#allocation7 + $0xd78] sm:$0xff]  ;;  %v2119_v25 = vld [vmem:[#allocation7 + $0x7e0] sm:$0xff] }
 0x1ab   : > { %2467 = vmatpush.msra.mxu0 %v2228_v26  ;;  %2488 = vmatpush.msrb.mxu1 %v2318_v35  ;;  %v2245_v35 = vld [vmem:[#allocation7 + $0xbd0] sm:$0xff] }
 0x1ac   : > { %2451 = vmatpush.msrb.mxu2 %v2113_v33  ;;  %2424 = vmatpush.msra.mxu3 %v2292_v39  ;;  %v2114_v33 = vld [vmem:[#allocation7 + $0x7b8] sm:$0xff]  ;;  %v2288_v39 = vld [vmem:[#allocation7 + $0xd28] sm:$0xff] }
 0x1ad   : > { %2468 = vmatpush.msra.mxu0 %v2223_v47  ;;  %2489 = vmatpush.msrb.mxu1 %v2313_v1  ;;  %v2345_v47 = vld [vmem:[#allocation7 + $0xef0] sm:$0xff]  ;;  %v2279_v1 = vld [vmem:[#allocation7 + $0xce0] sm:$0xff] }
 0x1ae   : > { %2452 = vmatpush.msrb.mxu2 %v2108_v24  ;;  %2425 = vmatpush.msra.mxu3 %v2287_v32  ;;  %v2283_v24 = vld [vmem:[#allocation7 + $0xd00] sm:$0xff] }
 0x1af   : > { %2469 = vmatpush.msra.mxu0 %v2218_v57  ;;  %2490 = vmatpush.msrb.mxu1 %v2308_v10  ;;  %v2340_v57 = vld [vmem:[#allocation7 + $0xec8] sm:$0xff] }
 0x1b0   : > { %2529 = vmatpush.msra.mxu2 %v2264_v12  ;;  %2426 = vmatpush.msra.mxu3 %v2282_v31  ;;  %v2278_v12 = vld [vmem:[#allocation7 + $0xcd8] sm:$0xff]  ;;  %v2268_v31 = vld [vmem:[#allocation7 + $0xc88] sm:$0xff] }
 0x1b1   : > { %2470 = vmatpush.msra.mxu0 %v2213_v58  ;;  %2491 = vmatpush.msrb.mxu1 %v2303_v6  ;;  %v2315_v58 = vld [vmem:[#allocation7 + $0xe00] sm:$0xff]  ;;  %v2240_v10 = vld [vmem:[#allocation7 + $0xba8] sm:$0xff]  ;;  %v2274_v6 = vld [vmem:[#allocation7 + $0xcb8] sm:$0xff] }
 0x1b2   : > { %2530 = vmatpush.msra.mxu2 %v2259_v46  ;;  %2427 = vmatpush.msra.mxu3 %v2277_v34 }
 0x1b3   : > { %2471 = vmatpush.msra.mxu0 %v2208_v15  ;;  %2492 = vmatpush.msrb.mxu1 %v2298_v20  ;;  %v2309_v15 = vld [vmem:[#allocation7 + $0xdd0] sm:$0xff]  ;;  %v2235_v20 = vld [vmem:[#allocation7 + $0xb80] sm:$0xff] }
 0x1b4   : > { %2531 = vmatpush.msra.mxu2 %v2254_v49  ;;  %2428 = vmatpush.msra.mxu3 %v2272_v44  ;;  %v2344_v49 = vld [vmem:[#allocation7 + $0xee8] sm:$0xff] }
 0x1b5   : > { %2472 = vmatpush.msra.mxu0 %v2203_v18  ;;  %2493 = vmatpush.msrb.mxu1 %v2293_v13  ;;  %v2265_v18 = vld [vmem:[#allocation7 + $0xc70] sm:$0xff] }
 0x1b6   : > { %2532 = vmatpush.msra.mxu2 %v2249_v38  ;;  %2429 = vmatpush.msra.mxu3 %v2267_v41  ;;  %v2339_v38 = vld [vmem:[#allocation7 + $0xec0] sm:$0xff]  ;;  %v2334_v41 = vld [vmem:[#allocation7 + $0xe98] sm:$0xff]  ;;  %v2269_v13 = vld [vmem:[#allocation7 + $0xc90] sm:$0xff] }
 0x1b7   : > { %2473 = vmatpush.msra.mxu0 %v2198_v19  ;;  %2494 = vmatpush.msrb.mxu1 %v2288_v39  ;;  %v2260_v19 = vld [vmem:[#allocation7 + $0xc48] sm:$0xff]  ;;  %v2230_v39 = vld [vmem:[#allocation7 + $0xb58] sm:$0xff] }
 0x1b8   : > { %2533 = vmatpush.msra.mxu2 %v2244_v54  ;;  %2506 = vmatpush.msrb.mxu3 %v2184_v55  ;;  %v2335_v54 = vld [vmem:[#allocation7 + $0xea0] sm:$0xff] }
 0x1b9   : > { %2474 = vmatpush.msra.mxu0 %v2193_v60  ;;  %2495 = vmatpush.msrb.mxu1 %v2283_v24  ;;  %v2295_v60 = vld [vmem:[#allocation7 + $0xd60] sm:$0xff]  ;;  %v2186_v24 = vld [vmem:[#allocation7 + $0x9f8] sm:$0xff] }
 0x1ba   : > { %2534 = vmatpush.msra.mxu2 %v2239_v40  ;;  %2507 = vmatpush.msrb.mxu3 %v2179_v56  ;;  %v2329_v40 = vld [vmem:[#allocation7 + $0xe70] sm:$0xff]  ;;  %v2330_v56 = vld [vmem:[#allocation7 + $0xe78] sm:$0xff] }
 0x1bb   : > { %2475 = vmatpush.msra.mxu0 %v2188_v62  ;;  %2496 = vmatpush.msrb.mxu1 %v2278_v12  ;;  %v1941_v12 = vld [vmem:[#allocation7 + $0x258] sm:$0xff] }
 0x1bc   : > { %2535 = vmatpush.msra.mxu2 %v2234_v48  ;;  %2508 = vmatpush.msrb.mxu3 %v2174_v45  ;;  %v2324_v48 = vld [vmem:[#allocation7 + $0xe48] sm:$0xff] }
 0x1bd   : > { %2497 = vmatpush.msrb.mxu1 %v2273_v43  ;;  %v2165_v43 = vld [vmem:[#allocation7 + $0x950] sm:$0xff] }
 0x1be   : > { %2536 = vmatpush.msra.mxu2 %v2229_v3  ;;  %2509 = vmatpush.msrb.mxu3 %v2169_v22  ;;  %v2325_v3 = vld [vmem:[#allocation7 + $0xe50] sm:$0xff]  ;;  %v2310_v22 = vld [vmem:[#allocation7 + $0xdd8] sm:$0xff] }
 0x1bf   : > { %2498 = vmatpush.msrb.mxu1 %v2268_v31  ;;  %v2225_v31 = vld [vmem:[#allocation7 + $0xb30] sm:$0xff] }
 0x1c0   : > { %2537 = vmatpush.msra.mxu2 %v2224_v23  ;;  %2510 = vmatpush.msrb.mxu3 %v2164_v63  ;;  %v2319_v23 = vld [vmem:[#allocation7 + $0xe20] sm:$0xff]  ;;  %v2305_v63 = vld [vmem:[#allocation7 + $0xdb0] sm:$0xff] }
 0x1c2   : > { %2538 = vmatpush.msra.mxu2 %v2219_v5  ;;  %2511 = vmatpush.msrb.mxu3 %v2159_v21  ;;  %v2320_v5 = vld [vmem:[#allocation7 + $0xe28] sm:$0xff]  ;;  %v2294_v21 = vld [vmem:[#allocation7 + $0xd58] sm:$0xff] }
 0x1c4   : > { %2539 = vmatpush.msra.mxu2 %v2214_v9  ;;  %2512 = vmatpush.msrb.mxu3 %v2154_v51  ;;  %v2289_v51 = vld [vmem:[#allocation7 + $0xd30] sm:$0xff] }
 0x1c6   : > { %2540 = vmatpush.msra.mxu2 %v2209_v4  ;;  %2513 = vmatpush.msrb.mxu3 %v2149_v7 }
 0x1c8   : > { %2541 = vmatpush.msra.mxu2 %v2204_v61  ;;  %2514 = vmatpush.msrb.mxu3 %v2144_v17  ;;  %v2299_v61 = vld [vmem:[#allocation7 + $0xd80] sm:$0xff]  ;;  %v2185_v17 = vld [vmem:[#allocation7 + $0x9f0] sm:$0xff] }
 0x1ca   : > { %2542 = vmatpush.msra.mxu2 %v2199_v27  ;;  %2515 = vmatpush.msrb.mxu3 %v2139_v36  ;;  %v2255_v27 = vld [vmem:[#allocation7 + $0xc20] sm:$0xff]  ;;  %v2285_v36 = vld [vmem:[#allocation7 + $0xd10] sm:$0xff] }
 0x1cc   : > { %2543 = vmatpush.msra.mxu2 %v2194_v29  ;;  %2516 = vmatpush.msrb.mxu3 %v2134_v30  ;;  %v2250_v29 = vld [vmem:[#allocation7 + $0xbf8] sm:$0xff]  ;;  %v2180_v30 = vld [vmem:[#allocation7 + $0x9c8] sm:$0xff] }
 0x1ce   : > { %2544 = vmatpush.msra.mxu2 %v2189_v28  ;;  %2517 = vmatpush.msrb.mxu3 %v2129_v2  ;;  %v2280_v2 = vld [vmem:[#allocation7 + $0xce8] sm:$0xff] }
 0x1d0   : > { %2518 = vmatpush.msrb.mxu3 %v2124_v37  ;;  %v2175_v37 = vld [vmem:[#allocation7 + $0x9a0] sm:$0xff] }
 0x1d2   : > { %2519 = vmatpush.msrb.mxu3 %v2119_v25  ;;  %v2275_v25 = vld [vmem:[#allocation7 + $0xcc0] sm:$0xff] }
 0x1d4   : > { %2520 = vmatpush.msrb.mxu3 %v2114_v33  ;;  %v2170_v33 = vld [vmem:[#allocation7 + $0x978] sm:$0xff] }
 0x1d6   : > { %2521 = vmatpush.msrb.mxu3 %v2109_v53  ;;  %v2270_v53 = vld [vmem:[#allocation7 + $0xc98] sm:$0xff] }
 0x202   : > { %v12780_v32 = vpop.f32.mrf.mxu2 }
 0x203   : > { %v2353_v34 = vrot.slane %v12780_v32, 1 }
 0x20a   : > { %v12782_v46 = vpop.f32.mrf.mxu2 }
 0x20b   : > { %v12785_v26 = vrot.slane %v12782_v46, 1 }
 0x20d   : > { %v12790_v44 = vsel %vm581_vm1, %v2353_v34, %v12785_v26  ;;  %v2181_v34 = vld [vmem:[#allocation7 + $0x9d0] sm:$0xff] }
 0x20e   : > { %2384 = vmatmul.f32.vlgmr.msrb.gmra.mxu0 %v12790_v44  ;;  %2453 = vmatmul.f32.vlgmr.msrb.gmra.mxu2 %v12790_v44 }
 0x20f   : > { %2552 = vmatpush.msrb.mxu0 %v2344_v49  ;;  %2621 = vmatpush.msrb.mxu2 %v2345_v47  ;;  %v1936_v49 = vld [vmem:[#allocation7 + $0x230] sm:$0xff]  ;;  %v2160_v47 = vld [vmem:[#allocation7 + $0x928] sm:$0xff] }
 0x211   : > { %2553 = vmatpush.msrb.mxu0 %v2339_v38  ;;  %2622 = vmatpush.msrb.mxu2 %v2340_v57  ;;  %v2220_v38 = vld [vmem:[#allocation7 + $0xb08] sm:$0xff] }
 0x212   : > { %v12794_v55 = vpop.f32.mrf.mxu2  ;;  %v2176_v57 = vld [vmem:[#allocation7 + $0x9a8] sm:$0xff] }
 0x213   : > { %2554 = vmatpush.msrb.mxu0 %v2334_v41  ;;  %2623 = vmatpush.msrb.mxu2 %v2335_v54  ;;  %v2359_v45 = vrot.slane %v12794_v55, 1  ;;  %v1931_v41 = vld [vmem:[#allocation7 + $0x208] sm:$0xff]  ;;  %v2155_v54 = vld [vmem:[#allocation7 + $0x900] sm:$0xff] }
 0x215   : > { %2555 = vmatpush.msrb.mxu0 %v2329_v40  ;;  %2624 = vmatpush.msrb.mxu2 %v2330_v56  ;;  %v2215_v40 = vld [vmem:[#allocation7 + $0xae0] sm:$0xff] }
 0x216   : > { %2387 = vmatmul.f32.gmra.mxu0 %v12785_v26  ;;  %2456 = vmatmul.f32.gmra.mxu2 %v12785_v26  ;;  %v2171_v56 = vld [vmem:[#allocation7 + $0x980] sm:$0xff] }
 0x217   : > { %2556 = vmatpush.msrb.mxu0 %v2324_v48  ;;  %2625 = vmatpush.msrb.mxu2 %v2325_v3  ;;  %v1926_v48 = vld [vmem:[#allocation7 + $0x1e0] sm:$0xff]  ;;  %v2150_v3 = vld [vmem:[#allocation7 + $0x8d8] sm:$0xff] }
 0x219   : > { %2557 = vmatpush.msrb.mxu0 %v2319_v23  ;;  %2626 = vmatpush.msrb.mxu2 %v2320_v5  ;;  %v2210_v23 = vld [vmem:[#allocation7 + $0xab8] sm:$0xff] }
 0x21a   : > { %v12799_v9 = vpop.f32.mrf.mxu3  ;;  %v12801_v42 = vpop.f32.mrf.mxu2  ;;  %v2166_v5 = vld [vmem:[#allocation7 + $0x958] sm:$0xff] }
 0x21b   : > { %v12804_v4 = vrot.slane %v12801_v42, 1  ;;  %2558 = vmatpush.msrb.mxu0 %v2314_v52  ;;  %2627 = vmatpush.msrb.mxu2 %v2315_v58  ;;  %v2356_v7 = vrot.slane %v12799_v9, 1  ;;  %v1921_v52 = vld [vmem:[#allocation7 + $0x1b8] sm:$0xff]  ;;  %v2145_v58 = vld [vmem:[#allocation7 + $0x8b0] sm:$0xff] }
 0x21d   : > { %2559 = vmatpush.msrb.mxu0 %v2309_v15  ;;  %2628 = vmatpush.msrb.mxu2 %v2310_v22  ;;  %v12808_v59 = vsel %vm581_vm1, %v2359_v45, %v12804_v4  ;;  %v2205_v45 = vld [vmem:[#allocation7 + $0xa90] sm:$0xff] }
 0x21e   : > { %2430 = vmatmul.f32.vlgmr.msra.gmra.mxu3 %v12808_v59  ;;  %v2161_v15 = vld [vmem:[#allocation7 + $0x930] sm:$0xff] }
 0x21f   : > { %2560 = vmatpush.msrb.mxu0 %v2304_v8  ;;  %2598 = vmatpush.msra.mxu3 %v2265_v18  ;;  %v1916_v22 = vld [vmem:[#allocation7 + $0x190] sm:$0xff]  ;;  %v2140_v8 = vld [vmem:[#allocation7 + $0x888] sm:$0xff] }
 0x220   : > { %2629 = vmatpush.msrb.mxu2 %v2305_v63  ;;  %v2200_v18 = vld [vmem:[#allocation7 + $0xa68] sm:$0xff] }
 0x221   : > { %2561 = vmatpush.msrb.mxu0 %v2299_v61  ;;  %2599 = vmatpush.msra.mxu3 %v2260_v19  ;;  %v2156_v63 = vld [vmem:[#allocation7 + $0x908] sm:$0xff]  ;;  %v2135_v19 = vld [vmem:[#allocation7 + $0x860] sm:$0xff] }
 0x222   : > { %2630 = vmatpush.msrb.mxu2 %v2300_v50  ;;  %v12811_v0 = vpop.f32.mrf.mxu3  ;;  %v1911_v61 = vld [vmem:[#allocation7 + $0x168] sm:$0xff]  ;;  %v2195_v50 = vld [vmem:[#allocation7 + $0xa40] sm:$0xff] }
 0x223   : > { %v12814_v62 = vrot.slane %v12811_v0, 1  ;;  %2562 = vmatpush.msrb.mxu0 %v2294_v21  ;;  %2600 = vmatpush.msra.mxu3 %v2255_v27  ;;  %v2151_v21 = vld [vmem:[#allocation7 + $0x8e0] sm:$0xff] }
 0x224   : > { %2631 = vmatpush.msrb.mxu2 %v2295_v60  ;;  %v1906_v27 = vld [vmem:[#allocation7 + $0x140] sm:$0xff]  ;;  %v2130_v60 = vld [vmem:[#allocation7 + $0x838] sm:$0xff] }
 0x225   : > { %2563 = vmatpush.msrb.mxu0 %v2289_v51  ;;  %2601 = vmatpush.msra.mxu3 %v2250_v29  ;;  %v12819_v28 = vsel %vm581_vm1, %v2356_v7, %v12814_v62  ;;  %v2190_v51 = vld [vmem:[#allocation7 + $0xa18] sm:$0xff] }
 0x226   : > { %2632 = vmatpush.msrb.mxu2 %v2290_v16  ;;  %2407 = vmatmul.f32.vlgmr.msra.gmra.mxu1 %v12819_v28  ;;  %v2146_v29 = vld [vmem:[#allocation7 + $0x8b8] sm:$0xff] }
 0x227   : > { %2433 = vmatmul.f32.gmra.mxu3 %v12804_v4  ;;  %2476 = vmatmul.f32.vlgmr.msra.gmra.mxu0 %v12819_v28  ;;  %v2346_v16 = vld [vmem:[#allocation7 + $0xef8] sm:$0xff] }
 0x228   : > { %2545 = vmatmul.f32.vlgmr.msra.gmra.mxu2 %v12819_v28  ;;  %2564 = vmatpush.msrb.mxu0 %v2284_v11  ;;  %v1901_v7 = vld [vmem:[#allocation7 + $0x118] sm:$0xff]  ;;  %v2125_v11 = vld [vmem:[#allocation7 + $0x810] sm:$0xff] }
 0x229   : > { %2575 = vmatpush.msra.mxu1 %v2185_v17  ;;  %2602 = vmatpush.msra.mxu3 %v2245_v35  ;;  %v2141_v17 = vld [vmem:[#allocation7 + $0x890] sm:$0xff] }
 0x22a   : > { %2633 = vmatpush.msrb.mxu2 %v2285_v36  ;;  %2565 = vmatpush.msrb.mxu0 %v2279_v1  ;;  %v2341_v35 = vld [vmem:[#allocation7 + $0xed0] sm:$0xff]  ;;  %v2120_v1 = vld [vmem:[#allocation7 + $0x7e8] sm:$0xff] }
 0x22b   : > { %2576 = vmatpush.msra.mxu1 %v2180_v30  ;;  %2603 = vmatpush.msra.mxu3 %v2240_v10  ;;  %v1896_v36 = vld [vmem:[#allocation7 + $0xf0] sm:$0xff]  ;;  %v2136_v30 = vld [vmem:[#allocation7 + $0x868] sm:$0xff] }
 0x22c   : > { %2634 = vmatpush.msrb.mxu2 %v2280_v2  ;;  %2566 = vmatpush.msrb.mxu0 %v2274_v6  ;;  %v2336_v10 = vld [vmem:[#allocation7 + $0xea8] sm:$0xff]  ;;  %v2115_v6 = vld [vmem:[#allocation7 + $0x7c0] sm:$0xff] }
 0x22d   : > { %2577 = vmatpush.msra.mxu1 %v2175_v37  ;;  %2604 = vmatpush.msra.mxu3 %v2235_v20  ;;  %v1891_v2 = vld [vmem:[#allocation7 + $0xc8] sm:$0xff]  ;;  %v2131_v37 = vld [vmem:[#allocation7 + $0x840] sm:$0xff] }
 0x22e   : > { %2635 = vmatpush.msrb.mxu2 %v2275_v25  ;;  %2567 = vmatpush.msrb.mxu0 %v2269_v13  ;;  %v2331_v20 = vld [vmem:[#allocation7 + $0xe80] sm:$0xff]  ;;  %v2110_v13 = vld [vmem:[#allocation7 + $0x798] sm:$0xff] }
 0x22f   : > { %2578 = vmatpush.msra.mxu1 %v2170_v33  ;;  %2605 = vmatpush.msra.mxu3 %v2230_v39  ;;  %v1886_v25 = vld [vmem:[#allocation7 + $0xa0] sm:$0xff]  ;;  %v2126_v33 = vld [vmem:[#allocation7 + $0x818] sm:$0xff] }
 0x230   : > { %2636 = vmatpush.msrb.mxu2 %v2270_v53  ;;  %2644 = vmatpush.msra.mxu0 %v2186_v24  ;;  %v2266_v39 = vld [vmem:[#allocation7 + $0xc78] sm:$0xff] }
 0x231   : > { %2410 = vmatmul.f32.gmra.mxu1 %v12814_v62  ;;  %2479 = vmatmul.f32.gmra.mxu0 %v12814_v62  ;;  %v2326_v53 = vld [vmem:[#allocation7 + $0xe58] sm:$0xff] }
 0x232   : > { %2713 = vmatpush.msra.mxu2 %v1941_v12  ;;  %2522 = vmatmul.f32.vlgmr.msrb.gmra.mxu3 %v12790_v44  ;;  %v1881_v24 = vld [vmem:[#allocation7 + $0x78] sm:$0xff]  ;;  %v2121_v12 = vld [vmem:[#allocation7 + $0x7f0] sm:$0xff] }
 0x233   : > { %2548 = vmatmul.f32.gmra.mxu2 %v12814_v62  ;;  %2579 = vmatpush.msra.mxu1 %v2165_v43  ;;  %v2261_v43 = vld [vmem:[#allocation7 + $0xc50] sm:$0xff] }
 0x234   : > { %2606 = vmatpush.msra.mxu3 %v2225_v31  ;;  %2645 = vmatpush.msra.mxu0 %v2181_v34  ;;  %v2321_v31 = vld [vmem:[#allocation7 + $0xe30] sm:$0xff] }
 0x235   : > { %2714 = vmatpush.msra.mxu2 %v1936_v49  ;;  %2580 = vmatpush.msra.mxu1 %v2160_v47  ;;  %v1876_v34 = vld [vmem:[#allocation7 + $0x50] sm:$0xff]  ;;  %v2116_v49 = vld [vmem:[#allocation7 + $0x7c8] sm:$0xff] }
 0x236   : > { %2607 = vmatpush.msra.mxu3 %v2220_v38  ;;  %2646 = vmatpush.msra.mxu0 %v2176_v57  ;;  %v2256_v47 = vld [vmem:[#allocation7 + $0xc28] sm:$0xff] }
 0x237   : > { %2715 = vmatpush.msra.mxu2 %v1931_v41  ;;  %2581 = vmatpush.msra.mxu1 %v2155_v54  ;;  %v2316_v38 = vld [vmem:[#allocation7 + $0xe08] sm:$0xff]  ;;  %v2111_v41 = vld [vmem:[#allocation7 + $0x7a0] sm:$0xff] }
 0x238   : > { %2608 = vmatpush.msra.mxu3 %v2215_v40  ;;  %2647 = vmatpush.msra.mxu0 %v2171_v56  ;;  %v1871_v57 = vld [vmem:[#allocation7 + $0x28] sm:$0xff]  ;;  %v2251_v54 = vld [vmem:[#allocation7 + $0xc00] sm:$0xff] }
 0x239   : > { %2716 = vmatpush.msra.mxu2 %v1926_v48  ;;  %2582 = vmatpush.msra.mxu1 %v2150_v3  ;;  %v2311_v40 = vld [vmem:[#allocation7 + $0xde0] sm:$0xff]  ;;  %v2021_v48 = vld [vmem:[#allocation7 + $0x4d8] sm:$0xff] }
 0x23a   : > { %2609 = vmatpush.msra.mxu3 %v2210_v23  ;;  %2648 = vmatpush.msra.mxu0 %v2166_v5  ;;  %v1866_v56 = vld [vmem:[#allocation7] sm:$0xff]  ;;  %v2246_v23 = vld [vmem:[#allocation7 + $0xbd8] sm:$0xff] }
 0x23b   : > { %2717 = vmatpush.msra.mxu2 %v1921_v52  ;;  %2499 = vmatmul.f32.vlgmr.msrb.gmra.mxu1 %v12808_v59  ;;  %v2022_v3 = vld [vmem:[#allocation7 + $0x4e0] sm:$0xff]  ;;  %v2306_v5 = vld [vmem:[#allocation7 + $0xdb8] sm:$0xff]  ;;  %v2016_v52 = vld [vmem:[#allocation7 + $0x4b0] sm:$0xff] }
 0x23c   : > { %2525 = vmatmul.f32.gmra.mxu3 %v12785_v26  ;;  %2568 = vmatmul.f32.vlgmr.msrb.gmra.mxu0 %v12808_v59 }
 0x23d   : > { %2583 = vmatpush.msra.mxu1 %v2145_v58  ;;  %2610 = vmatpush.msra.mxu3 %v2205_v45  ;;  %v2017_v58 = vld [vmem:[#allocation7 + $0x4b8] sm:$0xff]  ;;  %v2241_v45 = vld [vmem:[#allocation7 + $0xbb0] sm:$0xff] }
 0x23e   : > { %2637 = vmatmul.f32.vlgmr.msrb.gmra.mxu2 %v12808_v59  ;;  %2649 = vmatpush.msra.mxu0 %v2161_v15  ;;  %v2301_v15 = vld [vmem:[#allocation7 + $0xd90] sm:$0xff] }
 0x23f   : > { %2718 = vmatpush.msra.mxu2 %v1916_v22  ;;  %2584 = vmatpush.msra.mxu1 %v2140_v8  ;;  %v2011_v22 = vld [vmem:[#allocation7 + $0x488] sm:$0xff]  ;;  %v2012_v8 = vld [vmem:[#allocation7 + $0x490] sm:$0xff] }
 0x240   : > { %2611 = vmatpush.msra.mxu3 %v2200_v18  ;;  %2650 = vmatpush.msra.mxu0 %v2156_v63  ;;  %v2236_v18 = vld [vmem:[#allocation7 + $0xb88] sm:$0xff] }
 0x241   : > { %2719 = vmatpush.msra.mxu2 %v1911_v61  ;;  %2585 = vmatpush.msra.mxu1 %v2135_v19  ;;  %v2296_v63 = vld [vmem:[#allocation7 + $0xd68] sm:$0xff]  ;;  %v2231_v19 = vld [vmem:[#allocation7 + $0xb60] sm:$0xff] }
 0x242   : > { %2612 = vmatpush.msra.mxu3 %v2195_v50  ;;  %2651 = vmatpush.msra.mxu0 %v2151_v21  ;;  %v2007_v61 = vld [vmem:[#allocation7 + $0x468] sm:$0xff]  ;;  %v2291_v50 = vld [vmem:[#allocation7 + $0xd40] sm:$0xff]  ;;  %v2001_v21 = vld [vmem:[#allocation7 + $0x438] sm:$0xff] }
 0x243   : > { %2720 = vmatpush.msra.mxu2 %v1906_v27  ;;  %2586 = vmatpush.msra.mxu1 %v2130_v60  ;;  %v2002_v27 = vld [vmem:[#allocation7 + $0x440] sm:$0xff]  ;;  %v2226_v60 = vld [vmem:[#allocation7 + $0xb38] sm:$0xff] }
 0x244   : > { %2613 = vmatpush.msra.mxu3 %v2190_v51  ;;  %2652 = vmatpush.msra.mxu0 %v2146_v29  ;;  %v2286_v51 = vld [vmem:[#allocation7 + $0xd18] sm:$0xff]  ;;  %v1996_v29 = vld [vmem:[#allocation7 + $0x410] sm:$0xff] }
 0x245   : > { %2721 = vmatpush.msra.mxu2 %v1901_v7  ;;  %2502 = vmatmul.f32.gmra.mxu1 %v12804_v4  ;;  %v2221_v7 = vld [vmem:[#allocation7 + $0xb10] sm:$0xff] }
 0x246   : > { %2690 = vmatpush.msrb.mxu3 %v2346_v16  ;;  %2571 = vmatmul.f32.gmra.mxu0 %v12804_v4  ;;  %v1997_v16 = vld [vmem:[#allocation7 + $0x418] sm:$0xff] }
 0x247   : > { %2587 = vmatpush.msra.mxu1 %v2125_v11  ;;  %2614 = vmatmul.f32.vlgmr.msra.gmra.mxu3 %v12819_v28  ;;  %v2281_v11 = vld [vmem:[#allocation7 + $0xcf0] sm:$0xff] }
 0x248   : > { %2640 = vmatmul.f32.gmra.mxu2 %v12804_v4  ;;  %2653 = vmatpush.msra.mxu0 %v2141_v17  ;;  %v1991_v17 = vld [vmem:[#allocation7 + $0x3e8] sm:$0xff] }
 0x249   : > { %2691 = vmatpush.msrb.mxu3 %v2341_v35  ;;  %2722 = vmatpush.msra.mxu2 %v1896_v36  ;;  %v1992_v35 = vld [vmem:[#allocation7 + $0x3f0] sm:$0xff]  ;;  %v2216_v36 = vld [vmem:[#allocation7 + $0xae8] sm:$0xff] }
 0x24a   : > { %2588 = vmatpush.msra.mxu1 %v2120_v1  ;;  %2654 = vmatpush.msra.mxu0 %v2136_v30  ;;  %v2276_v1 = vld [vmem:[#allocation7 + $0xcc8] sm:$0xff]  ;;  %v1986_v30 = vld [vmem:[#allocation7 + $0x3c0] sm:$0xff] }
 0x24b   : > { %2692 = vmatpush.msrb.mxu3 %v2336_v10  ;;  %2723 = vmatpush.msra.mxu2 %v1891_v2  ;;  %v2211_v10 = vld [vmem:[#allocation7 + $0xac0] sm:$0xff] }
 0x24c   : > { %2589 = vmatpush.msra.mxu1 %v2115_v6  ;;  %2655 = vmatpush.msra.mxu0 %v2131_v37  ;;  %v2271_v2 = vld [vmem:[#allocation7 + $0xca0] sm:$0xff]  ;;  %v1981_v6 = vld [vmem:[#allocation7 + $0x398] sm:$0xff] }
 0x24d   : > { %2693 = vmatpush.msrb.mxu3 %v2331_v20  ;;  %2724 = vmatpush.msra.mxu2 %v1886_v25  ;;  %v1942_v37 = vld [vmem:[#allocation7 + $0x260] sm:$0xff]  ;;  %v2206_v25 = vld [vmem:[#allocation7 + $0xa98] sm:$0xff] }
 0x24e   : > { %2590 = vmatpush.msra.mxu1 %v2110_v13  ;;  %2656 = vmatpush.msra.mxu0 %v2126_v33  ;;  %v1982_v20 = vld [vmem:[#allocation7 + $0x3a0] sm:$0xff]  ;;  %v1976_v13 = vld [vmem:[#allocation7 + $0x370] sm:$0xff]  ;;  %v1937_v33 = vld [vmem:[#allocation7 + $0x238] sm:$0xff] }
 0x24f   : > { %2694 = vmatpush.msrb.mxu3 %v2326_v53  ;;  %2725 = vmatpush.msra.mxu2 %v1881_v24  ;;  %v2201_v53 = vld [vmem:[#allocation7 + $0xa70] sm:$0xff]  ;;  %v1971_v24 = vld [vmem:[#allocation7 + $0x348] sm:$0xff] }
 0x250   : > { %2667 = vmatpush.msrb.mxu1 %v2266_v39  ;;  %2617 = vmatmul.f32.gmra.mxu3 %v12814_v62  ;;  %v1977_v39 = vld [vmem:[#allocation7 + $0x378] sm:$0xff] }
 0x251   : > { %2591 = vmatmul.f32.vlgmr.msra.gmra.mxu1 %v12790_v44  ;;  %2657 = vmatpush.msra.mxu0 %v2121_v12  ;;  %v1932_v12 = vld [vmem:[#allocation7 + $0x210] sm:$0xff] }
 0x252   : > { %2668 = vmatpush.msrb.mxu1 %v2261_v43  ;;  %2695 = vmatpush.msrb.mxu3 %v2321_v31  ;;  %v1972_v43 = vld [vmem:[#allocation7 + $0x350] sm:$0xff]  ;;  %v2196_v31 = vld [vmem:[#allocation7 + $0xa48] sm:$0xff] }
 0x253   : > { %2726 = vmatpush.msra.mxu2 %v1876_v34  ;;  %2658 = vmatpush.msra.mxu0 %v2116_v49  ;;  %v1966_v34 = vld [vmem:[#allocation7 + $0x320] sm:$0xff]  ;;  %v1927_v49 = vld [vmem:[#allocation7 + $0x1e8] sm:$0xff] }
 0x254   : > { %2669 = vmatpush.msrb.mxu1 %v2256_v47  ;;  %2696 = vmatpush.msrb.mxu3 %v2316_v38  ;;  %v1967_v47 = vld [vmem:[#allocation7 + $0x328] sm:$0xff]  ;;  %v1961_v38 = vld [vmem:[#allocation7 + $0x2f8] sm:$0xff] }
 0x255   : > { %2727 = vmatpush.msra.mxu2 %v1871_v57  ;;  %2659 = vmatpush.msra.mxu0 %v2111_v41  ;;  %v2101_v57 = vld [vmem:[#allocation7 + $0x758] sm:$0xff]  ;;  %v1922_v41 = vld [vmem:[#allocation7 + $0x1c0] sm:$0xff] }
 0x256   : > { %2670 = vmatpush.msrb.mxu1 %v2251_v54  ;;  %2697 = vmatpush.msrb.mxu3 %v2311_v40  ;;  %v1962_v54 = vld [vmem:[#allocation7 + $0x300] sm:$0xff]  ;;  %v1956_v40 = vld [vmem:[#allocation7 + $0x2d0] sm:$0xff] }
 0x257   : > { %2728 = vmatpush.msra.mxu2 %v1866_v56  ;;  %2660 = vmatmul.f32.vlgmr.msra.gmra.mxu0 %v12790_v44  ;;  %v2006_v44 = vld [vmem:[#allocation7 + $0x460] sm:$0xff]  ;;  %v2096_v56 = vld [vmem:[#allocation7 + $0x730] sm:$0xff] }
 0x258   : > { %2729 = vmatmul.f32.vlgmr.msra.gmra.mxu2 %v12780_v32  ;;  %2736 = vmatpush.msrb.mxu0 %v2021_v48  ;;  %v1917_v48 = vld [vmem:[#allocation7 + $0x198] sm:$0xff] }
 0x259   : > { %2805 = vmatpush.msrb.mxu2 %v2022_v3  ;;  %2671 = vmatpush.msrb.mxu1 %v2246_v23  ;;  %v1957_v3 = vld [vmem:[#allocation7 + $0x2d8] sm:$0xff]  ;;  %v1951_v23 = vld [vmem:[#allocation7 + $0x2a8] sm:$0xff] }
 0x25a   : > { %2698 = vmatpush.msrb.mxu3 %v2306_v5  ;;  %2594 = vmatmul.f32.gmra.mxu1 %v12785_v26  ;;  %v2091_v5 = vld [vmem:[#allocation7 + $0x708] sm:$0xff] }
 0x25b   : > { %2737 = vmatpush.msrb.mxu0 %v2016_v52  ;;  %2806 = vmatpush.msrb.mxu2 %v2017_v58  ;;  %v1912_v52 = vld [vmem:[#allocation7 + $0x170] sm:$0xff] }
 0x25c   : > { %2672 = vmatpush.msrb.mxu1 %v2241_v45  ;;  %2699 = vmatpush.msrb.mxu3 %v2301_v15  ;;  %v1952_v58 = vld [vmem:[#allocation7 + $0x2b0] sm:$0xff]  ;;  %v1946_v45 = vld [vmem:[#allocation7 + $0x280] sm:$0xff]  ;;  %v1907_v15 = vld [vmem:[#allocation7 + $0x148] sm:$0xff] }
 0x25d   : > { %2738 = vmatpush.msrb.mxu0 %v2011_v22  ;;  %2807 = vmatpush.msrb.mxu2 %v2012_v8  ;;  %v2102_v22 = vld [vmem:[#allocation7 + $0x760] sm:$0xff]  ;;  %v2103_v8 = vld [vmem:[#allocation7 + $0x768] sm:$0xff] }
 0x25e   : > { %2673 = vmatpush.msrb.mxu1 %v2236_v18  ;;  %2700 = vmatpush.msrb.mxu3 %v2296_v63  ;;  %v2081_v18 = vld [vmem:[#allocation7 + $0x6b8] sm:$0xff]  ;;  %v1902_v63 = vld [vmem:[#allocation7 + $0x120] sm:$0xff] }
 0x25f   : > { %2739 = vmatpush.msrb.mxu0 %v2006_v44  ;;  %2808 = vmatpush.msrb.mxu2 %v2007_v61  ;;  %v2097_v44 = vld [vmem:[#allocation7 + $0x738] sm:$0xff]  ;;  %v2098_v61 = vld [vmem:[#allocation7 + $0x740] sm:$0xff] }
 0x260   : > { %2674 = vmatpush.msrb.mxu1 %v2231_v19  ;;  %2701 = vmatpush.msrb.mxu3 %v2291_v50  ;;  %v2076_v19 = vld [vmem:[#allocation7 + $0x690] sm:$0xff]  ;;  %v1897_v50 = vld [vmem:[#allocation7 + $0xf8] sm:$0xff] }
 0x261   : > { %2663 = vmatmul.f32.gmra.mxu0 %v12785_v26  ;;  %2732 = vmatmul.f32.gmra.mxu2 %v12782_v46  ;;  %v1987_v26 = vld [vmem:[#allocation7 + $0x3c8] sm:$0xff] }
 0x262   : > { %2740 = vmatpush.msrb.mxu0 %v2001_v21  ;;  %2809 = vmatpush.msrb.mxu2 %v2002_v27  ;;  %v2092_v21 = vld [vmem:[#allocation7 + $0x710] sm:$0xff]  ;;  %v2093_v27 = vld [vmem:[#allocation7 + $0x718] sm:$0xff] }
 0x263   : > { %2675 = vmatpush.msrb.mxu1 %v2226_v60  ;;  %2702 = vmatpush.msrb.mxu3 %v2286_v51  ;;  %v2071_v60 = vld [vmem:[#allocation7 + $0x668] sm:$0xff]  ;;  %v1892_v51 = vld [vmem:[#allocation7 + $0xd0] sm:$0xff] }
 0x264   : > { %2741 = vmatpush.msrb.mxu0 %v1996_v29  ;;  %2810 = vmatpush.msrb.mxu2 %v1997_v16  ;;  %v2087_v29 = vld [vmem:[#allocation7 + $0x6e8] sm:$0xff]  ;;  %v2088_v16 = vld [vmem:[#allocation7 + $0x6f0] sm:$0xff] }
 0x265   : > { %2676 = vmatpush.msrb.mxu1 %v2221_v7  ;;  %2703 = vmatpush.msrb.mxu3 %v2281_v11  ;;  %v2066_v7 = vld [vmem:[#allocation7 + $0x640] sm:$0xff]  ;;  %v1887_v11 = vld [vmem:[#allocation7 + $0xa8] sm:$0xff] }
 0x266   : > { %2742 = vmatpush.msrb.mxu0 %v1991_v17  ;;  %2811 = vmatpush.msrb.mxu2 %v1992_v35  ;;  %v2083_v17 = vld [vmem:[#allocation7 + $0x6c8] sm:$0xff]  ;;  %v2061_v35 = vld [vmem:[#allocation7 + $0x618] sm:$0xff] }
 0x267   : > { %2677 = vmatpush.msrb.mxu1 %v2216_v36  ;;  %2704 = vmatpush.msrb.mxu3 %v2276_v1  ;;  %v1882_v36 = vld [vmem:[#allocation7 + $0x80] sm:$0xff]  ;;  %v2077_v1 = vld [vmem:[#allocation7 + $0x698] sm:$0xff] }
 0x268   : > { %2743 = vmatpush.msrb.mxu0 %v1986_v30  ;;  %2812 = vmatpush.msrb.mxu2 %v1987_v26  ;;  %v2078_v30 = vld [vmem:[#allocation7 + $0x6a0] sm:$0xff]  ;;  %v2056_v26 = vld [vmem:[#allocation7 + $0x5f0] sm:$0xff] }
 0x269   : > { %2678 = vmatpush.msrb.mxu1 %v2211_v10  ;;  %2705 = vmatpush.msrb.mxu3 %v2271_v2  ;;  %v1877_v10 = vld [vmem:[#allocation7 + $0x58] sm:$0xff]  ;;  %v2072_v2 = vld [vmem:[#allocation7 + $0x670] sm:$0xff] }
 0x26a   : > { %2706 = vmatmul.f32.vlgmr.msrb.gmra.mxu3 %v12808_v59  ;;  %2744 = vmatpush.msrb.mxu0 %v1981_v6  ;;  %v2191_v59 = vld [vmem:[#allocation7 + $0xa20] sm:$0xff]  ;;  %v2073_v6 = vld [vmem:[#allocation7 + $0x678] sm:$0xff] }
 0x26b   : > { %2782 = vmatpush.msra.mxu3 %v1942_v37  ;;  %2813 = vmatpush.msrb.mxu2 %v1982_v20  ;;  %v2051_v37 = vld [vmem:[#allocation7 + $0x5c8] sm:$0xff]  ;;  %v1872_v20 = vld [vmem:[#allocation7 + $0x30] sm:$0xff] }
 0x26c   : > { %2679 = vmatpush.msrb.mxu1 %v2206_v25  ;;  %2745 = vmatpush.msrb.mxu0 %v1976_v13  ;;  %v2067_v25 = vld [vmem:[#allocation7 + $0x648] sm:$0xff]  ;;  %v2068_v13 = vld [vmem:[#allocation7 + $0x650] sm:$0xff] }
 0x26d   : > { %2783 = vmatpush.msra.mxu3 %v1937_v33  ;;  %2814 = vmatpush.msrb.mxu2 %v1977_v39  ;;  %v2046_v33 = vld [vmem:[#allocation7 + $0x5a0] sm:$0xff]  ;;  %v1867_v39 = vld [vmem:[#allocation7 + $0x8] sm:$0xff] }
 0x26e   : > { %2680 = vmatpush.msrb.mxu1 %v2201_v53  ;;  %2746 = vmatpush.msrb.mxu0 %v1971_v24  ;;  %v2062_v53 = vld [vmem:[#allocation7 + $0x620] sm:$0xff]  ;;  %v2023_v24 = vld [vmem:[#allocation7 + $0x4e8] sm:$0xff] }
 0x26f   : > { %2784 = vmatpush.msra.mxu3 %v1932_v12  ;;  %2815 = vmatpush.msrb.mxu2 %v1972_v43  ;;  %v2063_v12 = vld [vmem:[#allocation7 + $0x628] sm:$0xff]  ;;  %v2041_v43 = vld [vmem:[#allocation7 + $0x578] sm:$0xff] }
 0x270   : > { %2681 = vmatpush.msrb.mxu1 %v2196_v31  ;;  %2747 = vmatpush.msrb.mxu0 %v1966_v34  ;;  %v2057_v31 = vld [vmem:[#allocation7 + $0x5f8] sm:$0xff]  ;;  %v2018_v34 = vld [vmem:[#allocation7 + $0x4c0] sm:$0xff] }
 0x271   : > { %2785 = vmatpush.msra.mxu3 %v1927_v49  ;;  %2816 = vmatpush.msrb.mxu2 %v1967_v47  ;;  %v2058_v49 = vld [vmem:[#allocation7 + $0x600] sm:$0xff]  ;;  %v2036_v47 = vld [vmem:[#allocation7 + $0x550] sm:$0xff] }
 0x272   : > { %2682 = vmatpush.msrb.mxu1 %v2191_v59  ;;  %2709 = vmatmul.f32.gmra.mxu3 %v12804_v4  ;;  %v2086_v4 = vld [vmem:[#allocation7 + $0x6e0] sm:$0xff]  ;;  %v2052_v59 = vld [vmem:[#allocation7 + $0x5d0] sm:$0xff] }
 0x273   : > { %2683 = vmatmul.f32.vlgmr.msrb.gmra.mxu1 %v12819_v28  ;;  %2748 = vmatpush.msrb.mxu0 %v1961_v38  ;;  %v1947_v28 = vld [vmem:[#allocation7 + $0x288] sm:$0xff]  ;;  %v2013_v38 = vld [vmem:[#allocation7 + $0x498] sm:$0xff] }
 0x274   : > { %2759 = vmatpush.msra.mxu1 %v2101_v57  ;;  %2786 = vmatpush.msra.mxu3 %v1922_v41  ;;  %v2053_v57 = vld [vmem:[#allocation7 + $0x5d8] sm:$0xff]  ;;  %v2031_v41 = vld [vmem:[#allocation7 + $0x528] sm:$0xff] }
 0x275   : > { %2817 = vmatpush.msrb.mxu2 %v1962_v54  ;;  %2749 = vmatpush.msrb.mxu0 %v1956_v40  ;;  %v2047_v54 = vld [vmem:[#allocation7 + $0x5a8] sm:$0xff]  ;;  %v2008_v40 = vld [vmem:[#allocation7 + $0x470] sm:$0xff] }
 0x276   : > { %2760 = vmatpush.msra.mxu1 %v2096_v56  ;;  %2787 = vmatpush.msra.mxu3 %v1917_v48  ;;  %v2048_v56 = vld [vmem:[#allocation7 + $0x5b0] sm:$0xff] }
 0x277   : > { %2818 = vmatpush.msrb.mxu2 %v1957_v3  ;;  %2750 = vmatpush.msrb.mxu0 %v1951_v23  ;;  %v2026_v3 = vld [vmem:[#allocation7 + $0x500] sm:$0xff] }
 0x278   : > { %2761 = vmatpush.msra.mxu1 %v2091_v5  ;;  %2788 = vmatpush.msra.mxu3 %v1912_v52  ;;  %v2042_v23 = vld [vmem:[#allocation7 + $0x580] sm:$0xff]  ;;  %v1943_v5 = vld [vmem:[#allocation7 + $0x268] sm:$0xff] }
 0x279   : > { %2819 = vmatpush.msrb.mxu2 %v1952_v58  ;;  %2751 = vmatpush.msrb.mxu0 %v1946_v45  ;;  %v2003_v52 = vld [vmem:[#allocation7 + $0x448] sm:$0xff]  ;;  %v2037_v45 = vld [vmem:[#allocation7 + $0x558] sm:$0xff] }
 0x27a   : > { %2762 = vmatpush.msra.mxu1 %v2086_v4  ;;  %2789 = vmatpush.msra.mxu3 %v1907_v15  ;;  %v2043_v58 = vld [vmem:[#allocation7 + $0x588] sm:$0xff]  ;;  %v1938_v4 = vld [vmem:[#allocation7 + $0x240] sm:$0xff] }
 0x27b   : > { %2820 = vmatpush.msrb.mxu2 %v1947_v28  ;;  %2752 = vmatmul.f32.vlgmr.msrb.gmra.mxu0 %v12799_v9  ;;  %v1998_v15 = vld [vmem:[#allocation7 + $0x420] sm:$0xff] }
 0x27c   : > { %2821 = vmatmul.f32.vlgmr.msrb.gmra.mxu2 %v12799_v9  ;;  %2828 = vmatpush.msra.mxu0 %v2102_v22  ;;  %v2038_v28 = vld [vmem:[#allocation7 + $0x560] sm:$0xff]  ;;  %v2032_v22 = vld [vmem:[#allocation7 + $0x530] sm:$0xff] }
 0x27d   : > { %2897 = vmatpush.msra.mxu2 %v2103_v8  ;;  %2686 = vmatmul.f32.gmra.mxu1 %v12814_v62  ;;  %v2082_v62 = vld [vmem:[#allocation7 + $0x6c0] sm:$0xff]  ;;  %v1933_v8 = vld [vmem:[#allocation7 + $0x218] sm:$0xff] }
 0x27e   : > { %2763 = vmatpush.msra.mxu1 %v2081_v18  ;;  %2790 = vmatpush.msra.mxu3 %v1902_v63  ;;  %v1993_v18 = vld [vmem:[#allocation7 + $0x3f8] sm:$0xff] }
 0x27f   : > { %2829 = vmatpush.msra.mxu0 %v2097_v44  ;;  %2898 = vmatpush.msra.mxu2 %v2098_v61  ;;  %v2033_v63 = vld [vmem:[#allocation7 + $0x538] sm:$0xff]  ;;  %v2027_v44 = vld [vmem:[#allocation7 + $0x508] sm:$0xff]  ;;  %v1928_v61 = vld [vmem:[#allocation7 + $0x1f0] sm:$0xff] }
 0x280   : > { %2764 = vmatpush.msra.mxu1 %v2076_v19  ;;  %2791 = vmatpush.msra.mxu3 %v1897_v50  ;;  %v1988_v19 = vld [vmem:[#allocation7 + $0x3d0] sm:$0xff] }
 0x281   : > { %2830 = vmatpush.msra.mxu0 %v2092_v21  ;;  %2899 = vmatpush.msra.mxu2 %v2093_v27  ;;  %v2028_v50 = vld [vmem:[#allocation7 + $0x510] sm:$0xff] }
 0x282   : > { %2765 = vmatpush.msra.mxu1 %v2071_v60  ;;  %2792 = vmatpush.msra.mxu3 %v1892_v51  ;;  %v1944_v27 = vld [vmem:[#allocation7 + $0x270] sm:$0xff]  ;;  %v1945_v60 = vld [vmem:[#allocation7 + $0x278] sm:$0xff]  ;;  %v1923_v51 = vld [vmem:[#allocation7 + $0x1c8] sm:$0xff] }
 0x283   : > { %2831 = vmatpush.msra.mxu0 %v2087_v29  ;;  %2900 = vmatpush.msra.mxu2 %v2088_v16  ;;  %v1983_v29 = vld [vmem:[#allocation7 + $0x3a8] sm:$0xff] }
 0x284   : > { %2766 = vmatpush.msra.mxu1 %v2066_v7  ;;  %2793 = vmatpush.msra.mxu3 %v1887_v11  ;;  %v1939_v16 = vld [vmem:[#allocation7 + $0x248] sm:$0xff]  ;;  %v1940_v7 = vld [vmem:[#allocation7 + $0x250] sm:$0xff]  ;;  %v1918_v11 = vld [vmem:[#allocation7 + $0x1a0] sm:$0xff] }
 0x285   : > { %2755 = vmatmul.f32.gmra.mxu0 %v12811_v0  ;;  %2824 = vmatmul.f32.gmra.mxu2 %v12811_v0 }
 0x286   : > { %2832 = vmatpush.msra.mxu0 %v2082_v62  ;;  %2901 = vmatpush.msra.mxu2 %v2083_v17  ;;  %v1978_v62 = vld [vmem:[#allocation7 + $0x380] sm:$0xff] }
 0x287   : > { %2767 = vmatpush.msra.mxu1 %v2061_v35  ;;  %2794 = vmatpush.msra.mxu3 %v1882_v36  ;;  %v1934_v35 = vld [vmem:[#allocation7 + $0x220] sm:$0xff]  ;;  %v1935_v36 = vld [vmem:[#allocation7 + $0x228] sm:$0xff] }
 0x288   : > { %2833 = vmatpush.msra.mxu0 %v2077_v1  ;;  %2902 = vmatpush.msra.mxu2 %v2078_v30  ;;  %v1913_v1 = vld [vmem:[#allocation7 + $0x178] sm:$0xff] }
 0x289   : > { %2768 = vmatpush.msra.mxu1 %v2056_v26  ;;  %2795 = vmatpush.msra.mxu3 %v1877_v10  ;;  %v1973_v30 = vld [vmem:[#allocation7 + $0x358] sm:$0xff] }
 0x28a   : > { %2834 = vmatpush.msra.mxu0 %v2072_v2  ;;  %2903 = vmatpush.msra.mxu2 %v2073_v6  ;;  %v1929_v2 = vld [vmem:[#allocation7 + $0x1f8] sm:$0xff]  ;;  %v1930_v6 = vld [vmem:[#allocation7 + $0x200] sm:$0xff] }
 0x28b   : > { %2769 = vmatpush.msra.mxu1 %v2051_v37  ;;  %2796 = vmatpush.msra.mxu3 %v1872_v20  ;;  %v12853_v48 = vpop.f32.mrf.mxu0 }
 0x28c   : > { %2835 = vmatpush.msra.mxu0 %v2067_v25  ;;  %2904 = vmatpush.msra.mxu2 %v2068_v13  ;;  %v1908_v25 = vld [vmem:[#allocation7 + $0x150] sm:$0xff] }
 0x28d   : > { %2770 = vmatpush.msra.mxu1 %v2046_v33  ;;  %2797 = vmatpush.msra.mxu3 %v1867_v39  ;;  %v1968_v13 = vld [vmem:[#allocation7 + $0x330] sm:$0xff] }
 0x28e   : > { %2798 = vmatmul.f32.vlgmr.msra.gmra.mxu3 %v12780_v32  ;;  %2836 = vmatpush.msra.mxu0 %v2062_v53  ;;  %v1924_v39 = vld [vmem:[#allocation7 + $0x1d0] sm:$0xff]  ;;  %v1925_v53 = vld [vmem:[#allocation7 + $0x1d8] sm:$0xff] }
 0x28f   : > { %2874 = vmatpush.msrb.mxu3 %v2023_v24  ;;  %2905 = vmatpush.msra.mxu2 %v2063_v12  ;;  %v1903_v24 = vld [vmem:[#allocation7 + $0x128] sm:$0xff] }
 0x290   : > { %2771 = vmatpush.msra.mxu1 %v2041_v43  ;;  %2837 = vmatpush.msra.mxu0 %v2057_v31  ;;  %v1963_v12 = vld [vmem:[#allocation7 + $0x308] sm:$0xff]  ;;  %v1920_v31 = vld [vmem:[#allocation7 + $0x1b0] sm:$0xff] }
 0x291   : > { %2875 = vmatpush.msrb.mxu3 %v2018_v34  ;;  %2906 = vmatpush.msra.mxu2 %v2058_v49  ;;  %v2454_v26 = vpop.f32.mrf.mxu2  ;;  %v1919_v43 = vld [vmem:[#allocation7 + $0x1a8] sm:$0xff]  ;;  %v1898_v34 = vld [vmem:[#allocation7 + $0x100] sm:$0xff] }
 0x292   : > { %2772 = vmatpush.msra.mxu1 %v2036_v47  ;;  %2838 = vmatpush.msra.mxu0 %v2052_v59  ;;  %v1958_v49 = vld [vmem:[#allocation7 + $0x2e0] sm:$0xff]  ;;  %v1915_v59 = vld [vmem:[#allocation7 + $0x188] sm:$0xff] }
 0x293   : > { %2876 = vmatpush.msrb.mxu3 %v2013_v38  ;;  %2907 = vmatpush.msra.mxu2 %v2053_v57  ;;  %v12857_v21 = vpop.f32.mrf.mxu0  ;;  %v1914_v47 = vld [vmem:[#allocation7 + $0x180] sm:$0xff]  ;;  %v1893_v57 = vld [vmem:[#allocation7 + $0xd8] sm:$0xff] }
 0x294   : > { %2773 = vmatpush.msra.mxu1 %v2031_v41  ;;  %2839 = vmatpush.msra.mxu0 %v2047_v54  ;;  %v1953_v41 = vld [vmem:[#allocation7 + $0x2b8] sm:$0xff] }
 0x295   : > { %2877 = vmatpush.msrb.mxu3 %v2008_v40  ;;  %2908 = vmatpush.msra.mxu2 %v2048_v56  ;;  %v1909_v54 = vld [vmem:[#allocation7 + $0x158] sm:$0xff]  ;;  %v1910_v40 = vld [vmem:[#allocation7 + $0x160] sm:$0xff] }
 0x296   : > { %2774 = vmatpush.msra.mxu1 %v2026_v3  ;;  %2801 = vmatmul.f32.gmra.mxu3 %v12782_v46  ;;  %v1948_v3 = vld [vmem:[#allocation7 + $0x290] sm:$0xff] }
 0x297   : > { %2775 = vmatmul.f32.vlgmr.msra.gmra.mxu1 %v12794_v55  ;;  %2840 = vmatpush.msra.mxu0 %v2042_v23 }
 0x298   : > { %2851 = vmatpush.msrb.mxu1 %v1943_v5  ;;  %2878 = vmatpush.msrb.mxu3 %v2003_v52  ;;  %v1904_v5 = vld [vmem:[#allocation7 + $0x130] sm:$0xff] }
 0x299   : > { %2909 = vmatpush.msra.mxu2 %v2043_v58  ;;  %2841 = vmatpush.msra.mxu0 %v2037_v45  ;;  %v12873_v56 = vpop.f32.mrf.mxu2  ;;  %v2104_v58 = vld [vmem:[#allocation7 + $0x770] sm:$0xff]  ;;  %v1905_v45 = vld [vmem:[#allocation7 + $0x138] sm:$0xff] }
 0x29a   : > { %2852 = vmatpush.msrb.mxu1 %v1938_v4  ;;  %2879 = vmatpush.msrb.mxu3 %v1998_v15  ;;  %v1883_v4 = vld [vmem:[#allocation7 + $0x88] sm:$0xff] }
 0x29b   : > { %2910 = vmatpush.msra.mxu2 %v2038_v28  ;;  %2842 = vmatpush.msra.mxu0 %v2032_v22  ;;  %v1899_v15 = vld [vmem:[#allocation7 + $0x108] sm:$0xff]  ;;  %v1900_v22 = vld [vmem:[#allocation7 + $0x110] sm:$0xff] }
 0x29c   : > { %2853 = vmatpush.msrb.mxu1 %v1933_v8  ;;  %2880 = vmatpush.msrb.mxu3 %v1993_v18  ;;  %v2099_v28 = vld [vmem:[#allocation7 + $0x748] sm:$0xff]  ;;  %v1878_v8 = vld [vmem:[#allocation7 + $0x60] sm:$0xff] }
 0x29d   : > { %2911 = vmatpush.msra.mxu2 %v2033_v63  ;;  %2843 = vmatpush.msra.mxu0 %v2027_v44  ;;  %v1894_v18 = vld [vmem:[#allocation7 + $0xe0] sm:$0xff]  ;;  %v1895_v44 = vld [vmem:[#allocation7 + $0xe8] sm:$0xff] }
 0x29e   : > { %2854 = vmatpush.msrb.mxu1 %v1928_v61  ;;  %2881 = vmatpush.msrb.mxu3 %v1988_v19  ;;  %v2094_v63 = vld [vmem:[#allocation7 + $0x720] sm:$0xff]  ;;  %v1873_v61 = vld [vmem:[#allocation7 + $0x38] sm:$0xff] }
 0x29f   : > { %2912 = vmatpush.msra.mxu2 %v2028_v50  ;;  %2844 = vmatmul.f32.vlgmr.msra.gmra.mxu0 %v12794_v55  ;;  %v1889_v19 = vld [vmem:[#allocation7 + $0xb8] sm:$0xff] }
 0x2a0   : > { %2913 = vmatmul.f32.vlgmr.msra.gmra.mxu2 %v12794_v55  ;;  %2920 = vmatpush.msrb.mxu0 %v1944_v27 }
 0x2a1   : > { %2989 = vmatpush.msrb.mxu2 %v1945_v60  ;;  %2778 = vmatmul.f32.gmra.mxu1 %v12801_v42  ;;  %v12862_v17 = vpop.f32.mrf.mxu3  ;;  %v2089_v60 = vld [vmem:[#allocation7 + $0x6f8] sm:$0xff] }
 0x2a2   : > { %2855 = vmatpush.msrb.mxu1 %v1923_v51  ;;  %2882 = vmatpush.msrb.mxu3 %v1983_v29  ;;  %v1890_v51 = vld [vmem:[#allocation7 + $0xc0] sm:$0xff] }
 0x2a3   : > { %2921 = vmatpush.msrb.mxu0 %v1939_v16  ;;  %2990 = vmatpush.msrb.mxu2 %v1940_v7  ;;  %v2408_v10 = vpop.f32.mrf.mxu1  ;;  %v1868_v16 = vld [vmem:[#allocation7 + $0x10] sm:$0xff] }
 0x2a4   : > { %2856 = vmatpush.msrb.mxu1 %v1918_v11  ;;  %2883 = vmatpush.msrb.mxu3 %v1978_v62  ;;  %v12865_v37 = vadd.f32 %v2408_v10, %v12853_v48  ;;  %v2477_v20 = vpop.f32.mrf.mxu0  ;;  %v1888_v48 = vld [vmem:[#allocation7 + $0xb0] sm:$0xff] }
 0x2a5   : > { %2922 = vmatpush.msrb.mxu0 %v1934_v35  ;;  %2991 = vmatpush.msrb.mxu2 %v1935_v36  ;;  %v12867_v33 = vadd.f32 %v2477_v20, %v2454_v26  ;;  %v1884_v7 = vld [vmem:[#allocation7 + $0x90] sm:$0xff]  ;;  %v1879_v26 = vld [vmem:[#allocation7 + $0x68] sm:$0xff] }
 0x2a6   : > { %2857 = vmatpush.msrb.mxu1 %v1913_v1  ;;  %2884 = vmatpush.msrb.mxu3 %v1973_v30  ;;  %v2024_v62 = vld [vmem:[#allocation7 + $0x4f0] sm:$0xff]  ;;  %v1885_v30 = vld [vmem:[#allocation7 + $0x98] sm:$0xff] }
 0x2a7   : > { %2923 = vmatpush.msrb.mxu0 %v1929_v2  ;;  %2992 = vmatpush.msrb.mxu2 %v1930_v6  ;;  %v2084_v35 = vld [vmem:[#allocation7 + $0x6d0] sm:$0xff]  ;;  %v2019_v2 = vld [vmem:[#allocation7 + $0x4c8] sm:$0xff] }
 0x2a8   : > { %2858 = vmatpush.msrb.mxu1 %v1908_v25  ;;  %2885 = vmatpush.msrb.mxu3 %v1968_v13  ;;  %v2079_v6 = vld [vmem:[#allocation7 + $0x6a8] sm:$0xff]  ;;  %v1880_v20 = vld [vmem:[#allocation7 + $0x70] sm:$0xff]  ;;  %v1874_v25 = vld [vmem:[#allocation7 + $0x40] sm:$0xff] }
 0x2a9   : > { %2847 = vmatmul.f32.gmra.mxu0 %v12801_v42  ;;  %2916 = vmatmul.f32.gmra.mxu2 %v12801_v42  ;;  %v2014_v13 = vld [vmem:[#allocation7 + $0x4a0] sm:$0xff] }
 0x2aa   : > { %2924 = vmatpush.msrb.mxu0 %v1924_v39  ;;  %2993 = vmatpush.msrb.mxu2 %v1925_v53  ;;  %v12871_v38 = vpop.f32.mrf.mxu3  ;;  %v1875_v39 = vld [vmem:[#allocation7 + $0x48] sm:$0xff]  ;;  %v1869_v53 = vld [vmem:[#allocation7 + $0x18] sm:$0xff] }
 0x2ab   : > { %2859 = vmatpush.msrb.mxu1 %v1903_v24  ;;  %2886 = vmatpush.msrb.mxu3 %v1963_v12  ;;  %v2546_v50 = vpop.f32.mrf.mxu2  ;;  %v2009_v24 = vld [vmem:[#allocation7 + $0x478] sm:$0xff] }
 0x2ac   : > { %2925 = vmatpush.msrb.mxu0 %v1919_v43  ;;  %2994 = vmatpush.msrb.mxu2 %v1920_v31  ;;  %v2069_v12 = vld [vmem:[#allocation7 + $0x658] sm:$0xff]  ;;  %v1870_v31 = vld [vmem:[#allocation7 + $0x20] sm:$0xff] }
 0x2ad   : > { %2860 = vmatpush.msrb.mxu1 %v1898_v34  ;;  %2887 = vmatpush.msrb.mxu3 %v1958_v49  ;;  %v2025_v34 = vld [vmem:[#allocation7 + $0x4f8] sm:$0xff] }
 0x2ae   : > { %2926 = vmatpush.msrb.mxu0 %v1914_v47  ;;  %2995 = vmatpush.msrb.mxu2 %v1915_v59  ;;  %v12875_v23 = vpop.f32.mrf.mxu1  ;;  %v12877_v52 = vpop.f32.mrf.mxu0  ;;  %v3214_v49 = vld [vmem:[#allocation7 + $0x13d8] sm:$0xff]  ;;  %v2004_v47 = vld [vmem:[#allocation7 + $0x450] sm:$0xff] }
 0x2af   : > { %2861 = vmatpush.msrb.mxu1 %v1893_v57  ;;  %2888 = vmatpush.msrb.mxu3 %v1953_v41  ;;  %v2064_v59 = vld [vmem:[#allocation7 + $0x630] sm:$0xff] }
 0x2b0   : > { %2927 = vmatpush.msrb.mxu0 %v1909_v54  ;;  %2996 = vmatpush.msrb.mxu2 %v1910_v40  ;;  %v2020_v57 = vld [vmem:[#allocation7 + $0x4d0] sm:$0xff]  ;;  %v1999_v40 = vld [vmem:[#allocation7 + $0x428] sm:$0xff] }
 0x2b1   : > { %2862 = vmatpush.msrb.mxu1 %v1888_v48  ;;  %2889 = vmatpush.msrb.mxu3 %v1948_v3  ;;  %v3209_v41 = vld [vmem:[#allocation7 + $0x13b0] sm:$0xff]  ;;  %v2059_v48 = vld [vmem:[#allocation7 + $0x608] sm:$0xff] }
 0x2b2   : > { %2890 = vmatmul.f32.vlgmr.msrb.gmra.mxu3 %v12799_v9  ;;  %2928 = vmatpush.msrb.mxu0 %v1904_v5  ;;  %v2015_v3 = vld [vmem:[#allocation7 + $0x4a8] sm:$0xff] }
 0x2b3   : > { %2966 = vmatpush.msra.mxu3 %v2104_v58  ;;  %2997 = vmatpush.msrb.mxu2 %v1905_v45  ;;  %v3204_v5 = vld [vmem:[#allocation7 + $0x1388] sm:$0xff]  ;;  %v1994_v45 = vld [vmem:[#allocation7 + $0x400] sm:$0xff] }
 0x2b4   : > { %2863 = vmatpush.msrb.mxu1 %v1883_v4  ;;  %2929 = vmatpush.msrb.mxu0 %v1899_v15  ;;  %v2054_v4 = vld [vmem:[#allocation7 + $0x5e0] sm:$0xff] }
 0x2b5   : > { %2967 = vmatpush.msra.mxu3 %v2099_v28  ;;  %2998 = vmatpush.msrb.mxu2 %v1900_v22  ;;  %v2523_v27 = vpop.f32.mrf.mxu3  ;;  %v2010_v15 = vld [vmem:[#allocation7 + $0x480] sm:$0xff]  ;;  %v1989_v22 = vld [vmem:[#allocation7 + $0x3d8] sm:$0xff] }
 0x2b6   : > { %2864 = vmatpush.msrb.mxu1 %v1878_v8  ;;  %2930 = vmatpush.msrb.mxu0 %v1894_v18  ;;  %v2547_v29 = vadd.f32 %v2546_v50, %v2523_v27  ;;  %v12887_v43 = vpop.f32.mrf.mxu2  ;;  %v3199_v28 = vld [vmem:[#allocation7 + $0x1360] sm:$0xff]  ;;  %v2049_v8 = vld [vmem:[#allocation7 + $0x5b8] sm:$0xff]  ;;  %v2000_v50 = vld [vmem:[#allocation7 + $0x430] sm:$0xff] }
 0x2b7   : > { %2968 = vmatpush.msra.mxu3 %v2094_v63  ;;  %2999 = vmatpush.msrb.mxu2 %v1895_v44  ;;  %v2005_v63 = vld [vmem:[#allocation7 + $0x458] sm:$0xff]  ;;  %v3189_v27 = vld [vmem:[#allocation7 + $0x1310] sm:$0xff] }
 0x2b8   : > { %2865 = vmatpush.msrb.mxu1 %v1873_v61  ;;  %2931 = vmatpush.msrb.mxu0 %v1889_v19  ;;  %v2500_v11 = vpop.f32.mrf.mxu1  ;;  %v3194_v44 = vld [vmem:[#allocation7 + $0x1338] sm:$0xff]  ;;  %v1984_v61 = vld [vmem:[#allocation7 + $0x3b0] sm:$0xff] }
 0x2b9   : > { %2969 = vmatpush.msra.mxu3 %v2089_v60  ;;  %3000 = vmatpush.msrb.mxu2 %v1890_v51  ;;  %v12881_v36 = vadd.f32 %v2500_v11, %v12867_v33  ;;  %v2569_v1 = vpop.f32.mrf.mxu0  ;;  %v2074_v33 = vld [vmem:[#allocation7 + $0x680] sm:$0xff]  ;;  %v2044_v19 = vld [vmem:[#allocation7 + $0x590] sm:$0xff]  ;;  %v1979_v60 = vld [vmem:[#allocation7 + $0x388] sm:$0xff] }
 0x2ba   : > { %2866 = vmatpush.msrb.mxu1 %v1868_v16  ;;  %2893 = vmatmul.f32.gmra.mxu3 %v12811_v0  ;;  %v12884_v10 = vadd.f32 %v2569_v1, %v2547_v29  ;;  %v2039_v51 = vld [vmem:[#allocation7 + $0x568] sm:$0xff]  ;;  %v1974_v11 = vld [vmem:[#allocation7 + $0x360] sm:$0xff] }
 0x2bb   : > { %2867 = vmatmul.f32.vlgmr.msrb.gmra.mxu1 %v12780_v32  ;;  %2932 = vmatpush.msrb.mxu0 %v1884_v7  ;;  %v1995_v16 = vld [vmem:[#allocation7 + $0x408] sm:$0xff]  ;;  %v1990_v1 = vld [vmem:[#allocation7 + $0x3e0] sm:$0xff] }
 0x2bc   : > { %2943 = vmatpush.msra.mxu1 %v2024_v62  ;;  %2970 = vmatpush.msra.mxu3 %v2084_v35  ;;  %v3184_v7 = vld [vmem:[#allocation7 + $0x12e8] sm:$0xff]  ;;  %v2034_v62 = vld [vmem:[#allocation7 + $0x540] sm:$0xff] }
 0x2bd   : > { %3001 = vmatpush.msrb.mxu2 %v1885_v30  ;;  %2933 = vmatpush.msrb.mxu0 %v1879_v26  ;;  %v3179_v30 = vld [vmem:[#allocation7 + $0x12c0] sm:$0xff] }
 0x2be   : > { %2944 = vmatpush.msra.mxu1 %v2019_v2  ;;  %2971 = vmatpush.msra.mxu3 %v2079_v6  ;;  %v1969_v2 = vld [vmem:[#allocation7 + $0x338] sm:$0xff] }
 0x2bf   : > { %3002 = vmatpush.msrb.mxu2 %v1880_v20  ;;  %2934 = vmatpush.msrb.mxu0 %v1874_v25  ;;  %v12894_v58 = vpop.f32.mrf.mxu3  ;;  %v2029_v6 = vld [vmem:[#allocation7 + $0x518] sm:$0xff] }
 0x2c0   : > { %2945 = vmatpush.msra.mxu1 %v2014_v13  ;;  %2972 = vmatpush.msra.mxu3 %v2074_v33  ;;  %v1985_v20 = vld [vmem:[#allocation7 + $0x3b8] sm:$0xff] }
 0x2c1   : > { %3003 = vmatpush.msrb.mxu2 %v1875_v39  ;;  %2935 = vmatpush.msrb.mxu0 %v1869_v53  ;;  %v2638_v18 = vpop.f32.mrf.mxu2  ;;  %v3134_v13 = vld [vmem:[#allocation7 + $0x1158] sm:$0xff]  ;;  %v1964_v39 = vld [vmem:[#allocation7 + $0x310] sm:$0xff] }
 0x2c2   : > { %2946 = vmatpush.msra.mxu1 %v2009_v24  ;;  %2973 = vmatpush.msra.mxu3 %v2069_v12  ;;  %v12891_v54 = vpop.f32.mrf.mxu1  ;;  %v3174_v33 = vld [vmem:[#allocation7 + $0x1298] sm:$0xff]  ;;  %v1980_v53 = vld [vmem:[#allocation7 + $0x390] sm:$0xff] }
 0x2c3   : > { %3004 = vmatpush.msrb.mxu2 %v1870_v31  ;;  %2936 = vmatmul.f32.vlgmr.msrb.gmra.mxu0 %v12780_v32  ;;  %v3129_v12 = vld [vmem:[#allocation7 + $0x1130] sm:$0xff] }
 0x2c4   : > { %3005 = vmatmul.f32.vlgmr.msrb.gmra.mxu2 %v12780_v32  ;;  %3012 = vmatpush.msra.mxu0 %v2025_v34  ;;  %v3169_v31 = vld [vmem:[#allocation7 + $0x1270] sm:$0xff]  ;;  %v1959_v34 = vld [vmem:[#allocation7 + $0x2e8] sm:$0xff] }
 0x2c5   : > { %3337 = vmatpush.msra.mxu2 %v3214_v49  ;;  %2870 = vmatmul.f32.gmra.mxu1 %v12782_v46  ;;  %v1975_v49 = vld [vmem:[#allocation7 + $0x368] sm:$0xff] }
 0x2c6   : > { %2947 = vmatpush.msra.mxu1 %v2004_v47  ;;  %2974 = vmatpush.msra.mxu3 %v2064_v59  ;;  %v3124_v47 = vld [vmem:[#allocation7 + $0x1108] sm:$0xff] }
 0x2c7   : > { %3013 = vmatpush.msra.mxu0 %v2020_v57  ;;  %3338 = vmatpush.msra.mxu2 %v3209_v41  ;;  %v3164_v59 = vld [vmem:[#allocation7 + $0x1248] sm:$0xff]  ;;  %v1954_v57 = vld [vmem:[#allocation7 + $0x2c0] sm:$0xff] }
 0x2c8   : > { %2948 = vmatpush.msra.mxu1 %v1999_v40  ;;  %2975 = vmatpush.msra.mxu3 %v2059_v48  ;;  %v1970_v41 = vld [vmem:[#allocation7 + $0x340] sm:$0xff] }
 0x2c9   : > { %3014 = vmatpush.msra.mxu0 %v2015_v3  ;;  %3339 = vmatpush.msra.mxu2 %v3204_v5  ;;  %v3119_v40 = vld [vmem:[#allocation7 + $0x10e0] sm:$0xff]  ;;  %v2432_v3 = vadd.f32 %v12862_v17, %v12865_v37  ;;  %v1949_v5 = vld [vmem:[#allocation7 + $0x298] sm:$0xff]  ;;  %v1960_v17 = vld [vmem:[#allocation7 + $0x2f0] sm:$0xff] }
 0x2ca   : > { %2949 = vmatpush.msra.mxu1 %v1994_v45  ;;  %2976 = vmatpush.msra.mxu3 %v2054_v4  ;;  %v2615_v35 = vpop.f32.mrf.mxu3  ;;  %v3159_v48 = vld [vmem:[#allocation7 + $0x1220] sm:$0xff]  ;;  %v1965_v4 = vld [vmem:[#allocation7 + $0x318] sm:$0xff]  ;;  %v2100_v37 = vld [vmem:[#allocation7 + $0x750] sm:$0xff] }
 0x2cb   : > { %3015 = vmatpush.msra.mxu0 %v2010_v15  ;;  %3340 = vmatpush.msra.mxu2 %v3199_v28  ;;  %v12898_v25 = vpop.f32.mrf.mxu2  ;;  %v2105_v28 = vld [vmem:[#allocation7 + $0x778] sm:$0xff] }
 0x2cc   : > { %2950 = vmatpush.msra.mxu1 %v1989_v22  ;;  %2977 = vmatpush.msra.mxu3 %v2049_v8  ;;  %v3114_v22 = vld [vmem:[#allocation7 + $0x10b8] sm:$0xff]  ;;  %v12907_v8 = vpop.f32.mrf.mxu0 }
 0x2cd   : > { %2939 = vmatmul.f32.gmra.mxu0 %v12782_v46  ;;  %3008 = vmatmul.f32.gmra.mxu2 %v12782_v46 }
 0x2ce   : > { %3016 = vmatpush.msra.mxu0 %v2005_v63  ;;  %3341 = vmatpush.msra.mxu2 %v3194_v44  ;;  %v2592_v29 = vpop.f32.mrf.mxu1  ;;  %v3109_v63 = vld [vmem:[#allocation7 + $0x1090] sm:$0xff] }
 0x2cf   : > { %2951 = vmatpush.msra.mxu1 %v1984_v61  ;;  %2978 = vmatpush.msra.mxu3 %v2044_v19  ;;  %v2616_v26 = vadd.f32 %v2615_v35, %v2592_v29  ;;  %v3149_v44 = vld [vmem:[#allocation7 + $0x11d0] sm:$0xff]  ;;  %v1955_v61 = vld [vmem:[#allocation7 + $0x2c8] sm:$0xff]  ;;  %v2090_v29 = vld [vmem:[#allocation7 + $0x700] sm:$0xff] }
 0x2d0   : > { %3017 = vmatpush.msra.mxu0 %v2000_v50  ;;  %3342 = vmatpush.msra.mxu2 %v3189_v27  ;;  %v2095_v19 = vld [vmem:[#allocation7 + $0x728] sm:$0xff]  ;;  %v3295_v35 = vld [vmem:[#allocation7 + $0x1660] sm:$0xff] }
 0x2d1   : > { %2952 = vmatpush.msra.mxu1 %v1979_v60  ;;  %2979 = vmatpush.msra.mxu3 %v2039_v51  ;;  %v12900_v24 = vadd.f32 %v2638_v18, %v2616_v26  ;;  %v3154_v18 = vld [vmem:[#allocation7 + $0x11f8] sm:$0xff]  ;;  %v3104_v50 = vld [vmem:[#allocation7 + $0x1068] sm:$0xff]  ;;  %v1950_v60 = vld [vmem:[#allocation7 + $0x2a0] sm:$0xff]  ;;  %v12912_v51 = vrot.slane %v12811_v0, 2 }
 0x2d2   : > { %3018 = vmatpush.msra.mxu0 %v1995_v16  ;;  %3343 = vmatpush.msra.mxu2 %v3184_v7  ;;  %v3144_v27 = vld [vmem:[#allocation7 + $0x11a8] sm:$0xff]  ;;  %v3099_v16 = vld [vmem:[#allocation7 + $0x1040] sm:$0xff]  ;;  %v2085_v26 = vld [vmem:[#allocation7 + $0x6d8] sm:$0xff] }
 0x2d3   : > { %2953 = vmatpush.msra.mxu1 %v1974_v11  ;;  %2980 = vmatpush.msra.mxu3 %v2034_v62  ;;  %v3139_v7 = vld [vmem:[#allocation7 + $0x1180] sm:$0xff]  ;;  %v3302_v11 = vrot.slane %v12799_v9, 2  ;;  %v3294_v62 = vld [vmem:[#allocation7 + $0x1658] sm:$0xff] }
 0x2d4   : > { %3019 = vmatpush.msra.mxu0 %v1990_v1  ;;  %3344 = vmatpush.msra.mxu2 %v3179_v30  ;;  %v2661_v1 = vpop.f32.mrf.mxu0 }
 0x2d5   : > { %2954 = vmatpush.msra.mxu1 %v1969_v2  ;;  %2981 = vmatpush.msra.mxu3 %v2029_v6  ;;  %v12918_v30 = vsel %vm976_vm3, %v3302_v11, %v12912_v51  ;;  %v3094_v2 = vld [vmem:[#allocation7 + $0x1018] sm:$0xff]  ;;  %v3289_v6 = vld [vmem:[#allocation7 + $0x1630] sm:$0xff] }
 0x2d6   : > { %2982 = vmatmul.f32.vlgmr.msra.gmra.mxu3 %v12794_v55  ;;  %3020 = vmatpush.msra.mxu0 %v1985_v20  ;;  %v3290_v20 = vld [vmem:[#allocation7 + $0x1638] sm:$0xff] }
 0x2d7   : > { %3314 = vmatpush.msrb.mxu3 %v3134_v13  ;;  %3345 = vmatpush.msra.mxu2 %v3174_v33  ;;  %v12921_v13 = vpop.f32.mrf.mxu1  ;;  %v2080_v33 = vld [vmem:[#allocation7 + $0x6b0] sm:$0xff] }
 0x2d8   : > { %2955 = vmatpush.msra.mxu1 %v1964_v39  ;;  %3021 = vmatpush.msra.mxu0 %v1980_v53  ;;  %v3089_v39 = vld [vmem:[#allocation7 + $0xff0] sm:$0xff] }
 0x2d9   : > { %3315 = vmatpush.msrb.mxu3 %v3129_v12  ;;  %3346 = vmatpush.msra.mxu2 %v3169_v31  ;;  %v3285_v53 = vld [vmem:[#allocation7 + $0x1610] sm:$0xff]  ;;  %v2075_v12 = vld [vmem:[#allocation7 + $0x688] sm:$0xff] }
 0x2da   : > { %2956 = vmatpush.msra.mxu1 %v1959_v34  ;;  %3022 = vmatpush.msra.mxu0 %v1975_v49  ;;  %v3084_v31 = vld [vmem:[#allocation7 + $0xfc8] sm:$0xff]  ;;  %v3279_v34 = vld [vmem:[#allocation7 + $0x15e0] sm:$0xff] }
 0x2db   : > { %3316 = vmatpush.msrb.mxu3 %v3124_v47  ;;  %3347 = vmatpush.msra.mxu2 %v3164_v59  ;;  %v2730_v45 = vpop.f32.mrf.mxu2  ;;  %v3280_v49 = vld [vmem:[#allocation7 + $0x15e8] sm:$0xff]  ;;  %v2070_v47 = vld [vmem:[#allocation7 + $0x660] sm:$0xff] }
 0x2dc   : > { %2957 = vmatpush.msra.mxu1 %v1954_v57  ;;  %3023 = vmatpush.msra.mxu0 %v1970_v41  ;;  %v12905_v15 = vadd.f32 %v2730_v45, %v2432_v3  ;;  %v3079_v59 = vld [vmem:[#allocation7 + $0xfa0] sm:$0xff]  ;;  %v3274_v57 = vld [vmem:[#allocation7 + $0x15b8] sm:$0xff]  ;;  %v3269_v45 = vld [vmem:[#allocation7 + $0x1590] sm:$0xff] }
 0x2dd   : > { %3317 = vmatpush.msrb.mxu3 %v3119_v40  ;;  %3348 = vmatpush.msra.mxu2 %v3159_v48  ;;  %v3275_v41 = vld [vmem:[#allocation7 + $0x15c0] sm:$0xff]  ;;  %v2065_v48 = vld [vmem:[#allocation7 + $0x638] sm:$0xff] }
 0x2de   : > { %2958 = vmatpush.msra.mxu1 %v1949_v5  ;;  %2985 = vmatmul.f32.gmra.mxu3 %v12801_v42  ;;  %v12924_v40 = vpop.f32.mrf.mxu0  ;;  %v3074_v3 = vld [vmem:[#allocation7 + $0xf78] sm:$0xff] }
 0x2df   : > { %2959 = vmatmul.f32.vlgmr.msra.gmra.mxu1 %v12799_v9  ;;  %3024 = vmatpush.msra.mxu0 %v1965_v4  ;;  %v3270_v4 = vld [vmem:[#allocation7 + $0x1598] sm:$0xff] }
 0x2e0   : > { %3035 = vmatpush.msrb.mxu1 %v2105_v28  ;;  %3318 = vmatpush.msrb.mxu3 %v3114_v22  ;;  %v2060_v22 = vld [vmem:[#allocation7 + $0x610] sm:$0xff] }
 0x2e1   : > { %3349 = vmatpush.msra.mxu2 %v3154_v18  ;;  %3025 = vmatpush.msra.mxu0 %v1960_v17  ;;  %v3069_v18 = vld [vmem:[#allocation7 + $0xf50] sm:$0xff]  ;;  %v3264_v17 = vld [vmem:[#allocation7 + $0x1568] sm:$0xff] }
 0x2e2   : > { %3036 = vmatpush.msrb.mxu1 %v2100_v37  ;;  %3319 = vmatpush.msrb.mxu3 %v3109_v63  ;;  %v3265_v37 = vld [vmem:[#allocation7 + $0x1570] sm:$0xff]  ;;  %v2055_v63 = vld [vmem:[#allocation7 + $0x5e8] sm:$0xff] }
 0x2e3   : > { %3350 = vmatpush.msra.mxu2 %v3149_v44  ;;  %3026 = vmatpush.msra.mxu0 %v1955_v61  ;;  %v3064_v44 = vld [vmem:[#allocation7 + $0xf28] sm:$0xff]  ;;  %v3259_v61 = vld [vmem:[#allocation7 + $0x1540] sm:$0xff] }
 0x2e4   : > { %3037 = vmatpush.msrb.mxu1 %v2095_v19  ;;  %3320 = vmatpush.msrb.mxu3 %v3104_v50  ;;  %v3260_v19 = vld [vmem:[#allocation7 + $0x1548] sm:$0xff]  ;;  %v2050_v50 = vld [vmem:[#allocation7 + $0x5c0] sm:$0xff] }
 0x2e5   : > { %3351 = vmatpush.msra.mxu2 %v3144_v27  ;;  %3027 = vmatpush.msra.mxu0 %v1950_v60  ;;  %v3059_v27 = vld [vmem:[#allocation7 + $0xf00] sm:$0xff]  ;;  %v12933_v60 = vpop.f32.mrf.mxu3 }
 0x2e6   : > { %3038 = vmatpush.msrb.mxu1 %v2090_v29  ;;  %3321 = vmatpush.msrb.mxu3 %v3099_v16  ;;  %v3299_v29 = vrot.slane %v12780_v32, 2  ;;  %v3254_v16 = vld [vmem:[#allocation7 + $0x1518] sm:$0xff] }
 0x2e7   : > { %3352 = vmatpush.msra.mxu2 %v3139_v7  ;;  %3028 = vmatmul.f32.vlgmr.msra.gmra.mxu0 %v12799_v9  ;;  %v3284_v9 = vld [vmem:[#allocation7 + $0x1608] sm:$0xff]  ;;  %v3215_v7 = vld [vmem:[#allocation7 + $0x13e0] sm:$0xff]  ;;  %v3210_v32 = vld [vmem:[#allocation7 + $0x13b8] sm:$0xff] }
 0x2e8   : > { %3353 = vmatmul.f32.vlgmr.msra.gmra.mxu2 %v12918_v30  ;;  %3360 = vmatpush.msrb.mxu0 %v3294_v62 }
 0x2e9   : > { %3429 = vmatpush.msrb.mxu2 %v3295_v35  ;;  %2962 = vmatmul.f32.gmra.mxu1 %v12811_v0  ;;  %v2045_v35 = vld [vmem:[#allocation7 + $0x598] sm:$0xff] }
 0x2ea   : > { %3039 = vmatpush.msrb.mxu1 %v2085_v26  ;;  %3322 = vmatpush.msrb.mxu3 %v3094_v2  ;;  %v3250_v2 = vld [vmem:[#allocation7 + $0x14f8] sm:$0xff] }
 0x2eb   : > { %3361 = vmatpush.msrb.mxu0 %v3289_v6  ;;  %3430 = vmatpush.msrb.mxu2 %v3290_v20  ;;  %v2040_v6 = vld [vmem:[#allocation7 + $0x570] sm:$0xff]  ;;  %v3244_v20 = vld [vmem:[#allocation7 + $0x14c8] sm:$0xff] }
 0x2ec   : > { %3040 = vmatpush.msrb.mxu1 %v2080_v33  ;;  %3323 = vmatpush.msrb.mxu3 %v3089_v39  ;;  %v3205_v33 = vld [vmem:[#allocation7 + $0x1390] sm:$0xff] }
 0x2ed   : > { %3362 = vmatpush.msrb.mxu0 %v3284_v9  ;;  %3431 = vmatpush.msrb.mxu2 %v3285_v53  ;;  %v3245_v39 = vld [vmem:[#allocation7 + $0x14d0] sm:$0xff]  ;;  %v2035_v9 = vld [vmem:[#allocation7 + $0x548] sm:$0xff]  ;;  %v3239_v53 = vld [vmem:[#allocation7 + $0x14a0] sm:$0xff] }
 0x2ee   : > { %3041 = vmatpush.msrb.mxu1 %v2075_v12  ;;  %3324 = vmatpush.msrb.mxu3 %v3084_v31  ;;  %v3240_v12 = vld [vmem:[#allocation7 + $0x14a8] sm:$0xff]  ;;  %v12944_v31 = vpop.f32.mrf.mxu3 }
 0x2ef   : > { %3363 = vmatpush.msrb.mxu0 %v3279_v34  ;;  %3432 = vmatpush.msrb.mxu2 %v3280_v49  ;;  %v2030_v34 = vld [vmem:[#allocation7 + $0x520] sm:$0xff]  ;;  %v3234_v49 = vld [vmem:[#allocation7 + $0x1478] sm:$0xff] }
 0x2f0   : > { %3042 = vmatpush.msrb.mxu1 %v2070_v47  ;;  %3325 = vmatpush.msrb.mxu3 %v3079_v59  ;;  %v2684_v5 = vpop.f32.mrf.mxu1  ;;  %v3135_v47 = vld [vmem:[#allocation7 + $0x1160] sm:$0xff] }
 0x2f1   : > { %3031 = vmatmul.f32.gmra.mxu0 %v12811_v0  ;;  %3356 = vmatmul.f32.gmra.mxu2 %v12912_v51  ;;  %v12928_v28 = vadd.f32 %v2684_v5, %v2661_v1  ;;  %v12931_v0 = vrot.slane %v12782_v46, 2  ;;  %v3255_v46 = vld [vmem:[#allocation7 + $0x1520] sm:$0xff]  ;;  %v3249_v1 = vld [vmem:[#allocation7 + $0x14f0] sm:$0xff]  ;;  %v3230_v5 = vld [vmem:[#allocation7 + $0x1458] sm:$0xff] }
 0x2f2   : > { %3364 = vmatpush.msrb.mxu0 %v3274_v57  ;;  %3433 = vmatpush.msrb.mxu2 %v3275_v41  ;;  %v3195_v59 = vld [vmem:[#allocation7 + $0x1340] sm:$0xff]  ;;  %v3229_v41 = vld [vmem:[#allocation7 + $0x1450] sm:$0xff] }
 0x2f3   : > { %3043 = vmatpush.msrb.mxu1 %v2065_v48  ;;  %3326 = vmatpush.msrb.mxu3 %v3074_v3  ;;  %v12938_v62 = vsel %vm976_vm3, %v3299_v29, %v12931_v0  ;;  %v3235_v57 = vld [vmem:[#allocation7 + $0x1480] sm:$0xff]  ;;  %v3130_v48 = vld [vmem:[#allocation7 + $0x1138] sm:$0xff] }
 0x2f4   : > { %3365 = vmatpush.msrb.mxu0 %v3269_v45  ;;  %3434 = vmatpush.msrb.mxu2 %v3270_v4  ;;  %v3190_v3 = vld [vmem:[#allocation7 + $0x1318] sm:$0xff]  ;;  %v3224_v45 = vld [vmem:[#allocation7 + $0x1428] sm:$0xff]  ;;  %v3125_v4 = vld [vmem:[#allocation7 + $0x1110] sm:$0xff] }
 0x2f5   : > { %3044 = vmatpush.msrb.mxu1 %v2060_v22  ;;  %3327 = vmatpush.msrb.mxu3 %v3069_v18  ;;  %v3185_v22 = vld [vmem:[#allocation7 + $0x12f0] sm:$0xff]  ;;  %v12949_v18 = vrot.slane %v12801_v42, 2 }
 0x2f6   : > { %3366 = vmatpush.msrb.mxu0 %v3264_v17  ;;  %3435 = vmatpush.msrb.mxu2 %v3265_v37  ;;  %v3225_v17 = vld [vmem:[#allocation7 + $0x1430] sm:$0xff]  ;;  %v3219_v37 = vld [vmem:[#allocation7 + $0x1400] sm:$0xff] }
 0x2f7   : > { %3045 = vmatpush.msrb.mxu1 %v2055_v63  ;;  %3328 = vmatpush.msrb.mxu3 %v3064_v44  ;;  %v3305_v63 = vrot.slane %v12794_v55, 2  ;;  %v3120_v44 = vld [vmem:[#allocation7 + $0x10e8] sm:$0xff] }
 0x2f8   : > { %3367 = vmatpush.msrb.mxu0 %v3259_v61  ;;  %3436 = vmatpush.msrb.mxu2 %v3260_v19  ;;  %v2753_v11 = vpop.f32.mrf.mxu0  ;;  %v3180_v61 = vld [vmem:[#allocation7 + $0x12c8] sm:$0xff] }
 0x2f9   : > { %3046 = vmatpush.msrb.mxu1 %v2050_v50  ;;  %3329 = vmatpush.msrb.mxu3 %v3059_v27  ;;  %v12941_v26 = vadd.f32 %v2753_v11, %v12905_v15  ;;  %v3200_v15 = vld [vmem:[#allocation7 + $0x1368] sm:$0xff]  ;;  %v12952_v50 = vpop.f32.mrf.mxu3  ;;  %v12956_v29 = vsel %vm976_vm3, %v3305_v63, %v12949_v18  ;;  %v3107_v63 = vld [vmem:[#allocation7 + $0x1080] sm:$0xff] }
 0x2fa   : > { %3330 = vmatmul.f32.vlgmr.msrb.gmra.mxu3 %v12938_v62  ;;  %3368 = vmatpush.msrb.mxu0 %v3254_v16  ;;  %v3220_v19 = vld [vmem:[#allocation7 + $0x1408] sm:$0xff]  ;;  %v3137_v16 = vld [vmem:[#allocation7 + $0x1170] sm:$0xff]  ;;  %v12962_v11 = vpop.f32.mrf.mxu1 }
 0x2fb   : > { %3406 = vmatpush.msra.mxu3 %v3215_v7  ;;  %3437 = vmatpush.msrb.mxu2 %v3255_v46  ;;  %v3136_v27 = vld [vmem:[#allocation7 + $0x1168] sm:$0xff]  ;;  %v3115_v7 = vld [vmem:[#allocation7 + $0x10c0] sm:$0xff] }
 0x2fc   : > { %3047 = vmatpush.msrb.mxu1 %v2045_v35  ;;  %3369 = vmatpush.msrb.mxu0 %v3249_v1  ;;  %v3175_v46 = vld [vmem:[#allocation7 + $0x12a0] sm:$0xff]  ;;  %v3132_v1 = vld [vmem:[#allocation7 + $0x1148] sm:$0xff] }
 0x2fd   : > { %3407 = vmatpush.msra.mxu3 %v3210_v32  ;;  %3438 = vmatpush.msrb.mxu2 %v3250_v2  ;;  %v3131_v35 = vld [vmem:[#allocation7 + $0x1140] sm:$0xff]  ;;  %v3110_v32 = vld [vmem:[#allocation7 + $0x1098] sm:$0xff] }
 0x2fe   : > { %3048 = vmatpush.msrb.mxu1 %v2040_v6  ;;  %3370 = vmatpush.msrb.mxu0 %v3244_v20  ;;  %v3170_v2 = vld [vmem:[#allocation7 + $0x1278] sm:$0xff]  ;;  %v3127_v20 = vld [vmem:[#allocation7 + $0x1120] sm:$0xff] }
 0x2ff   : > { %3408 = vmatpush.msra.mxu3 %v3205_v33  ;;  %3439 = vmatpush.msrb.mxu2 %v3245_v39  ;;  %v3126_v6 = vld [vmem:[#allocation7 + $0x1118] sm:$0xff]  ;;  %v3105_v33 = vld [vmem:[#allocation7 + $0x1070] sm:$0xff] }
 0x300   : > { %3049 = vmatpush.msrb.mxu1 %v2035_v9  ;;  %3371 = vmatpush.msrb.mxu0 %v3239_v53  ;;  %v3165_v39 = vld [vmem:[#allocation7 + $0x1250] sm:$0xff]  ;;  %v3122_v53 = vld [vmem:[#allocation7 + $0x10f8] sm:$0xff] }
 0x301   : > { %3409 = vmatpush.msra.mxu3 %v3200_v15  ;;  %3440 = vmatpush.msrb.mxu2 %v3240_v12  ;;  %v3121_v9 = vld [vmem:[#allocation7 + $0x10f0] sm:$0xff]  ;;  %v3100_v15 = vld [vmem:[#allocation7 + $0x1048] sm:$0xff] }
 0x302   : > { %3050 = vmatpush.msrb.mxu1 %v2030_v34  ;;  %3333 = vmatmul.f32.gmra.mxu3 %v12931_v0  ;;  %v3160_v12 = vld [vmem:[#allocation7 + $0x1228] sm:$0xff] }
 0x303   : > { %3051 = vmatmul.f32.vlgmr.msrb.gmra.mxu1 %v12794_v55  ;;  %3372 = vmatpush.msrb.mxu0 %v3234_v49  ;;  %v12958_v55 = vpop.f32.mrf.mxu2 }
 0x304   : > { %3383 = vmatpush.msra.mxu1 %v3135_v47  ;;  %3410 = vmatpush.msra.mxu3 %v3195_v59  ;;  %v3116_v47 = vld [vmem:[#allocation7 + $0x10c8] sm:$0xff]  ;;  %v3117_v59 = vld [vmem:[#allocation7 + $0x10d0] sm:$0xff] }
 0x305   : > { %3441 = vmatpush.msrb.mxu2 %v3235_v57  ;;  %3373 = vmatpush.msrb.mxu0 %v3229_v41  ;;  %v12966_v57 = vpop.f32.mrf.mxu0  ;;  %v3095_v41 = vld [vmem:[#allocation7 + $0x1020] sm:$0xff] }
 0x306   : > { %3384 = vmatpush.msra.mxu1 %v3130_v48  ;;  %3411 = vmatpush.msra.mxu3 %v3190_v3  ;;  %v3155_v48 = vld [vmem:[#allocation7 + $0x1200] sm:$0xff] }
 0x307   : > { %3442 = vmatpush.msrb.mxu2 %v3230_v5  ;;  %3374 = vmatpush.msrb.mxu0 %v3224_v45  ;;  %v3111_v45 = vld [vmem:[#allocation7 + $0x10a0] sm:$0xff] }
 0x308   : > { %3385 = vmatpush.msra.mxu1 %v3125_v4  ;;  %3412 = vmatpush.msra.mxu3 %v3185_v22  ;;  %v3112_v4 = vld [vmem:[#allocation7 + $0x10a8] sm:$0xff]  ;;  %v3090_v22 = vld [vmem:[#allocation7 + $0xff8] sm:$0xff] }
 0x309   : > { %3443 = vmatpush.msrb.mxu2 %v3225_v17  ;;  %3375 = vmatpush.msrb.mxu0 %v3219_v37  ;;  %v3150_v17 = vld [vmem:[#allocation7 + $0x11d8] sm:$0xff] }
 0x30a   : > { %3386 = vmatpush.msra.mxu1 %v3120_v44  ;;  %3413 = vmatpush.msra.mxu3 %v3180_v61  ;;  %v3106_v37 = vld [vmem:[#allocation7 + $0x1078] sm:$0xff]  ;;  %v3085_v44 = vld [vmem:[#allocation7 + $0xfd0] sm:$0xff] }
 0x30b   : > { %3444 = vmatpush.msrb.mxu2 %v3220_v19  ;;  %3376 = vmatmul.f32.vlgmr.msrb.gmra.mxu0 %v12956_v29  ;;  %v2822_v49 = vpop.f32.mrf.mxu2  ;;  %v3145_v61 = vld [vmem:[#allocation7 + $0x11b0] sm:$0xff] }
 0x30c   : > { %3445 = vmatmul.f32.vlgmr.msrb.gmra.mxu2 %v12956_v29  ;;  %3452 = vmatpush.msra.mxu0 %v3136_v27  ;;  %v3101_v19 = vld [vmem:[#allocation7 + $0x1050] sm:$0xff]  ;;  %v3102_v27 = vld [vmem:[#allocation7 + $0x1058] sm:$0xff] }
 0x30d   : > { %3521 = vmatpush.msra.mxu2 %v3137_v16  ;;  %3054 = vmatmul.f32.gmra.mxu1 %v12801_v42  ;;  %v3140_v16 = vld [vmem:[#allocation7 + $0x1188] sm:$0xff] }
 0x30e   : > { %3387 = vmatpush.msra.mxu1 %v3115_v7  ;;  %3414 = vmatpush.msra.mxu3 %v3175_v46  ;;  %v3096_v7 = vld [vmem:[#allocation7 + $0x1028] sm:$0xff] }
 0x30f   : > { %3453 = vmatpush.msra.mxu0 %v3131_v35  ;;  %3522 = vmatpush.msra.mxu2 %v3132_v1  ;;  %v3296_v46 = vld [vmem:[#allocation7 + $0x1668] sm:$0xff]  ;;  %v3097_v35 = vld [vmem:[#allocation7 + $0x1030] sm:$0xff] }
 0x310   : > { %3388 = vmatpush.msra.mxu1 %v3110_v32  ;;  %3415 = vmatpush.msra.mxu3 %v3170_v2  ;;  %v3075_v32 = vld [vmem:[#allocation7 + $0xf80] sm:$0xff] }
 0x311   : > { %3454 = vmatpush.msra.mxu0 %v3126_v6  ;;  %3523 = vmatpush.msra.mxu2 %v3127_v20  ;;  %v2799_v34 = vpop.f32.mrf.mxu3  ;;  %v3091_v2 = vld [vmem:[#allocation7 + $0x1000] sm:$0xff] }
 0x312   : > { %3389 = vmatpush.msra.mxu1 %v3105_v33  ;;  %3416 = vmatpush.msra.mxu3 %v3165_v39  ;;  %v2800_v42 = vadd.f32 %v2799_v34, %v12881_v36  ;;  %v3291_v20 = vld [vmem:[#allocation7 + $0x1640] sm:$0xff]  ;;  %v3092_v33 = vld [vmem:[#allocation7 + $0x1008] sm:$0xff]  ;;  %v3070_v39 = vld [vmem:[#allocation7 + $0xf58] sm:$0xff] }
 0x313   : > { %3455 = vmatpush.msra.mxu0 %v3121_v9  ;;  %3524 = vmatpush.msra.mxu2 %v3122_v53  ;;  %v3086_v9 = vld [vmem:[#allocation7 + $0xfd8] sm:$0xff]  ;;  %v3081_v34 = vld [vmem:[#allocation7 + $0xfb0] sm:$0xff] }
 0x314   : > { %3390 = vmatpush.msra.mxu1 %v3100_v15  ;;  %3417 = vmatpush.msra.mxu3 %v3160_v12  ;;  %v2776_v3 = vpop.f32.mrf.mxu1  ;;  %v2823_v5 = vadd.f32 %v2822_v49, %v2800_v42  ;;  %v3286_v53 = vld [vmem:[#allocation7 + $0x1618] sm:$0xff]  ;;  %v3087_v15 = vld [vmem:[#allocation7 + $0xfe0] sm:$0xff]  ;;  %v3065_v12 = vld [vmem:[#allocation7 + $0xf30] sm:$0xff] }
 0x315   : > { %3379 = vmatmul.f32.gmra.mxu0 %v12949_v18  ;;  %3448 = vmatmul.f32.gmra.mxu2 %v12949_v18  ;;  %v12971_v36 = vadd.f32 %v2776_v3, %v12941_v26  ;;  %v3080_v26 = vld [vmem:[#allocation7 + $0xfa8] sm:$0xff]  ;;  %v3281_v42 = vld [vmem:[#allocation7 + $0x15f0] sm:$0xff]  ;;  %v3082_v49 = vld [vmem:[#allocation7 + $0xfb8] sm:$0xff] }
 0x316   : > { %3456 = vmatpush.msra.mxu0 %v3116_v47  ;;  %3525 = vmatpush.msra.mxu2 %v3117_v59  ;;  %v3060_v47 = vld [vmem:[#allocation7 + $0xf08] sm:$0xff]  ;;  %v3077_v3 = vld [vmem:[#allocation7 + $0xf90] sm:$0xff] }
 0x317   : > { %3391 = vmatpush.msra.mxu1 %v3095_v41  ;;  %3418 = vmatpush.msra.mxu3 %v3155_v48  ;;  %v3076_v59 = vld [vmem:[#allocation7 + $0xf88] sm:$0xff] }
 0x318   : > { %3457 = vmatpush.msra.mxu0 %v3111_v45  ;;  %3526 = vmatpush.msra.mxu2 %v3112_v4  ;;  %v3216_v41 = vld [vmem:[#allocation7 + $0x13e8] sm:$0xff]  ;;  %v3211_v45 = vld [vmem:[#allocation7 + $0x13c0] sm:$0xff] }
 0x319   : > { %3392 = vmatpush.msra.mxu1 %v3090_v22  ;;  %3419 = vmatpush.msra.mxu3 %v3150_v17  ;;  %v3276_v48 = vld [vmem:[#allocation7 + $0x15c8] sm:$0xff]  ;;  %v3271_v4 = vld [vmem:[#allocation7 + $0x15a0] sm:$0xff]  ;;  %v3066_v17 = vld [vmem:[#allocation7 + $0xf38] sm:$0xff] }
 0x31a   : > { %3458 = vmatpush.msra.mxu0 %v3106_v37  ;;  %3527 = vmatpush.msra.mxu2 %v3107_v63  ;;  %v3072_v22 = vld [vmem:[#allocation7 + $0xf68] sm:$0xff]  ;;  %v3206_v37 = vld [vmem:[#allocation7 + $0x1398] sm:$0xff] }
 0x31b   : > { %3393 = vmatpush.msra.mxu1 %v3085_v44  ;;  %3420 = vmatpush.msra.mxu3 %v3145_v61  ;;  %v3266_v63 = vld [vmem:[#allocation7 + $0x1578] sm:$0xff]  ;;  %v3067_v44 = vld [vmem:[#allocation7 + $0xf40] sm:$0xff]  ;;  %v3061_v61 = vld [vmem:[#allocation7 + $0xf10] sm:$0xff] }
 0x31c   : > { %3459 = vmatpush.msra.mxu0 %v3101_v19  ;;  %3528 = vmatpush.msra.mxu2 %v3102_v27  ;;  %v2845_v1 = vpop.f32.mrf.mxu0  ;;  %v3201_v19 = vld [vmem:[#allocation7 + $0x1370] sm:$0xff] }
 0x31d   : > { %3394 = vmatpush.msra.mxu1 %v3080_v26  ;;  %3421 = vmatpush.msra.mxu3 %v3140_v16  ;;  %v12973_v6 = vadd.f32 %v2845_v1, %v2823_v5  ;;  %v3071_v5 = vld [vmem:[#allocation7 + $0xf60] sm:$0xff]  ;;  %v3261_v27 = vld [vmem:[#allocation7 + $0x1550] sm:$0xff]  ;;  %v3062_v26 = vld [vmem:[#allocation7 + $0xf18] sm:$0xff]  ;;  %v12978_v16 = vpop.f32.mrf.mxu2 }
 0x31e   : > { %3422 = vmatmul.f32.vlgmr.msra.gmra.mxu3 %v12918_v30  ;;  %3460 = vmatpush.msra.mxu0 %v3096_v7  ;;  %v3217_v7 = vld [vmem:[#allocation7 + $0x13f0] sm:$0xff]  ;;  %v3256_v1 = vld [vmem:[#allocation7 + $0x1528] sm:$0xff] }
 0x31f   : > { %3498 = vmatpush.msrb.mxu3 %v3296_v46  ;;  %3529 = vmatpush.msra.mxu2 %v3097_v35  ;;  %v3218_v46 = vld [vmem:[#allocation7 + $0x13f8] sm:$0xff]  ;;  %v3196_v35 = vld [vmem:[#allocation7 + $0x1348] sm:$0xff] }
 0x320   : > { %3395 = vmatpush.msra.mxu1 %v3075_v32  ;;  %3461 = vmatpush.msra.mxu0 %v3091_v2  ;;  %v12982_v32 = vpop.f32.mrf.mxu1  ;;  %v3212_v2 = vld [vmem:[#allocation7 + $0x13c8] sm:$0xff] }
 0x321   : > { %3499 = vmatpush.msrb.mxu3 %v3291_v20  ;;  %3530 = vmatpush.msra.mxu2 %v3092_v33  ;;  %v3213_v20 = vld [vmem:[#allocation7 + $0x13d0] sm:$0xff]  ;;  %v3191_v33 = vld [vmem:[#allocation7 + $0x1320] sm:$0xff] }
 0x322   : > { %3396 = vmatpush.msra.mxu1 %v3070_v39  ;;  %3462 = vmatpush.msra.mxu0 %v3086_v9  ;;  %v3251_v39 = vld [vmem:[#allocation7 + $0x1500] sm:$0xff] }
 0x323   : > { %3500 = vmatpush.msrb.mxu3 %v3286_v53  ;;  %3531 = vmatpush.msra.mxu2 %v3087_v15  ;;  %v3207_v9 = vld [vmem:[#allocation7 + $0x13a0] sm:$0xff]  ;;  %v3208_v53 = vld [vmem:[#allocation7 + $0x13a8] sm:$0xff]  ;;  %v3186_v15 = vld [vmem:[#allocation7 + $0x12f8] sm:$0xff] }
 0x324   : > { %3397 = vmatpush.msra.mxu1 %v3065_v12  ;;  %3463 = vmatpush.msra.mxu0 %v3081_v34  ;;  %v3246_v12 = vld [vmem:[#allocation7 + $0x14d8] sm:$0xff] }
 0x325   : > { %3501 = vmatpush.msrb.mxu3 %v3281_v42  ;;  %3532 = vmatpush.msra.mxu2 %v3082_v49  ;;  %v3202_v34 = vld [vmem:[#allocation7 + $0x1378] sm:$0xff]  ;;  %v3203_v42 = vld [vmem:[#allocation7 + $0x1380] sm:$0xff]  ;;  %v12985_v49 = vpop.f32.mrf.mxu2 }
 0x326   : > { %3398 = vmatpush.msra.mxu1 %v3060_v47  ;;  %3425 = vmatmul.f32.gmra.mxu3 %v12912_v51  ;;  %v3181_v47 = vld [vmem:[#allocation7 + $0x12d0] sm:$0xff] }
 0x327   : > { %3399 = vmatmul.f32.vlgmr.msra.gmra.mxu1 %v12938_v62  ;;  %3464 = vmatpush.msra.mxu0 %v3076_v59  ;;  %v3241_v59 = vld [vmem:[#allocation7 + $0x14b0] sm:$0xff] }
 0x328   : > { %3475 = vmatpush.msrb.mxu1 %v3216_v41  ;;  %3502 = vmatpush.msrb.mxu3 %v3276_v48  ;;  %v3197_v41 = vld [vmem:[#allocation7 + $0x1350] sm:$0xff]  ;;  %v3198_v48 = vld [vmem:[#allocation7 + $0x1358] sm:$0xff] }
 0x329   : > { %3533 = vmatpush.msra.mxu2 %v3077_v3  ;;  %3465 = vmatpush.msra.mxu0 %v3071_v5  ;;  %v12987_v3 = vpop.f32.mrf.mxu0  ;;  %v3176_v5 = vld [vmem:[#allocation7 + $0x12a8] sm:$0xff] }
 0x32a   : > { %3476 = vmatpush.msrb.mxu1 %v3211_v45  ;;  %3503 = vmatpush.msrb.mxu3 %v3271_v4  ;;  %v3236_v45 = vld [vmem:[#allocation7 + $0x1488] sm:$0xff] }
 0x32b   : > { %3534 = vmatpush.msra.mxu2 %v3072_v22  ;;  %3466 = vmatpush.msra.mxu0 %v3066_v17  ;;  %v3192_v22 = vld [vmem:[#allocation7 + $0x1328] sm:$0xff]  ;;  %v3193_v17 = vld [vmem:[#allocation7 + $0x1330] sm:$0xff] }
 0x32c   : > { %3477 = vmatpush.msrb.mxu1 %v3206_v37  ;;  %3504 = vmatpush.msrb.mxu3 %v3266_v63  ;;  %v3171_v63 = vld [vmem:[#allocation7 + $0x1280] sm:$0xff] }
 0x32d   : > { %3535 = vmatpush.msra.mxu2 %v3067_v44  ;;  %3467 = vmatpush.msra.mxu0 %v3061_v61  ;;  %v3231_v44 = vld [vmem:[#allocation7 + $0x1460] sm:$0xff] }
 0x32e   : > { %3478 = vmatpush.msrb.mxu1 %v3201_v19  ;;  %3505 = vmatpush.msrb.mxu3 %v3261_v27  ;;  %v3187_v61 = vld [vmem:[#allocation7 + $0x1300] sm:$0xff]  ;;  %v3188_v19 = vld [vmem:[#allocation7 + $0x1308] sm:$0xff]  ;;  %v3166_v27 = vld [vmem:[#allocation7 + $0x1258] sm:$0xff] }
 0x32f   : > { %3536 = vmatpush.msra.mxu2 %v3062_v26  ;;  %3468 = vmatmul.f32.vlgmr.msra.gmra.mxu0 %v12938_v62  ;;  %v3226_v26 = vld [vmem:[#allocation7 + $0x1438] sm:$0xff] }
 0x330   : > { %3537 = vmatmul.f32.vlgmr.msra.gmra.mxu2 %v12938_v62  ;;  %3544 = vmatpush.msrb.mxu0 %v3217_v7  ;;  %v3182_v7 = vld [vmem:[#allocation7 + $0x12d8] sm:$0xff] }
 0x331   : > { %3613 = vmatpush.msrb.mxu2 %v3218_v46  ;;  %3402 = vmatmul.f32.gmra.mxu1 %v12931_v0  ;;  %v3183_v46 = vld [vmem:[#allocation7 + $0x12e0] sm:$0xff] }
 0x332   : > { %3479 = vmatpush.msrb.mxu1 %v3196_v35  ;;  %3506 = vmatpush.msrb.mxu3 %v3256_v1  ;;  %v3221_v35 = vld [vmem:[#allocation7 + $0x1410] sm:$0xff]  ;;  %v12994_v1 = vpop.f32.mrf.mxu2 }
 0x333   : > { %3545 = vmatpush.msrb.mxu0 %v3212_v2  ;;  %3614 = vmatpush.msrb.mxu2 %v3213_v20  ;;  %v3177_v2 = vld [vmem:[#allocation7 + $0x12b0] sm:$0xff]  ;;  %v3138_v20 = vld [vmem:[#allocation7 + $0x1178] sm:$0xff] }
 0x334   : > { %3480 = vmatpush.msrb.mxu1 %v3191_v33  ;;  %3507 = vmatpush.msrb.mxu3 %v3251_v39  ;;  %v3178_v33 = vld [vmem:[#allocation7 + $0x12b8] sm:$0xff] }
 0x335   : > { %3546 = vmatpush.msrb.mxu0 %v3207_v9  ;;  %3615 = vmatpush.msrb.mxu2 %v3208_v53  ;;  %v3156_v9 = vld [vmem:[#allocation7 + $0x1208] sm:$0xff] }
 0x336   : > { %3481 = vmatpush.msrb.mxu1 %v3186_v15  ;;  %3508 = vmatpush.msrb.mxu3 %v3246_v12  ;;  %v3172_v53 = vld [vmem:[#allocation7 + $0x1288] sm:$0xff]  ;;  %v3133_v12 = vld [vmem:[#allocation7 + $0x1150] sm:$0xff] }
 0x337   : > { %3547 = vmatpush.msrb.mxu0 %v3202_v34  ;;  %3616 = vmatpush.msrb.mxu2 %v3203_v42  ;;  %v3173_v34 = vld [vmem:[#allocation7 + $0x1290] sm:$0xff]  ;;  %v3151_v42 = vld [vmem:[#allocation7 + $0x11e0] sm:$0xff] }
 0x338   : > { %3482 = vmatpush.msrb.mxu1 %v3181_v47  ;;  %3509 = vmatpush.msrb.mxu3 %v3241_v59  ;;  %v2868_v4 = vpop.f32.mrf.mxu1  ;;  %v3167_v47 = vld [vmem:[#allocation7 + $0x1260] sm:$0xff]  ;;  %v13000_v59 = vpop.f32.mrf.mxu3 }
 0x339   : > { %3471 = vmatmul.f32.gmra.mxu0 %v12931_v0  ;;  %3540 = vmatmul.f32.gmra.mxu2 %v12931_v0  ;;  %v12992_v37 = vadd.f32 %v2868_v4, %v12884_v10  ;;  %v3161_v10 = vld [vmem:[#allocation7 + $0x1230] sm:$0xff]  ;;  %v3163_v4 = vld [vmem:[#allocation7 + $0x1240] sm:$0xff] }
 0x33a   : > { %3548 = vmatpush.msrb.mxu0 %v3197_v41  ;;  %3617 = vmatpush.msrb.mxu2 %v3198_v48  ;;  %v3128_v41 = vld [vmem:[#allocation7 + $0x1128] sm:$0xff] }
 0x33b   : > { %3483 = vmatpush.msrb.mxu1 %v3176_v5  ;;  %3510 = vmatpush.msrb.mxu3 %v3236_v45  ;;  %v3168_v48 = vld [vmem:[#allocation7 + $0x1268] sm:$0xff]  ;;  %v3146_v5 = vld [vmem:[#allocation7 + $0x11b8] sm:$0xff]  ;;  %v3123_v45 = vld [vmem:[#allocation7 + $0x1100] sm:$0xff] }
 0x33c   : > { %3549 = vmatpush.msrb.mxu0 %v3192_v22  ;;  %3618 = vmatpush.msrb.mxu2 %v3193_v17  ;;  %v2708_v22 = vadd.f32 %v12944_v31, %v12928_v28  ;;  %v3141_v17 = vld [vmem:[#allocation7 + $0x1190] sm:$0xff]  ;;  %v3292_v28 = vld [vmem:[#allocation7 + $0x1648] sm:$0xff] }
 0x33d   : > { %3484 = vmatpush.msrb.mxu1 %v3171_v63  ;;  %3511 = vmatpush.msrb.mxu3 %v3231_v44  ;;  %v3157_v44 = vld [vmem:[#allocation7 + $0x1210] sm:$0xff] }
 0x33e   : > { %3550 = vmatpush.msrb.mxu0 %v3187_v61  ;;  %3619 = vmatpush.msrb.mxu2 %v3188_v19  ;;  %v3297_v19 = vld [vmem:[#allocation7 + $0x1670] sm:$0xff] }
 0x33f   : > { %3485 = vmatpush.msrb.mxu1 %v3166_v27  ;;  %3512 = vmatpush.msrb.mxu3 %v3226_v26  ;;  %v3118_v27 = vld [vmem:[#allocation7 + $0x10d8] sm:$0xff]  ;;  %v3113_v31 = vld [vmem:[#allocation7 + $0x10b0] sm:$0xff] }
 0x340   : > { %3551 = vmatpush.msrb.mxu0 %v3182_v7  ;;  %3620 = vmatpush.msrb.mxu2 %v3183_v46  ;;  %v2937_v39 = vpop.f32.mrf.mxu0  ;;  %v3158_v26 = vld [vmem:[#allocation7 + $0x1218] sm:$0xff]  ;;  %v3152_v7 = vld [vmem:[#allocation7 + $0x11e8] sm:$0xff]  ;;  %v13008_v46 = vpop.f32.mrf.mxu3 }
 0x341   : > { %3486 = vmatpush.msrb.mxu1 %v3161_v10  ;;  %3513 = vmatpush.msrb.mxu3 %v3221_v35  ;;  %v12997_v15 = vadd.f32 %v2937_v39, %v12900_v24  ;;  %v3162_v24 = vld [vmem:[#allocation7 + $0x1238] sm:$0xff]  ;;  %v3153_v10 = vld [vmem:[#allocation7 + $0x11f0] sm:$0xff]  ;;  %v3147_v35 = vld [vmem:[#allocation7 + $0x11c0] sm:$0xff] }
 0x342   : > { %3514 = vmatmul.f32.vlgmr.msrb.gmra.mxu3 %v12956_v29  ;;  %3552 = vmatpush.msrb.mxu0 %v3177_v2  ;;  %v3287_v2 = vld [vmem:[#allocation7 + $0x1620] sm:$0xff]  ;;  %v3142_v39 = vld [vmem:[#allocation7 + $0x1198] sm:$0xff] }
 0x343   : > { %3590 = vmatpush.msra.mxu3 %v3138_v20  ;;  %3621 = vmatpush.msrb.mxu2 %v3178_v33  ;;  %v3108_v20 = vld [vmem:[#allocation7 + $0x1088] sm:$0xff] }
 0x344   : > { %3487 = vmatpush.msrb.mxu1 %v3156_v9  ;;  %3553 = vmatpush.msrb.mxu0 %v3172_v53  ;;  %v3148_v33 = vld [vmem:[#allocation7 + $0x11c8] sm:$0xff]  ;;  %v3282_v9 = vld [vmem:[#allocation7 + $0x15f8] sm:$0xff]  ;;  %v3103_v53 = vld [vmem:[#allocation7 + $0x1060] sm:$0xff] }
 0x345   : > { %3591 = vmatpush.msra.mxu3 %v3133_v12  ;;  %3622 = vmatpush.msrb.mxu2 %v3173_v34  ;;  %v3143_v12 = vld [vmem:[#allocation7 + $0x11a0] sm:$0xff]  ;;  %v3298_v34 = vld [vmem:[#allocation7 + $0x1678] sm:$0xff] }
 0x346   : > { %3488 = vmatpush.msrb.mxu1 %v3151_v42  ;;  %3554 = vmatpush.msrb.mxu0 %v3167_v47  ;;  %v3098_v42 = vld [vmem:[#allocation7 + $0x1038] sm:$0xff]  ;;  %v3277_v47 = vld [vmem:[#allocation7 + $0x15d0] sm:$0xff] }
 0x347   : > { %3592 = vmatpush.msra.mxu3 %v3128_v41  ;;  %3623 = vmatpush.msrb.mxu2 %v3168_v48  ;;  %v3006_v63 = vpop.f32.mrf.mxu2  ;;  %v3293_v41 = vld [vmem:[#allocation7 + $0x1650] sm:$0xff]  ;;  %v13012_v48 = vpop.f32.mrf.mxu1 }
 0x348   : > { %3489 = vmatpush.msrb.mxu1 %v3146_v5  ;;  %3555 = vmatpush.msrb.mxu0 %v3162_v24  ;;  %v13004_v61 = vadd.f32 %v3006_v63, %v2708_v22  ;;  %v3093_v5 = vld [vmem:[#allocation7 + $0x1010] sm:$0xff]  ;;  %v3272_v24 = vld [vmem:[#allocation7 + $0x15a8] sm:$0xff]  ;;  %v3283_v63 = vld [vmem:[#allocation7 + $0x1600] sm:$0xff] }
 0x349   : > { %3593 = vmatpush.msra.mxu3 %v3123_v45  ;;  %3624 = vmatpush.msrb.mxu2 %v3163_v4  ;;  %v3288_v45 = vld [vmem:[#allocation7 + $0x1628] sm:$0xff]  ;;  %v13015_v4 = vpop.f32.mrf.mxu3 }
 0x34a   : > { %3490 = vmatpush.msrb.mxu1 %v3141_v17  ;;  %3517 = vmatmul.f32.gmra.mxu3 %v12949_v18  ;;  %v3088_v22 = vld [vmem:[#allocation7 + $0xfe8] sm:$0xff]  ;;  %v3267_v17 = vld [vmem:[#allocation7 + $0x1580] sm:$0xff] }
 0x34b   : > { %3491 = vmatmul.f32.vlgmr.msrb.gmra.mxu1 %v12918_v30  ;;  %3556 = vmatpush.msrb.mxu0 %v3157_v44  ;;  %v3262_v44 = vld [vmem:[#allocation7 + $0x1558] sm:$0xff] }
 0x34c   : > { %3567 = vmatpush.msra.mxu1 %v3297_v19  ;;  %3594 = vmatpush.msra.mxu3 %v3118_v27  ;;  %v3278_v19 = vld [vmem:[#allocation7 + $0x15d8] sm:$0xff] }
 0x34d   : > { %3625 = vmatpush.msrb.mxu2 %v3158_v26  ;;  %3557 = vmatpush.msrb.mxu0 %v3152_v7  ;;  %v3078_v27 = vld [vmem:[#allocation7 + $0xf98] sm:$0xff]  ;;  %v3257_v26 = vld [vmem:[#allocation7 + $0x1530] sm:$0xff]  ;;  %v2940_v7 = vpop.f32.mrf.mxu0 }
 0x34e   : > { %3568 = vmatpush.msra.mxu1 %v3292_v28  ;;  %3595 = vmatpush.msra.mxu3 %v3113_v31  ;;  %v3273_v28 = vld [vmem:[#allocation7 + $0x15b0] sm:$0xff] }
 0x34f   : > { %3626 = vmatpush.msrb.mxu2 %v3153_v10  ;;  %3558 = vmatpush.msrb.mxu0 %v3147_v35  ;;  %v3073_v31 = vld [vmem:[#allocation7 + $0xf70] sm:$0xff]  ;;  %v3252_v35 = vld [vmem:[#allocation7 + $0x1508] sm:$0xff] }
 0x350   : > { %3569 = vmatpush.msra.mxu1 %v3287_v2  ;;  %3596 = vmatpush.msra.mxu3 %v3108_v20  ;;  %v3268_v20 = vld [vmem:[#allocation7 + $0x1588] sm:$0xff] }
 0x351   : > { %3627 = vmatpush.msrb.mxu2 %v3148_v33  ;;  %3559 = vmatpush.msrb.mxu0 %v3142_v39  ;;  %v3068_v33 = vld [vmem:[#allocation7 + $0xf48] sm:$0xff] }
 0x352   : > { %3570 = vmatpush.msra.mxu1 %v3282_v9  ;;  %3597 = vmatpush.msra.mxu3 %v3103_v53  ;;  %v2619_v9 = vadd.f32 %v12933_v60, %v12921_v13  ;;  %v3263_v53 = vld [vmem:[#allocation7 + $0x1560] sm:$0xff]  ;;  %v3253_v13 = vld [vmem:[#allocation7 + $0x1510] sm:$0xff] }
 0x353   : > { %3628 = vmatpush.msrb.mxu2 %v3143_v12  ;;  %3560 = vmatmul.f32.vlgmr.msrb.gmra.mxu0 %v12918_v30  ;;  %v3063_v12 = vld [vmem:[#allocation7 + $0xf20] sm:$0xff] }
 0x354   : > { %3629 = vmatmul.f32.vlgmr.msrb.gmra.mxu2 %v12918_v30  ;;  %3636 = vmatpush.msra.mxu0 %v3298_v34  ;;  %v3083_v30 = vld [vmem:[#allocation7 + $0xfc0] sm:$0xff]  ;;  %v3242_v34 = vld [vmem:[#allocation7 + $0x14b8] sm:$0xff] }
 0x355   : > { %3494 = vmatmul.f32.gmra.mxu1 %v12912_v51  ;;  %3598 = vmatpush.msra.mxu3 %v3098_v42  ;;  %v2642_v42 = vadd.f32 %v12898_v25, %v2619_v9  ;;  %v3243_v25 = vld [vmem:[#allocation7 + $0x14c0] sm:$0xff]  ;;  %v2412_v9 = vadd.f32 %v12875_v23, %v12857_v21 }
 0x356   : > { %3571 = vmatpush.msra.mxu1 %v3277_v47  ;;  %3637 = vmatpush.msra.mxu0 %v3293_v41  ;;  %v3237_v47 = vld [vmem:[#allocation7 + $0x1490] sm:$0xff] }
 0x357   : > { %3599 = vmatpush.msra.mxu3 %v3093_v5  ;;  %v2941_v41 = vadd.f32 %v2940_v7, %v2642_v42  ;;  %v3232_v5 = vld [vmem:[#allocation7 + $0x1468] sm:$0xff]  ;;  %v13036_v7 = vpop.f32.mrf.mxu2 }
 0x358   : > { %3572 = vmatpush.msra.mxu1 %v3272_v24  ;;  %3638 = vmatpush.msra.mxu0 %v3288_v45  ;;  %v3248_v45 = vld [vmem:[#allocation7 + $0x14e8] sm:$0xff] }
 0x359   : > { %3600 = vmatpush.msra.mxu3 %v3088_v22  ;;  %v13022_v39 = vpop.f32.mrf.mxu3 }
 0x35a   : > { %3573 = vmatpush.msra.mxu1 %v3267_v17  ;;  %3639 = vmatpush.msra.mxu0 %v3283_v63  ;;  %v3227_v17 = vld [vmem:[#allocation7 + $0x1440] sm:$0xff] }
 0x35b   : > { %3601 = vmatpush.msra.mxu3 %v3083_v30  ;;  %3563 = vmatmul.f32.gmra.mxu0 %v12912_v51 }
 0x35c   : > { %3574 = vmatpush.msra.mxu1 %v3262_v44  ;;  %3632 = vmatmul.f32.gmra.mxu2 %v12912_v51  ;;  %v2960_v10 = vpop.f32.mrf.mxu1  ;;  %v3247_v51 = vld [vmem:[#allocation7 + $0x14e0] sm:$0xff]  ;;  %v3222_v44 = vld [vmem:[#allocation7 + $0x1418] sm:$0xff] }
 0x35d   : > { %3640 = vmatpush.msra.mxu0 %v3278_v19  ;;  %3602 = vmatpush.msra.mxu3 %v3078_v27  ;;  %v13020_v2 = vadd.f32 %v2960_v10, %v12997_v15  ;;  %v3258_v15 = vld [vmem:[#allocation7 + $0x1538] sm:$0xff]  ;;  %v3228_v27 = vld [vmem:[#allocation7 + $0x1448] sm:$0xff] }
 0x35e   : > { %3575 = vmatpush.msra.mxu1 %v3257_v26  ;;  %v3223_v26 = vld [vmem:[#allocation7 + $0x1420] sm:$0xff] }
 0x35f   : > { %3641 = vmatpush.msra.mxu0 %v3273_v28  ;;  %3603 = vmatpush.msra.mxu3 %v3073_v31 }
 0x360   : > { %3576 = vmatpush.msra.mxu1 %v3252_v35 }
 0x361   : > { %3642 = vmatpush.msra.mxu0 %v3268_v20  ;;  %3604 = vmatpush.msra.mxu3 %v3068_v33  ;;  %v2986_v30 = vpop.f32.mrf.mxu3 }
 0x362   : > { %3577 = vmatpush.msra.mxu1 %v3247_v51 }
 0x363   : > { %3643 = vmatpush.msra.mxu0 %v3263_v53  ;;  %3605 = vmatpush.msra.mxu3 %v3063_v12  ;;  %v2435_v53 = vadd.f32 %v12871_v38, %v2412_v9  ;;  %v13046_v12 = vld [vmem:[#allocation8] sm:$0x1f] }
 0x364   : > { %3578 = vmatpush.msra.mxu1 %v3242_v34  ;;  %3606 = vmatmul.f32.vlgmr.msra.gmra.mxu3 %v12938_v62  ;;  %v3029_v60 = vpop.f32.mrf.mxu0  ;;  %v3238_v62 = vld [vmem:[#allocation7 + $0x1498] sm:$0xff] }
 0x365   : > { %3644 = vmatpush.msra.mxu0 %v3258_v15  ;;  %v3030_v24 = vadd.f32 %v3029_v60, %v13004_v61  ;;  %v3233_v61 = vld [vmem:[#allocation7 + $0x1470] sm:$0xff]  ;;  %v2734_v34 = vadd.f32 %v12958_v55, %v2435_v53 }
 0x366   : > { %3579 = vmatpush.msra.mxu1 %v3237_v47  ;;  %v2963_v22 = vpop.f32.mrf.mxu1 }
 0x367   : > { %3645 = vmatpush.msra.mxu0 %v3253_v13  ;;  %v2964_v63 = vadd.f32 %v2963_v22, %v2941_v41  ;;  %v2757_v42 = vadd.f32 %v12966_v57, %v2734_v34  ;;  %v3671_v13 = vperm.slane %v13046_v12, 0 }
 0x368   : > { %3580 = vmatpush.msra.mxu1 %v3232_v5 }
 0x369   : > { %3646 = vmatpush.msra.mxu0 %v3248_v45  ;;  %v13029_v19 = vadd.f32 %v2986_v30, %v2964_v63  ;;  %v2780_v41 = vadd.f32 %v12982_v32, %v2757_v42  ;;  %v2892_v42 = vadd.f32 %v13008_v46, %v12992_v37 }
 0x36a   : > { %3581 = vmatpush.msra.mxu1 %v3227_v17 }
 0x36b   : > { %3647 = vmatpush.msra.mxu0 %v3243_v25  ;;  %v3354_v35 = vpop.f32.mrf.mxu2  ;;  %v2481_v25 = vadd.f32 %v12877_v52, %v12873_v56 }
 0x36c   : > { %3582 = vmatpush.msra.mxu1 %v3222_v44  ;;  %3609 = vmatmul.f32.gmra.mxu3 %v12931_v0 }
 0x36d   : > { %3583 = vmatmul.f32.vlgmr.msra.gmra.mxu1 %v12956_v29  ;;  %3648 = vmatpush.msra.mxu0 %v3238_v62  ;;  %v2504_v44 = vadd.f32 %v12891_v54, %v2481_v25 }
 0x36e   : > { %v13038_v28 = vpop.f32.mrf.mxu0 }
 0x36f   : > { %3649 = vmatpush.msra.mxu0 %v3233_v61  ;;  %v2803_v61 = vadd.f32 %v13000_v59, %v2504_v44 }
 0x371   : > { %3650 = vmatpush.msra.mxu0 %v3228_v27 }
 0x373   : > { %3651 = vmatpush.msra.mxu0 %v3223_v26 }
 0x374   : > { %3652 = vmatmul.f32.vlgmr.msra.gmra.mxu0 %v12956_v29  ;;  %v3357_v15 = vpop.f32.mrf.mxu2 }
 0x375   : > { %3586 = vmatmul.f32.gmra.mxu1 %v12949_v18 }
 0x37c   : > { %3655 = vmatmul.f32.gmra.mxu0 %v12949_v18 }
 0x37d   : > { %v3331_v10 = vpop.f32.mrf.mxu3 }
 0x37e   : > { %v3355_v20 = vadd.f32 %v3354_v35, %v3331_v10  ;;  %v3672_v10 = vperm.slane %v13046_v12, 1 }
 0x380   : > { %v3052_v0 = vpop.f32.mrf.mxu1 }
 0x381   : > { %v13040_v31 = vadd.f32 %v3052_v0, %v3030_v24  ;;  %v2826_v0 = vadd.f32 %v12978_v16, %v2803_v61 }
 0x385   : > { %v3334_v18 = vpop.f32.mrf.mxu3 }
 0x386   : > { %v3358_v47 = vadd.f32 %v3357_v15, %v3334_v18 }
 0x388   : > { %v3377_v33 = vpop.f32.mrf.mxu0 }
 0x389   : > { %v3378_v51 = vadd.f32 %v3377_v33, %v3355_v20  ;;  %v2849_v33 = vadd.f32 %v12987_v3, %v2826_v0  ;;  %v2550_v3 = vadd.f32 %v12887_v43, %v12894_v58  ;;  %v3673_v58 = vperm.slane %v13046_v12, 2 }
 0x38a   : > { %v13063_v57 = vpop.f32.mrf.mxu1 }
 0x38b   : > { %v3659_v29 = vadd.f32 %v3378_v51, %v12971_v36  ;;  %v2573_v34 = vadd.f32 %v12907_v8, %v2550_v3 }
 0x38d   : > { %v13052_v23 = vadd.f32 %v3671_v13, %v3659_v29 }
 0x38f   : > { %v3701_v38 = vrot.slane %v13052_v23, 1  ;;  %v3446_v63 = vpop.f32.mrf.mxu2 }
 0x392   : > { %v3380_v60 = vpop.f32.mrf.mxu0 }
 0x393   : > { %v3381_v21 = vadd.f32 %v3380_v60, %v3358_v47  ;;  %v2872_v47 = vadd.f32 %v13012_v48, %v2573_v34  ;;  %v2915_v60 = vadd.f32 %v12985_v49, %v2892_v42 }
 0x395   : > { %v3664_v36 = vadd.f32 %v3381_v21, %v2780_v41  ;;  %v2895_v41 = vadd.f32 %v13015_v4, %v2872_v47 }
 0x397   : > { %v13054_v5 = vadd.f32 %v3671_v13, %v3664_v36  ;;  %v2918_v8 = vadd.f32 %v12994_v1, %v2895_v41 }
 0x398   : > { %v3449_v20 = vpop.f32.mrf.mxu2 }
 0x399   : > { %v3702_v24 = vrot.slane %v13054_v5, 1 }
 0x39b   : > { %v13061_v55 = vsel %vm581_vm1, %v3701_v38, %v3702_v24 }
 0x39c   : > { %v3726_v32 = vmax.f32 %v13052_v23, %v13061_v55  ;;  %v11079_v55 = vld [vmem:[#allocation10 + $0x284] sm:$0xf] }
 0x3a1   : > { %v3423_v45 = vpop.f32.mrf.mxu3 }
 0x3a4   : > { %v3400_v22 = vpop.f32.mrf.mxu1 }
 0x3a5   : > { %v3424_v17 = vadd.f32 %v3423_v45, %v3400_v22 }
 0x3a7   : > { %v3447_v30 = vadd.f32 %v3446_v63, %v3424_v17 }
 0x3a9   : > { %v3660_v62 = vadd.f32 %v3447_v30, %v12973_v6  ;;  %v3426_v27 = vpop.f32.mrf.mxu3 }
 0x3ab   : > { %v13075_v51 = vadd.f32 %v3672_v10, %v3660_v62 }
 0x3ac   : > { %v3469_v29 = vpop.f32.mrf.mxu0 }
 0x3ad   : > { %v3704_v54 = vrot.slane %v13075_v51, 1 }
 0x3ae   : > { %v3403_v26 = vpop.f32.mrf.mxu1 }
 0x3af   : > { %v3427_v35 = vadd.f32 %v3426_v27, %v3403_v26 }
 0x3b1   : > { %v3450_v9 = vadd.f32 %v3449_v20, %v3427_v35  ;;  %v2688_v35 = vadd.f32 %v12962_v11, %v12924_v40 }
 0x3b3   : > { %v3665_v56 = vadd.f32 %v3450_v9, %v2849_v33  ;;  %v3538_v46 = vpop.f32.mrf.mxu2  ;;  %v3674_v9 = vperm.slane %v13046_v12, 3 }
 0x3b5   : > { %v13077_v52 = vadd.f32 %v3672_v10, %v3665_v56  ;;  %v2984_v10 = vadd.f32 %v13022_v39, %v13020_v2 }
 0x3b6   : > { %v3472_v21 = vpop.f32.mrf.mxu0 }
 0x3b7   : > { %v3705_v6 = vrot.slane %v13077_v52, 1 }
 0x3b9   : > { %v13084_v16 = vsel %vm581_vm1, %v3704_v54, %v3705_v6 }
 0x3ba   : > { %v3727_v59 = vmax.f32 %v13075_v51, %v13084_v16  ;;  %v3731_v51 = vmax.f32 %v13054_v5, %v3702_v24 }
 0x3bc   : > { %v3541_v44 = vpop.f32.mrf.mxu2 }
 0x3c5   : > { %v3515_v18 = vpop.f32.mrf.mxu3 }
 0x3c8   : > { %v3492_v53 = vpop.f32.mrf.mxu1 }
 0x3c9   : > { %v3493_v15 = vadd.f32 %v3492_v53, %v3469_v29  ;;  %v2711_v53 = vadd.f32 %v12952_v50, %v2688_v35  ;;  %v11095_v35 = vld [vmem:[#allocation10 + $0x304] sm:$0xf] }
 0x3cb   : > { %v3516_v13 = vadd.f32 %v3515_v18, %v3493_v15  ;;  %v3010_v2 = vadd.f32 %v13036_v7, %v2711_v53 }
 0x3cd   : > { %v3661_v38 = vadd.f32 %v3516_v13, %v2915_v60  ;;  %v3518_v45 = vpop.f32.mrf.mxu3  ;;  %v3033_v40 = vadd.f32 %v13038_v28, %v3010_v2  ;;  %v3675_v60 = vperm.slane %v13046_v12, 4  ;;  %v11101_v2 = vld [vmem:[#allocation10 + $0x32c] sm:$0xf0] }
 0x3cf   : > { %v3683_v63 = vadd.f32 %v3673_v58, %v3661_v38  ;;  %v3056_v50 = vadd.f32 %v13063_v57, %v3033_v40  ;;  %v8788_v40 = vld [vmem:[#allocation10 + $0x2f0] sm:$0xf0] }
 0x3d0   : > { %v3561_v4 = vpop.f32.mrf.mxu0 }
 0x3d1   : > { %v3707_v48 = vrot.slane %v3683_v63, 1  ;;  %v3562_v1 = vadd.f32 %v3561_v4, %v3538_v46 }
 0x3d2   : > { %v3495_v36 = vpop.f32.mrf.mxu1 }
 0x3d3   : > { %v3496_v43 = vadd.f32 %v3495_v36, %v3472_v21 }
 0x3d5   : > { %v3519_v22 = vadd.f32 %v3518_v45, %v3496_v43 }
 0x3d7   : > { %v3666_v17 = vadd.f32 %v3519_v22, %v2918_v8  ;;  %v3630_v26 = vpop.f32.mrf.mxu2 }
 0x3d8   : > { %v3564_v62 = vpop.f32.mrf.mxu0 }
 0x3d9   : > { %v3688_v37 = vadd.f32 %v3673_v58, %v3666_v17  ;;  %v3565_v20 = vadd.f32 %v3564_v62, %v3541_v44  ;;  %v11103_v44 = vld [vmem:[#allocation10 + $0x344] sm:$0xf]  ;;  %v8836_v62 = vld [vmem:[#allocation10 + $0x350] sm:$0xf0] }
 0x3db   : > { %v3708_v25 = vrot.slane %v3688_v37, 1 }
 0x3dd   : > { %v3709_v49 = vsel %vm581_vm1, %v3707_v48, %v3708_v25  ;;  %v13120_v57 = vmax.f32 %v3688_v37, %v3708_v25  ;;  %v11107_v48 = vld [vmem:[#allocation10 + $0x364] sm:$0xf]  ;;  %v3732_v37 = vmax.f32 %v13077_v52, %v3705_v6 }
 0x3de   : > { %v13099_v30 = vmax.f32 %v3683_v63, %v3709_v49  ;;  %v8852_v49 = vld [vmem:[#allocation10 + $0x370] sm:$0xf0] }
 0x3df   : > { %v3633_v39 = vpop.f32.mrf.mxu2  ;;  %v8855_v4 = vor.u32 %v11107_v48, %v8852_v49  ;;  %v11083_v48 = vld [vmem:[#allocation10 + $0x2a4] sm:$0xf]  ;;  %v8756_v49 = vld [vmem:[#allocation10 + $0x2b0] sm:$0xf0] }
 0x3e0   : > { %3742 = vrot.lane.b32.xlu2 %v13099_v30, %s12076_s14 }
 0x3e1   : > { %4468 = vmatpush.bf16.msrb.mxu0 %v8855_v4  ;;  %v11157_v4 = vld [vmem:[#allocation10 + $0x4ec] sm:$0xf0] }
 0x3e7   : > { %v3607_v27 = vpop.f32.mrf.mxu3 }
 0x3e8   : > { %v3631_v54 = vadd.f32 %v3630_v26, %v3607_v27  ;;  %v8820_v27 = vld [vmem:[#allocation10 + $0x330] sm:$0xf0]  ;;  %v8850_v26 = vld [vmem:[#allocation10 + $0x360] sm:$0xf] }
 0x3ea   : > { %v3584_v61 = vpop.f32.mrf.mxu1 }
 0x3eb   : > { %v3585_v0 = vadd.f32 %v3584_v61, %v3562_v1  ;;  %v8839_v61 = vor.u32 %v11103_v44, %v8836_v62  ;;  %v11099_v1 = vld [vmem:[#allocation10 + $0x324] sm:$0xf]  ;;  %v8930_v44 = vld [vmem:[#allocation10 + $0x400] sm:$0xf]  ;;  %v11129_v62 = vld [vmem:[#allocation10 + $0x40c] sm:$0xf0] }
 0x3ed   : > { %v3662_v33 = vadd.f32 %v3585_v0, %v2984_v10  ;;  %v11109_v0 = vld [vmem:[#allocation10 + $0x36c] sm:$0xf0]  ;;  %4469 = vmatpush.bf16.msrb.mxu0 %v8839_v61  ;;  %v8823_v10 = vor.u32 %v11099_v1, %v8820_v27  ;;  %v8759_v27 = vor.u32 %v11083_v48, %v8756_v49  ;;  %v11110_v48 = vld [vmem:[#allocation10 + $0x374] sm:$0xf0]  ;;  %v11135_v49 = vld [vmem:[#allocation10 + $0x444] sm:$0xf] }
 0x3ef   : > { %v3684_v34 = vadd.f32 %v3674_v9, %v3662_v33  ;;  %v3610_v15 = vpop.f32.mrf.mxu3 }
 0x3f0   : > { %v3634_v11 = vadd.f32 %v3633_v39, %v3610_v15  ;;  %v8818_v15 = vld [vmem:[#allocation10 + $0x320] sm:$0xf] }
 0x3f1   : > { %v3653_v56 = vpop.f32.mrf.mxu0  ;;  %v3710_v41 = vrot.slane %v3684_v34, 1  ;;  %4470 = vmatpush.bf16.msrb.mxu0 %v8823_v10  ;;  %v8931_v10 = vor.u32 %v11129_v62, %v8930_v44  ;;  %v11126_v44 = vld [vmem:[#allocation10 + $0x3f4] sm:$0xf0] }
 0x3f2   : > { %v3587_v3 = vpop.f32.mrf.mxu1  ;;  %v3654_v18 = vadd.f32 %v3653_v56, %v3631_v54  ;;  %v8834_v56 = vld [vmem:[#allocation10 + $0x340] sm:$0xf]  ;;  %v11105_v54 = vld [vmem:[#allocation10 + $0x34c] sm:$0xf0] }
 0x3f3   : > { %v3588_v29 = vadd.f32 %v3587_v3, %v3565_v20  ;;  %v8851_v20 = vor.u32 %v11109_v0, %v8850_v26  ;;  %v8835_v53 = vor.u32 %v11105_v54, %v8834_v56  ;;  %v8770_v26 = vld [vmem:[#allocation10 + $0x2c0] sm:$0xf]  ;;  %v11089_v0 = vld [vmem:[#allocation10 + $0x2cc] sm:$0xf0] }
 0x3f4   : > { %v3663_v13 = vadd.f32 %v3654_v18, %v13040_v31  ;;  %v8978_v18 = vld [vmem:[#allocation10 + $0x460] sm:$0xf]  ;;  %v8771_v56 = vor.u32 %v11089_v0, %v8770_v26  ;;  %v11131_v26 = vld [vmem:[#allocation10 + $0x424] sm:$0xf]  ;;  %v8948_v0 = vld [vmem:[#allocation10 + $0x430] sm:$0xf0] }
 0x3f5   : > { %v3667_v42 = vadd.f32 %v3588_v29, %v13029_v19  ;;  %4429 = vmatpush.bf16.msra.mxu2 %v8851_v20  ;;  %v11125_v20 = vld [vmem:[#allocation10 + $0x3ec] sm:$0xf0] }
 0x3f6   : > { %v3685_v58 = vadd.f32 %v3675_v60, %v3663_v13 }
 0x3f7   : > { %v3689_v47 = vadd.f32 %v3674_v9, %v3667_v42  ;;  %v8804_v9 = vld [vmem:[#allocation10 + $0x310] sm:$0xf0] }
 0x3f8   : > { %v3713_v8 = vrot.slane %v3685_v58, 1  ;;  %v8807_v42 = vor.u32 %v11095_v35, %v8804_v9  ;;  %v11142_v35 = vld [vmem:[#allocation10 + $0x474] sm:$0xf0]  ;;  %v11153_v9 = vld [vmem:[#allocation10 + $0x4cc] sm:$0xf0] }
 0x3f9   : > { %v3656_v21 = vpop.f32.mrf.mxu0  ;;  %v3711_v36 = vrot.slane %v3689_v47, 1  ;;  %4430 = vmatpush.bf16.msra.mxu2 %v8835_v53  ;;  %v11085_v53 = vld [vmem:[#allocation10 + $0x2ac] sm:$0xf0] }
 0x3fa   : > { %v3657_v38 = vadd.f32 %v3656_v21, %v3634_v11  ;;  %v11137_v21 = vld [vmem:[#allocation10 + $0x44c] sm:$0xf0]  ;;  %4471 = vmatpush.bf16.msrb.mxu0 %v8807_v42  ;;  %v9010_v42 = vld [vmem:[#allocation10 + $0x4a0] sm:$0xf] }
 0x3fb   : > { %v3734_v43 = vmax.f32 %v3689_v47, %v3711_v36  ;;  %v3712_v19 = vsel %vm581_vm1, %v3710_v41, %v3711_v36  ;;  %v11091_v47 = vld [vmem:[#allocation10 + $0x2e4] sm:$0xf]  ;;  %v8962_v41 = vld [vmem:[#allocation10 + $0x440] sm:$0xf] }
 0x3fc   : > { %v3668_v7 = vadd.f32 %v3657_v38, %v3056_v50  ;;  %v3729_v45 = vmax.f32 %v3684_v34, %v3712_v19  ;;  %v11141_v34 = vld [vmem:[#allocation10 + $0x46c] sm:$0xf0]  ;;  %v8791_v36 = vor.u32 %v11091_v47, %v8788_v40  ;;  %v8802_v50 = vld [vmem:[#allocation10 + $0x300] sm:$0xf]  ;;  %v8772_v19 = vld [vmem:[#allocation10 + $0x2d0] sm:$0xf0]  ;;  %v8963_v16 = vor.u32 %v11137_v21, %v8962_v41 }
 0x3fd   : > { %3750 = vrot.lane.b32.xlu0 %v3734_v43, %s12076_s14  ;;  %v8979_v13 = vor.u32 %v11141_v34, %v8978_v18  ;;  %v11097_v38 = vld [vmem:[#allocation10 + $0x30c] sm:$0xf0]  ;;  %v11087_v43 = vld [vmem:[#allocation10 + $0x2c4] sm:$0xf]  ;;  %v8970_v18 = vld [vmem:[#allocation10 + $0x448] sm:$0xf] }
 0x3fe   : > { %v3690_v28 = vadd.f32 %v3675_v60, %v3668_v7  ;;  %v8819_v60 = vor.u32 %v11101_v2, %v8818_v15  ;;  %4472 = vmatpush.bf16.msrb.mxu0 %v8791_v36  ;;  %v11138_v34 = vld [vmem:[#allocation10 + $0x454] sm:$0xf0]  ;;  %v11121_v15 = vld [vmem:[#allocation10 + $0x3cc] sm:$0xf0]  ;;  %v8738_v47 = vld [vmem:[#allocation10 + $0x280] sm:$0xf] }
 0x3ff   : > { %v11149_v2 = vld [vmem:[#allocation10 + $0x4ac] sm:$0xf0]  ;;  %v8882_v21 = vld [vmem:[#allocation10 + $0x3a0] sm:$0xf] }
 0x400   : > { %v3714_v22 = vrot.slane %v3690_v28, 1  ;;  %4431 = vmatpush.bf16.msra.mxu2 %v8819_v60  ;;  %v11081_v40 = vld [vmem:[#allocation10 + $0x28c] sm:$0xf0]  ;;  %v9044_v60 = vld [vmem:[#allocation10 + $0x4f0] sm:$0xf0]  ;;  %v9011_v36 = vor.u32 %v11149_v2, %v9010_v42 }
 0x401   : > { %v11090_v42 = vld [vmem:[#allocation10 + $0x2d4] sm:$0xf0]  ;;  %v11123_v2 = vld [vmem:[#allocation10 + $0x3e4] sm:$0xf] }
 0x402   : > { %v3735_v31 = vmax.f32 %v3690_v28, %v3714_v22  ;;  %v3715_v12 = vsel %vm581_vm1, %v3713_v8, %v3714_v22  ;;  %v8946_v28 = vld [vmem:[#allocation10 + $0x420] sm:$0xf]  ;;  %v11133_v8 = vld [vmem:[#allocation10 + $0x42c] sm:$0xf0]  ;;  %v8803_v22 = vor.u32 %v11097_v38, %v8802_v50  ;;  %v8954_v50 = vld [vmem:[#allocation10 + $0x428] sm:$0xf] }
 0x403   : > { %v3730_v17 = vmax.f32 %v3685_v58, %v3715_v12  ;;  %v8775_v12 = vor.u32 %v11087_v43, %v8772_v19  ;;  %v8947_v24 = vor.u32 %v11133_v8, %v8946_v28  ;;  %v11134_v38 = vld [vmem:[#allocation10 + $0x434] sm:$0xf0]  ;;  %v11117_v43 = vld [vmem:[#allocation10 + $0x3ac] sm:$0xf0]  ;;  %v8994_v19 = vld [vmem:[#allocation10 + $0x480] sm:$0xf] }
 0x404   : > { %4432 = vmatpush.bf16.msra.mxu2 %v8803_v22  ;;  %v8938_v8 = vld [vmem:[#allocation10 + $0x408] sm:$0xf]  ;;  %v11130_v22 = vld [vmem:[#allocation10 + $0x414] sm:$0xf0] }
 0x405   : > { %3752 = vrot.lane.b32.xlu0 %v3735_v31, %s12076_s14  ;;  %v11701_v63 = vpack.i.bf16 %v3730_v17, %v3729_v45  ;;  %v8786_v17 = vld [vmem:[#allocation10 + $0x2e0] sm:$0xf]  ;;  %4473 = vmatpush.bf16.msrb.mxu0 %v8775_v12  ;;  %v11113_v12 = vld [vmem:[#allocation10 + $0x38c] sm:$0xf0] }
 0x407   : > { %11702 = vrot.lane.b32.xlu1 %v11701_v63, %s12076_s14  ;;  %v11093_v63 = vld [vmem:[#allocation10 + $0x2ec] sm:$0xf0] }
 0x408   : > { %v8787_v61 = vor.u32 %v11093_v63, %v8786_v17  ;;  %v8858_v17 = vld [vmem:[#allocation10 + $0x368] sm:$0xf] }
 0x409   : > { %4474 = vmatpush.bf16.msrb.mxu0 %v8759_v27  ;;  %v8859_v62 = vor.u32 %v11110_v48, %v8858_v17  ;;  %v11106_v27 = vld [vmem:[#allocation10 + $0x354] sm:$0xf0]  ;;  %v11111_v48 = vld [vmem:[#allocation10 + $0x384] sm:$0xf] }
 0x40a   : > { %4433 = vmatpush.bf16.msra.mxu2 %v8787_v61  ;;  %v8842_v61 = vld [vmem:[#allocation10 + $0x348] sm:$0xf] }
 0x40e   : > { %4434 = vmatpush.bf16.msra.mxu2 %v8771_v56 }
 0x40f   : > { %3748 = vrot.lane.b32.xlu1 %v13120_v57, %s12076_s14  ;;  %s8428_s14 = scalar_lea.hbm %s13583_s11, %s12158_s21 }
 0x410   : > { %s8432_s22 = sshll.u32 %s8428_s14, 4  ;;  %s8433_s22 = int_to_ptr.hbm [resolvable:$true] %s8432_s22 }
 0x411   : > { %s11990_s6 = sshra.s32 %s8433_s22, 4  ;;  %s11991_s6 = int_to_ptr.hbm [resolvable:$true] %s11990_s6 }
 0x412   : > { %s11992_s16 = scalar_lea.hbm %s11991_s6, 1  ;;  %p11997_p3 = scmp.lt.s32.totalorder %s11991_s6, %s13583_s11 }
 0x413   : > { %p11993_p0 = scmp.ne.s32.totalorder %s11991_s6, %s11992_s16  ;;  %p11998_p4 = scmp.lt.s32.totalorder %s11996_s30, %s11992_s16 }
 0x415   : > { %p11994_p1 = pnand %p11993_p0, %p12175_p5  ;;  %p11999_p7 = por %p11998_p4, %p11997_p3 }
 0x417   : > { %p11995_p2 = pneg %p11994_p1 }
 0x419   : > { %p12000_p8 = pnand %p11999_p7, %p11995_p2 }
 0x43a   : > { %v3743_v58 = vpop.permute.xlu2 %3742 }
 0x46f   : > { %v3751_v46 = vpop.permute.xlu0 %3750 }
 0x477   : > { %v13127_v25 = vpop.permute.xlu0 %3752 }
 0x478   : > { %v3758_v33 = vsel %vm3754_vm8, %v3751_v46, %v13127_v25  ;;  %v3770_v1 = vmax.f32 %v13120_v57, %v13127_v25  ;;  %v8914_v57 = vld [vmem:[#allocation10 + $0x3e0] sm:$0xf]  ;;  %v8986_v25 = vld [vmem:[#allocation10 + $0x468] sm:$0xf] }
 0x479   : > { %v3769_v3 = vmax.f32 %v3732_v37, %v3758_v33  ;;  %v13131_v29 = vpop.permute.xlu1 %11702  ;;  %v9026_v33 = vld [vmem:[#allocation10 + $0x4c0] sm:$0xf] }
 0x47a   : > { %v11705_v52 = vunpack.i.h.bf16 %v13131_v29  ;;  %v11704_v6 = vunpack.i.l.bf16 %v13131_v29  ;;  %v8987_v29 = vor.u32 %v11142_v35, %v8986_v25  ;;  %v8810_v25 = vld [vmem:[#allocation10 + $0x308] sm:$0xf]  ;;  %v11098_v35 = vld [vmem:[#allocation10 + $0x314] sm:$0xf0] }
 0x47b   : > { %8732 = vmatpush.msk.msrb.mxu3 %vm3774_vm9, %v3769_v3  ;;  %v8754_v3 = vld [vmem:[#allocation10 + $0x2a0] sm:$0xf] }
 0x47c   : > { %v3756_v39 = vsel %vm3754_vm8, %v11704_v6, %v11705_v52  ;;  %v3755_v45 = vsel %vm3754_vm8, %v3743_v58, %v11704_v6  ;;  %v3767_v37 = vmax.f32 %v13099_v30, %v11705_v52  ;;  %v8915_v30 = vor.u32 %v11125_v20, %v8914_v57  ;;  %v8898_v52 = vld [vmem:[#allocation10 + $0x3c0] sm:$0xf]  ;;  %v11145_v58 = vld [vmem:[#allocation10 + $0x48c] sm:$0xf0] }
 0x47d   : > { %v3766_v11 = vmax.f32 %v3727_v59, %v3756_v39  ;;  %v3765_v5 = vmax.f32 %v3726_v32, %v3755_v45  ;;  %v8740_v32 = vld [vmem:[#allocation10 + $0x290] sm:$0xf0]  ;;  %v9027_v6 = vor.u32 %v11153_v9, %v9026_v33  ;;  %v8755_v39 = vor.u32 %v11085_v53, %v8754_v3  ;;  %v8794_v33 = vld [vmem:[#allocation10 + $0x2e8] sm:$0xf]  ;;  %v11094_v9 = vld [vmem:[#allocation10 + $0x2f4] sm:$0xf0] }
 0x47e   : > { %v8743_v54 = vor.u32 %v11079_v55, %v8740_v32  ;;  %v8899_v41 = vor.u32 %v11121_v15, %v8898_v52  ;;  %v8883_v45 = vor.u32 %v11117_v43, %v8882_v21  ;;  %v8995_v28 = vor.u32 %v11145_v58, %v8994_v19  ;;  %v8932_v3 = vld [vmem:[#allocation10 + $0x410] sm:$0xf0]  ;;  %v8906_v53 = vld [vmem:[#allocation10 + $0x3c8] sm:$0xf]  ;;  %v11119_v43 = vld [vmem:[#allocation10 + $0x3c4] sm:$0xf] }
 0x47f   : > { %3819 = vmatpush.msrb.mxu3 %v3766_v11  ;;  %v8971_v11 = vor.u32 %v11138_v34, %v8970_v18  ;;  %4435 = vmatpush.bf16.msra.mxu2 %v8755_v39  ;;  %v8843_v55 = vor.u32 %v11106_v27, %v8842_v61  ;;  %v8951_v32 = vor.u32 %v11131_v26, %v8948_v0  ;;  %v9028_v18 = vld [vmem:[#allocation10 + $0x4d0] sm:$0xf0]  ;;  %v8778_v34 = vld [vmem:[#allocation10 + $0x2c8] sm:$0xf]  ;;  %v9174_v61 = vld [vmem:[#allocation10 + $0xe0] sm:$0xf] }
 0x480   : > { %8733 = vmatmul.msk.f32.vlgmr.msrb.gmra.mxu3 %vm3771_vm10, %v12720_v14  ;;  %4475 = vmatpush.bf16.msrb.mxu0 %v8743_v54  ;;  %v8811_v20 = vor.u32 %v11098_v35, %v8810_v25  ;;  %v8795_v56 = vor.u32 %v11094_v9, %v8794_v33  ;;  %v11127_v54 = vld [vmem:[#allocation10 + $0x404] sm:$0xf]  ;;  %v8916_v39 = vld [vmem:[#allocation10 + $0x3f0] sm:$0xf0]  ;;  %v11158_v27 = vld [vmem:[#allocation10 + $0x4f4] sm:$0xf0] }
 0x481   : > { %v3749_v7 = vpop.permute.xlu1 %3748  ;;  %4442 = vmatpush.bf16.msra.mxu3 %v8979_v13  ;;  %v11155_v13 = vld [vmem:[#allocation10 + $0x4e4] sm:$0xf]  ;;  %v9012_v21 = vld [vmem:[#allocation10 + $0x4b0] sm:$0xf0]  ;;  %v11029_v26 = vld [vmem:[#allocation10 + $0xec] sm:$0xf0] }
 0x482   : > { %v3757_v59 = vsel %vm3754_vm8, %v3749_v7, %v3751_v46  ;;  %v9042_v46 = vld [vmem:[#allocation10 + $0x4e0] sm:$0xf]  ;;  %v8739_v7 = vor.u32 %v11081_v40, %v8738_v47  ;;  %v8779_v47 = vor.u32 %v11090_v42, %v8778_v34  ;;  %v8919_v40 = vor.u32 %v11123_v2, %v8916_v39  ;;  %v8900_v19 = vld [vmem:[#allocation10 + $0x3d0] sm:$0xf0]  ;;  %v11156_v0 = vld [vmem:[#allocation10 + $0x4ec] sm:$0xf] }
 0x483   : > { %v3768_v31 = vmax.f32 %v3731_v51, %v3757_v59  ;;  %v9043_v23 = vor.u32 %v11157_v4, %v9042_v46  ;;  %v11139_v51 = vld [vmem:[#allocation10 + $0x464] sm:$0xf]  ;;  %v9047_v59 = vor.u32 %v11155_v13, %v9044_v60  ;;  %v8922_v4 = vld [vmem:[#allocation10 + $0x3e8] sm:$0xf]  ;;  %v11118_v13 = vld [vmem:[#allocation10 + $0x3b4] sm:$0xf0]  ;;  %v9175_v35 = vor.u32 %v11029_v26, %v9174_v61 }
 0x484   : > { %4520 = vmatpush.bf16.msra.mxu0 %v8987_v29  ;;  %4436 = vmatpush.bf16.msra.mxu2 %v8739_v7  ;;  %v8935_v29 = vor.u32 %v11127_v54, %v8932_v3  ;;  %v8903_v7 = vor.u32 %v11119_v43, %v8900_v19  ;;  %v9034_v33 = vld [vmem:[#allocation10 + $0x4c8] sm:$0xf]  ;;  %v11154_v9 = vld [vmem:[#allocation10 + $0x4d4] sm:$0xf0]  ;;  %v11025_v54 = vld [vmem:[#allocation10 + $0xcc] sm:$0xf0] }
 0x485   : > { %8730 = vmatpush.msk.msrb.mxu1 %vm3774_vm9, %v3768_v31  ;;  %4443 = vmatpush.bf16.msra.mxu3 %v8963_v16  ;;  %v8980_v16 = vld [vmem:[#allocation10 + $0x470] sm:$0xf0]  ;;  %v8866_v31 = vld [vmem:[#allocation10 + $0x380] sm:$0xf]  ;;  %v11152_v3 = vld [vmem:[#allocation10 + $0x4cc] sm:$0xf] }
 0x486   : > { %v8983_v63 = vor.u32 %v11139_v51, %v8980_v16  ;;  %v8867_v46 = vor.u32 %v11113_v12, %v8866_v31  ;;  %v8874_v51 = vld [vmem:[#allocation10 + $0x388] sm:$0xf]  ;;  %v11114_v16 = vld [vmem:[#allocation10 + $0x394] sm:$0xf0]  ;;  %v11115_v31 = vld [vmem:[#allocation10 + $0x3a4] sm:$0xf] }
 0x487   : > { %3799 = vmatpush.msrb.mxu1 %v3765_v5  ;;  %v8964_v5 = vld [vmem:[#allocation10 + $0x450] sm:$0xf0]  ;;  %v9142_v42 = vld [vmem:[#allocation10 + $0xa0] sm:$0xf]  ;;  %v9018_v2 = vld [vmem:[#allocation10 + $0x4a8] sm:$0xf] }
 0x488   : > { %8731 = vmatmul.msk.f32.vlgmr.msrb.gmra.mxu1 %vm3771_vm10, %v12720_v14  ;;  %4521 = vmatpush.bf16.msra.mxu0 %v8971_v11  ;;  %v8890_v11 = vld [vmem:[#allocation10 + $0x3a8] sm:$0xf]  ;;  %v8884_v12 = vld [vmem:[#allocation10 + $0x3b0] sm:$0xf0]  ;;  %v11150_v39 = vld [vmem:[#allocation10 + $0x4b4] sm:$0xf0] }
 0x489   : > { %8734 = vmatpush.msk.msra.mxu1 %vm3774_vm9, %v3770_v1  ;;  %4444 = vmatpush.bf16.msra.mxu3 %v8947_v24  ;;  %v8939_v24 = vor.u32 %v11130_v22, %v8938_v8  ;;  %v8967_v1 = vor.u32 %v11135_v49, %v8964_v5  ;;  %v8891_v60 = vor.u32 %v11118_v13, %v8890_v11  ;;  %v11082_v22 = vld [vmem:[#allocation10 + $0x294] sm:$0xf0]  ;;  %v8868_v49 = vld [vmem:[#allocation10 + $0x390] sm:$0xf0]  ;;  %v9020_v11 = vld [vmem:[#allocation10 + $0x4b8] sm:$0xf0] }
 0x48a   : > { %4498 = vmatpush.bf16.msrb.mxu2 %v9047_v59  ;;  %v8875_v59 = vor.u32 %v11114_v16, %v8874_v51  ;;  %v8871_v5 = vor.u32 %v11111_v48, %v8868_v49  ;;  %v11017_v51 = vld [vmem:[#allocation10 + $0x8c] sm:$0xf0]  ;;  %v11144_v16 = vld [vmem:[#allocation10 + $0x48c] sm:$0xf]  ;;  %v9302_v49 = vld [vmem:[#allocation10 + $0x1e0] sm:$0xf] }
 0x48b   : > { %3839 = vmatpush.msra.mxu1 %v3767_v37  ;;  %v8826_v37 = vld [vmem:[#allocation10 + $0x328] sm:$0xf]  ;;  %v11013_v48 = vld [vmem:[#allocation10 + $0x6c] sm:$0xf0]  ;;  %v11136_v61 = vld [vmem:[#allocation10 + $0x44c] sm:$0xf] }
 0x48c   : > { %v9094_v26 = vld [vmem:[#allocation10 + $0x40] sm:$0xf] }
 0x48d   : > { %4459 = vmatpush.bf16.msrb.mxu1 %v9043_v23  ;;  %4445 = vmatpush.bf16.msra.mxu3 %v8931_v10  ;;  %v8923_v23 = vor.u32 %v11126_v44, %v8922_v4  ;;  %v11102_v10 = vld [vmem:[#allocation10 + $0x334] sm:$0xf0] }
 0x48e   : > { %v8827_v57 = vor.u32 %v11102_v10, %v8826_v37  ;;  %v9158_v10 = vld [vmem:[#allocation10 + $0xc0] sm:$0xf] }
 0x48f   : > { %v9159_v34 = vor.u32 %v11025_v54, %v9158_v10 }
 0x490   : > { %8735 = vmatmul.msk.f32.vlgmr.msra.gmra.mxu1 %vm3771_vm10, %v12720_v14  ;;  %v8955_v14 = vor.u32 %v11134_v38, %v8954_v50  ;;  %v11086_v38 = vld [vmem:[#allocation10 + $0x2b4] sm:$0xf0] }
 0x491   : > { %4446 = vmatpush.bf16.msra.mxu3 %v8915_v30  ;;  %4460 = vmatpush.bf16.msrb.mxu1 %v9027_v6  ;;  %v11122_v30 = vld [vmem:[#allocation10 + $0x3d4] sm:$0xf0]  ;;  %v11151_v6 = vld [vmem:[#allocation10 + $0x4c4] sm:$0xf] }
 0x492   : > { %4522 = vmatpush.bf16.msra.mxu0 %v8955_v14  ;;  %v8907_v52 = vor.u32 %v11122_v30, %v8906_v53  ;;  %v9031_v15 = vor.u32 %v11151_v6, %v9028_v18  ;;  %v11143_v14 = vld [vmem:[#allocation10 + $0x484] sm:$0xf]  ;;  %v9036_v53 = vld [vmem:[#allocation10 + $0x4d8] sm:$0xf0]  ;;  %v9035_v30 = vor.u32 %v11154_v9, %v9034_v33  ;;  %v11092_v33 = vld [vmem:[#allocation10 + $0x2ec] sm:$0xf] }
 0x493   : > { %v8860_v6 = vld [vmem:[#allocation10 + $0x378] sm:$0xf0] }
 0x494   : > { %4499 = vmatpush.bf16.msrb.mxu2 %v9031_v15  ;;  %v9039_v15 = vor.u32 %v11152_v3, %v9036_v53  ;;  %v8796_v9 = vld [vmem:[#allocation10 + $0x2f8] sm:$0xf0]  ;;  %v9078_v53 = vld [vmem:[#allocation10 + $0x20] sm:$0xf] }
 0x495   : > { %4447 = vmatpush.bf16.msra.mxu3 %v8899_v41  ;;  %4461 = vmatpush.bf16.msrb.mxu1 %v9011_v36  ;;  %v11147_v41 = vld [vmem:[#allocation10 + $0x4a4] sm:$0xf]  ;;  %v8762_v36 = vld [vmem:[#allocation10 + $0x2a8] sm:$0xf]  ;;  %v8956_v3 = vld [vmem:[#allocation10 + $0x438] sm:$0xf0] }
 0x496   : > { %4523 = vmatpush.bf16.msra.mxu0 %v8939_v24  ;;  %v9015_v50 = vor.u32 %v11147_v41, %v9012_v21  ;;  %v8763_v58 = vor.u32 %v11086_v38, %v8762_v36  ;;  %v9019_v41 = vor.u32 %v11150_v39, %v9018_v2  ;;  %v11104_v21 = vld [vmem:[#allocation10 + $0x34c] sm:$0xf]  ;;  %v8844_v36 = vld [vmem:[#allocation10 + $0x358] sm:$0xf0] }
 0x497   : > { %v11128_v2 = vld [vmem:[#allocation10 + $0x40c] sm:$0xf]  ;;  %v8940_v39 = vld [vmem:[#allocation10 + $0x418] sm:$0xf0] }
 0x498   : > { %4500 = vmatpush.bf16.msrb.mxu2 %v9015_v50  ;;  %v9126_v50 = vld [vmem:[#allocation10 + $0x80] sm:$0xf] }
 0x499   : > { %4448 = vmatpush.bf16.msra.mxu3 %v8883_v45  ;;  %4462 = vmatpush.bf16.msrb.mxu1 %v8995_v28  ;;  %v8996_v45 = vld [vmem:[#allocation10 + $0x490] sm:$0xf0]  ;;  %v8746_v28 = vld [vmem:[#allocation10 + $0x288] sm:$0xf] }
 0x49a   : > { %4524 = vmatpush.bf16.msra.mxu0 %v8923_v23  ;;  %v8999_v8 = vor.u32 %v11143_v14, %v8996_v45  ;;  %v8747_v17 = vor.u32 %v11082_v22, %v8746_v28  ;;  %v9052_v23 = vld [vmem:[#allocation10 + $0x4f8] sm:$0xf0]  ;;  %v8847_v14 = vor.u32 %v11104_v21, %v8844_v36  ;;  %v9127_v28 = vor.u32 %v11017_v51, %v9126_v50  ;;  %v11100_v22 = vld [vmem:[#allocation10 + $0x32c] sm:$0xf]  ;;  %v11075_v21 = vld [vmem:[#allocation10 + $0x264] sm:$0xf] }
 0x49b   : > { %v9368_v36 = vld [vmem:[#allocation10 + $0x270] sm:$0xf0] }
 0x49c   : > { %4501 = vmatpush.bf16.msrb.mxu2 %v8999_v8 }
 0x49d   : > { %4481 = vmatpush.bf16.msra.mxu1 %v8983_v63  ;;  %4449 = vmatpush.bf16.msra.mxu3 %v8867_v46  ;;  %v8887_v63 = vor.u32 %v11115_v31, %v8884_v12  ;;  %v8828_v31 = vld [vmem:[#allocation10 + $0x338] sm:$0xf0]  ;;  %v11140_v12 = vld [vmem:[#allocation10 + $0x46c] sm:$0xf] }
 0x49e   : > { %4525 = vmatpush.bf16.msra.mxu0 %v8907_v52  ;;  %v11108_v52 = vld [vmem:[#allocation10 + $0x36c] sm:$0xf] }
 0x4a1   : > { %4507 = vmatpush.bf16.msrb.mxu3 %v8859_v62  ;;  %4482 = vmatpush.bf16.msra.mxu1 %v8967_v1  ;;  %v9050_v1 = vld [vmem:[#allocation10 + $0x4e8] sm:$0xf] }
 0x4a2   : > { %4526 = vmatpush.bf16.msra.mxu0 %v8891_v60  ;;  %v9051_v37 = vor.u32 %v11158_v27, %v9050_v1  ;;  %v8863_v60 = vor.u32 %v11108_v52, %v8860_v6  ;;  %v8972_v27 = vld [vmem:[#allocation10 + $0x458] sm:$0xf0]  ;;  %v11053_v52 = vld [vmem:[#allocation10 + $0x1ac] sm:$0xf0]  ;;  %v8799_v6 = vor.u32 %v11092_v33, %v8796_v9  ;;  %v9350_v33 = vld [vmem:[#allocation10 + $0x240] sm:$0xf] }
 0x4a3   : > { %v11073_v9 = vld [vmem:[#allocation10 + $0x24c] sm:$0xf0] }
 0x4a5   : > { %4508 = vmatpush.bf16.msrb.mxu3 %v8843_v55  ;;  %4483 = vmatpush.bf16.msra.mxu1 %v8951_v32 }
 0x4a6   : > { %4527 = vmatpush.bf16.msra.mxu0 %v8875_v59  ;;  %v9004_v59 = vld [vmem:[#allocation10 + $0x498] sm:$0xf0] }
 0x4a7   : > { %v9007_v8 = vor.u32 %v11144_v16, %v9004_v59  ;;  %v9371_v16 = vor.u32 %v11075_v21, %v9368_v36  ;;  %v11124_v59 = vld [vmem:[#allocation10 + $0x3ec] sm:$0xf]  ;;  %v11030_v21 = vld [vmem:[#allocation10 + $0xf4] sm:$0xf0]  ;;  %v9294_v36 = vld [vmem:[#allocation10 + $0x1c8] sm:$0xf] }
 0x4a9   : > { %4509 = vmatpush.bf16.msrb.mxu3 %v8827_v57  ;;  %4484 = vmatpush.bf16.msra.mxu1 %v8935_v29 }
 0x4ad   : > { %4510 = vmatpush.bf16.msrb.mxu3 %v8811_v20  ;;  %4485 = vmatpush.bf16.msra.mxu1 %v8919_v40  ;;  %v9055_v20 = vor.u32 %v11156_v0, %v9052_v23  ;;  %v11148_v40 = vld [vmem:[#allocation10 + $0x4ac] sm:$0xf]  ;;  %v11009_v0 = vld [vmem:[#allocation10 + $0x4c] sm:$0xf0]  ;;  %v9286_v23 = vld [vmem:[#allocation10 + $0x1c0] sm:$0xf] }
 0x4ae   : > { %v9023_v19 = vor.u32 %v11148_v40, %v9020_v11  ;;  %v9062_v40 = vld [vmem:[#allocation10] sm:$0xf]  ;;  %v11001_v11 = vld [vmem:[#allocation10 + $0xc] sm:$0xf0] }
 0x4b1   : > { %4511 = vmatpush.bf16.msrb.mxu3 %v8795_v56  ;;  %4486 = vmatpush.bf16.msra.mxu1 %v8903_v7  ;;  %v11146_v7 = vld [vmem:[#allocation10 + $0x494] sm:$0xf0] }
 0x4b5   : > { %4512 = vmatpush.bf16.msrb.mxu3 %v8779_v47  ;;  %4487 = vmatpush.bf16.msra.mxu1 %v8887_v63  ;;  %v11021_v47 = vld [vmem:[#allocation10 + $0xac] sm:$0xf0]  ;;  %v9110_v63 = vld [vmem:[#allocation10 + $0x60] sm:$0xf] }
 0x4b6   : > { %v9143_v43 = vor.u32 %v11021_v47, %v9142_v42  ;;  %v8780_v42 = vld [vmem:[#allocation10 + $0x2d8] sm:$0xf0] }
 0x4b9   : > { %4513 = vmatpush.bf16.msrb.mxu3 %v8763_v58  ;;  %4488 = vmatpush.bf16.msra.mxu1 %v8871_v5  ;;  %v9002_v58 = vld [vmem:[#allocation10 + $0x488] sm:$0xf]  ;;  %v11061_v5 = vld [vmem:[#allocation10 + $0x1ec] sm:$0xf0] }
 0x4ba   : > { %v9003_v45 = vor.u32 %v11146_v7, %v9002_v58  ;;  %v9303_v1 = vor.u32 %v11061_v5, %v9302_v49  ;;  %v11084_v58 = vld [vmem:[#allocation10 + $0x2ac] sm:$0xf]  ;;  %v8764_v7 = vld [vmem:[#allocation10 + $0x2b8] sm:$0xf0] }
 0x4bb   : > { %v8908_v49 = vld [vmem:[#allocation10 + $0x3d8] sm:$0xf0] }
 0x4bd   : > { %4514 = vmatpush.bf16.msrb.mxu3 %v8747_v17  ;;  %v8988_v17 = vld [vmem:[#allocation10 + $0x478] sm:$0xf0] }
 0x503   : > { %v3821_v24 = vpop.f32.mrf.mxu3 }
 0x505   : > { %v3801_v46 = vpop.f32.mrf.mxu1 }
 0x506   : > { %v3844_v4 = vpack.c.bf16 %v3821_v24, %v3801_v46  ;;  %v8831_v24 = vor.u32 %v11100_v22, %v8828_v31  ;;  %v8991_v46 = vor.u32 %v11140_v12, %v8988_v17  ;;  %v9352_v22 = vld [vmem:[#allocation10 + $0x250] sm:$0xf0]  ;;  %v8767_v31 = vor.u32 %v11084_v58, %v8764_v7  ;;  %v11080_v12 = vld [vmem:[#allocation10 + $0x28c] sm:$0xf]  ;;  %v9318_v58 = vld [vmem:[#allocation10 + $0x200] sm:$0xf] }
 0x508   : > { %v4009_v44 = vunpack.c.l.b16 %v3844_v4  ;;  %v4010_v62 = vunpack.c.h.b16 %v3844_v4  ;;  %v9111_v4 = vor.u32 %v11013_v48, %v9110_v63  ;;  %v8748_v63 = vld [vmem:[#allocation10 + $0x298] sm:$0xf0]  ;;  %v11120_v48 = vld [vmem:[#allocation10 + $0x3cc] sm:$0xf] }
 0x50a   : > { %v13163_v55 = vpack.c.b16 %v4009_v44, %v4009_v44  ;;  %v13165_v32 = vpack.c.b16 %v4010_v62, %v4010_v62  ;;  %v11096_v44 = vld [vmem:[#allocation10 + $0x30c] sm:$0xf]  ;;  %v8812_v62 = vld [vmem:[#allocation10 + $0x318] sm:$0xf0] }
 0x50b   : > { %v8815_v10 = vor.u32 %v11096_v44, %v8812_v62  ;;  %v11077_v44 = vld [vmem:[#allocation10 + $0x26c] sm:$0xf0] }
 0x50c   : > { %v13168_v57 = vshrl.u32 %v13163_v55, 16  ;;  %v13171_v25 = vshrl.u32 %v13165_v32, 16  ;;  %v11041_v62 = vld [vmem:[#allocation10 + $0x14c] sm:$0xf0] }
 0x50d   : > { %v3841_v56 = vpop.f32.mrf.mxu1 }
 0x50e   : > { %v3845_v29 = vpack.c.bf16 %v3841_v56, %v3841_v56  ;;  %4437 = vmatmul.bf16.vlgmr.msra.gmra.mxu2 %v13168_v57  ;;  %4450 = vmatmul.bf16.vlgmr.msra.gmra.mxu3 %v13171_v25  ;;  %v11132_v56 = vld [vmem:[#allocation10 + $0x42c] sm:$0xf] }
 0x50f   : > { %4476 = vmatmul.bf16.vlgmr.msrb.gmra.mxu0 %v13168_v57  ;;  %4537 = vmatpush.bf16.msra.mxu2 %v9051_v37  ;;  %v11057_v37 = vld [vmem:[#allocation10 + $0x1cc] sm:$0xf0] }
 0x510   : > { %v4011_v18 = vunpack.c.l.b16 %v3845_v29  ;;  %4989 = vmatpush.bf16.msrb.mxu0 %v9175_v35  ;;  %4576 = vmatpush.bf16.msra.mxu3 %v9055_v20  ;;  %v8975_v35 = vor.u32 %v11136_v61, %v8972_v27  ;;  %v9095_v20 = vor.u32 %v11009_v0, %v9094_v26  ;;  %v9287_v54 = vor.u32 %v11057_v37, %v9286_v23  ;;  %v11005_v29 = vld [vmem:[#allocation10 + $0x2c] sm:$0xf0]  ;;  %v11067_v61 = vld [vmem:[#allocation10 + $0x224] sm:$0xf]  ;;  %v11116_v23 = vld [vmem:[#allocation10 + $0x3ac] sm:$0xf] }
 0x511   : > { %v8751_v27 = vor.u32 %v11080_v12, %v8748_v63  ;;  %v8911_v26 = vor.u32 %v11120_v48, %v8908_v49  ;;  %v8892_v37 = vld [vmem:[#allocation10 + $0x3b8] sm:$0xf0]  ;;  %v11026_v12 = vld [vmem:[#allocation10 + $0xd4] sm:$0xf0] }
 0x512   : > { %v13176_v13 = vpack.c.b16 %v4011_v18, %v4011_v18  ;;  %v11088_v18 = vld [vmem:[#allocation10 + $0x2cc] sm:$0xf]  ;;  %v11054_v63 = vld [vmem:[#allocation10 + $0x1b4] sm:$0xf0] }
 0x513   : > { %4538 = vmatpush.bf16.msra.mxu2 %v9035_v30  ;;  %v9270_v30 = vld [vmem:[#allocation10 + $0x1a0] sm:$0xf]  ;;  %v8783_v50 = vor.u32 %v11088_v18, %v8780_v42  ;;  %v8876_v18 = vld [vmem:[#allocation10 + $0x398] sm:$0xf0] }
 0x514   : > { %4990 = vmatpush.bf16.msrb.mxu0 %v9159_v34  ;;  %4577 = vmatpush.bf16.msra.mxu3 %v9039_v15  ;;  %v13179_v38 = vshrl.u32 %v13176_v13, 16  ;;  %v8959_v34 = vor.u32 %v11132_v56, %v8956_v3  ;;  %v9079_v15 = vor.u32 %v11005_v29, %v9078_v53  ;;  %v9271_v47 = vor.u32 %v11053_v52, %v9270_v30  ;;  %v11037_v56 = vld [vmem:[#allocation10 + $0x12c] sm:$0xf0]  ;;  %v9320_v3 = vld [vmem:[#allocation10 + $0x210] sm:$0xf0] }
 0x515   : > { %v9310_v53 = vld [vmem:[#allocation10 + $0x1e8] sm:$0xf]  ;;  %v11062_v29 = vld [vmem:[#allocation10 + $0x1f4] sm:$0xf0]  ;;  %v8895_v30 = vor.u32 %v11116_v23, %v8892_v37  ;;  %v9351_v52 = vor.u32 %v11073_v9, %v9350_v33 }
 0x516   : > { %9056 = vmatmul.msk.bf16.vlgmr.msrb.gmra.mxu1 %vm3754_vm8, %v13179_v38  ;;  %v9134_v9 = vld [vmem:[#allocation10 + $0x88] sm:$0xf] }
 0x517   : > { %4546 = vmatpush.bf16.msrb.mxu1 %v8863_v60  ;;  %4539 = vmatpush.bf16.msra.mxu2 %v9019_v41  ;;  %v9254_v60 = vld [vmem:[#allocation10 + $0x180] sm:$0xf]  ;;  %v11049_v41 = vld [vmem:[#allocation10 + $0x18c] sm:$0xf0] }
 0x518   : > { %4991 = vmatpush.bf16.msrb.mxu0 %v9143_v43  ;;  %4578 = vmatpush.bf16.msra.mxu3 %v9023_v19  ;;  %v8943_v43 = vor.u32 %v11128_v2, %v8940_v39  ;;  %v9063_v19 = vor.u32 %v11001_v11, %v9062_v40  ;;  %v9255_v51 = vor.u32 %v11049_v41, %v9254_v60  ;;  %v11033_v2 = vld [vmem:[#allocation10 + $0x10c] sm:$0xf0]  ;;  %v9334_v39 = vld [vmem:[#allocation10 + $0x220] sm:$0xf]  ;;  %v11027_v11 = vld [vmem:[#allocation10 + $0xe4] sm:$0xf] }
 0x519   : > { %v9311_v40 = vor.u32 %v11062_v29, %v9310_v53  ;;  %v9176_v60 = vld [vmem:[#allocation10 + $0xf0] sm:$0xf0]  ;;  %v9182_v41 = vld [vmem:[#allocation10 + $0xe8] sm:$0xf]  ;;  %v11046_v29 = vld [vmem:[#allocation10 + $0x174] sm:$0xf0] }
 0x51a   : > { %v9246_v53 = vld [vmem:[#allocation10 + $0x168] sm:$0xf] }
 0x51b   : > { %4547 = vmatpush.bf16.msrb.mxu1 %v8847_v14  ;;  %4540 = vmatpush.bf16.msra.mxu2 %v9003_v45  ;;  %v8924_v14 = vld [vmem:[#allocation10 + $0x3f8] sm:$0xf0]  ;;  %v9238_v45 = vld [vmem:[#allocation10 + $0x160] sm:$0xf] }
 0x51c   : > { %4992 = vmatpush.bf16.msrb.mxu0 %v9127_v28  ;;  %4579 = vmatpush.bf16.msra.mxu3 %v9007_v8  ;;  %v11045_v28 = vld [vmem:[#allocation10 + $0x16c] sm:$0xf0]  ;;  %v11071_v8 = vld [vmem:[#allocation10 + $0x244] sm:$0xf]  ;;  %v8927_v17 = vor.u32 %v11124_v59, %v8924_v14  ;;  %v9160_v14 = vld [vmem:[#allocation10 + $0xd0] sm:$0xf0] }
 0x51d   : > { %v9239_v5 = vor.u32 %v11045_v28, %v9238_v45  ;;  %v11023_v59 = vld [vmem:[#allocation10 + $0xc4] sm:$0xf]  ;;  %v9183_v45 = vor.u32 %v11030_v21, %v9182_v41 }
 0x51e   : > { %9057 = vmatmul.msk.bf16.vlgmr.msrb.gmra.mxu2 %vm3754_vm8, %v13179_v38  ;;  %4515 = vmatmul.bf16.vlgmr.msrb.gmra.mxu3 %v13168_v57  ;;  %v9163_v49 = vor.u32 %v11023_v59, %v9160_v14  ;;  %v11007_v21 = vld [vmem:[#allocation10 + $0x44] sm:$0xf]  ;;  %v11038_v59 = vld [vmem:[#allocation10 + $0x134] sm:$0xf0] }
 0x51f   : > { %4528 = vmatmul.bf16.vlgmr.msra.gmra.mxu0 %v13171_v25  ;;  %4548 = vmatpush.bf16.msrb.mxu1 %v8831_v24  ;;  %v9355_v24 = vor.u32 %v11071_v8, %v9352_v22  ;;  %v9166_v8 = vld [vmem:[#allocation10 + $0xc8] sm:$0xf]  ;;  %v11059_v22 = vld [vmem:[#allocation10 + $0x1e4] sm:$0xf] }
 0x520   : > { %4559 = vmatpush.bf16.msrb.mxu2 %v8991_v46  ;;  %4993 = vmatpush.bf16.msrb.mxu0 %v9111_v4  ;;  %v9222_v46 = vld [vmem:[#allocation10 + $0x140] sm:$0xf] }
 0x521   : > { %5002 = vmatpush.bf16.msrb.mxu3 %v9303_v1  ;;  %v9366_v4 = vld [vmem:[#allocation10 + $0x260] sm:$0xf]  ;;  %v9336_v1 = vld [vmem:[#allocation10 + $0x230] sm:$0xf0] }
 0x522   : > { %v9367_v0 = vor.u32 %v11077_v44, %v9366_v4  ;;  %v9167_v4 = vor.u32 %v11026_v12, %v9166_v8  ;;  %v9080_v8 = vld [vmem:[#allocation10 + $0x30] sm:$0xf0]  ;;  %v9086_v12 = vld [vmem:[#allocation10 + $0x28] sm:$0xf] }
 0x523   : > { %4549 = vmatpush.bf16.msrb.mxu1 %v8815_v10  ;;  %v9223_v10 = vor.u32 %v11041_v62, %v9222_v46  ;;  %v9144_v46 = vld [vmem:[#allocation10 + $0xb0] sm:$0xf0]  ;;  %v9150_v62 = vld [vmem:[#allocation10 + $0xa8] sm:$0xf] }
 0x524   : > { %4560 = vmatpush.bf16.msrb.mxu2 %v8975_v35  ;;  %4994 = vmatpush.bf16.msrb.mxu0 %v9095_v20  ;;  %v9339_v35 = vor.u32 %v11067_v61, %v9336_v1  ;;  %v9206_v20 = vld [vmem:[#allocation10 + $0x120] sm:$0xf]  ;;  %v11055_v61 = vld [vmem:[#allocation10 + $0x1c4] sm:$0xf]  ;;  %v9288_v1 = vld [vmem:[#allocation10 + $0x1d0] sm:$0xf0] }
 0x525   : > { %5003 = vmatpush.bf16.msrb.mxu3 %v9287_v54  ;;  %v11063_v54 = vld [vmem:[#allocation10 + $0x204] sm:$0xf]  ;;  %v9291_v37 = vor.u32 %v11055_v61, %v9288_v1 }
 0x526   : > { %4489 = vmatmul.bf16.vlgmr.msra.gmra.mxu1 %v13171_v25  ;;  %v9323_v42 = vor.u32 %v11063_v54, %v9320_v3  ;;  %v9272_v54 = vld [vmem:[#allocation10 + $0x1b0] sm:$0xf0]  ;;  %v11018_v3 = vld [vmem:[#allocation10 + $0x94] sm:$0xf0] }
 0x527   : > { %4550 = vmatpush.bf16.msrb.mxu1 %v8799_v6  ;;  %v11112_v6 = vld [vmem:[#allocation10 + $0x38c] sm:$0xf] }
 0x528   : > { %4561 = vmatpush.bf16.msrb.mxu2 %v8959_v34  ;;  %4995 = vmatpush.bf16.msrb.mxu0 %v9079_v15  ;;  %v9190_v34 = vld [vmem:[#allocation10 + $0x100] sm:$0xf]  ;;  %v9207_v15 = vor.u32 %v11037_v56, %v9206_v20  ;;  %v11051_v56 = vld [vmem:[#allocation10 + $0x1a4] sm:$0xf] }
 0x529   : > { %5004 = vmatpush.bf16.msrb.mxu3 %v9271_v47  ;;  %v11069_v47 = vld [vmem:[#allocation10 + $0x22c] sm:$0xf0]  ;;  %v9191_v7 = vor.u32 %v11033_v2, %v9190_v34  ;;  %v9135_v34 = vor.u32 %v11018_v3, %v9134_v9  ;;  %v11047_v2 = vld [vmem:[#allocation10 + $0x184] sm:$0xf]  ;;  %v9376_v9 = vld [vmem:[#allocation10 + $0x278] sm:$0xf0] }
 0x52a   : > { %v11185_v3 = vld [vmem:[#allocation10 + $0x5cc] sm:$0xf0] }
 0x52b   : > { %4551 = vmatpush.bf16.msrb.mxu1 %v8783_v50  ;;  %v11058_v50 = vld [vmem:[#allocation10 + $0x1d4] sm:$0xf0] }
 0x52c   : > { %4562 = vmatpush.bf16.msrb.mxu2 %v8943_v43  ;;  %4996 = vmatpush.bf16.msrb.mxu0 %v9063_v19  ;;  %v8879_v43 = vor.u32 %v11112_v6, %v8876_v18  ;;  %v9335_v19 = vor.u32 %v11069_v47, %v9334_v39  ;;  %v9295_v28 = vor.u32 %v11058_v50, %v9294_v36  ;;  %v11011_v6 = vld [vmem:[#allocation10 + $0x64] sm:$0xf]  ;;  %v9112_v18 = vld [vmem:[#allocation10 + $0x70] sm:$0xf0]  ;;  %v11014_v47 = vld [vmem:[#allocation10 + $0x74] sm:$0xf0] }
 0x52d   : > { %5005 = vmatpush.bf16.msrb.mxu3 %v9255_v51  ;;  %v9179_v51 = vor.u32 %v11027_v11, %v9176_v60  ;;  %v9256_v39 = vld [vmem:[#allocation10 + $0x190] sm:$0xf0]  ;;  %v11042_v11 = vld [vmem:[#allocation10 + $0x154] sm:$0xf0]  ;;  %v9115_v60 = vor.u32 %v11011_v6, %v9112_v18 }
 0x52e   : > { %9058 = vmatmul.msk.bf16.vlgmr.msra.gmra.mxu2 %vm3754_vm8, %v13179_v38  ;;  %9059 = vmatmul.msk.bf16.vlgmr.msra.gmra.mxu3 %vm3754_vm8, %v13179_v38  ;;  %v9259_v41 = vor.u32 %v11047_v2, %v9256_v39  ;;  %v9096_v36 = vld [vmem:[#allocation10 + $0x50] sm:$0xf0]  ;;  %v11072_v2 = vld [vmem:[#allocation10 + $0x24c] sm:$0xf]  ;;  %v9360_v39 = vld [vmem:[#allocation10 + $0x258] sm:$0xf0] }
 0x52f   : > { %4552 = vmatpush.bf16.msrb.mxu1 %v8767_v31  ;;  %4997 = vmatmul.bf16.vlgmr.msrb.gmra.mxu0 %v13163_v55  ;;  %v9304_v31 = vld [vmem:[#allocation10 + $0x1f0] sm:$0xf0]  ;;  %v9099_v14 = vor.u32 %v11007_v21, %v9096_v36  ;;  %v9363_v36 = vor.u32 %v11072_v2, %v9360_v39  ;;  %v11165_v2 = vld [vmem:[#allocation10 + $0x52c] sm:$0xf0]  ;;  %v9594_v39 = vld [vmem:[#allocation10 + $0x6a0] sm:$0xf] }
 0x530   : > { %5058 = vmatpush.bf16.msra.mxu0 %v9371_v16  ;;  %4563 = vmatpush.bf16.msrb.mxu2 %v8927_v17  ;;  %v11065_v16 = vld [vmem:[#allocation10 + $0x20c] sm:$0xf0]  ;;  %v9278_v17 = vld [vmem:[#allocation10 + $0x1a8] sm:$0xf]  ;;  %v9192_v18 = vld [vmem:[#allocation10 + $0x110] sm:$0xf0] }
 0x531   : > { %5006 = vmatpush.bf16.msrb.mxu3 %v9239_v5  ;;  %v9319_v48 = vor.u32 %v11065_v16, %v9318_v58  ;;  %v9307_v5 = vor.u32 %v11059_v22, %v9304_v31  ;;  %v9279_v44 = vor.u32 %v11054_v63, %v9278_v17  ;;  %v11043_v58 = vld [vmem:[#allocation10 + $0x164] sm:$0xf]  ;;  %v9214_v16 = vld [vmem:[#allocation10 + $0x128] sm:$0xf]  ;;  %v9224_v63 = vld [vmem:[#allocation10 + $0x150] sm:$0xf0] }
 0x532   : > { %v9215_v31 = vor.u32 %v11038_v59, %v9214_v16  ;;  %v11039_v17 = vld [vmem:[#allocation10 + $0x144] sm:$0xf]  ;;  %v11024_v16 = vld [vmem:[#allocation10 + $0xcc] sm:$0xf]  ;;  %v9168_v59 = vld [vmem:[#allocation10 + $0xd8] sm:$0xf0] }
 0x533   : > { %4553 = vmatpush.bf16.msrb.mxu1 %v8751_v27  ;;  %v11022_v27 = vld [vmem:[#allocation10 + $0xb4] sm:$0xf0] }
 0x534   : > { %5059 = vmatpush.bf16.msra.mxu0 %v9355_v24  ;;  %4564 = vmatpush.bf16.msrb.mxu2 %v8911_v26  ;;  %v11019_v24 = vld [vmem:[#allocation10 + $0xa4] sm:$0xf]  ;;  %v9262_v26 = vld [vmem:[#allocation10 + $0x188] sm:$0xf]  ;;  %v9151_v20 = vor.u32 %v11022_v27, %v9150_v62  ;;  %v9064_v27 = vld [vmem:[#allocation10 + $0x10] sm:$0xf0] }
 0x535   : > { %5007 = vmatpush.bf16.msrb.mxu3 %v9223_v10  ;;  %v9147_v23 = vor.u32 %v11019_v24, %v9144_v46  ;;  %v11015_v10 = vld [vmem:[#allocation10 + $0x84] sm:$0xf]  ;;  %v9498_v24 = vld [vmem:[#allocation10 + $0x5e0] sm:$0xf]  ;;  %v11189_v46 = vld [vmem:[#allocation10 + $0x5ec] sm:$0xf0] }
 0x536   : > { %4554 = vmatmul.bf16.vlgmr.msrb.gmra.mxu1 %v13168_v57  ;;  %v10999_v62 = vld [vmem:[#allocation10 + $0x4] sm:$0xf] }
 0x537   : > { %5019 = vmatpush.bf16.msra.mxu1 %v9367_v0  ;;  %v11050_v0 = vld [vmem:[#allocation10 + $0x194] sm:$0xf0] }
 0x538   : > { %5060 = vmatpush.bf16.msra.mxu0 %v9339_v35  ;;  %4565 = vmatpush.bf16.msrb.mxu2 %v8895_v30  ;;  %v9128_v35 = vld [vmem:[#allocation10 + $0x90] sm:$0xf0]  ;;  %v9263_v33 = vor.u32 %v11050_v0, %v9262_v26  ;;  %v9070_v26 = vld [vmem:[#allocation10 + $0x8] sm:$0xf]  ;;  %v11002_v0 = vld [vmem:[#allocation10 + $0x14] sm:$0xf0] }
 0x539   : > { %5008 = vmatpush.bf16.msrb.mxu3 %v9207_v15  ;;  %v9131_v30 = vor.u32 %v11015_v10, %v9128_v35  ;;  %v9247_v15 = vor.u32 %v11046_v29, %v9246_v53  ;;  %v9208_v10 = vld [vmem:[#allocation10 + $0x130] sm:$0xf0]  ;;  %v9374_v35 = vld [vmem:[#allocation10 + $0x268] sm:$0xf]  ;;  %v9071_v53 = vor.u32 %v11002_v0, %v9070_v26 }
 0x53b   : > { %5020 = vmatpush.bf16.msra.mxu1 %v9351_v52  ;;  %v9275_v52 = vor.u32 %v11051_v56, %v9272_v54  ;;  %v9067_v56 = vor.u32 %v10999_v62, %v9064_v27  ;;  %v9482_v54 = vld [vmem:[#allocation10 + $0x5c0] sm:$0xf] }
 0x53c   : > { %5061 = vmatpush.bf16.msra.mxu0 %v9323_v42  ;;  %4566 = vmatpush.bf16.msrb.mxu2 %v8879_v43  ;;  %v9118_v42 = vld [vmem:[#allocation10 + $0x68] sm:$0xf]  ;;  %v9626_v62 = vld [vmem:[#allocation10 + $0x6e0] sm:$0xf] }
 0x53d   : > { %5009 = vmatpush.bf16.msrb.mxu3 %v9191_v7  ;;  %v9119_v50 = vor.u32 %v11014_v47, %v9118_v42  ;;  %v9240_v7 = vld [vmem:[#allocation10 + $0x170] sm:$0xf0]  ;;  %v9483_v42 = vor.u32 %v11185_v3, %v9482_v54  ;;  %v11028_v47 = vld [vmem:[#allocation10 + $0xec] sm:$0xf]  ;;  %v9610_v54 = vld [vmem:[#allocation10 + $0x6c0] sm:$0xf] }
 0x53e   : > { %v11217_v3 = vld [vmem:[#allocation10 + $0x6cc] sm:$0xf0] }
 0x53f   : > { %5021 = vmatpush.bf16.msra.mxu1 %v9335_v19  ;;  %4567 = vmatmul.bf16.vlgmr.msrb.gmra.mxu2 %v13171_v25  ;;  %v9102_v19 = vld [vmem:[#allocation10 + $0x48] sm:$0xf] }
 0x540   : > { %5080 = vmatpush.bf16.msrb.mxu0 %v9311_v40  ;;  %5028 = vmatpush.bf16.msra.mxu2 %v9179_v51  ;;  %v9230_v40 = vld [vmem:[#allocation10 + $0x148] sm:$0xf]  ;;  %v11010_v51 = vld [vmem:[#allocation10 + $0x54] sm:$0xf0] }
 0x541   : > { %5067 = vmatpush.bf16.msra.mxu3 %v9183_v45  ;;  %9381 = vmatmul.msk.bf16.vlgmr.msra.gmra.mxu0 %vm3754_vm8, %v13176_v13  ;;  %v9231_v43 = vor.u32 %v11042_v11, %v9230_v40  ;;  %v9243_v45 = vor.u32 %v11043_v58, %v9240_v7  ;;  %v9103_v22 = vor.u32 %v11010_v51, %v9102_v19  ;;  %v9184_v40 = vld [vmem:[#allocation10 + $0xf8] sm:$0xf0]  ;;  %v9466_v11 = vld [vmem:[#allocation10 + $0x5a0] sm:$0xf]  ;;  %v11068_v7 = vld [vmem:[#allocation10 + $0x22c] sm:$0xf] }
 0x542   : > { %5010 = vmatmul.bf16.vlgmr.msrb.gmra.mxu3 %v13165_v32  ;;  %v9187_v19 = vor.u32 %v11028_v47, %v9184_v40  ;;  %v9344_v51 = vld [vmem:[#allocation10 + $0x238] sm:$0xf0]  ;;  %v11213_v47 = vld [vmem:[#allocation10 + $0x6ac] sm:$0xf0] }
 0x543   : > { %5022 = vmatpush.bf16.msra.mxu1 %v9319_v48  ;;  %v11006_v48 = vld [vmem:[#allocation10 + $0x34] sm:$0xf0] }
 0x544   : > { %5081 = vmatpush.bf16.msrb.mxu0 %v9295_v28  ;;  %5029 = vmatpush.bf16.msra.mxu2 %v9163_v49  ;;  %v11003_v28 = vld [vmem:[#allocation10 + $0x24] sm:$0xf]  ;;  %v9198_v49 = vld [vmem:[#allocation10 + $0x108] sm:$0xf]  ;;  %v9087_v61 = vor.u32 %v11006_v48, %v9086_v12  ;;  %v11064_v12 = vld [vmem:[#allocation10 + $0x20c] sm:$0xf] }
 0x545   : > { %5068 = vmatpush.bf16.msra.mxu3 %v9167_v4  ;;  %v9083_v4 = vor.u32 %v11003_v28, %v9080_v8  ;;  %v9347_v8 = vor.u32 %v11068_v7, %v9344_v51  ;;  %v9328_v48 = vld [vmem:[#allocation10 + $0x218] sm:$0xf0]  ;;  %v9578_v7 = vld [vmem:[#allocation10 + $0x680] sm:$0xf]  ;;  %v11209_v51 = vld [vmem:[#allocation10 + $0x68c] sm:$0xf0] }
 0x546   : > { %9380 = vmatmul.msk.bf16.vlgmr.msra.gmra.mxu1 %vm3754_vm8, %v13176_v13  ;;  %v9331_v27 = vor.u32 %v11064_v12, %v9328_v48  ;;  %v11044_v12 = vld [vmem:[#allocation10 + $0x16c] sm:$0xf]  ;;  %v9562_v48 = vld [vmem:[#allocation10 + $0x660] sm:$0xf] }
 0x547   : > { %5041 = vmatpush.bf16.msrb.mxu1 %v9307_v5  ;;  %v11034_v5 = vld [vmem:[#allocation10 + $0x114] sm:$0xf0] }
 0x548   : > { %5082 = vmatpush.bf16.msrb.mxu0 %v9279_v44  ;;  %5030 = vmatpush.bf16.msra.mxu2 %v9147_v23  ;;  %v9227_v44 = vor.u32 %v11039_v17, %v9224_v63  ;;  %v9199_v1 = vor.u32 %v11034_v5, %v9198_v49  ;;  %v9499_v23 = vor.u32 %v11189_v46, %v9498_v24  ;;  %v11020_v49 = vld [vmem:[#allocation10 + $0xac] sm:$0xf]  ;;  %v9152_v5 = vld [vmem:[#allocation10 + $0xb8] sm:$0xf0] }
 0x549   : > { %5069 = vmatpush.bf16.msra.mxu3 %v9151_v20  ;;  %v11078_v20 = vld [vmem:[#allocation10 + $0x274] sm:$0xf0]  ;;  %v9171_v17 = vor.u32 %v11024_v16, %v9168_v59  ;;  %v11060_v24 = vld [vmem:[#allocation10 + $0x1ec] sm:$0xf]  ;;  %v9312_v46 = vld [vmem:[#allocation10 + $0x1f8] sm:$0xf0]  ;;  %v9155_v26 = vor.u32 %v11020_v49, %v9152_v5 }
 0x54a   : > { %v9315_v0 = vor.u32 %v11060_v24, %v9312_v46  ;;  %v11235_v16 = vld [vmem:[#allocation10 + $0x764] sm:$0xf]  ;;  %v9692_v59 = vld [vmem:[#allocation10 + $0x770] sm:$0xf0]  ;;  %v11205_v49 = vld [vmem:[#allocation10 + $0x66c] sm:$0xf0] }
 0x54b   : > { %5042 = vmatpush.bf16.msrb.mxu1 %v9291_v37  ;;  %v11035_v37 = vld [vmem:[#allocation10 + $0x124] sm:$0xf]  ;;  %v9676_v24 = vld [vmem:[#allocation10 + $0x750] sm:$0xf0]  ;;  %v13209_v46 = vrot.slane %v13163_v55, 1 }
 0x54c   : > { %5083 = vmatpush.bf16.msrb.mxu0 %v9263_v33  ;;  %5031 = vmatpush.bf16.msra.mxu2 %v9131_v30  ;;  %v11076_v33 = vld [vmem:[#allocation10 + $0x26c] sm:$0xf]  ;;  %v9211_v29 = vor.u32 %v11035_v37, %v9208_v10  ;;  %v11031_v30 = vld [vmem:[#allocation10 + $0x104] sm:$0xf]  ;;  %v9136_v37 = vld [vmem:[#allocation10 + $0x98] sm:$0xf0] }
 0x54d   : > { %5070 = vmatpush.bf16.msra.mxu3 %v9135_v34  ;;  %v9379_v6 = vor.u32 %v11076_v33, %v9376_v9  ;;  %v9358_v34 = vld [vmem:[#allocation10 + $0x248] sm:$0xf]  ;;  %v9296_v33 = vld [vmem:[#allocation10 + $0x1d8] sm:$0xf0]  ;;  %v9418_v9 = vld [vmem:[#allocation10 + $0x540] sm:$0xf] }
 0x54e   : > { %v11231_v5 = vld [vmem:[#allocation10 + $0x744] sm:$0xf] }
 0x54f   : > { %5043 = vmatpush.bf16.msrb.mxu1 %v9275_v52  ;;  %v9375_v52 = vor.u32 %v11078_v20, %v9374_v35  ;;  %v11056_v20 = vld [vmem:[#allocation10 + $0x1cc] sm:$0xf] }
 0x550   : > { %5084 = vmatpush.bf16.msrb.mxu0 %v9247_v15  ;;  %5032 = vmatpush.bf16.msra.mxu2 %v9115_v60  ;;  %v11074_v15 = vld [vmem:[#allocation10 + $0x254] sm:$0xf0]  ;;  %v11181_v60 = vld [vmem:[#allocation10 + $0x5ac] sm:$0xf0] }
 0x551   : > { %5071 = vmatpush.bf16.msra.mxu3 %v9119_v50  ;;  %v9359_v21 = vor.u32 %v11074_v15, %v9358_v34  ;;  %v9342_v50 = vld [vmem:[#allocation10 + $0x228] sm:$0xf]  ;;  %v9467_v58 = vor.u32 %v11181_v60, %v9466_v11  ;;  %v11052_v34 = vld [vmem:[#allocation10 + $0x1ac] sm:$0xf]  ;;  %v9280_v15 = vld [vmem:[#allocation10 + $0x1b8] sm:$0xf0] }
 0x552   : > { %v9283_v11 = vor.u32 %v11052_v34, %v9280_v15  ;;  %v11008_v60 = vld [vmem:[#allocation10 + $0x4c] sm:$0xf]  ;;  %v11233_v34 = vld [vmem:[#allocation10 + $0x74c] sm:$0xf0]  ;;  %v11223_v15 = vld [vmem:[#allocation10 + $0x704] sm:$0xf] }
 0x553   : > { %5044 = vmatpush.bf16.msrb.mxu1 %v9259_v41  ;;  %v9195_v41 = vor.u32 %v11031_v30, %v9192_v18  ;;  %v11012_v30 = vld [vmem:[#allocation10 + $0x6c] sm:$0xf]  ;;  %v9611_v18 = vor.u32 %v11217_v3, %v9610_v54 }
 0x554   : > { %5085 = vmatpush.bf16.msrb.mxu0 %v9231_v43  ;;  %5033 = vmatpush.bf16.msra.mxu2 %v9099_v14  ;;  %v11070_v43 = vld [vmem:[#allocation10 + $0x234] sm:$0xf0]  ;;  %v9450_v14 = vld [vmem:[#allocation10 + $0x580] sm:$0xf]  ;;  %v11036_v3 = vld [vmem:[#allocation10 + $0x12c] sm:$0xf] }
 0x555   : > { %5072 = vmatpush.bf16.msra.mxu3 %v9103_v22  ;;  %v9343_v28 = vor.u32 %v11070_v43, %v9342_v50  ;;  %v9326_v22 = vld [vmem:[#allocation10 + $0x208] sm:$0xf]  ;;  %v11048_v50 = vld [vmem:[#allocation10 + $0x18c] sm:$0xf]  ;;  %v9264_v43 = vld [vmem:[#allocation10 + $0x198] sm:$0xf0] }
 0x557   : > { %5045 = vmatpush.bf16.msrb.mxu1 %v9243_v45  ;;  %v11177_v45 = vld [vmem:[#allocation10 + $0x58c] sm:$0xf0] }
 0x558   : > { %5086 = vmatpush.bf16.msrb.mxu0 %v9215_v31  ;;  %5034 = vmatpush.bf16.msra.mxu2 %v9083_v4  ;;  %v11066_v31 = vld [vmem:[#allocation10 + $0x214] sm:$0xf0]  ;;  %v9451_v63 = vor.u32 %v11177_v45, %v9450_v14  ;;  %v9434_v4 = vld [vmem:[#allocation10 + $0x560] sm:$0xf]  ;;  %v9267_v45 = vor.u32 %v11048_v50, %v9264_v43  ;;  %v11193_v50 = vld [vmem:[#allocation10 + $0x60c] sm:$0xf0] }
 0x559   : > { %5073 = vmatpush.bf16.msra.mxu3 %v9087_v61  ;;  %v11221_v61 = vld [vmem:[#allocation10 + $0x6ec] sm:$0xf0]  ;;  %v9658_v43 = vld [vmem:[#allocation10 + $0x720] sm:$0xf] }
 0x55a   : > { %v9627_v35 = vor.u32 %v11221_v61, %v9626_v62  ;;  %v9563_v61 = vor.u32 %v11205_v49, %v9562_v48  ;;  %v11183_v49 = vld [vmem:[#allocation10 + $0x5c4] sm:$0xf] }
 0x55b   : > { %5046 = vmatpush.bf16.msrb.mxu1 %v9227_v44  ;;  %v11173_v44 = vld [vmem:[#allocation10 + $0x56c] sm:$0xf0] }
 0x55c   : > { %5087 = vmatpush.bf16.msrb.mxu0 %v9199_v1  ;;  %5035 = vmatpush.bf16.msra.mxu2 %v9067_v56  ;;  %v9327_v1 = vor.u32 %v11066_v31, %v9326_v22  ;;  %v9435_v10 = vor.u32 %v11173_v44, %v9434_v4  ;;  %v11169_v56 = vld [vmem:[#allocation10 + $0x54c] sm:$0xf0]  ;;  %v11004_v22 = vld [vmem:[#allocation10 + $0x2c] sm:$0xf]  ;;  %v9088_v31 = vld [vmem:[#allocation10 + $0x38] sm:$0xf0] }
 0x55d   : > { %5074 = vmatpush.bf16.msra.mxu3 %v9071_v53  ;;  %v9091_v4 = vor.u32 %v11004_v22, %v9088_v31  ;;  %v11000_v44 = vld [vmem:[#allocation10 + $0xc] sm:$0xf] }
 0x55f   : > { %5088 = vmatmul.bf16.vlgmr.msrb.gmra.mxu0 %v13165_v32  ;;  %5047 = vmatpush.bf16.msrb.mxu1 %v9211_v29  ;;  %v9299_v29 = vor.u32 %v11056_v20, %v9296_v33  ;;  %v11227_v20 = vld [vmem:[#allocation10 + $0x724] sm:$0xf]  ;;  %v9660_v33 = vld [vmem:[#allocation10 + $0x730] sm:$0xf0] }
 0x560   : > { %5634 = vmatpush.bf16.msra.mxu0 %v9499_v23  ;;  %5097 = vmatpush.bf16.msrb.mxu2 %v9375_v52  ;;  %v11016_v23 = vld [vmem:[#allocation10 + $0x8c] sm:$0xf]  ;;  %v9120_v52 = vld [vmem:[#allocation10 + $0x78] sm:$0xf0] }
 0x561   : > { %5136 = vmatpush.bf16.msrb.mxu3 %v9379_v6  ;;  %5036 = vmatmul.bf16.vlgmr.msra.gmra.mxu2 %v13163_v55  ;;  %v9139_v53 = vor.u32 %v11016_v23, %v9136_v37  ;;  %v9419_v6 = vor.u32 %v11169_v56, %v9418_v9  ;;  %v9123_v40 = vor.u32 %v11012_v30, %v9120_v52  ;;  %v9546_v23 = vld [vmem:[#allocation10 + $0x640] sm:$0xf]  ;;  %v11201_v37 = vld [vmem:[#allocation10 + $0x64c] sm:$0xf0] }
 0x562   : > { %5075 = vmatmul.bf16.vlgmr.msra.gmra.mxu3 %v13163_v55  ;;  %v9547_v54 = vor.u32 %v11201_v37, %v9546_v23  ;;  %v9663_v30 = vor.u32 %v11227_v20, %v9660_v33  ;;  %v9530_v52 = vld [vmem:[#allocation10 + $0x620] sm:$0xf]  ;;  %v9468_v20 = vld [vmem:[#allocation10 + $0x5b0] sm:$0xf0]  ;;  %v9474_v33 = vld [vmem:[#allocation10 + $0x5a8] sm:$0xf] }
 0x563   : > { %5048 = vmatpush.bf16.msrb.mxu1 %v9195_v41  ;;  %v9104_v41 = vld [vmem:[#allocation10 + $0x58] sm:$0xf0] }
 0x564   : > { %5635 = vmatpush.bf16.msra.mxu0 %v9483_v42  ;;  %5098 = vmatpush.bf16.msrb.mxu2 %v9359_v21  ;;  %v9402_v42 = vld [vmem:[#allocation10 + $0x520] sm:$0xf]  ;;  %v9107_v14 = vor.u32 %v11008_v60, %v9104_v41  ;;  %v9200_v60 = vld [vmem:[#allocation10 + $0x118] sm:$0xf0] }
 0x565   : > { %5137 = vmatpush.bf16.msrb.mxu3 %v9363_v36  ;;  %v9403_v21 = vor.u32 %v11165_v2, %v9402_v42  ;;  %v9595_v36 = vor.u32 %v11213_v47, %v9594_v39  ;;  %v9644_v42 = vld [vmem:[#allocation10 + $0x710] sm:$0xf0]  ;;  %v9634_v2 = vld [vmem:[#allocation10 + $0x6e8] sm:$0xf]  ;;  %v11222_v39 = vld [vmem:[#allocation10 + $0x6f4] sm:$0xf0] }
 0x566   : > { %5049 = vmatmul.bf16.vlgmr.msrb.gmra.mxu1 %v13165_v32  ;;  %v9514_v41 = vld [vmem:[#allocation10 + $0x600] sm:$0xf] }
 0x567   : > { %5106 = vmatpush.bf16.msra.mxu1 %v9187_v19  ;;  %v9386_v19 = vld [vmem:[#allocation10 + $0x500] sm:$0xf] }
 0x568   : > { %5636 = vmatpush.bf16.msra.mxu0 %v9467_v58  ;;  %5099 = vmatpush.bf16.msrb.mxu2 %v9343_v28  ;;  %v11161_v58 = vld [vmem:[#allocation10 + $0x50c] sm:$0xf0] }
 0x569   : > { %5138 = vmatpush.bf16.msrb.mxu3 %v9347_v8  ;;  %v9387_v28 = vor.u32 %v11161_v58, %v9386_v19  ;;  %v9579_v8 = vor.u32 %v11209_v51, %v9578_v7  ;;  %v11229_v19 = vld [vmem:[#allocation10 + $0x72c] sm:$0xf0]  ;;  %v9635_v58 = vor.u32 %v11222_v39, %v9634_v2  ;;  %v11187_v7 = vld [vmem:[#allocation10 + $0x5e4] sm:$0xf]  ;;  %v9500_v51 = vld [vmem:[#allocation10 + $0x5f0] sm:$0xf0] }
 0x56a   : > { %v9659_v22 = vor.u32 %v11229_v19, %v9658_v43  ;;  %v9503_v31 = vor.u32 %v11187_v7, %v9500_v51  ;;  %v11178_v39 = vld [vmem:[#allocation10 + $0x594] sm:$0xf0]  ;;  %v9436_v43 = vld [vmem:[#allocation10 + $0x570] sm:$0xf0]  ;;  %v9442_v19 = vld [vmem:[#allocation10 + $0x568] sm:$0xf] }
 0x56b   : > { %5107 = vmatpush.bf16.msra.mxu1 %v9171_v17  ;;  %v9695_v17 = vor.u32 %v11235_v16, %v9692_v59  ;;  %v9506_v16 = vld [vmem:[#allocation10 + $0x5e8] sm:$0xf]  ;;  %v11190_v59 = vld [vmem:[#allocation10 + $0x5f4] sm:$0xf0]  ;;  %v11207_v51 = vld [vmem:[#allocation10 + $0x684] sm:$0xf] }
 0x56c   : > { %5637 = vmatpush.bf16.msra.mxu0 %v9451_v63  ;;  %5100 = vmatpush.bf16.msrb.mxu2 %v9327_v1  ;;  %v9248_v63 = vld [vmem:[#allocation10 + $0x178] sm:$0xf0]  ;;  %v11174_v7 = vld [vmem:[#allocation10 + $0x574] sm:$0xf0] }
 0x56d   : > { %5139 = vmatpush.bf16.msrb.mxu3 %v9331_v27  ;;  %v9251_v62 = vor.u32 %v11044_v12, %v9248_v63  ;;  %v9072_v1 = vld [vmem:[#allocation10 + $0x18] sm:$0xf0]  ;;  %v11040_v27 = vld [vmem:[#allocation10 + $0x14c] sm:$0xf]  ;;  %v9642_v12 = vld [vmem:[#allocation10 + $0x700] sm:$0xf]  ;;  %v9507_v63 = vor.u32 %v11190_v59, %v9506_v16 }
 0x56e   : > { %v9075_v9 = vor.u32 %v11000_v44, %v9072_v1  ;;  %v11219_v44 = vld [vmem:[#allocation10 + $0x6e4] sm:$0xf]  ;;  %v11214_v1 = vld [vmem:[#allocation10 + $0x6b4] sm:$0xf0]  ;;  %v9580_v16 = vld [vmem:[#allocation10 + $0x690] sm:$0xf0] }
 0x56f   : > { %5108 = vmatpush.bf16.msra.mxu1 %v9155_v26  ;;  %v9232_v26 = vld [vmem:[#allocation10 + $0x158] sm:$0xf0] }
 0x570   : > { %5119 = vmatpush.bf16.msra.mxu2 %v9315_v0  ;;  %5638 = vmatpush.bf16.msra.mxu0 %v9435_v10  ;;  %v9679_v0 = vor.u32 %v11231_v5, %v9676_v24  ;;  %v9690_v10 = vld [vmem:[#allocation10 + $0x760] sm:$0xf]  ;;  %v9235_v56 = vor.u32 %v11040_v27, %v9232_v26  ;;  %v9484_v5 = vld [vmem:[#allocation10 + $0x5d0] sm:$0xf0]  ;;  %v9490_v24 = vld [vmem:[#allocation10 + $0x5c8] sm:$0xf] }
 0x571   : > { %5647 = vmatpush.bf16.msra.mxu3 %v9627_v35  ;;  %9382 = vmatmul.msk.bf16.vlgmr.msrb.gmra.mxu2 %vm3754_vm8, %v13176_v13  ;;  %v11237_v35 = vld [vmem:[#allocation10 + $0x76c] sm:$0xf0]  ;;  %v13214_v27 = vrot.slane %v13165_v32, 1  ;;  %v13217_v26 = vrot.slane %v13176_v13, 1  ;;  %v9487_v23 = vor.u32 %v11183_v49, %v9484_v5  ;;  %v9426_v49 = vld [vmem:[#allocation10 + $0x548] sm:$0xf] }
 0x572   : > { %9383 = vmatmul.msk.bf16.vlgmr.msrb.gmra.mxu3 %vm3754_vm8, %v13176_v13 }
 0x573   : > { %5109 = vmatpush.bf16.msra.mxu1 %v9139_v53  ;;  %v9216_v53 = vld [vmem:[#allocation10 + $0x138] sm:$0xf0] }
 0x574   : > { %5120 = vmatpush.bf16.msra.mxu2 %v9299_v29  ;;  %5639 = vmatpush.bf16.msra.mxu0 %v9419_v6  ;;  %v9691_v29 = vor.u32 %v11237_v35, %v9690_v10  ;;  %v11197_v6 = vld [vmem:[#allocation10 + $0x62c] sm:$0xf0]  ;;  %v9219_v47 = vor.u32 %v11036_v3, %v9216_v53  ;;  %v11179_v35 = vld [vmem:[#allocation10 + $0x5a4] sm:$0xf]  ;;  %v9612_v3 = vld [vmem:[#allocation10 + $0x6d0] sm:$0xf0] }
 0x575   : > { %5648 = vmatpush.bf16.msra.mxu3 %v9611_v18  ;;  %v9674_v18 = vld [vmem:[#allocation10 + $0x740] sm:$0xf]  ;;  %v9586_v53 = vld [vmem:[#allocation10 + $0x688] sm:$0xf] }
 0x577   : > { %5110 = vmatpush.bf16.msra.mxu1 %v9123_v40  ;;  %v9531_v40 = vor.u32 %v11197_v6, %v9530_v52 }
 0x578   : > { %5121 = vmatpush.bf16.msra.mxu2 %v9283_v11  ;;  %5640 = vmatpush.bf16.msra.mxu0 %v9403_v21  ;;  %v11032_v11 = vld [vmem:[#allocation10 + $0x10c] sm:$0xf]  ;;  %v9675_v21 = vor.u32 %v11233_v34, %v9674_v18  ;;  %v11175_v18 = vld [vmem:[#allocation10 + $0x584] sm:$0xf]  ;;  %v9452_v34 = vld [vmem:[#allocation10 + $0x590] sm:$0xf0] }
 0x579   : > { %5649 = vmatpush.bf16.msra.mxu3 %v9595_v36  ;;  %v9647_v36 = vor.u32 %v11223_v15, %v9644_v42  ;;  %v9458_v15 = vld [vmem:[#allocation10 + $0x588] sm:$0xf] }
 0x57b   : > { %5111 = vmatpush.bf16.msra.mxu1 %v9107_v14  ;;  %v9618_v14 = vld [vmem:[#allocation10 + $0x6c8] sm:$0xf] }
 0x57c   : > { %5122 = vmatpush.bf16.msra.mxu2 %v9267_v45  ;;  %5641 = vmatpush.bf16.msra.mxu0 %v9387_v28  ;;  %v11218_v45 = vld [vmem:[#allocation10 + $0x6d4] sm:$0xf0]  ;;  %v9203_v28 = vor.u32 %v11032_v11, %v9200_v60  ;;  %v9570_v11 = vld [vmem:[#allocation10 + $0x668] sm:$0xf] }
 0x57d   : > { %5650 = vmatpush.bf16.msra.mxu3 %v9579_v8  ;;  %v9515_v8 = vor.u32 %v11193_v50, %v9514_v41  ;;  %v9619_v48 = vor.u32 %v11218_v45, %v9618_v14  ;;  %v11206_v60 = vld [vmem:[#allocation10 + $0x674] sm:$0xf0]  ;;  %v9455_v41 = vor.u32 %v11175_v18, %v9452_v34  ;;  %v11171_v50 = vld [vmem:[#allocation10 + $0x564] sm:$0xf]  ;;  %v9554_v45 = vld [vmem:[#allocation10 + $0x648] sm:$0xf] }
 0x57e   : > { %v9822_v18 = vld [vmem:[#allocation10 + $0x860] sm:$0xf]  ;;  %v11269_v34 = vld [vmem:[#allocation10 + $0x86c] sm:$0xf0] }
 0x57f   : > { %5642 = vmatmul.bf16.vlgmr.msra.gmra.mxu0 %v13209_v46  ;;  %5112 = vmatpush.bf16.msra.mxu1 %v9091_v4  ;;  %v11186_v4 = vld [vmem:[#allocation10 + $0x5d4] sm:$0xf0] }
 0x580   : > { %5703 = vmatpush.bf16.msrb.mxu0 %v9695_v17  ;;  %5123 = vmatpush.bf16.msra.mxu2 %v9251_v62  ;;  %v11225_v17 = vld [vmem:[#allocation10 + $0x70c] sm:$0xf0]  ;;  %v9628_v62 = vld [vmem:[#allocation10 + $0x6f0] sm:$0xf0]  ;;  %v9491_v37 = vor.u32 %v11186_v4, %v9490_v24 }
 0x581   : > { %5651 = vmatpush.bf16.msra.mxu3 %v9563_v61  ;;  %v9602_v61 = vld [vmem:[#allocation10 + $0x6a8] sm:$0xf]  ;;  %v9631_v10 = vor.u32 %v11219_v44, %v9628_v62  ;;  %v11170_v44 = vld [vmem:[#allocation10 + $0x554] sm:$0xf0]  ;;  %v11203_v62 = vld [vmem:[#allocation10 + $0x664] sm:$0xf] }
 0x583   : > { %5113 = vmatpush.bf16.msra.mxu1 %v9075_v9  ;;  %v9603_v9 = vor.u32 %v11214_v1, %v9602_v61  ;;  %v9564_v61 = vld [vmem:[#allocation10 + $0x670] sm:$0xf0]  ;;  %v9538_v1 = vld [vmem:[#allocation10 + $0x628] sm:$0xf] }
 0x584   : > { %5704 = vmatpush.bf16.msrb.mxu0 %v9679_v0  ;;  %5124 = vmatpush.bf16.msra.mxu2 %v9235_v56  ;;  %v9643_v0 = vor.u32 %v11225_v17, %v9642_v12  ;;  %v11182_v56 = vld [vmem:[#allocation10 + $0x5b4] sm:$0xf0]  ;;  %v9583_v17 = vor.u32 %v11207_v51, %v9580_v16  ;;  %v9700_v16 = vld [vmem:[#allocation10 + $0x778] sm:$0xf0] }
 0x585   : > { %5652 = vmatpush.bf16.msra.mxu3 %v9547_v54  ;;  %v11215_v54 = vld [vmem:[#allocation10 + $0x6c4] sm:$0xf]  ;;  %v9475_v52 = vor.u32 %v11182_v56, %v9474_v33  ;;  %v9410_v33 = vld [vmem:[#allocation10 + $0x528] sm:$0xf]  ;;  %v11166_v56 = vld [vmem:[#allocation10 + $0x534] sm:$0xf0] }
 0x586   : > { %5114 = vmatmul.bf16.vlgmr.msra.gmra.mxu1 %v13163_v55  ;;  %v9615_v6 = vor.u32 %v11215_v54, %v9612_v3  ;;  %v11199_v54 = vld [vmem:[#allocation10 + $0x644] sm:$0xf]  ;;  %v9548_v3 = vld [vmem:[#allocation10 + $0x650] sm:$0xf0] }
 0x587   : > { %5664 = vmatpush.bf16.msrb.mxu1 %v9691_v29  ;;  %v11210_v29 = vld [vmem:[#allocation10 + $0x694] sm:$0xf0] }
 0x588   : > { %5705 = vmatpush.bf16.msrb.mxu0 %v9663_v30  ;;  %5125 = vmatpush.bf16.msra.mxu2 %v9219_v47  ;;  %v9471_v30 = vor.u32 %v11179_v35, %v9468_v20  ;;  %v9587_v2 = vor.u32 %v11210_v29, %v9586_v53  ;;  %v11211_v47 = vld [vmem:[#allocation10 + $0x6a4] sm:$0xf]  ;;  %v9404_v20 = vld [vmem:[#allocation10 + $0x530] sm:$0xf0] }
 0x589   : > { %5653 = vmatpush.bf16.msra.mxu3 %v9531_v40  ;;  %v9596_v40 = vld [vmem:[#allocation10 + $0x6b0] sm:$0xf0]  ;;  %v11163_v35 = vld [vmem:[#allocation10 + $0x524] sm:$0xf] }
 0x58b   : > { %5665 = vmatpush.bf16.msrb.mxu1 %v9675_v21  ;;  %v9459_v21 = vor.u32 %v11178_v39, %v9458_v15  ;;  %v9411_v15 = vor.u32 %v11166_v56, %v9410_v33  ;;  %v9551_v39 = vor.u32 %v11199_v54, %v9548_v3  ;;  %v9666_v54 = vld [vmem:[#allocation10 + $0x728] sm:$0xf]  ;;  %v11230_v3 = vld [vmem:[#allocation10 + $0x734] sm:$0xf0] }
 0x58c   : > { %5706 = vmatpush.bf16.msrb.mxu0 %v9647_v36  ;;  %5126 = vmatpush.bf16.msra.mxu2 %v9203_v28  ;;  %v13223_v42 = vpop.f32.mrf.mxu0  ;;  %v9599_v36 = vor.u32 %v11211_v47, %v9596_v40  ;;  %v11202_v28 = vld [vmem:[#allocation10 + $0x654] sm:$0xf0]  ;;  %v11159_v47 = vld [vmem:[#allocation10 + $0x504] sm:$0xf]  ;;  %v9388_v40 = vld [vmem:[#allocation10 + $0x510] sm:$0xf0] }
 0x58d   : > { %5654 = vmatpush.bf16.msra.mxu3 %v9515_v8  ;;  %v9555_v4 = vor.u32 %v11202_v28, %v9554_v45  ;;  %v9391_v51 = vor.u32 %v11159_v47, %v9388_v40 }
 0x58f   : > { %5666 = vmatpush.bf16.msrb.mxu1 %v9659_v22  ;;  %5127 = vmatmul.bf16.vlgmr.msra.gmra.mxu2 %v13165_v32  ;;  %v9439_v22 = vor.u32 %v11171_v50, %v9436_v43  ;;  %v9532_v50 = vld [vmem:[#allocation10 + $0x630] sm:$0xf0]  ;;  %v9823_v43 = vor.u32 %v11269_v34, %v9822_v18  ;;  %v11257_v34 = vld [vmem:[#allocation10 + $0x80c] sm:$0xf0] }
 0x590   : > { %5725 = vmatpush.bf16.msra.mxu0 %v9635_v58  ;;  %5673 = vmatpush.bf16.msrb.mxu2 %v9503_v31  ;;  %v9571_v58 = vor.u32 %v11206_v60, %v9570_v11  ;;  %v9443_v31 = vor.u32 %v11174_v7, %v9442_v19  ;;  %v9394_v11 = vld [vmem:[#allocation10 + $0x508] sm:$0xf]  ;;  %v11236_v7 = vld [vmem:[#allocation10 + $0x76c] sm:$0xf] }
 0x591   : > { %5712 = vmatpush.bf16.msrb.mxu3 %v9507_v63  ;;  %9705 = vmatmul.msk.bf16.vlgmr.msrb.gmra.mxu0 %vm3754_vm8, %v13217_v26  ;;  %v4438_v59 = vpop.f32.mrf.mxu2  ;;  %v4451_v14 = vpop.f32.mrf.mxu3  ;;  %v11167_v63 = vld [vmem:[#allocation10 + $0x544] sm:$0xf]  ;;  %v9698_v19 = vld [vmem:[#allocation10 + $0x768] sm:$0xf] }
 0x592   : > { %5655 = vmatmul.bf16.vlgmr.msra.gmra.mxu3 %v13214_v27  ;;  %v4452_v8 = vadd.f32 %v4451_v14, %v4438_v59  ;;  %v9806_v59 = vld [vmem:[#allocation10 + $0x840] sm:$0xf]  ;;  %v11265_v14 = vld [vmem:[#allocation10 + $0x84c] sm:$0xf0] }
 0x593   : > { %5667 = vmatpush.bf16.msrb.mxu1 %v9643_v0  ;;  %v4464_v12 = vpop.f32.mrf.mxu1  ;;  %v11198_v0 = vld [vmem:[#allocation10 + $0x634] sm:$0xf0] }
 0x594   : > { %5726 = vmatpush.bf16.msra.mxu0 %v9619_v48  ;;  %5674 = vmatpush.bf16.msrb.mxu2 %v9487_v23  ;;  %v9420_v48 = vld [vmem:[#allocation10 + $0x550] sm:$0xf0]  ;;  %v13227_v5 = vadd.f32 %v4464_v12, %v4452_v8  ;;  %v4479_v24 = vpop.f32.mrf.mxu0  ;;  %v9703_v12 = vor.u32 %v11236_v7, %v9700_v16  ;;  %v9636_v7 = vld [vmem:[#allocation10 + $0x6f8] sm:$0xf0]  ;;  %v11253_v16 = vld [vmem:[#allocation10 + $0x7ec] sm:$0xf0] }
 0x595   : > { %5713 = vmatpush.bf16.msrb.mxu3 %v9491_v37  ;;  %v9423_v23 = vor.u32 %v11167_v63, %v9420_v48  ;;  %v9427_v37 = vor.u32 %v11170_v44, %v9426_v49  ;;  %v9682_v49 = vld [vmem:[#allocation10 + $0x748] sm:$0xf]  ;;  %v11234_v24 = vld [vmem:[#allocation10 + $0x754] sm:$0xf0] }
 0x596   : > { %9704 = vmatmul.msk.bf16.vlgmr.msrb.gmra.mxu1 %vm3754_vm8, %v13217_v26  ;;  %v9683_v33 = vor.u32 %v11234_v24, %v9682_v49  ;;  %v11216_v49 = vld [vmem:[#allocation10 + $0x6cc] sm:$0xf] }
 0x597   : > { %5686 = vmatpush.bf16.msra.mxu1 %v9631_v10  ;;  %v9567_v10 = vor.u32 %v11203_v62, %v9564_v61  ;;  %v9684_v62 = vld [vmem:[#allocation10 + $0x758] sm:$0xf0]  ;;  %v11188_v61 = vld [vmem:[#allocation10 + $0x5ec] sm:$0xf] }
 0x598   : > { %5727 = vmatpush.bf16.msra.mxu0 %v9603_v9  ;;  %5675 = vmatpush.bf16.msrb.mxu2 %v9471_v30  ;;  %v9539_v9 = vor.u32 %v11198_v0, %v9538_v1  ;;  %v9522_v30 = vld [vmem:[#allocation10 + $0x608] sm:$0xf]  ;;  %v9508_v1 = vld [vmem:[#allocation10 + $0x5f8] sm:$0xf0] }
 0x599   : > { %5714 = vmatpush.bf16.msrb.mxu3 %v9475_v52  ;;  %v4440_v53 = vpop.f32.mrf.mxu2  ;;  %v4453_v29 = vpop.f32.mrf.mxu3  ;;  %v11194_v52 = vld [vmem:[#allocation10 + $0x614] sm:$0xf0]  ;;  %v9511_v56 = vor.u32 %v11188_v61, %v9508_v1  ;;  %v11249_v61 = vld [vmem:[#allocation10 + $0x7cc] sm:$0xf0]  ;;  %v9934_v1 = vld [vmem:[#allocation10 + $0x940] sm:$0xf] }
 0x59a   : > { %v11228_v53 = vld [vmem:[#allocation10 + $0x72c] sm:$0xf] }
 0x59b   : > { %5687 = vmatpush.bf16.msra.mxu1 %v9615_v6  ;;  %v9407_v6 = vor.u32 %v11163_v35, %v9404_v20 }
 0x59c   : > { %5728 = vmatpush.bf16.msra.mxu0 %v9587_v2  ;;  %5676 = vmatpush.bf16.msrb.mxu2 %v9455_v41  ;;  %v4466_v2 = vpop.f32.mrf.mxu1  ;;  %v4529_v60 = vpop.f32.mrf.mxu0  ;;  %v9523_v41 = vor.u32 %v11194_v52, %v9522_v30  ;;  %v9668_v30 = vld [vmem:[#allocation10 + $0x738] sm:$0xf0]  ;;  %v11184_v52 = vld [vmem:[#allocation10 + $0x5cc] sm:$0xf] }
 0x59d   : > { %5715 = vmatpush.bf16.msrb.mxu3 %v9459_v21  ;;  %v11162_v21 = vld [vmem:[#allocation10 + $0x514] sm:$0xf0]  ;;  %v9650_v2 = vld [vmem:[#allocation10 + $0x708] sm:$0xf] }
 0x59e   : > { %v9395_v45 = vor.u32 %v11162_v21, %v9394_v11  ;;  %v9652_v21 = vld [vmem:[#allocation10 + $0x718] sm:$0xf0] }
 0x59f   : > { %5688 = vmatpush.bf16.msra.mxu1 %v9599_v36  ;;  %v11195_v36 = vld [vmem:[#allocation10 + $0x624] sm:$0xf] }
 0x5a0   : > { %5729 = vmatpush.bf16.msra.mxu0 %v9571_v58  ;;  %5677 = vmatpush.bf16.msrb.mxu2 %v9439_v22  ;;  %v11238_v58 = vld [vmem:[#allocation10 + $0x774] sm:$0xf0]  ;;  %v9535_v28 = vor.u32 %v11195_v36, %v9532_v50  ;;  %v11191_v22 = vld [vmem:[#allocation10 + $0x604] sm:$0xf]  ;;  %v11180_v50 = vld [vmem:[#allocation10 + $0x5ac] sm:$0xf] }
 0x5a1   : > { %5716 = vmatpush.bf16.msrb.mxu3 %v9443_v31  ;;  %v9699_v8 = vor.u32 %v11238_v58, %v9698_v19  ;;  %v9516_v31 = vld [vmem:[#allocation10 + $0x610] sm:$0xf0]  ;;  %v4503_v63 = vpop.f32.mrf.mxu2  ;;  %v4516_v48 = vpop.f32.mrf.mxu3  ;;  %v11220_v19 = vld [vmem:[#allocation10 + $0x6ec] sm:$0xf] }
 0x5a2   : > { %v13229_v44 = vadd.f32 %v4529_v60, %v4516_v48  ;;  %v9519_v20 = vor.u32 %v11191_v22, %v9516_v31  ;;  %v11226_v60 = vld [vmem:[#allocation10 + $0x714] sm:$0xf0]  ;;  %v9460_v48 = vld [vmem:[#allocation10 + $0x598] sm:$0xf0] }
 0x5a3   : > { %5689 = vmatpush.bf16.msra.mxu1 %v9583_v17  ;;  %v9807_v17 = vor.u32 %v11265_v14, %v9806_v59  ;;  %v9651_v14 = vor.u32 %v11226_v60, %v9650_v2  ;;  %v9710_v60 = vld [vmem:[#allocation10 + $0x780] sm:$0xf] }
 0x5a4   : > { %5730 = vmatpush.bf16.msra.mxu0 %v9555_v4  ;;  %5678 = vmatpush.bf16.msrb.mxu2 %v9423_v23  ;;  %v11232_v4 = vld [vmem:[#allocation10 + $0x74c] sm:$0xf]  ;;  %v4490_v0 = vpop.f32.mrf.mxu1  ;;  %v9790_v23 = vld [vmem:[#allocation10 + $0x820] sm:$0xf]  ;;  %v4531_v35 = vpop.f32.mrf.mxu0 }
 0x5a5   : > { %5717 = vmatpush.bf16.msrb.mxu3 %v9427_v37  ;;  %v11261_v37 = vld [vmem:[#allocation10 + $0x82c] sm:$0xf0] }
 0x5a6   : > { %v9791_v29 = vor.u32 %v11261_v37, %v9790_v23 }
 0x5a7   : > { %5690 = vmatpush.bf16.msra.mxu1 %v9567_v10  ;;  %v4491_v10 = vadd.f32 %v4490_v0, %v13223_v42  ;;  %v9774_v42 = vld [vmem:[#allocation10 + $0x800] sm:$0xf]  ;;  %v11297_v0 = vld [vmem:[#allocation10 + $0x94c] sm:$0xf0] }
 0x5a8   : > { %5731 = vmatpush.bf16.msra.mxu0 %v9539_v9  ;;  %5679 = vmatpush.bf16.msrb.mxu2 %v9407_v6  ;;  %v9687_v9 = vor.u32 %v11232_v4, %v9684_v62  ;;  %v9492_v6 = vld [vmem:[#allocation10 + $0x5d8] sm:$0xf0]  ;;  %v9775_v36 = vor.u32 %v11257_v34, %v9774_v42  ;;  %v9742_v62 = vld [vmem:[#allocation10 + $0x7c0] sm:$0xf]  ;;  %v11293_v42 = vld [vmem:[#allocation10 + $0x92c] sm:$0xf0] }
 0x5a9   : > { %5718 = vmatpush.bf16.msrb.mxu3 %v9411_v15  ;;  %v13235_v18 = vadd.f32 %v4503_v63, %v4491_v10  ;;  %v9667_v15 = vor.u32 %v11230_v3, %v9666_v54  ;;  %v9495_v47 = vor.u32 %v11184_v52, %v9492_v6  ;;  %v4505_v40 = vpop.f32.mrf.mxu2  ;;  %v4518_v11 = vpop.f32.mrf.mxu3  ;;  %v11176_v63 = vld [vmem:[#allocation10 + $0x58c] sm:$0xf]  ;;  %v9620_v4 = vld [vmem:[#allocation10 + $0x6d8] sm:$0xf0]  ;;  %v9743_v35 = vor.u32 %v11249_v61, %v9742_v62  ;;  %v9918_v6 = vld [vmem:[#allocation10 + $0x920] sm:$0xf] }
 0x5aa   : > { %v9463_v23 = vor.u32 %v11176_v63, %v9460_v48  ;;  %v9623_v10 = vor.u32 %v11216_v49, %v9620_v4  ;;  %v9935_v54 = vor.u32 %v11297_v0, %v9934_v1  ;;  %v9588_v40 = vld [vmem:[#allocation10 + $0x698] sm:$0xf0]  ;;  %v9919_v11 = vor.u32 %v11293_v42, %v9918_v6  ;;  %v11285_v63 = vld [vmem:[#allocation10 + $0x8ec] sm:$0xf0]  ;;  %v11311_v48 = vld [vmem:[#allocation10 + $0x9c4] sm:$0xf] }
 0x5ab   : > { %5691 = vmatpush.bf16.msra.mxu1 %v9551_v39  ;;  %v9671_v39 = vor.u32 %v11228_v53, %v9668_v30  ;;  %v9604_v53 = vld [vmem:[#allocation10 + $0x6b8] sm:$0xf0]  ;;  %v11245_v30 = vld [vmem:[#allocation10 + $0x7ac] sm:$0xf0]  ;;  %v10000_v49 = vld [vmem:[#allocation10 + $0x9d0] sm:$0xf0] }
 0x5ac   : > { %5732 = vmatpush.bf16.msra.mxu0 %v9523_v41  ;;  %5680 = vmatpush.bf16.msrb.mxu2 %v9391_v51  ;;  %v11224_v41 = vld [vmem:[#allocation10 + $0x70c] sm:$0xf]  ;;  %v4492_v58 = vpop.f32.mrf.mxu1  ;;  %v9758_v51 = vld [vmem:[#allocation10 + $0x7e0] sm:$0xf]  ;;  %v4998_v59 = vpop.f32.mrf.mxu0  ;;  %v9396_v1 = vld [vmem:[#allocation10 + $0x518] sm:$0xf0] }
 0x5ad   : > { %5719 = vmatpush.bf16.msrb.mxu3 %v9395_v45  ;;  %v9950_v45 = vld [vmem:[#allocation10 + $0x960] sm:$0xf]  ;;  %v9655_v22 = vor.u32 %v11224_v41, %v9652_v21  ;;  %v11241_v41 = vld [vmem:[#allocation10 + $0x78c] sm:$0xf0]  ;;  %v11160_v62 = vld [vmem:[#allocation10 + $0x50c] sm:$0xf] }
 0x5ae   : > { %v9902_v21 = vld [vmem:[#allocation10 + $0x900] sm:$0xf]  ;;  %v11200_v0 = vld [vmem:[#allocation10 + $0x64c] sm:$0xf]  ;;  %v9540_v42 = vld [vmem:[#allocation10 + $0x638] sm:$0xf0] }
 0x5af   : > { %5733 = vmatmul.bf16.vlgmr.msra.gmra.mxu0 %v13214_v27  ;;  %5692 = vmatpush.bf16.msra.mxu1 %v9535_v28  ;;  %v11301_v28 = vld [vmem:[#allocation10 + $0x96c] sm:$0xf0]  ;;  %v11196_v6 = vld [vmem:[#allocation10 + $0x62c] sm:$0xf] }
 0x5b0   : > { %6283 = vmatpush.bf16.msrb.mxu0 %v9823_v43  ;;  %5742 = vmatpush.bf16.msra.mxu2 %v9699_v8  ;;  %v9476_v43 = vld [vmem:[#allocation10 + $0x5b8] sm:$0xf0]  ;;  %v13239_v8 = vadd.f32 %v4998_v59, %v13227_v5  ;;  %v9951_v24 = vor.u32 %v11301_v28, %v9950_v45  ;;  %v11164_v59 = vld [vmem:[#allocation10 + $0x52c] sm:$0xf] }
 0x5b1   : > { %5781 = vmatpush.bf16.msra.mxu3 %v9703_v12  ;;  %5681 = vmatmul.bf16.vlgmr.msrb.gmra.mxu2 %v13209_v46  ;;  %v9479_v31 = vor.u32 %v11180_v50, %v9476_v43  ;;  %v9639_v12 = vor.u32 %v11220_v19, %v9636_v7  ;;  %v4542_v5 = vpop.f32.mrf.mxu2  ;;  %v13241_v37 = vpop.f32.mrf.mxu3  ;;  %v11315_v50 = vld [vmem:[#allocation10 + $0x9e4] sm:$0xf]  ;;  %v10016_v43 = vld [vmem:[#allocation10 + $0x9f0] sm:$0xf0] }
 0x5b2   : > { %5720 = vmatmul.bf16.vlgmr.msrb.gmra.mxu3 %v13209_v46  ;;  %v10019_v28 = vor.u32 %v11315_v50, %v10016_v43  ;;  %v9968_v50 = vld [vmem:[#allocation10 + $0x990] sm:$0xf0]  ;;  %v9958_v43 = vld [vmem:[#allocation10 + $0x968] sm:$0xf] }
 0x5b3   : > { %5693 = vmatpush.bf16.msra.mxu1 %v9519_v20  ;;  %v13244_v20 = vadd.f32 %v4542_v5, %v13229_v44 }
 0x5b4   : > { %6284 = vmatpush.bf16.msrb.mxu0 %v9807_v17  ;;  %5743 = vmatpush.bf16.msra.mxu2 %v9683_v33  ;;  %v9759_v17 = vor.u32 %v11253_v16, %v9758_v51  ;;  %v11172_v33 = vld [vmem:[#allocation10 + $0x56c] sm:$0xf]  ;;  %v13246_v3 = vpop.f32.mrf.mxu1  ;;  %v5000_v52 = vpop.f32.mrf.mxu0  ;;  %v9711_v16 = vor.u32 %v11241_v41, %v9710_v60 }
 0x5b5   : > { %5782 = vmatpush.bf16.msra.mxu3 %v9687_v9  ;;  %v9444_v9 = vld [vmem:[#allocation10 + $0x578] sm:$0xf0] }
 0x5b6   : > { %5694 = vmatmul.bf16.vlgmr.msra.gmra.mxu1 %v13214_v27  ;;  %v9447_v34 = vor.u32 %v11172_v33, %v9444_v9  ;;  %v10014_v33 = vld [vmem:[#allocation10 + $0x9e0] sm:$0xf]  ;;  %v11317_v9 = vld [vmem:[#allocation10 + $0x9ec] sm:$0xf0] }
 0x5b7   : > { %5751 = vmatpush.bf16.msrb.mxu1 %v9511_v56  ;;  %v11212_v56 = vld [vmem:[#allocation10 + $0x6ac] sm:$0xf]  ;;  %v10015_v52 = vor.u32 %v11317_v9, %v10014_v33  ;;  %v9808_v33 = vld [vmem:[#allocation10 + $0x850] sm:$0xf0] }
 0x5b8   : > { %6285 = vmatpush.bf16.msrb.mxu0 %v9791_v29  ;;  %5744 = vmatpush.bf16.msra.mxu2 %v9667_v15  ;;  %v9726_v29 = vld [vmem:[#allocation10 + $0x7a0] sm:$0xf]  ;;  %v11168_v15 = vld [vmem:[#allocation10 + $0x54c] sm:$0xf]  ;;  %v9607_v44 = vor.u32 %v11212_v56, %v9604_v53  ;;  %v11281_v56 = vld [vmem:[#allocation10 + $0x8cc] sm:$0xf0] }
 0x5b9   : > { %5783 = vmatpush.bf16.msra.mxu3 %v9671_v39  ;;  %v9727_v2 = vor.u32 %v11245_v30, %v9726_v29  ;;  %v9428_v39 = vld [vmem:[#allocation10 + $0x558] sm:$0xf0]  ;;  %v4544_v58 = vpop.f32.mrf.mxu2  ;;  %v4583_v7 = vpop.f32.mrf.mxu3  ;;  %v9984_v53 = vld [vmem:[#allocation10 + $0x9b0] sm:$0xf0] }
 0x5ba   : > { %v9431_v19 = vor.u32 %v11168_v15, %v9428_v39  ;;  %v9854_v39 = vld [vmem:[#allocation10 + $0x8a0] sm:$0xf]  ;;  %v9543_v7 = vor.u32 %v11196_v6, %v9540_v42  ;;  %v11294_v6 = vld [vmem:[#allocation10 + $0x934] sm:$0xf0] }
 0x5bb   : > { %5752 = vmatpush.bf16.msrb.mxu1 %v9495_v47  ;;  %v11208_v47 = vld [vmem:[#allocation10 + $0x68c] sm:$0xf] }
 0x5bc   : > { %6286 = vmatpush.bf16.msrb.mxu0 %v9775_v36  ;;  %5745 = vmatpush.bf16.msra.mxu2 %v9651_v14  ;;  %v11289_v36 = vld [vmem:[#allocation10 + $0x90c] sm:$0xf0]  ;;  %v9591_v51 = vor.u32 %v11208_v47, %v9588_v40  ;;  %v9412_v14 = vld [vmem:[#allocation10 + $0x538] sm:$0xf0]  ;;  %v9998_v47 = vld [vmem:[#allocation10 + $0x9c0] sm:$0xf] }
 0x5bd   : > { %5784 = vmatpush.bf16.msra.mxu3 %v9655_v22  ;;  %v9903_v45 = vor.u32 %v11289_v36, %v9902_v21  ;;  %v4557_v22 = vpop.f32.mrf.mxu1  ;;  %v9415_v4 = vor.u32 %v11164_v59, %v9412_v14  ;;  %v11313_v40 = vld [vmem:[#allocation10 + $0x9cc] sm:$0xf0]  ;;  %v11303_v36 = vld [vmem:[#allocation10 + $0x984] sm:$0xf]  ;;  %v9524_v59 = vld [vmem:[#allocation10 + $0x618] sm:$0xf0] }
 0x5be   : > { %v11277_v21 = vld [vmem:[#allocation10 + $0x8ac] sm:$0xf0]  ;;  %v9982_v22 = vld [vmem:[#allocation10 + $0x9a0] sm:$0xf] }
 0x5bf   : > { %5753 = vmatpush.bf16.msrb.mxu1 %v9479_v31  ;;  %v11204_v31 = vld [vmem:[#allocation10 + $0x66c] sm:$0xf]  ;;  %v9855_v14 = vor.u32 %v11277_v21, %v9854_v39  ;;  %v11259_v39 = vld [vmem:[#allocation10 + $0x824] sm:$0xf]  ;;  %v9936_v21 = vld [vmem:[#allocation10 + $0x950] sm:$0xf0] }
 0x5c0   : > { %5764 = vmatpush.bf16.msrb.mxu2 %v9639_v12  ;;  %6287 = vmatpush.bf16.msrb.mxu0 %v9759_v17  ;;  %v9572_v12 = vld [vmem:[#allocation10 + $0x678] sm:$0xf0]  ;;  %v13252_v17 = vpop.f32.mrf.mxu0 }
 0x5c1   : > { %6296 = vmatpush.bf16.msrb.mxu3 %v9951_v24  ;;  %9706 = vmatmul.msk.bf16.vlgmr.msra.gmra.mxu2 %vm3754_vm8, %v13217_v26  ;;  %v13255_v24 = vrot.slane %v13168_v57, 1  ;;  %v9575_v61 = vor.u32 %v11204_v31, %v9572_v12  ;;  %v9399_v57 = vor.u32 %v11160_v62, %v9396_v1  ;;  %v11309_v31 = vld [vmem:[#allocation10 + $0x9ac] sm:$0xf0]  ;;  %v11267_v12 = vld [vmem:[#allocation10 + $0x864] sm:$0xf] }
 0x5c2   : > { %9707 = vmatmul.msk.bf16.vlgmr.msra.gmra.mxu3 %vm3754_vm8, %v13217_v26  ;;  %v9886_v26 = vld [vmem:[#allocation10 + $0x8e0] sm:$0xf]  ;;  %v4568_v30 = vpop.f32.mrf.mxu2  ;;  %v9983_v1 = vor.u32 %v11309_v31, %v9982_v22 }
 0x5c3   : > { %5754 = vmatpush.bf16.msrb.mxu1 %v9463_v23  ;;  %v9556_v23 = vld [vmem:[#allocation10 + $0x658] sm:$0xf0]  ;;  %v9887_v5 = vor.u32 %v11285_v63, %v9886_v26  ;;  %v4569_v15 = vadd.f32 %v4568_v30, %v13246_v3  ;;  %v9824_v26 = vld [vmem:[#allocation10 + $0x870] sm:$0xf0]  ;;  %v9830_v63 = vld [vmem:[#allocation10 + $0x868] sm:$0xf] }
 0x5c4   : > { %5765 = vmatpush.bf16.msrb.mxu2 %v9623_v10  ;;  %6288 = vmatpush.bf16.msrb.mxu0 %v9743_v35  ;;  %v10003_v10 = vor.u32 %v11311_v48, %v10000_v49  ;;  %v9870_v35 = vld [vmem:[#allocation10 + $0x8c0] sm:$0xf]  ;;  %v9559_v29 = vor.u32 %v11200_v0, %v9556_v23  ;;  %v11270_v48 = vld [vmem:[#allocation10 + $0x874] sm:$0xf0]  ;;  %v9942_v49 = vld [vmem:[#allocation10 + $0x948] sm:$0xf] }
 0x5c5   : > { %6297 = vmatpush.bf16.msrb.mxu3 %v9935_v54  ;;  %v11307_v54 = vld [vmem:[#allocation10 + $0x9a4] sm:$0xf]  ;;  %v5024_v60 = vpop.f32.mrf.mxu1  ;;  %v13261_v58 = vadd.f32 %v13241_v37, %v4569_v15  ;;  %v9966_v0 = vld [vmem:[#allocation10 + $0x980] sm:$0xf]  ;;  %v9831_v9 = vor.u32 %v11270_v48, %v9830_v63  ;;  %v11266_v30 = vld [vmem:[#allocation10 + $0x854] sm:$0xf0] }
 0x5c6   : > { %v13270_v15 = vrot.slane %v13179_v38, 1  ;;  %v11290_v38 = vld [vmem:[#allocation10 + $0x914] sm:$0xf0] }
 0x5c7   : > { %5755 = vmatpush.bf16.msrb.mxu1 %v9447_v34  ;;  %v9871_v34 = vor.u32 %v11281_v56, %v9870_v35  ;;  %v11305_v35 = vld [vmem:[#allocation10 + $0x98c] sm:$0xf0] }
 0x5c8   : > { %5766 = vmatpush.bf16.msrb.mxu2 %v9607_v44  ;;  %6289 = vmatpush.bf16.msrb.mxu0 %v9727_v2  ;;  %v5011_v44 = vpop.f32.mrf.mxu3  ;;  %v9987_v2 = vor.u32 %v11307_v54, %v9984_v53  ;;  %v5065_v41 = vpop.f32.mrf.mxu0  ;;  %v9814_v53 = vld [vmem:[#allocation10 + $0x848] sm:$0xf]  ;;  %v9967_v42 = vor.u32 %v11305_v35, %v9966_v0  ;;  %v11282_v0 = vld [vmem:[#allocation10 + $0x8d4] sm:$0xf0]  ;;  %v9744_v35 = vld [vmem:[#allocation10 + $0x7d0] sm:$0xf0] }
 0x5c9   : > { %6298 = vmatpush.bf16.msrb.mxu3 %v9919_v11  ;;  %v5012_v11 = vadd.f32 %v5011_v44, %v13239_v8  ;;  %v9838_v8 = vld [vmem:[#allocation10 + $0x880] sm:$0xf]  ;;  %v11295_v41 = vld [vmem:[#allocation10 + $0x944] sm:$0xf] }
 0x5cb   : > { %5756 = vmatpush.bf16.msrb.mxu1 %v9431_v19  ;;  %v11302_v19 = vld [vmem:[#allocation10 + $0x974] sm:$0xf0]  ;;  %v13263_v3 = vadd.f32 %v5024_v60, %v5012_v11  ;;  %v9798_v60 = vld [vmem:[#allocation10 + $0x828] sm:$0xf] }
 0x5cc   : > { %5767 = vmatpush.bf16.msrb.mxu2 %v9591_v51  ;;  %6290 = vmatpush.bf16.msrb.mxu0 %v9711_v16  ;;  %v9999_v51 = vor.u32 %v11313_v40, %v9998_v47  ;;  %v11192_v16 = vld [vmem:[#allocation10 + $0x60c] sm:$0xf]  ;;  %v9959_v37 = vor.u32 %v11302_v19, %v9958_v43  ;;  %v9792_v47 = vld [vmem:[#allocation10 + $0x830] sm:$0xf0]  ;;  %v9815_v40 = vor.u32 %v11266_v30, %v9814_v53  ;;  %v11255_v19 = vld [vmem:[#allocation10 + $0x804] sm:$0xf] }
 0x5cd   : > { %6299 = vmatpush.bf16.msrb.mxu3 %v9903_v45  ;;  %v9971_v45 = vor.u32 %v11303_v36, %v9968_v50  ;;  %v9527_v62 = vor.u32 %v11192_v16, %v9524_v59  ;;  %v5026_v54 = vpop.f32.mrf.mxu1  ;;  %v9910_v36 = vld [vmem:[#allocation10 + $0x908] sm:$0xf]  ;;  %v9795_v50 = vor.u32 %v11259_v39, %v9792_v47  ;;  %v9939_v43 = vor.u32 %v11295_v41, %v9936_v21  ;;  %v11291_v59 = vld [vmem:[#allocation10 + $0x924] sm:$0xf]  ;;  %v11250_v53 = vld [vmem:[#allocation10 + $0x7d4] sm:$0xf0] }
 0x5ce   : > { %v9911_v16 = vor.u32 %v11290_v38, %v9910_v36  ;;  %v9888_v54 = vld [vmem:[#allocation10 + $0x8f0] sm:$0xf0]  ;;  %v9734_v41 = vld [vmem:[#allocation10 + $0x7a8] sm:$0xf]  ;;  %v11279_v21 = vld [vmem:[#allocation10 + $0x8c4] sm:$0xf] }
 0x5cf   : > { %6291 = vmatmul.bf16.vlgmr.msrb.gmra.mxu0 %v13255_v24  ;;  %5757 = vmatpush.bf16.msrb.mxu1 %v9415_v4  ;;  %v11298_v4 = vld [vmem:[#allocation10 + $0x954] sm:$0xf0]  ;;  %v9728_v39 = vld [vmem:[#allocation10 + $0x7b0] sm:$0xf0] }
 0x5d0   : > { %6352 = vmatpush.bf16.msra.mxu0 %v10019_v28  ;;  %5768 = vmatpush.bf16.msrb.mxu2 %v9575_v61  ;;  %v11273_v28 = vld [vmem:[#allocation10 + $0x88c] sm:$0xf0]  ;;  %v4570_v61 = vpop.f32.mrf.mxu2  ;;  %v9943_v56 = vor.u32 %v11298_v4, %v9942_v49  ;;  %v9766_v49 = vld [vmem:[#allocation10 + $0x7e8] sm:$0xf]  ;;  %v11287_v4 = vld [vmem:[#allocation10 + $0x904] sm:$0xf] }
 0x5d1   : > { %6300 = vmatpush.bf16.msrb.mxu3 %v9887_v5  ;;  %v9839_v23 = vor.u32 %v11273_v28, %v9838_v8  ;;  %v5013_v5 = vpop.f32.mrf.mxu3  ;;  %v9920_v8 = vld [vmem:[#allocation10 + $0x930] sm:$0xf0]  ;;  %v11286_v28 = vld [vmem:[#allocation10 + $0x8f4] sm:$0xf0] }
 0x5d2   : > { %v11254_v61 = vld [vmem:[#allocation10 + $0x7f4] sm:$0xf0] }
 0x5d3   : > { %5758 = vmatpush.bf16.msrb.mxu1 %v9399_v57  ;;  %v11299_v57 = vld [vmem:[#allocation10 + $0x964] sm:$0xf]  ;;  %v11246_v38 = vld [vmem:[#allocation10 + $0x7b4] sm:$0xf0] }
 0x5d4   : > { %6353 = vmatpush.bf16.msra.mxu0 %v10003_v10  ;;  %5769 = vmatpush.bf16.msrb.mxu2 %v9559_v29  ;;  %v9827_v10 = vor.u32 %v11267_v12, %v9824_v26  ;;  %v9952_v29 = vld [vmem:[#allocation10 + $0x970] sm:$0xf0]  ;;  %v11251_v12 = vld [vmem:[#allocation10 + $0x7e4] sm:$0xf] }
 0x5d5   : > { %6301 = vmatpush.bf16.msrb.mxu3 %v9871_v34  ;;  %v13267_v34 = vrot.slane %v13171_v25, 1  ;;  %v11262_v25 = vld [vmem:[#allocation10 + $0x834] sm:$0xf0]  ;;  %v9760_v26 = vld [vmem:[#allocation10 + $0x7f0] sm:$0xf0] }
 0x5d6   : > { %5759 = vmatmul.bf16.vlgmr.msrb.gmra.mxu1 %v13209_v46  ;;  %v11263_v46 = vld [vmem:[#allocation10 + $0x844] sm:$0xf] }
 0x5d7   : > { %6313 = vmatpush.bf16.msra.mxu1 %v10015_v52  ;;  %v9926_v52 = vld [vmem:[#allocation10 + $0x928] sm:$0xf]  ;;  %v9811_v44 = vor.u32 %v11263_v46, %v9808_v33  ;;  %v9767_v46 = vor.u32 %v11254_v61, %v9766_v49  ;;  %v11318_v49 = vld [vmem:[#allocation10 + $0x9f4] sm:$0xf0]  ;;  %v10130_v61 = vld [vmem:[#allocation10 + $0xac0] sm:$0xf] }
 0x5d8   : > { %6354 = vmatpush.bf16.msra.mxu0 %v9987_v2  ;;  %5770 = vmatpush.bf16.msrb.mxu2 %v9543_v7  ;;  %v9955_v2 = vor.u32 %v11299_v57, %v9952_v29  ;;  %v9927_v11 = vor.u32 %v11294_v6, %v9926_v52  ;;  %v9776_v7 = vld [vmem:[#allocation10 + $0x810] sm:$0xf0]  ;;  %v9862_v57 = vld [vmem:[#allocation10 + $0x8a8] sm:$0xf]  ;;  %v11278_v29 = vld [vmem:[#allocation10 + $0x8b4] sm:$0xf0] }
 0x5d9   : > { %6302 = vmatpush.bf16.msrb.mxu3 %v9855_v14  ;;  %v11258_v14 = vld [vmem:[#allocation10 + $0x814] sm:$0xf0]  ;;  %v9779_v31 = vor.u32 %v11255_v19, %v9776_v7  ;;  %v10146_v7 = vld [vmem:[#allocation10 + $0xae0] sm:$0xf] }
 0x5db   : > { %6314 = vmatpush.bf16.msra.mxu1 %v9999_v51  ;;  %v9799_v51 = vor.u32 %v11262_v25, %v9798_v60  ;;  %v9863_v60 = vor.u32 %v11278_v29, %v9862_v57  ;;  %v9872_v25 = vld [vmem:[#allocation10 + $0x8d0] sm:$0xf0]  ;;  %v10008_v57 = vld [vmem:[#allocation10 + $0x9d8] sm:$0xf0]  ;;  %v11268_v29 = vld [vmem:[#allocation10 + $0x86c] sm:$0xf] }
 0x5dc   : > { %6355 = vmatpush.bf16.msra.mxu0 %v9971_v45  ;;  %5771 = vmatpush.bf16.msrb.mxu2 %v9527_v62  ;;  %v9894_v45 = vld [vmem:[#allocation10 + $0x8e8] sm:$0xf]  ;;  %v13276_v22 = vpop.f32.mrf.mxu0  ;;  %v9904_v62 = vld [vmem:[#allocation10 + $0x910] sm:$0xf0] }
 0x5dd   : > { %6303 = vmatpush.bf16.msrb.mxu3 %v9839_v23  ;;  %v9895_v48 = vor.u32 %v11286_v28, %v9894_v45  ;;  %v9763_v23 = vor.u32 %v11251_v12, %v9760_v26  ;;  %v9907_v5 = vor.u32 %v11287_v4, %v9904_v62  ;;  %v9712_v45 = vld [vmem:[#allocation10 + $0x790] sm:$0xf0]  ;;  %v9718_v28 = vld [vmem:[#allocation10 + $0x788] sm:$0xf]  ;;  %v11275_v12 = vld [vmem:[#allocation10 + $0x8a4] sm:$0xf] }
 0x5de   : > { %v9856_v26 = vld [vmem:[#allocation10 + $0x8b0] sm:$0xf0]  ;;  %v11316_v4 = vld [vmem:[#allocation10 + $0x9ec] sm:$0xf]  ;;  %v10024_v62 = vld [vmem:[#allocation10 + $0x9f8] sm:$0xf0] }
 0x5df   : > { %6315 = vmatpush.bf16.msra.mxu1 %v9983_v1  ;;  %5772 = vmatmul.bf16.vlgmr.msrb.gmra.mxu2 %v13214_v27  ;;  %v9782_v27 = vld [vmem:[#allocation10 + $0x808] sm:$0xf] }
 0x5e0   : > { %6374 = vmatpush.bf16.msrb.mxu0 %v9959_v37  ;;  %6322 = vmatpush.bf16.msra.mxu2 %v9827_v10  ;;  %v9923_v37 = vor.u32 %v11291_v59, %v9920_v8  ;;  %v9783_v63 = vor.u32 %v11258_v14, %v9782_v27  ;;  %v9878_v1 = vld [vmem:[#allocation10 + $0x8c8] sm:$0xf]  ;;  %v11247_v10 = vld [vmem:[#allocation10 + $0x7c4] sm:$0xf]  ;;  %v9875_v27 = vor.u32 %v11279_v21, %v9872_v25  ;;  %v11264_v21 = vld [vmem:[#allocation10 + $0x84c] sm:$0xf] }
 0x5e1   : > { %6361 = vmatpush.bf16.msra.mxu3 %v9831_v9  ;;  %10029 = vmatmul.msk.bf16.vlgmr.msra.gmra.mxu0 %vm3754_vm8, %v13270_v15  ;;  %v9879_v33 = vor.u32 %v11282_v0, %v9878_v1  ;;  %v9750_v9 = vld [vmem:[#allocation10 + $0x7c8] sm:$0xf]  ;;  %v11239_v59 = vld [vmem:[#allocation10 + $0x784] sm:$0xf]  ;;  %v11345_v1 = vld [vmem:[#allocation10 + $0xacc] sm:$0xf0] }
 0x5e2   : > { %6304 = vmatmul.bf16.vlgmr.msrb.gmra.mxu3 %v13267_v34  ;;  %v9816_v25 = vld [vmem:[#allocation10 + $0x858] sm:$0xf0] }
 0x5e3   : > { %6316 = vmatpush.bf16.msra.mxu1 %v9967_v42  ;;  %v5050_v30 = vpop.f32.mrf.mxu1  ;;  %v9747_v42 = vor.u32 %v11247_v10, %v9744_v35  ;;  %v11271_v10 = vld [vmem:[#allocation10 + $0x884] sm:$0xf] }
 0x5e4   : > { %6375 = vmatpush.bf16.msrb.mxu0 %v9943_v56  ;;  %6323 = vmatpush.bf16.msra.mxu2 %v9811_v44  ;;  %v11283_v56 = vld [vmem:[#allocation10 + $0x8e4] sm:$0xf]  ;;  %v5091_v52 = vpop.f32.mrf.mxu0  ;;  %v5037_v6 = vpop.f32.mrf.mxu2 }
 0x5e5   : > { %6362 = vmatpush.bf16.msra.mxu3 %v9815_v40  ;;  %v9891_v44 = vor.u32 %v11283_v56, %v9888_v54  ;;  %v5038_v47 = vadd.f32 %v5037_v6, %v13235_v18  ;;  %v5076_v40 = vpop.f32.mrf.mxu3  ;;  %v11314_v56 = vld [vmem:[#allocation10 + $0x9d4] sm:$0xf0]  ;;  %v10131_v54 = vor.u32 %v11345_v1, %v10130_v61  ;;  %v10114_v52 = vld [vmem:[#allocation10 + $0xaa0] sm:$0xf]  ;;  %v11341_v6 = vld [vmem:[#allocation10 + $0xaac] sm:$0xf0] }
 0x5e6   : > { %10028 = vmatmul.msk.bf16.vlgmr.msra.gmra.mxu1 %vm3754_vm8, %v13270_v15  ;;  %v5077_v36 = vadd.f32 %v5076_v40, %v13244_v20  ;;  %v9735_v20 = vor.u32 %v11246_v38, %v9734_v41  ;;  %v9992_v41 = vld [vmem:[#allocation10 + $0x9b8] sm:$0xf0]  ;;  %v11337_v38 = vld [vmem:[#allocation10 + $0xa8c] sm:$0xf0]  ;;  %v11256_v61 = vld [vmem:[#allocation10 + $0x80c] sm:$0xf] }
 0x5e7   : > { %6335 = vmatpush.bf16.msrb.mxu1 %v9955_v2  ;;  %v11243_v2 = vld [vmem:[#allocation10 + $0x7a4] sm:$0xf]  ;;  %v5051_v19 = vadd.f32 %v5050_v30, %v5038_v47  ;;  %v9832_v30 = vld [vmem:[#allocation10 + $0x878] sm:$0xf0]  ;;  %v11310_v47 = vld [vmem:[#allocation10 + $0x9b4] sm:$0xf0] }
 0x5e8   : > { %6376 = vmatpush.bf16.msrb.mxu0 %v9927_v11  ;;  %6324 = vmatpush.bf16.msra.mxu2 %v9795_v50  ;;  %v9751_v11 = vor.u32 %v11250_v53, %v9750_v9  ;;  %v9846_v50 = vld [vmem:[#allocation10 + $0x888] sm:$0xf]  ;;  %v13283_v18 = vadd.f32 %v13276_v22, %v5077_v36  ;;  %v11312_v53 = vld [vmem:[#allocation10 + $0x9cc] sm:$0xf]  ;;  %v9835_v40 = vor.u32 %v11268_v29, %v9832_v30  ;;  %v10098_v36 = vld [vmem:[#allocation10 + $0xa80] sm:$0xf] }
 0x5e9   : > { %6363 = vmatpush.bf16.msra.mxu3 %v9799_v51  ;;  %v11349_v51 = vld [vmem:[#allocation10 + $0xaec] sm:$0xf0]  ;;  %v13286_v8 = vadd.f32 %v13252_v17, %v5051_v19  ;;  %v9715_v17 = vor.u32 %v11239_v59, %v9712_v45  ;;  %v10006_v9 = vld [vmem:[#allocation10 + $0x9c8] sm:$0xf]  ;;  %v9976_v45 = vld [vmem:[#allocation10 + $0x998] sm:$0xf0] }
 0x5ea   : > { %v9784_v1 = vld [vmem:[#allocation10 + $0x818] sm:$0xf0]  ;;  %v11252_v29 = vld [vmem:[#allocation10 + $0x7ec] sm:$0xf] }
 0x5eb   : > { %6336 = vmatpush.bf16.msrb.mxu1 %v9939_v43  ;;  %v11274_v43 = vld [vmem:[#allocation10 + $0x894] sm:$0xf0]  ;;  %v9768_v30 = vld [vmem:[#allocation10 + $0x7f8] sm:$0xf0] }
 0x5ec   : > { %6377 = vmatpush.bf16.msrb.mxu0 %v9911_v16  ;;  %6325 = vmatpush.bf16.msra.mxu2 %v9779_v31  ;;  %v9731_v16 = vor.u32 %v11243_v2, %v9728_v39  ;;  %v9847_v14 = vor.u32 %v11274_v43, %v9846_v50  ;;  %v11242_v31 = vld [vmem:[#allocation10 + $0x794] sm:$0xf0]  ;;  %v5039_v22 = vpop.f32.mrf.mxu2  ;;  %v10011_v2 = vor.u32 %v11312_v53, %v10008_v57  ;;  %v9990_v39 = vld [vmem:[#allocation10 + $0x9a8] sm:$0xf] }
 0x5ed   : > { %6364 = vmatpush.bf16.msra.mxu3 %v9783_v63  ;;  %v10022_v63 = vld [vmem:[#allocation10 + $0x9e8] sm:$0xf]  ;;  %v5078_v0 = vpop.f32.mrf.mxu3  ;;  %v9991_v19 = vor.u32 %v11310_v47, %v9990_v39  ;;  %v9787_v53 = vor.u32 %v11256_v61, %v9784_v1  ;;  %v11325_v47 = vld [vmem:[#allocation10 + $0xa2c] sm:$0xf0]  ;;  %v10324_v61 = vld [vmem:[#allocation10 + $0xc50] sm:$0xf0] }
 0x5ee   : > { %v10023_v35 = vor.u32 %v11318_v49, %v10022_v63  ;;  %v11333_v63 = vld [vmem:[#allocation10 + $0xa6c] sm:$0xf0] }
 0x5ef   : > { %6337 = vmatpush.bf16.msrb.mxu1 %v9923_v37  ;;  %v10147_v37 = vor.u32 %v11349_v51, %v10146_v7  ;;  %v9974_v51 = vld [vmem:[#allocation10 + $0x988] sm:$0xf]  ;;  %v11381_v49 = vld [vmem:[#allocation10 + $0xbec] sm:$0xf0] }
 0x5f0   : > { %6378 = vmatpush.bf16.msrb.mxu0 %v9895_v48  ;;  %6326 = vmatpush.bf16.msra.mxu2 %v9763_v23  ;;  %v5052_v48 = vpop.f32.mrf.mxu1  ;;  %v9719_v23 = vor.u32 %v11242_v31, %v9718_v28  ;;  %v11260_v28 = vld [vmem:[#allocation10 + $0x82c] sm:$0xf]  ;;  %v9800_v31 = vld [vmem:[#allocation10 + $0x838] sm:$0xf0] }
 0x5f1   : > { %6365 = vmatpush.bf16.msra.mxu3 %v9767_v46  ;;  %v10027_v46 = vor.u32 %v11316_v4, %v10024_v62  ;;  %v10274_v48 = vld [vmem:[#allocation10 + $0xbe0] sm:$0xf]  ;;  %v9803_v22 = vor.u32 %v11260_v28, %v9800_v31 }
 0x5f3   : > { %6338 = vmatpush.bf16.msrb.mxu1 %v9907_v5  ;;  %v9859_v5 = vor.u32 %v11275_v12, %v9856_v26  ;;  %v9960_v12 = vld [vmem:[#allocation10 + $0x978] sm:$0xf0]  ;;  %v10082_v26 = vld [vmem:[#allocation10 + $0xa60] sm:$0xf] }
 0x5f4   : > { %6379 = vmatpush.bf16.msrb.mxu0 %v9879_v33  ;;  %6327 = vmatpush.bf16.msra.mxu2 %v9747_v42  ;;  %v9840_v33 = vld [vmem:[#allocation10 + $0x890] sm:$0xf0]  ;;  %v5102_v50 = vpop.f32.mrf.mxu2  ;;  %v10083_v0 = vor.u32 %v11333_v63, %v10082_v26  ;;  %v11244_v26 = vld [vmem:[#allocation10 + $0x7ac] sm:$0xf]  ;;  %v9736_v63 = vld [vmem:[#allocation10 + $0x7b8] sm:$0xf0] }
 0x5f5   : > { %6366 = vmatpush.bf16.msra.mxu3 %v9751_v11  ;;  %v9843_v42 = vor.u32 %v11271_v10, %v9840_v33  ;;  %v10115_v11 = vor.u32 %v11341_v6, %v10114_v52  ;;  %v13291_v43 = vpop.f32.mrf.mxu3  ;;  %v13294_v59 = vadd.f32 %v5102_v50, %v13283_v18  ;;  %v9944_v10 = vld [vmem:[#allocation10 + $0x958] sm:$0xf0]  ;;  %v10258_v33 = vld [vmem:[#allocation10 + $0xbc0] sm:$0xf] }
 0x5f7   : > { %6339 = vmatpush.bf16.msrb.mxu1 %v9891_v44  ;;  %v10007_v44 = vor.u32 %v11314_v56, %v10006_v9  ;;  %v11377_v9 = vld [vmem:[#allocation10 + $0xbcc] sm:$0xf0] }
 0x5f8   : > { %6380 = vmatpush.bf16.msrb.mxu0 %v9863_v60  ;;  %6328 = vmatpush.bf16.msra.mxu2 %v9731_v16  ;;  %v11308_v60 = vld [vmem:[#allocation10 + $0x9ac] sm:$0xf]  ;;  %v11306_v16 = vld [vmem:[#allocation10 + $0x994] sm:$0xf0]  ;;  %v10259_v6 = vor.u32 %v11377_v9, %v10258_v33  ;;  %v9880_v9 = vld [vmem:[#allocation10 + $0x8d8] sm:$0xf0] }
 0x5f9   : > { %6367 = vmatpush.bf16.msra.mxu3 %v9735_v20  ;;  %v9995_v7 = vor.u32 %v11308_v60, %v9992_v41  ;;  %v9819_v20 = vor.u32 %v11264_v21, %v9816_v25  ;;  %v9975_v62 = vor.u32 %v11306_v16, %v9974_v51  ;;  %v9771_v21 = vor.u32 %v11252_v29, %v9768_v30  ;;  %v9912_v51 = vld [vmem:[#allocation10 + $0x918] sm:$0xf0]  ;;  %v10034_v16 = vld [vmem:[#allocation10 + $0xa00] sm:$0xf]  ;;  %v11280_v33 = vld [vmem:[#allocation10 + $0x8cc] sm:$0xf] }
 0x5fa   : > { %v11397_v29 = vld [vmem:[#allocation10 + $0xc6c] sm:$0xf0]  ;;  %v11387_v30 = vld [vmem:[#allocation10 + $0xc24] sm:$0xf] }
 0x5fb   : > { %6340 = vmatpush.bf16.msrb.mxu1 %v9875_v27  ;;  %v11304_v27 = vld [vmem:[#allocation10 + $0x98c] sm:$0xf] }
 0x5fc   : > { %6381 = vmatpush.bf16.msrb.mxu0 %v9847_v14  ;;  %6329 = vmatpush.bf16.msra.mxu2 %v9715_v17  ;;  %v10099_v14 = vor.u32 %v11337_v38, %v10098_v36  ;;  %v13297_v4 = vpop.f32.mrf.mxu0  ;;  %v9979_v18 = vor.u32 %v11304_v27, %v9976_v45  ;;  %v5104_v56 = vpop.f32.mrf.mxu2  ;;  %v11248_v36 = vld [vmem:[#allocation10 + $0x7cc] sm:$0xf]  ;;  %v9752_v38 = vld [vmem:[#allocation10 + $0x7d8] sm:$0xf0]  ;;  %v10226_v27 = vld [vmem:[#allocation10 + $0xb80] sm:$0xf] }
 0x5fd   : > { %6368 = vmatpush.bf16.msra.mxu3 %v9719_v23  ;;  %v10275_v23 = vor.u32 %v11381_v49, %v10274_v48  ;;  %v10340_v45 = vld [vmem:[#allocation10 + $0xc70] sm:$0xf0]  ;;  %v9755_v28 = vor.u32 %v11248_v36, %v9752_v38  ;;  %v11284_v48 = vld [vmem:[#allocation10 + $0x8ec] sm:$0xf]  ;;  %v11357_v36 = vld [vmem:[#allocation10 + $0xb2c] sm:$0xf0] }
 0x5fe   : > { %v10322_v38 = vld [vmem:[#allocation10 + $0xc40] sm:$0xf] }
 0x5ff   : > { %6382 = vmatmul.bf16.vlgmr.msrb.gmra.mxu0 %v13267_v34  ;;  %6341 = vmatpush.bf16.msrb.mxu1 %v9859_v5  ;;  %v11296_v5 = vld [vmem:[#allocation10 + $0x94c] sm:$0xf] }
 0x600   : > { %6932 = vmatpush.bf16.msra.mxu0 %v10147_v37  ;;  %6391 = vmatpush.bf16.msrb.mxu2 %v10023_v35  ;;  %v11300_v37 = vld [vmem:[#allocation10 + $0x96c] sm:$0xf]  ;;  %v10066_v35 = vld [vmem:[#allocation10 + $0xa40] sm:$0xf]  ;;  %v9947_v57 = vor.u32 %v11296_v5, %v9944_v10 }
 0x601   : > { %6430 = vmatpush.bf16.msrb.mxu3 %v10027_v46  ;;  %6330 = vmatmul.bf16.vlgmr.msra.gmra.mxu2 %v13255_v24  ;;  %v9963_v17 = vor.u32 %v11300_v37, %v9960_v12  ;;  %v11329_v46 = vld [vmem:[#allocation10 + $0xa4c] sm:$0xf0]  ;;  %v11240_v5 = vld [vmem:[#allocation10 + $0x78c] sm:$0xf] }
 0x602   : > { %6369 = vmatmul.bf16.vlgmr.msra.gmra.mxu3 %v13255_v24  ;;  %v10067_v52 = vor.u32 %v11329_v46, %v10066_v35  ;;  %v9720_v46 = vld [vmem:[#allocation10 + $0x798] sm:$0xf0] }
 0x603   : > { %6342 = vmatpush.bf16.msrb.mxu1 %v9843_v42  ;;  %v11292_v42 = vld [vmem:[#allocation10 + $0x92c] sm:$0xf]  ;;  %v5115_v39 = vpop.f32.mrf.mxu1 }
 0x604   : > { %6933 = vmatpush.bf16.msra.mxu0 %v10131_v54  ;;  %6392 = vmatpush.bf16.msrb.mxu2 %v10007_v44  ;;  %v5143_v54 = vpop.f32.mrf.mxu3  ;;  %v9928_v44 = vld [vmem:[#allocation10 + $0x938] sm:$0xf0]  ;;  %v13300_v60 = vadd.f32 %v5115_v39, %v13261_v58  ;;  %v5645_v41 = vpop.f32.mrf.mxu0  ;;  %v11321_v58 = vld [vmem:[#allocation10 + $0xa0c] sm:$0xf0]  ;;  %v11276_v39 = vld [vmem:[#allocation10 + $0x8ac] sm:$0xf] }
 0x605   : > { %6431 = vmatpush.bf16.msrb.mxu3 %v10011_v2  ;;  %v10050_v2 = vld [vmem:[#allocation10 + $0xa20] sm:$0xf]  ;;  %v9931_v25 = vor.u32 %v11292_v42, %v9928_v44  ;;  %v10035_v37 = vor.u32 %v11321_v58, %v10034_v16  ;;  %v9883_v44 = vor.u32 %v11280_v33, %v9880_v9  ;;  %v11385_v9 = vld [vmem:[#allocation10 + $0xc0c] sm:$0xf0] }
 0x606   : > { %6343 = vmatmul.bf16.vlgmr.msrb.gmra.mxu1 %v13267_v34  ;;  %v10051_v50 = vor.u32 %v11325_v47, %v10050_v2  ;;  %v10194_v54 = vld [vmem:[#allocation10 + $0xb40] sm:$0xf]  ;;  %v9864_v47 = vld [vmem:[#allocation10 + $0x8b8] sm:$0xf0] }
 0x607   : > { %6400 = vmatpush.bf16.msra.mxu1 %v9835_v40  ;;  %v10242_v40 = vld [vmem:[#allocation10 + $0xba0] sm:$0xf] }
 0x608   : > { %6934 = vmatpush.bf16.msra.mxu0 %v10115_v11  ;;  %6393 = vmatpush.bf16.msrb.mxu2 %v9991_v19  ;;  %v11373_v11 = vld [vmem:[#allocation10 + $0xbac] sm:$0xf0]  ;;  %v10290_v33 = vld [vmem:[#allocation10 + $0xc00] sm:$0xf] }
 0x609   : > { %6432 = vmatpush.bf16.msrb.mxu3 %v9995_v7  ;;  %v10243_v19 = vor.u32 %v11373_v11, %v10242_v40  ;;  %v11288_v7 = vld [vmem:[#allocation10 + $0x90c] sm:$0xf] }
 0x60a   : > { %v9915_v31 = vor.u32 %v11288_v7, %v9912_v51  ;;  %v11383_v7 = vld [vmem:[#allocation10 + $0xc04] sm:$0xf]  ;;  %v10292_v51 = vld [vmem:[#allocation10 + $0xc10] sm:$0xf0] }
 0x60b   : > { %6401 = vmatpush.bf16.msra.mxu1 %v9819_v20  ;;  %v11369_v20 = vld [vmem:[#allocation10 + $0xb8c] sm:$0xf0] }
 0x60c   : > { %6935 = vmatpush.bf16.msra.mxu0 %v10099_v14  ;;  %6394 = vmatpush.bf16.msrb.mxu2 %v9975_v62  ;;  %v11395_v14 = vld [vmem:[#allocation10 + $0xc64] sm:$0xf]  ;;  %v10227_v12 = vor.u32 %v11369_v20, %v10226_v27  ;;  %v5117_v62 = vpop.f32.mrf.mxu1  ;;  %v10282_v20 = vld [vmem:[#allocation10 + $0xbe8] sm:$0xf] }
 0x60d   : > { %6433 = vmatpush.bf16.msrb.mxu3 %v9979_v18  ;;  %v10343_v49 = vor.u32 %v11395_v14, %v10340_v45  ;;  %v9896_v18 = vld [vmem:[#allocation10 + $0x8f8] sm:$0xf0]  ;;  %v11382_v14 = vld [vmem:[#allocation10 + $0xbf4] sm:$0xf0]  ;;  %v11272_v45 = vld [vmem:[#allocation10 + $0x88c] sm:$0xf] }
 0x60e   : > { %v13306_v1 = vpop.f32.mrf.mxu0  ;;  %v9899_v10 = vor.u32 %v11284_v48, %v9896_v18  ;;  %v11389_v48 = vld [vmem:[#allocation10 + $0xc2c] sm:$0xf0]  ;;  %v11347_v62 = vld [vmem:[#allocation10 + $0xae4] sm:$0xf]  ;;  %v10148_v18 = vld [vmem:[#allocation10 + $0xaf0] sm:$0xf0] }
 0x60f   : > { %6402 = vmatpush.bf16.msra.mxu1 %v9803_v22  ;;  %v11365_v22 = vld [vmem:[#allocation10 + $0xb6c] sm:$0xf0] }
 0x610   : > { %6413 = vmatpush.bf16.msra.mxu2 %v9963_v17  ;;  %6936 = vmatpush.bf16.msra.mxu0 %v10083_v0  ;;  %v11391_v17 = vld [vmem:[#allocation10 + $0xc44] sm:$0xf]  ;;  %v13309_v0 = vrot.slane %v13163_v55, 2  ;;  %v9723_v55 = vor.u32 %v11240_v5, %v9720_v46  ;;  %v10151_v46 = vor.u32 %v11347_v62, %v10148_v18  ;;  %v10090_v62 = vld [vmem:[#allocation10 + $0xa68] sm:$0xf] }
 0x611   : > { %6945 = vmatpush.bf16.msra.mxu3 %v10275_v23  ;;  %10030 = vmatmul.msk.bf16.vlgmr.msrb.gmra.mxu2 %vm3754_vm8, %v13270_v15  ;;  %v9739_v23 = vor.u32 %v11244_v26, %v9736_v63  ;;  %v10327_v56 = vor.u32 %v11391_v17, %v10324_v61  ;;  %v11353_v26 = vld [vmem:[#allocation10 + $0xb0c] sm:$0xf0]  ;;  %v10306_v63 = vld [vmem:[#allocation10 + $0xc20] sm:$0xf]  ;;  %v10266_v17 = vld [vmem:[#allocation10 + $0xbc8] sm:$0xf] }
 0x612   : > { %10031 = vmatmul.msk.bf16.vlgmr.msrb.gmra.mxu3 %vm3754_vm8, %v13270_v15  ;;  %v10210_v15 = vld [vmem:[#allocation10 + $0xb60] sm:$0xf]  ;;  %v11378_v61 = vld [vmem:[#allocation10 + $0xbd4] sm:$0xf0] }
 0x613   : > { %6403 = vmatpush.bf16.msra.mxu1 %v9787_v53  ;;  %v10211_v35 = vor.u32 %v11365_v22, %v10210_v15  ;;  %v11361_v53 = vld [vmem:[#allocation10 + $0xb4c] sm:$0xf0]  ;;  %v10154_v15 = vld [vmem:[#allocation10 + $0xae8] sm:$0xf]  ;;  %v11350_v22 = vld [vmem:[#allocation10 + $0xaf4] sm:$0xf0] }
 0x614   : > { %6414 = vmatpush.bf16.msra.mxu2 %v9947_v57  ;;  %6937 = vmatpush.bf16.msra.mxu0 %v10067_v52  ;;  %v10338_v57 = vld [vmem:[#allocation10 + $0xc60] sm:$0xf]  ;;  %v10308_v52 = vld [vmem:[#allocation10 + $0xc30] sm:$0xf0]  ;;  %v10195_v2 = vor.u32 %v11361_v53, %v10194_v54  ;;  %v10267_v54 = vor.u32 %v11378_v61, %v10266_v17  ;;  %v11343_v53 = vld [vmem:[#allocation10 + $0xac4] sm:$0xf] }
 0x615   : > { %6946 = vmatpush.bf16.msra.mxu3 %v10259_v6  ;;  %v5128_v6 = vpop.f32.mrf.mxu2  ;;  %v5656_v42 = vpop.f32.mrf.mxu3  ;;  %v10339_v41 = vor.u32 %v11397_v29, %v10338_v57  ;;  %v10132_v57 = vld [vmem:[#allocation10 + $0xad0] sm:$0xf0]  ;;  %v10138_v29 = vld [vmem:[#allocation10 + $0xac8] sm:$0xf] }
 0x616   : > { %v5129_v40 = vadd.f32 %v5128_v6, %v13300_v60  ;;  %v5657_v11 = vadd.f32 %v5656_v42, %v13297_v4  ;;  %v5710_v27 = vpop.f32.mrf.mxu0  ;;  %v9867_v4 = vor.u32 %v11276_v39, %v9864_v47  ;;  %v10250_v6 = vld [vmem:[#allocation10 + $0xba8] sm:$0xf]  ;;  %v11374_v42 = vld [vmem:[#allocation10 + $0xbb4] sm:$0xf0]  ;;  %v10291_v39 = vor.u32 %v11385_v9, %v10290_v33  ;;  %v10228_v17 = vld [vmem:[#allocation10 + $0xb90] sm:$0xf0] }
 0x617   : > { %6404 = vmatpush.bf16.msra.mxu1 %v9771_v21  ;;  %v10311_v21 = vor.u32 %v11387_v30, %v10308_v52  ;;  %v11346_v30 = vld [vmem:[#allocation10 + $0xad4] sm:$0xf0]  ;;  %v11379_v52 = vld [vmem:[#allocation10 + $0xbe4] sm:$0xf]  ;;  %v10135_v47 = vor.u32 %v11343_v53, %v10132_v57  ;;  %v10202_v61 = vld [vmem:[#allocation10 + $0xb48] sm:$0xf] }
 0x618   : > { %6415 = vmatpush.bf16.msra.mxu2 %v9931_v25  ;;  %6938 = vmatpush.bf16.msra.mxu0 %v10051_v50  ;;  %v10178_v25 = vld [vmem:[#allocation10 + $0xb20] sm:$0xf]  ;;  %v5669_v50 = vpop.f32.mrf.mxu1  ;;  %v13315_v16 = vadd.f32 %v13291_v43, %v5129_v40  ;;  %v10295_v43 = vor.u32 %v11383_v7, %v10292_v51  ;;  %v10139_v40 = vor.u32 %v11346_v30, %v10138_v29  ;;  %v11335_v27 = vld [vmem:[#allocation10 + $0xa84] sm:$0xf]  ;;  %v10074_v33 = vld [vmem:[#allocation10 + $0xa48] sm:$0xf] }
 0x619   : > { %6947 = vmatpush.bf16.msra.mxu3 %v10243_v19  ;;  %v11393_v19 = vld [vmem:[#allocation10 + $0xc4c] sm:$0xf0]  ;;  %v5670_v58 = vadd.f32 %v5669_v50, %v5657_v11  ;;  %v10179_v60 = vor.u32 %v11357_v36, %v10178_v25  ;;  %v10122_v25 = vld [vmem:[#allocation10 + $0xaa8] sm:$0xf]  ;;  %v10251_v36 = vor.u32 %v11374_v42, %v10250_v6  ;;  %v10260_v50 = vld [vmem:[#allocation10 + $0xbd0] sm:$0xf0] }
 0x61a   : > { %v10186_v53 = vld [vmem:[#allocation10 + $0xb28] sm:$0xf]  ;;  %v11358_v57 = vld [vmem:[#allocation10 + $0xb34] sm:$0xf0] }
 0x61b   : > { %6405 = vmatpush.bf16.msra.mxu1 %v9755_v28  ;;  %v9848_v28 = vld [vmem:[#allocation10 + $0x898] sm:$0xf0] }
 0x61c   : > { %6416 = vmatpush.bf16.msra.mxu2 %v9915_v31  ;;  %6939 = vmatpush.bf16.msra.mxu0 %v10035_v37  ;;  %v10162_v31 = vld [vmem:[#allocation10 + $0xb00] sm:$0xf]  ;;  %v13318_v37 = vadd.f32 %v5670_v58, %v13263_v3  ;;  %v9851_v3 = vor.u32 %v11272_v45, %v9848_v28  ;;  %v10244_v45 = vld [vmem:[#allocation10 + $0xbb0] sm:$0xf0]  ;;  %v10218_v28 = vld [vmem:[#allocation10 + $0xb68] sm:$0xf] }
 0x61d   : > { %6948 = vmatpush.bf16.msra.mxu3 %v10227_v12  ;;  %v10323_v12 = vor.u32 %v11393_v19, %v10322_v38  ;;  %v5658_v5 = vpop.f32.mrf.mxu3  ;;  %v11342_v38 = vld [vmem:[#allocation10 + $0xab4] sm:$0xf0] }
 0x61e   : > { %v11370_v19 = vld [vmem:[#allocation10 + $0xb94] sm:$0xf0]  ;;  %v10123_v51 = vor.u32 %v11342_v38, %v10122_v25  ;;  %v10187_v25 = vor.u32 %v11358_v57, %v10186_v53  ;;  %v11359_v38 = vld [vmem:[#allocation10 + $0xb44] sm:$0xf]  ;;  %v11344_v53 = vld [vmem:[#allocation10 + $0xacc] sm:$0xf] }
 0x61f   : > { %6940 = vmatmul.bf16.vlgmr.msra.gmra.mxu0 %v13309_v0  ;;  %6406 = vmatpush.bf16.msra.mxu1 %v9739_v23  ;;  %v5130_v23 = vpop.f32.mrf.mxu2  ;;  %v10140_v57 = vld [vmem:[#allocation10 + $0xad8] sm:$0xf0] }
 0x620   : > { %7001 = vmatpush.bf16.msrb.mxu0 %v10343_v49  ;;  %6417 = vmatpush.bf16.msra.mxu2 %v9899_v10  ;;  %v10283_v49 = vor.u32 %v11382_v14, %v10282_v20  ;;  %v10163_v10 = vor.u32 %v11353_v26, %v10162_v31  ;;  %v10106_v20 = vld [vmem:[#allocation10 + $0xa88] sm:$0xf]  ;;  %v11366_v31 = vld [vmem:[#allocation10 + $0xb74] sm:$0xf0] }
 0x621   : > { %6949 = vmatpush.bf16.msra.mxu3 %v10211_v35  ;;  %v10307_v35 = vor.u32 %v11389_v48, %v10306_v63  ;;  %v11331_v48 = vld [vmem:[#allocation10 + $0xa64] sm:$0xf]  ;;  %v10219_v18 = vor.u32 %v11366_v31, %v10218_v28  ;;  %v11362_v23 = vld [vmem:[#allocation10 + $0xb54] sm:$0xf0]  ;;  %v10180_v28 = vld [vmem:[#allocation10 + $0xb30] sm:$0xf0] }
 0x622   : > { %v10203_v9 = vor.u32 %v11362_v23, %v10202_v61  ;;  %v10346_v31 = vld [vmem:[#allocation10 + $0xc68] sm:$0xf]  ;;  %v11394_v23 = vld [vmem:[#allocation10 + $0xc54] sm:$0xf0] }
 0x623   : > { %6407 = vmatpush.bf16.msra.mxu1 %v9723_v55  ;;  %v10276_v55 = vld [vmem:[#allocation10 + $0xbf0] sm:$0xf0]  ;;  %v10330_v61 = vld [vmem:[#allocation10 + $0xc48] sm:$0xf] }
 0x624   : > { %7002 = vmatpush.bf16.msrb.mxu0 %v10327_v56  ;;  %6418 = vmatpush.bf16.msra.mxu2 %v9883_v44  ;;  %v5671_v56 = vpop.f32.mrf.mxu1  ;;  %v13322_v44 = vrot.slane %v13165_v32, 2  ;;  %v10279_v11 = vor.u32 %v11379_v52, %v10276_v55  ;;  %v11375_v32 = vld [vmem:[#allocation10 + $0xbc4] sm:$0xf] }
 0x625   : > { %6950 = vmatpush.bf16.msra.mxu3 %v10195_v2  ;;  %v13325_v2 = vrot.slane %v13176_v13, 2  ;;  %v10234_v13 = vld [vmem:[#allocation10 + $0xb88] sm:$0xf]  ;;  %v10263_v58 = vor.u32 %v11375_v32, %v10260_v50  ;;  %v11363_v56 = vld [vmem:[#allocation10 + $0xb64] sm:$0xf] }
 0x626   : > { %6408 = vmatmul.bf16.vlgmr.msra.gmra.mxu1 %v13255_v24  ;;  %v10155_v24 = vor.u32 %v11350_v22, %v10154_v15  ;;  %v10235_v14 = vor.u32 %v11370_v19, %v10234_v13  ;;  %v11334_v15 = vld [vmem:[#allocation10 + $0xa74] sm:$0xf0]  ;;  %v11367_v22 = vld [vmem:[#allocation10 + $0xb84] sm:$0xf]  ;;  %v10196_v32 = vld [vmem:[#allocation10 + $0xb50] sm:$0xf0] }
 0x627   : > { %6962 = vmatpush.bf16.msrb.mxu1 %v10339_v41  ;;  %v11339_v41 = vld [vmem:[#allocation10 + $0xaa4] sm:$0xf]  ;;  %v10170_v50 = vld [vmem:[#allocation10 + $0xb08] sm:$0xf]  ;;  %v11354_v13 = vld [vmem:[#allocation10 + $0xb14] sm:$0xf0] }
 0x628   : > { %7003 = vmatpush.bf16.msrb.mxu0 %v10311_v21  ;;  %6419 = vmatpush.bf16.msra.mxu2 %v9867_v4  ;;  %v10116_v21 = vld [vmem:[#allocation10 + $0xab0] sm:$0xf0]  ;;  %v11338_v4 = vld [vmem:[#allocation10 + $0xa94] sm:$0xf0] }
 0x629   : > { %6951 = vmatpush.bf16.msra.mxu3 %v10179_v60  ;;  %v10119_v7 = vor.u32 %v11339_v41, %v10116_v21  ;;  %v11371_v60 = vld [vmem:[#allocation10 + $0xba4] sm:$0xf]  ;;  %v10107_v26 = vor.u32 %v11338_v4, %v10106_v20  ;;  %v10042_v4 = vld [vmem:[#allocation10 + $0xa08] sm:$0xf] }
 0x62a   : > { %v10247_v63 = vor.u32 %v11371_v60, %v10244_v45  ;;  %v11322_v60 = vld [vmem:[#allocation10 + $0xa14] sm:$0xf0]  ;;  %v11355_v45 = vld [vmem:[#allocation10 + $0xb24] sm:$0xf] }
 0x62b   : > { %6963 = vmatpush.bf16.msrb.mxu1 %v10323_v12 }
 0x62c   : > { %7004 = vmatpush.bf16.msrb.mxu0 %v10295_v43  ;;  %6420 = vmatpush.bf16.msra.mxu2 %v9851_v3  ;;  %v5734_v12 = vpop.f32.mrf.mxu0  ;;  %v10091_v3 = vor.u32 %v11334_v15, %v10090_v62  ;;  %v10043_v62 = vor.u32 %v11322_v60, %v10042_v4  ;;  %v11351_v15 = vld [vmem:[#allocation10 + $0xb04] sm:$0xf]  ;;  %v10268_v4 = vld [vmem:[#allocation10 + $0xbd8] sm:$0xf0] }
 0x62d   : > { %6952 = vmatpush.bf16.msra.mxu3 %v10163_v10  ;;  %v10231_v10 = vor.u32 %v11367_v22, %v10228_v17  ;;  %v10164_v22 = vld [vmem:[#allocation10 + $0xb10] sm:$0xf0] }
 0x62f   : > { %6964 = vmatpush.bf16.msrb.mxu1 %v10307_v35  ;;  %6421 = vmatmul.bf16.vlgmr.msra.gmra.mxu2 %v13267_v34  ;;  %v10100_v34 = vld [vmem:[#allocation10 + $0xa90] sm:$0xf0]  ;;  %v11327_v35 = vld [vmem:[#allocation10 + $0xa44] sm:$0xf] }
 0x630   : > { %7023 = vmatpush.bf16.msra.mxu0 %v10283_v49  ;;  %6971 = vmatpush.bf16.msrb.mxu2 %v10151_v46  ;;  %v10103_v43 = vor.u32 %v11335_v27, %v10100_v34  ;;  %v10084_v49 = vld [vmem:[#allocation10 + $0xa70] sm:$0xf0]  ;;  %v11319_v27 = vld [vmem:[#allocation10 + $0xa04] sm:$0xf] }
 0x631   : > { %7010 = vmatpush.bf16.msrb.mxu3 %v10155_v24  ;;  %10353 = vmatmul.msk.bf16.vlgmr.msrb.gmra.mxu0 %vm3754_vm8, %v13325_v2  ;;  %v10087_v5 = vor.u32 %v11331_v48, %v10084_v49  ;;  %v10068_v46 = vld [vmem:[#allocation10 + $0xa50] sm:$0xf0]  ;;  %v11330_v24 = vld [vmem:[#allocation10 + $0xa54] sm:$0xf0] }
 0x632   : > { %6953 = vmatmul.bf16.vlgmr.msra.gmra.mxu3 %v13322_v44  ;;  %v10071_v52 = vor.u32 %v11327_v35, %v10068_v46  ;;  %v10075_v42 = vor.u32 %v11330_v24, %v10074_v33  ;;  %v10036_v34 = vld [vmem:[#allocation10 + $0xa10] sm:$0xf0]  ;;  %v10332_v35 = vld [vmem:[#allocation10 + $0xc58] sm:$0xf0]  ;;  %v10167_v46 = vor.u32 %v11351_v15, %v10164_v22  ;;  %v10331_v33 = vor.u32 %v11394_v23, %v10330_v61  ;;  %v10470_v22 = vld [vmem:[#allocation13 + $0xe0] sm:$0xf] }
 0x633   : > { %6965 = vmatpush.bf16.msrb.mxu1 %v10291_v39  ;;  %v5695_v29 = vpop.f32.mrf.mxu1  ;;  %v10236_v15 = vld [vmem:[#allocation10 + $0xb98] sm:$0xf0] }
 0x634   : > { %7024 = vmatpush.bf16.msra.mxu0 %v10267_v54  ;;  %6972 = vmatpush.bf16.msrb.mxu2 %v10135_v47  ;;  %v10212_v54 = vld [vmem:[#allocation10 + $0xb70] sm:$0xf0]  ;;  %v5736_v30 = vpop.f32.mrf.mxu0  ;;  %v5682_v55 = vpop.f32.mrf.mxu2  ;;  %v11323_v47 = vld [vmem:[#allocation10 + $0xa24] sm:$0xf] }
 0x635   : > { %7011 = vmatpush.bf16.msrb.mxu3 %v10139_v40  ;;  %v5721_v6 = vpop.f32.mrf.mxu3  ;;  %v10215_v39 = vor.u32 %v11363_v56, %v10212_v54  ;;  %v10052_v40 = vld [vmem:[#allocation10 + $0xa30] sm:$0xf0]  ;;  %v5696_v41 = vadd.f32 %v5695_v29, %v5682_v55  ;;  %v10314_v56 = vld [vmem:[#allocation10 + $0xc28] sm:$0xf]  ;;  %v11390_v54 = vld [vmem:[#allocation10 + $0xc34] sm:$0xf0] }
 0x636   : > { %10352 = vmatmul.msk.bf16.vlgmr.msrb.gmra.mxu1 %vm3754_vm8, %v13325_v2  ;;  %v13333_v21 = vadd.f32 %v5734_v12, %v5721_v6  ;;  %v11398_v12 = vld [vmem:[#allocation10 + $0xc74] sm:$0xf0]  ;;  %v11388_v29 = vld [vmem:[#allocation10 + $0xc2c] sm:$0xf]  ;;  %v10316_v30 = vld [vmem:[#allocation10 + $0xc38] sm:$0xf0]  ;;  %v10315_v55 = vor.u32 %v11390_v54, %v10314_v56 }
 0x637   : > { %6984 = vmatpush.bf16.msra.mxu1 %v10279_v11  ;;  %v10058_v11 = vld [vmem:[#allocation10 + $0xa28] sm:$0xf]  ;;  %v5709_v19 = vadd.f32 %v13306_v1, %v5696_v41  ;;  %v11340_v41 = vld [vmem:[#allocation10 + $0xaac] sm:$0xf]  ;;  %v10044_v54 = vld [vmem:[#allocation10 + $0xa18] sm:$0xf0] }
 0x638   : > { %7025 = vmatpush.bf16.msra.mxu0 %v10251_v36  ;;  %6973 = vmatpush.bf16.msrb.mxu2 %v10119_v7  ;;  %v11326_v36 = vld [vmem:[#allocation10 + $0xa34] sm:$0xf0]  ;;  %v10055_v7 = vor.u32 %v11323_v47, %v10052_v40  ;;  %v10319_v47 = vor.u32 %v11388_v29, %v10316_v30  ;;  %v10298_v40 = vld [vmem:[#allocation10 + $0xc08] sm:$0xf]  ;;  %v11320_v56 = vld [vmem:[#allocation10 + $0xa0c] sm:$0xf] }
 0x639   : > { %7012 = vmatpush.bf16.msrb.mxu3 %v10123_v51  ;;  %v10059_v51 = vor.u32 %v11326_v36, %v10058_v11  ;;  %v13337_v20 = vadd.f32 %v5709_v19, %v13286_v8  ;;  %v10183_v8 = vor.u32 %v11355_v45, %v10180_v28  ;;  %v11386_v11 = vld [vmem:[#allocation10 + $0xc14] sm:$0xf0]  ;;  %v11380_v36 = vld [vmem:[#allocation10 + $0xbec] sm:$0xf]  ;;  %v10454_v29 = vld [vmem:[#allocation13 + $0xc0] sm:$0xf] }
 0x63a   : > { %v10299_v19 = vor.u32 %v11386_v11, %v10298_v40  ;;  %v11425_v30 = vld [vmem:[#allocation13 + $0xcc] sm:$0xf0]  ;;  %v10188_v40 = vld [vmem:[#allocation10 + $0xb38] sm:$0xf0] }
 0x63b   : > { %6985 = vmatpush.bf16.msra.mxu1 %v10263_v58  ;;  %v10199_v58 = vor.u32 %v11359_v38, %v10196_v32  ;;  %v5697_v1 = vpop.f32.mrf.mxu1  ;;  %v10284_v38 = vld [vmem:[#allocation10 + $0xbf8] sm:$0xf0] }
 0x63c   : > { %7026 = vmatpush.bf16.msra.mxu0 %v10235_v14  ;;  %6974 = vmatpush.bf16.msrb.mxu2 %v10103_v43  ;;  %v10171_v14 = vor.u32 %v11354_v13, %v10170_v50  ;;  %v10039_v43 = vor.u32 %v11319_v27, %v10036_v34  ;;  %v5684_v48 = vpop.f32.mrf.mxu2  ;;  %v11384_v50 = vld [vmem:[#allocation10 + $0xc0c] sm:$0xf]  ;;  %v10300_v13 = vld [vmem:[#allocation10 + $0xc18] sm:$0xf0] }
 0x63d   : > { %7013 = vmatpush.bf16.msrb.mxu3 %v10107_v26  ;;  %v11396_v26 = vld [vmem:[#allocation10 + $0xc6c] sm:$0xf]  ;;  %v5723_v49 = vpop.f32.mrf.mxu3  ;;  %v10303_v27 = vor.u32 %v11384_v50, %v10300_v13  ;;  %v10108_v34 = vld [vmem:[#allocation10 + $0xa98] sm:$0xf0]  ;;  %v10438_v50 = vld [vmem:[#allocation13 + $0xa0] sm:$0xf] }
 0x63e   : > { %v11372_v1 = vld [vmem:[#allocation10 + $0xbac] sm:$0xf]  ;;  %v11421_v13 = vld [vmem:[#allocation13 + $0xac] sm:$0xf0] }
 0x63f   : > { %6986 = vmatpush.bf16.msra.mxu1 %v10247_v63  ;;  %v10348_v63 = vld [vmem:[#allocation10 + $0xc78] sm:$0xf0] }
 0x640   : > { %7027 = vmatpush.bf16.msra.mxu0 %v10219_v18  ;;  %6975 = vmatpush.bf16.msrb.mxu2 %v10087_v5  ;;  %v10347_v18 = vor.u32 %v11398_v12, %v10346_v31  ;;  %v10351_v17 = vor.u32 %v11396_v26, %v10348_v63  ;;  %v11348_v5 = vld [vmem:[#allocation10 + $0xaec] sm:$0xf]  ;;  %v10092_v12 = vld [vmem:[#allocation10 + $0xa78] sm:$0xf0] }
 0x641   : > { %7014 = vmatpush.bf16.msrb.mxu3 %v10091_v3  ;;  %v10156_v3 = vld [vmem:[#allocation10 + $0xaf8] sm:$0xf0]  ;;  %v11332_v31 = vld [vmem:[#allocation10 + $0xa6c] sm:$0xf] }
 0x642   : > { %v10095_v48 = vor.u32 %v11332_v31, %v10092_v12 }
 0x643   : > { %6987 = vmatpush.bf16.msra.mxu1 %v10231_v10  ;;  %v11392_v10 = vld [vmem:[#allocation10 + $0xc4c] sm:$0xf] }
 0x644   : > { %7028 = vmatpush.bf16.msra.mxu0 %v10203_v9  ;;  %6976 = vmatpush.bf16.msrb.mxu2 %v10071_v52  ;;  %v10159_v9 = vor.u32 %v11348_v5, %v10156_v3  ;;  %v10335_v24 = vor.u32 %v11392_v10, %v10332_v35  ;;  %v5747_v52 = vpop.f32.mrf.mxu2  ;;  %v11324_v3 = vld [vmem:[#allocation10 + $0xa2c] sm:$0xf]  ;;  %v10060_v10 = vld [vmem:[#allocation10 + $0xa38] sm:$0xf0] }
 0x645   : > { %7015 = vmatpush.bf16.msrb.mxu3 %v10075_v42  ;;  %v5748_v6 = vadd.f32 %v5747_v52, %v13333_v21  ;;  %v13343_v42 = vpop.f32.mrf.mxu3  ;;  %v11364_v35 = vld [vmem:[#allocation10 + $0xb6c] sm:$0xf]  ;;  %v10047_v52 = vor.u32 %v11320_v56, %v10044_v54  ;;  %v11453_v56 = vld [vmem:[#allocation13 + $0x1ac] sm:$0xf0] }
 0x647   : > { %6988 = vmatpush.bf16.msra.mxu1 %v10215_v39  ;;  %v10143_v39 = vor.u32 %v11344_v53, %v10140_v57  ;;  %v13346_v32 = vadd.f32 %v5748_v6, %v13294_v59  ;;  %v11360_v53 = vld [vmem:[#allocation10 + $0xb4c] sm:$0xf]  ;;  %v10204_v57 = vld [vmem:[#allocation10 + $0xb58] sm:$0xf0]  ;;  %v10455_v6 = vor.u32 %v11425_v30, %v10454_v29  ;;  %v10440_v29 = vld [vmem:[#allocation13 + $0xb0] sm:$0xf0] }
 0x648   : > { %7029 = vmatpush.bf16.msra.mxu0 %v10187_v25  ;;  %6977 = vmatpush.bf16.msrb.mxu2 %v10055_v7  ;;  %v10124_v25 = vld [vmem:[#allocation10 + $0xab8] sm:$0xf0] }
 0x649   : > { %7016 = vmatpush.bf16.msrb.mxu3 %v10059_v51  ;;  %v10127_v7 = vor.u32 %v11340_v41, %v10124_v25  ;;  %v10287_v51 = vor.u32 %v11380_v36, %v10284_v38 }
 0x64b   : > { %6989 = vmatpush.bf16.msra.mxu1 %v10199_v58  ;;  %v11336_v58 = vld [vmem:[#allocation10 + $0xa8c] sm:$0xf] }
 0x64c   : > { %7030 = vmatpush.bf16.msra.mxu0 %v10171_v14  ;;  %6978 = vmatpush.bf16.msrb.mxu2 %v10039_v43  ;;  %v13349_v21 = vpop.f32.mrf.mxu0  ;;  %v11376_v14 = vld [vmem:[#allocation10 + $0xbcc] sm:$0xf]  ;;  %v5749_v59 = vpop.f32.mrf.mxu2  ;;  %v10111_v45 = vor.u32 %v11336_v58, %v10108_v34  ;;  %v10252_v43 = vld [vmem:[#allocation10 + $0xbb8] sm:$0xf0] }
 0x64d   : > { %7017 = vmatpush.bf16.msrb.mxu3 %v10043_v62  ;;  %v5788_v60 = vpop.f32.mrf.mxu3  ;;  %v10271_v28 = vor.u32 %v11376_v14, %v10268_v4  ;;  %v10255_v49 = vor.u32 %v11372_v1, %v10252_v43  ;;  %v11328_v62 = vld [vmem:[#allocation10 + $0xa4c] sm:$0xf]  ;;  %v10172_v34 = vld [vmem:[#allocation10 + $0xb18] sm:$0xf0]  ;;  %v11417_v59 = vld [vmem:[#allocation13 + $0x8c] sm:$0xf0] }
 0x64e   : > { %v10406_v60 = vld [vmem:[#allocation13 + $0x60] sm:$0xf] }
 0x64f   : > { %7031 = vmatmul.bf16.vlgmr.msra.gmra.mxu0 %v13322_v44  ;;  %6990 = vmatpush.bf16.msra.mxu1 %v10183_v8  ;;  %v10076_v8 = vld [vmem:[#allocation10 + $0xa58] sm:$0xf0] }
 0x650   : > { %7040 = vmatpush.bf16.msra.mxu2 %v10347_v18  ;;  %7018 = vmatmul.bf16.vlgmr.msrb.gmra.mxu3 %v13309_v0  ;;  %v11368_v18 = vld [vmem:[#allocation10 + $0xb8c] sm:$0xf]  ;;  %v10079_v23 = vor.u32 %v11328_v62, %v10076_v8  ;;  %v10358_v62 = vld [vmem:[#allocation13] sm:$0xf]  ;;  %v11401_v8 = vld [vmem:[#allocation13 + $0xc] sm:$0xf0] }
 0x651   : > { %6979 = vmatmul.bf16.vlgmr.msrb.gmra.mxu2 %v13309_v0  ;;  %7079 = vmatpush.bf16.msra.mxu3 %v10351_v17  ;;  %v11429_v17 = vld [vmem:[#allocation13 + $0xec] sm:$0xf0]  ;;  %v10239_v5 = vor.u32 %v11368_v18, %v10236_v15  ;;  %v10359_v18 = vor.u32 %v11401_v8, %v10358_v62  ;;  %v10598_v15 = vld [vmem:[#allocation13 + $0x1e0] sm:$0xf] }
 0x652   : > { %v10471_v61 = vor.u32 %v11429_v17, %v10470_v22  ;;  %v11461_v22 = vld [vmem:[#allocation13 + $0x1ec] sm:$0xf0]  ;;  %v11427_v17 = vld [vmem:[#allocation13 + $0xe4] sm:$0xf]  ;;  %v10502_v62 = vld [vmem:[#allocation13 + $0x120] sm:$0xf] }
 0x653   : > { %6991 = vmatpush.bf16.msra.mxu1 %v10167_v46  ;;  %v5760_v26 = vpop.f32.mrf.mxu1  ;;  %v10220_v46 = vld [vmem:[#allocation10 + $0xb78] sm:$0xf0]  ;;  %v11437_v8 = vld [vmem:[#allocation13 + $0x12c] sm:$0xf0] }
 0x654   : > { %7041 = vmatpush.bf16.msra.mxu2 %v10331_v33  ;;  %v6294_v63 = vpop.f32.mrf.mxu0  ;;  %7892 = vmatpush.bf16.msrb.mxu0 %v10471_v61  ;;  %v10599_v61 = vor.u32 %v11461_v22, %v10598_v15  ;;  %v10503_v15 = vor.u32 %v11437_v8, %v10502_v62  ;;  %v11403_v22 = vld [vmem:[#allocation13 + $0x24] sm:$0xf]  ;;  %v10712_v8 = vld [vmem:[#allocation13 + $0x2d0] sm:$0xf0] }
 0x655   : > { %7080 = vmatpush.bf16.msra.mxu3 %v10335_v24  ;;  %v10063_v24 = vor.u32 %v11324_v3, %v10060_v10  ;;  %v11405_v63 = vld [vmem:[#allocation13 + $0x2c] sm:$0xf0]  ;;  %v11423_v10 = vld [vmem:[#allocation13 + $0xc4] sm:$0xf] }
 0x656   : > { %6992 = vmatmul.bf16.vlgmr.msra.gmra.mxu1 %v13322_v44  ;;  %v11457_v3 = vld [vmem:[#allocation13 + $0x1cc] sm:$0xf0]  ;;  %v11487_v62 = vld [vmem:[#allocation13 + $0x2c4] sm:$0xf] }
 0x657   : > { %7049 = vmatpush.bf16.msrb.mxu1 %v10159_v9 }
 0x658   : > { %7042 = vmatpush.bf16.msra.mxu2 %v10315_v55  ;;  %v10207_v55 = vor.u32 %v11360_v53, %v10204_v57  ;;  %7893 = vmatpush.bf16.msrb.mxu0 %v10455_v6  ;;  %v11419_v57 = vld [vmem:[#allocation13 + $0xa4] sm:$0xf] }
 0x659   : > { %7081 = vmatpush.bf16.msra.mxu3 %v10319_v47  ;;  %v11356_v47 = vld [vmem:[#allocation10 + $0xb2c] sm:$0xf] }
 0x65b   : > { %7050 = vmatpush.bf16.msrb.mxu1 %v10143_v39  ;;  %v5762_v33 = vpop.f32.mrf.mxu1 }
 0x65c   : > { %7043 = vmatpush.bf16.msra.mxu2 %v10299_v19 }
 0x65d   : > { %7082 = vmatpush.bf16.msra.mxu3 %v10303_v27  ;;  %v11352_v27 = vld [vmem:[#allocation10 + $0xb0c] sm:$0xf] }
 0x65e   : > { %v13355_v9 = vpop.f32.mrf.mxu0 }
 0x65f   : > { %7051 = vmatpush.bf16.msrb.mxu1 %v10127_v7  ;;  %v10191_v7 = vor.u32 %v11356_v47, %v10188_v40 }
 0x660   : > { %7062 = vmatpush.bf16.msrb.mxu2 %v10287_v51  ;;  %10355 = vmatmul.msk.bf16.vlgmr.msra.gmra.mxu3 %vm3754_vm8, %v13325_v2  ;;  %v10439_v51 = vor.u32 %v11421_v13, %v10438_v50  ;;  %v10424_v50 = vld [vmem:[#allocation13 + $0x90] sm:$0xf0]  ;;  %v10726_v13 = vld [vmem:[#allocation13 + $0x2e0] sm:$0xf] }
 0x661   : > { %10354 = vmatmul.msk.bf16.vlgmr.msra.gmra.mxu2 %vm3754_vm8, %v13325_v2  ;;  %v10223_v2 = vor.u32 %v11364_v35, %v10220_v46  ;;  %7905 = vmatpush.bf16.msrb.mxu3 %v10599_v61 }
 0x662   : > { %v5773_v39 = vpop.f32.mrf.mxu2  ;;  %7894 = vmatpush.bf16.msrb.mxu0 %v10439_v51 }
 0x663   : > { %7052 = vmatpush.bf16.msrb.mxu1 %v10111_v45  ;;  %v5774_v11 = vadd.f32 %v5773_v39, %v5760_v26  ;;  %v6318_v36 = vpop.f32.mrf.mxu1  ;;  %v10443_v39 = vor.u32 %v11419_v57, %v10440_v29  ;;  %v10662_v29 = vld [vmem:[#allocation13 + $0x260] sm:$0xf] }
 0x664   : > { %7063 = vmatpush.bf16.msrb.mxu2 %v10271_v28  ;;  %v11413_v28 = vld [vmem:[#allocation13 + $0x6c] sm:$0xf0] }
 0x665   : > { %v6305_v41 = vpop.f32.mrf.mxu3  ;;  %v5787_v19 = vadd.f32 %v13343_v42, %v5774_v11  ;;  %v10175_v42 = vor.u32 %v11352_v27, %v10172_v34  ;;  %v10407_v1 = vor.u32 %v11413_v28, %v10406_v60  ;;  %v10550_v11 = vld [vmem:[#allocation13 + $0x180] sm:$0xf]  ;;  %v11411_v34 = vld [vmem:[#allocation13 + $0x64] sm:$0xf] }
 0x666   : > { %v6306_v25 = vadd.f32 %v6305_v41, %v13349_v21  ;;  %v6359_v38 = vpop.f32.mrf.mxu0  ;;  %v10422_v21 = vld [vmem:[#allocation13 + $0x80] sm:$0xf]  ;;  %v11449_v41 = vld [vmem:[#allocation13 + $0x18c] sm:$0xf0] }
 0x667   : > { %7053 = vmatpush.bf16.msrb.mxu1 %v10095_v48  ;;  %v13360_v14 = vadd.f32 %v5787_v19, %v13315_v16  ;;  %v10423_v45 = vor.u32 %v11417_v59, %v10422_v21  ;;  %v10390_v16 = vld [vmem:[#allocation13 + $0x40] sm:$0xf]  ;;  %v10551_v38 = vor.u32 %v11449_v41, %v10550_v11  ;;  %v11493_v19 = vld [vmem:[#allocation13 + $0x2ec] sm:$0xf0]  ;;  %v10408_v59 = vld [vmem:[#allocation13 + $0x70] sm:$0xf0] }
 0x668   : > { %7064 = vmatpush.bf16.msrb.mxu2 %v10255_v49  ;;  %v6319_v58 = vadd.f32 %v6318_v36, %v6306_v25  ;;  %v11415_v25 = vld [vmem:[#allocation13 + $0x84] sm:$0xf]  ;;  %v10411_v60 = vor.u32 %v11411_v34, %v10408_v59  ;;  %v10646_v11 = vld [vmem:[#allocation13 + $0x240] sm:$0xf]  ;;  %v11473_v41 = vld [vmem:[#allocation13 + $0x24c] sm:$0xf0] }
 0x669   : > { %7895 = vmatpush.bf16.msrb.mxu0 %v10423_v45  ;;  %v10427_v51 = vor.u32 %v11415_v25, %v10424_v50  ;;  %v11489_v45 = vld [vmem:[#allocation13 + $0x2cc] sm:$0xf0]  ;;  %v11451_v50 = vld [vmem:[#allocation13 + $0x1a4] sm:$0xf]  ;;  %v10614_v34 = vld [vmem:[#allocation13 + $0x200] sm:$0xf] }
 0x66a   : > { %v13363_v4 = vadd.f32 %v6319_v58, %v13318_v37  ;;  %v5775_v31 = vpop.f32.mrf.mxu2  ;;  %v11409_v37 = vld [vmem:[#allocation13 + $0x4c] sm:$0xf0]  ;;  %v10727_v58 = vor.u32 %v11493_v19, %v10726_v13  ;;  %v10568_v13 = vld [vmem:[#allocation13 + $0x1b0] sm:$0xf0]  ;;  %v10854_v59 = vld [vmem:[#allocation13 + $0x3e0] sm:$0xf] }
 0x66b   : > { %7054 = vmatpush.bf16.msrb.mxu1 %v10079_v23  ;;  %v6320_v43 = vpop.f32.mrf.mxu1  ;;  %v10391_v26 = vor.u32 %v11409_v37, %v10390_v16  ;;  %v10472_v23 = vld [vmem:[#allocation13 + $0xf0] sm:$0xf0]  ;;  %v10518_v31 = vld [vmem:[#allocation13 + $0x140] sm:$0xf]  ;;  %v10571_v19 = vor.u32 %v11451_v50, %v10568_v13  ;;  %v11430_v13 = vld [vmem:[#allocation13 + $0xf4] sm:$0xf0] }
 0x66c   : > { %7065 = vmatpush.bf16.msrb.mxu2 %v10239_v5  ;;  %v10475_v5 = vor.u32 %v11427_v17, %v10472_v23  ;;  %v10392_v16 = vld [vmem:[#allocation13 + $0x50] sm:$0xf0]  ;;  %v10678_v23 = vld [vmem:[#allocation13 + $0x280] sm:$0xf] }
 0x66d   : > { %v6307_v12 = vpop.f32.mrf.mxu3  ;;  %7896 = vmatpush.bf16.msrb.mxu0 %v10407_v1  ;;  %v11407_v1 = vld [vmem:[#allocation13 + $0x44] sm:$0xf]  ;;  %v10376_v17 = vld [vmem:[#allocation13 + $0x30] sm:$0xf0] }
 0x66e   : > { %v11441_v12 = vld [vmem:[#allocation13 + $0x14c] sm:$0xf0]  ;;  %v10395_v37 = vor.u32 %v11407_v1, %v10392_v16  ;;  %v10379_v61 = vor.u32 %v11403_v22, %v10376_v17  ;;  %v11443_v16 = vld [vmem:[#allocation13 + $0x164] sm:$0xf]  ;;  %v10520_v22 = vld [vmem:[#allocation13 + $0x150] sm:$0xf0] }
 0x66f   : > { %7055 = vmatpush.bf16.msrb.mxu1 %v10063_v24  ;;  %v10456_v24 = vld [vmem:[#allocation13 + $0xd0] sm:$0xf0]  ;;  %v10519_v43 = vor.u32 %v11441_v12, %v10518_v31 }
 0x670   : > { %7066 = vmatpush.bf16.msrb.mxu2 %v10223_v2  ;;  %v10566_v2 = vld [vmem:[#allocation13 + $0x1a0] sm:$0xf]  ;;  %v10459_v53 = vor.u32 %v11423_v10, %v10456_v24  ;;  %v10728_v31 = vld [vmem:[#allocation13 + $0x2f0] sm:$0xf0] }
 0x671   : > { %7897 = vmatpush.bf16.msrb.mxu0 %v10391_v26  ;;  %v10694_v26 = vld [vmem:[#allocation13 + $0x2a0] sm:$0xf] }
 0x673   : > { %7056 = vmatpush.bf16.msrb.mxu1 %v10047_v52 }
 0x674   : > { %7067 = vmatpush.bf16.msrb.mxu2 %v10207_v55  ;;  %v10567_v55 = vor.u32 %v11453_v56, %v10566_v2  ;;  %v10360_v2 = vld [vmem:[#allocation13 + $0x10] sm:$0xf0]  ;;  %v11459_v56 = vld [vmem:[#allocation13 + $0x1e4] sm:$0xf] }
 0x676   : > { %7057 = vmatmul.bf16.vlgmr.msrb.gmra.mxu1 %v13309_v0  ;;  %v10374_v0 = vld [vmem:[#allocation13 + $0x20] sm:$0xf] }
 0x677   : > { %v10375_v48 = vor.u32 %v11405_v63, %v10374_v0  ;;  %7918 = vmatpush.bf16.msra.mxu1 %v10727_v58  ;;  %v11485_v0 = vld [vmem:[#allocation13 + $0x2ac] sm:$0xf0] }
 0x678   : > { %7068 = vmatpush.bf16.msrb.mxu2 %v10191_v7  ;;  %v10695_v63 = vor.u32 %v11485_v0, %v10694_v26  ;;  %v10838_v0 = vld [vmem:[#allocation13 + $0x3c0] sm:$0xf] }
 0x679   : > { %7898 = vmatpush.bf16.msrb.mxu0 %v10375_v48 }
 0x67c   : > { %7069 = vmatpush.bf16.msrb.mxu2 %v10175_v42  ;;  %v6383_v49 = vpop.f32.mrf.mxu0  ;;  %v10710_v42 = vld [vmem:[#allocation13 + $0x2c0] sm:$0xf] }
 0x67d   : > { %7899 = vmatpush.bf16.msrb.mxu0 %v10359_v18  ;;  %v10711_v28 = vor.u32 %v11489_v45, %v10710_v42  ;;  %v11525_v45 = vld [vmem:[#allocation13 + $0x3ec] sm:$0xf0] }
 0x67e   : > { %v10855_v12 = vor.u32 %v11525_v45, %v10854_v59  ;;  %v11475_v59 = vld [vmem:[#allocation13 + $0x264] sm:$0xf]  ;;  %v11426_v45 = vld [vmem:[#allocation13 + $0xd4] sm:$0xf0] }
 0x67f   : > { %7070 = vmatmul.bf16.vlgmr.msrb.gmra.mxu2 %v13322_v44  ;;  %v10582_v44 = vld [vmem:[#allocation13 + $0x1c0] sm:$0xf]  ;;  %7919 = vmatpush.bf16.msra.mxu1 %v10711_v28  ;;  %v11491_v28 = vld [vmem:[#allocation13 + $0x2e4] sm:$0xf] }
 0x680   : > { %v10583_v33 = vor.u32 %v11457_v3, %v10582_v44  ;;  %v10731_v1 = vor.u32 %v11491_v28, %v10728_v31  ;;  %7931 = vmatpush.bf16.msra.mxu2 %v10855_v12  ;;  %v10664_v28 = vld [vmem:[#allocation13 + $0x270] sm:$0xf0]  ;;  %v10774_v12 = vld [vmem:[#allocation13 + $0x340] sm:$0xf] }
 0x681   : > { %7944 = vmatpush.bf16.msra.mxu0 %v10475_v5  ;;  %v11481_v5 = vld [vmem:[#allocation13 + $0x28c] sm:$0xf0]  ;;  %v10667_v31 = vor.u32 %v11475_v59, %v10664_v28 }
 0x682   : > { %7906 = vmatpush.bf16.msrb.mxu3 %v10583_v33  ;;  %v10679_v3 = vor.u32 %v11481_v5, %v10678_v23  ;;  %v11399_v33 = vld [vmem:[#allocation13 + $0x4] sm:$0xf]  ;;  %v13380_v23 = vld [vmem:[#allocation11] sm:$0xf] }
 0x683   : > { %v6344_v35 = vpop.f32.mrf.mxu1  ;;  %7920 = vmatpush.bf16.msra.mxu1 %v10695_v63  ;;  %v11521_v63 = vld [vmem:[#allocation13 + $0x3cc] sm:$0xf0] }
 0x684   : > { %v6385_v46 = vpop.f32.mrf.mxu0  ;;  %v6331_v54 = vpop.f32.mrf.mxu2 }
 0x685   : > { %v6345_v30 = vadd.f32 %v6344_v35, %v6331_v54  ;;  %v6370_v52 = vpop.f32.mrf.mxu3  ;;  %7945 = vmatpush.bf16.msra.mxu0 %v10459_v53  ;;  %v10486_v35 = vld [vmem:[#allocation13 + $0x100] sm:$0xf]  ;;  %v11433_v46 = vld [vmem:[#allocation13 + $0x10c] sm:$0xf0]  ;;  %v10600_v54 = vld [vmem:[#allocation13 + $0x1f0] sm:$0xf0]  ;;  %v10363_v53 = vor.u32 %v11399_v33, %v10360_v2 }
 0x686   : > { %v6384_v6 = vadd.f32 %v6383_v49, %v6370_v52  ;;  %7907 = vmatpush.bf16.msrb.mxu3 %v10567_v55  ;;  %v10487_v24 = vor.u32 %v11433_v46, %v10486_v35  ;;  %v10603_v57 = vor.u32 %v11459_v56, %v10600_v54  ;;  %v11517_v35 = vld [vmem:[#allocation13 + $0x3ac] sm:$0xf0]  ;;  %v11483_v2 = vld [vmem:[#allocation13 + $0x2a4] sm:$0xf]  ;;  %v10696_v56 = vld [vmem:[#allocation13 + $0x2b0] sm:$0xf0] }
 0x687   : > { %v6358_v47 = vadd.f32 %v13355_v9, %v6345_v30  ;;  %v10534_v9 = vld [vmem:[#allocation13 + $0x160] sm:$0xf]  ;;  %7921 = vmatpush.bf16.msra.mxu1 %v10679_v3  ;;  %v11477_v30 = vld [vmem:[#allocation13 + $0x26c] sm:$0xf0] }
 0x688   : > { %v10663_v55 = vor.u32 %v11477_v30, %v10662_v29  ;;  %v10822_v3 = vld [vmem:[#allocation13 + $0x3a0] sm:$0xf]  ;;  %v7094_v30 = vperm.slane %v13380_v23, 0 }
 0x689   : > { %v13369_v40 = vadd.f32 %v6358_v47, %v13337_v20  ;;  %7946 = vmatpush.bf16.msra.mxu0 %v10443_v39  ;;  %v11445_v20 = vld [vmem:[#allocation13 + $0x16c] sm:$0xf0]  ;;  %v10584_v39 = vld [vmem:[#allocation13 + $0x1d0] sm:$0xf0] }
 0x68a   : > { %7908 = vmatpush.bf16.msrb.mxu3 %v10551_v38  ;;  %v10535_v21 = vor.u32 %v11445_v20, %v10534_v9  ;;  %v10552_v9 = vld [vmem:[#allocation13 + $0x190] sm:$0xf0] }
 0x68b   : > { %v6346_v36 = vpop.f32.mrf.mxu1  ;;  %7922 = vmatpush.bf16.msra.mxu1 %v10663_v55  ;;  %v10504_v55 = vld [vmem:[#allocation13 + $0x130] sm:$0xf0] }
 0x68c   : > { %v6333_v7 = vpop.f32.mrf.mxu2  ;;  %v10647_v36 = vor.u32 %v11473_v41, %v10646_v11  ;;  %v11513_v11 = vld [vmem:[#allocation13 + $0x38c] sm:$0xf0]  ;;  %v11479_v41 = vld [vmem:[#allocation13 + $0x284] sm:$0xf] }
 0x68d   : > { %v6372_v27 = vpop.f32.mrf.mxu3  ;;  %7947 = vmatpush.bf16.msra.mxu0 %v10427_v51  ;;  %v10630_v7 = vld [vmem:[#allocation13 + $0x220] sm:$0xf]  ;;  %v11469_v51 = vld [vmem:[#allocation13 + $0x22c] sm:$0xf0] }
 0x68e   : > { %7909 = vmatpush.bf16.msrb.mxu3 %v10535_v21  ;;  %v10631_v58 = vor.u32 %v11469_v51, %v10630_v7  ;;  %v11447_v27 = vld [vmem:[#allocation13 + $0x184] sm:$0xf]  ;;  %v11465_v21 = vld [vmem:[#allocation13 + $0x20c] sm:$0xf0]  ;;  %v10488_v7 = vld [vmem:[#allocation13 + $0x110] sm:$0xf0] }
 0x68f   : > { %7923 = vmatpush.bf16.msra.mxu1 %v10647_v36  ;;  %v10555_v20 = vor.u32 %v11447_v27, %v10552_v9  ;;  %v10615_v42 = vor.u32 %v11465_v21, %v10614_v34  ;;  %v10478_v36 = vld [vmem:[#allocation13 + $0xe8] sm:$0xf]  ;;  %v11509_v9 = vld [vmem:[#allocation13 + $0x36c] sm:$0xf0] }
 0x690   : > { %v10479_v21 = vor.u32 %v11430_v13, %v10478_v36 }
 0x691   : > { %7948 = vmatpush.bf16.msra.mxu0 %v10411_v60 }
 0x692   : > { %7910 = vmatpush.bf16.msrb.mxu3 %v10519_v43 }
 0x693   : > { %7924 = vmatpush.bf16.msra.mxu1 %v10631_v58 }
 0x694   : > { %v6396_v48 = vpop.f32.mrf.mxu2 }
 0x695   : > { %v13371_v49 = vpop.f32.mrf.mxu3  ;;  %7949 = vmatpush.bf16.msra.mxu0 %v10395_v37  ;;  %v6397_v18 = vadd.f32 %v6396_v48, %v6384_v6  ;;  %v11455_v6 = vld [vmem:[#allocation13 + $0x1c4] sm:$0xf]  ;;  %v10536_v37 = vld [vmem:[#allocation13 + $0x170] sm:$0xf0]  ;;  %v10839_v48 = vor.u32 %v11521_v63, %v10838_v0  ;;  %v11422_v0 = vld [vmem:[#allocation13 + $0xb4] sm:$0xf0] }
 0x696   : > { %7911 = vmatpush.bf16.msrb.mxu3 %v10503_v15  ;;  %v10587_v47 = vor.u32 %v11455_v6, %v10584_v39  ;;  %v10539_v26 = vor.u32 %v11443_v16, %v10536_v37  ;;  %v11439_v15 = vld [vmem:[#allocation13 + $0x144] sm:$0xf]  ;;  %v10806_v39 = vld [vmem:[#allocation13 + $0x380] sm:$0xf]  ;;  %v10446_v37 = vld [vmem:[#allocation13 + $0xa8] sm:$0xf] }
 0x697   : > { %v13374_v44 = vadd.f32 %v6397_v18, %v13346_v32  ;;  %7925 = vmatpush.bf16.msra.mxu1 %v10615_v42  ;;  %v10715_v18 = vor.u32 %v11487_v62, %v10712_v8  ;;  %7932 = vmatpush.bf16.msra.mxu2 %v10839_v48  ;;  %v10523_v5 = vor.u32 %v11439_v15, %v10520_v22  ;;  %v10462_v42 = vld [vmem:[#allocation13 + $0xc8] sm:$0xf]  ;;  %v11471_v63 = vld [vmem:[#allocation13 + $0x244] sm:$0xf]  ;;  %v10648_v48 = vld [vmem:[#allocation13 + $0x250] sm:$0xf0] }
 0x698   : > { %v10463_v16 = vor.u32 %v11426_v45, %v10462_v42  ;;  %v10651_v62 = vor.u32 %v11471_v63, %v10648_v48  ;;  %v10758_v8 = vld [vmem:[#allocation13 + $0x320] sm:$0xf]  ;;  %v10447_v15 = vor.u32 %v11422_v0, %v10446_v37  ;;  %v10430_v22 = vld [vmem:[#allocation13 + $0x88] sm:$0xf]  ;;  %v11402_v45 = vld [vmem:[#allocation13 + $0x14] sm:$0xf0] }
 0x699   : > { %7950 = vmatpush.bf16.msra.mxu0 %v10379_v61  ;;  %v10366_v42 = vld [vmem:[#allocation13 + $0x8] sm:$0xf]  ;;  %v11507_v48 = vld [vmem:[#allocation13 + $0x364] sm:$0xf] }
 0x69a   : > { %7912 = vmatpush.bf16.msrb.mxu3 %v10487_v24  ;;  %v10823_v24 = vor.u32 %v11517_v35, %v10822_v3  ;;  %v10632_v3 = vld [vmem:[#allocation13 + $0x230] sm:$0xf0]  ;;  %v10606_v37 = vld [vmem:[#allocation13 + $0x1e8] sm:$0xf]  ;;  %v10367_v63 = vor.u32 %v11402_v45, %v10366_v42 }
 0x69b   : > { %7970 = vmatpush.bf16.msrb.mxu1 %v10731_v1  ;;  %v11505_v1 = vld [vmem:[#allocation13 + $0x34c] sm:$0xf0] }
 0x69c   : > { %v13376_v10 = vpop.f32.mrf.mxu0  ;;  %v6398_v32 = vpop.f32.mrf.mxu2  ;;  %7933 = vmatpush.bf16.msra.mxu2 %v10823_v24  ;;  %v11497_v24 = vld [vmem:[#allocation13 + $0x30c] sm:$0xf0] }
 0x69d   : > { %v6437_v52 = vpop.f32.mrf.mxu3  ;;  %7951 = vmatpush.bf16.msra.mxu0 %v10363_v53  ;;  %v10699_v53 = vor.u32 %v11483_v2, %v10696_v56  ;;  %v10414_v56 = vld [vmem:[#allocation13 + $0x68] sm:$0xf] }
 0x69e   : > { %7957 = vmatpush.bf16.msra.mxu3 %v10603_v57  ;;  %v11435_v52 = vld [vmem:[#allocation13 + $0x124] sm:$0xf] }
 0x69f   : > { %7971 = vmatpush.bf16.msrb.mxu1 %v10715_v18  ;;  %v10507_v6 = vor.u32 %v11435_v52, %v10504_v55  ;;  %v11501_v18 = vld [vmem:[#allocation13 + $0x32c] sm:$0xf0]  ;;  %v10856_v52 = vld [vmem:[#allocation13 + $0x3f0] sm:$0xf0] }
 0x6a2   : > { %7958 = vmatpush.bf16.msra.mxu3 %v10587_v47 }
 0x6a3   : > { %v6409_v25 = vpop.f32.mrf.mxu1  ;;  %7972 = vmatpush.bf16.msrb.mxu1 %v10699_v53 }
 0x6a4   : > { %v6943_v38 = vpop.f32.mrf.mxu0 }
 0x6a6   : > { %7959 = vmatpush.bf16.msra.mxu3 %v10571_v19  ;;  %v11431_v19 = vld [vmem:[#allocation13 + $0x104] sm:$0xf] }
 0x6a7   : > { %v10491_v27 = vor.u32 %v11431_v19, %v10488_v7  ;;  %v11515_v19 = vld [vmem:[#allocation13 + $0x3a4] sm:$0xf]  ;;  %v10824_v7 = vld [vmem:[#allocation13 + $0x3b0] sm:$0xf0] }
 0x6aa   : > { %7960 = vmatpush.bf16.msra.mxu3 %v10555_v20 }
 0x6ab   : > { %v6411_v60 = vpop.f32.mrf.mxu1 }
 0x6ae   : > { %v13378_v43 = vpop.f32.mrf.mxu0  ;;  %7961 = vmatpush.bf16.msra.mxu3 %v10539_v26  ;;  %v10775_v26 = vor.u32 %v11505_v1, %v10774_v12  ;;  %v10480_v12 = vld [vmem:[#allocation13 + $0xf8] sm:$0xf0] }
 0x6b2   : > { %v6422_v17 = vpop.f32.mrf.mxu2  ;;  %7962 = vmatpush.bf16.msra.mxu3 %v10523_v5  ;;  %v11467_v5 = vld [vmem:[#allocation13 + $0x224] sm:$0xf] }
 0x6b3   : > { %v6423_v46 = vadd.f32 %v6422_v17, %v6409_v25  ;;  %v6967_v54 = vpop.f32.mrf.mxu1  ;;  %v10680_v25 = vld [vmem:[#allocation13 + $0x290] sm:$0xf0]  ;;  %v10759_v17 = vor.u32 %v11501_v18, %v10758_v8  ;;  %v10635_v35 = vor.u32 %v11467_v5, %v10632_v3  ;;  %v10590_v5 = vld [vmem:[#allocation13 + $0x1c8] sm:$0xf]  ;;  %v11458_v3 = vld [vmem:[#allocation13 + $0x1d4] sm:$0xf0] }
 0x6b4   : > { %v10683_v38 = vor.u32 %v11479_v41, %v10680_v25  ;;  %v11410_v41 = vld [vmem:[#allocation13 + $0x54] sm:$0xf0] }
 0x6b5   : > { %v6954_v61 = vpop.f32.mrf.mxu3  ;;  %v6436_v57 = vadd.f32 %v13371_v49, %v6423_v46  ;;  %v10807_v49 = vor.u32 %v11513_v11, %v10806_v39  ;;  %v11519_v39 = vld [vmem:[#allocation13 + $0x3c4] sm:$0xf]  ;;  %v10398_v11 = vld [vmem:[#allocation13 + $0x48] sm:$0xf] }
 0x6b6   : > { %v6955_v33 = vadd.f32 %v6954_v61, %v13376_v10  ;;  %v7008_v32 = vpop.f32.mrf.mxu0  ;;  %7963 = vmatpush.bf16.msra.mxu3 %v10507_v6  ;;  %7973 = vmatpush.bf16.msrb.mxu1 %v10683_v38  ;;  %v11418_v61 = vld [vmem:[#allocation13 + $0x94] sm:$0xf0]  ;;  %v10399_v13 = vor.u32 %v11410_v41, %v10398_v11 }
 0x6b7   : > { %v13386_v10 = vadd.f32 %v6436_v57, %v13360_v14  ;;  %7934 = vmatpush.bf16.msra.mxu2 %v10807_v49  ;;  %v10790_v14 = vld [vmem:[#allocation13 + $0x360] sm:$0xf]  ;;  %v10431_v2 = vor.u32 %v11418_v61, %v10430_v22  ;;  %v11463_v57 = vld [vmem:[#allocation13 + $0x204] sm:$0xf]  ;;  %v10464_v22 = vld [vmem:[#allocation13 + $0xd8] sm:$0xf0] }
 0x6b8   : > { %v6968_v29 = vadd.f32 %v6967_v54, %v6955_v33  ;;  %v10742_v33 = vld [vmem:[#allocation13 + $0x300] sm:$0xf]  ;;  %v11414_v54 = vld [vmem:[#allocation13 + $0x74] sm:$0xf0] }
 0x6b9   : > { %v10743_v53 = vor.u32 %v11497_v24, %v10742_v33  ;;  %v10415_v6 = vor.u32 %v11414_v54, %v10414_v56  ;;  %v10776_v33 = vld [vmem:[#allocation13 + $0x350] sm:$0xf0]  ;;  %v11420_v56 = vld [vmem:[#allocation13 + $0xac] sm:$0xf]  ;;  %v10448_v54 = vld [vmem:[#allocation13 + $0xb8] sm:$0xf0] }
 0x6ba   : > { %v7088_v47 = vadd.f32 %v6968_v29, %v13363_v4  ;;  %v6424_v51 = vpop.f32.mrf.mxu2  ;;  %v10791_v4 = vor.u32 %v11509_v9, %v10790_v14  ;;  %7964 = vmatpush.bf16.msra.mxu3 %v10491_v27  ;;  %7974 = vmatpush.bf16.msrb.mxu1 %v10667_v31  ;;  %v10616_v29 = vld [vmem:[#allocation13 + $0x210] sm:$0xf0]  ;;  %v11406_v27 = vld [vmem:[#allocation13 + $0x34] sm:$0xf0]  ;;  %v10827_v14 = vor.u32 %v11515_v19, %v10824_v7  ;;  %v11428_v31 = vld [vmem:[#allocation13 + $0xec] sm:$0xf] }
 0x6bb   : > { %v6969_v34 = vpop.f32.mrf.mxu1  ;;  %v10619_v32 = vor.u32 %v11463_v57, %v10616_v29  ;;  %v10483_v18 = vor.u32 %v11428_v31, %v10480_v12  ;;  %v10574_v29 = vld [vmem:[#allocation13 + $0x1a8] sm:$0xf]  ;;  %v10451_v11 = vor.u32 %v11420_v56, %v10448_v54  ;;  %v10744_v19 = vld [vmem:[#allocation13 + $0x310] sm:$0xf0]  ;;  %v11400_v56 = vld [vmem:[#allocation13 + $0xc] sm:$0xf] }
 0x6bc   : > { %v7102_v50 = vadd.f32 %v7094_v30, %v7088_v47  ;;  %7935 = vmatpush.bf16.msra.mxu2 %v10791_v4  ;;  %v11523_v30 = vld [vmem:[#allocation13 + $0x3e4] sm:$0xf]  ;;  %v10840_v47 = vld [vmem:[#allocation13 + $0x3d0] sm:$0xf0]  ;;  %v10718_v12 = vld [vmem:[#allocation13 + $0x2c8] sm:$0xf] }
 0x6bd   : > { %v6956_v58 = vpop.f32.mrf.mxu3  ;;  %v10859_v55 = vor.u32 %v11523_v30, %v10856_v52  ;;  %v10843_v25 = vor.u32 %v11519_v39, %v10840_v47  ;;  %v11511_v34 = vld [vmem:[#allocation13 + $0x384] sm:$0xf]  ;;  %v11454_v30 = vld [vmem:[#allocation13 + $0x1b4] sm:$0xf0]  ;;  %v7096_v47 = vperm.slane %v13380_v23, 2 }
 0x6be   : > { %v7106_v20 = vmax.f32 %v7102_v50, 0.0  ;;  %7975 = vmatpush.bf16.msrb.mxu1 %v10651_v62  ;;  %v10382_v58 = vld [vmem:[#allocation13 + $0x28] sm:$0xf]  ;;  %v10792_v62 = vld [vmem:[#allocation13 + $0x370] sm:$0xf0]  ;;  %v10575_v41 = vor.u32 %v11454_v30, %v10574_v29 }
 0x6bf   : > { %v10383_v4 = vor.u32 %v11406_v27, %v10382_v58  ;;  %v10734_v58 = vld [vmem:[#allocation13 + $0x2e8] sm:$0xf]  ;;  %v11494_v27 = vld [vmem:[#allocation13 + $0x2f4] sm:$0xf0]  ;;  %v10368_v54 = vld [vmem:[#allocation13 + $0x18] sm:$0xf0] }
 0x6c0   : > { %v13389_v60 = vpack.c.bf16 %v7106_v20, %v7106_v20  ;;  %7936 = vmatpush.bf16.msra.mxu2 %v10775_v26  ;;  %v7095_v20 = vperm.slane %v13380_v23, 1  ;;  %v11462_v26 = vld [vmem:[#allocation13 + $0x1f4] sm:$0xf0]  ;;  %v10735_v45 = vor.u32 %v11494_v27, %v10734_v58  ;;  %v10576_v58 = vld [vmem:[#allocation13 + $0x1b8] sm:$0xf0] }
 0x6c2   : > { %7900 = vmatmul.bf16.vlgmr.msrb.gmra.mxu0 %v13389_v60  ;;  %7976 = vmatpush.bf16.msrb.mxu1 %v10635_v35  ;;  %v11503_v35 = vld [vmem:[#allocation13 + $0x344] sm:$0xf] }
 0x6c3   : > { %7996 = vmatpush.bf16.msrb.mxu0 %v10479_v21  ;;  %v10808_v21 = vld [vmem:[#allocation13 + $0x390] sm:$0xf0] }
 0x6c4   : > { %7937 = vmatpush.bf16.msra.mxu2 %v10759_v17  ;;  %v10811_v28 = vor.u32 %v11511_v34, %v10808_v21  ;;  %v10795_v17 = vor.u32 %v11507_v48, %v10792_v62  ;;  %v10542_v21 = vld [vmem:[#allocation13 + $0x168] sm:$0xf] }
 0x6c6   : > { %7977 = vmatpush.bf16.msrb.mxu1 %v10619_v32 }
 0x6c7   : > { %7997 = vmatpush.bf16.msrb.mxu0 %v10463_v16 }
 0x6c8   : > { %7938 = vmatpush.bf16.msra.mxu2 %v10743_v53  ;;  %v10779_v53 = vor.u32 %v11503_v35, %v10776_v33  ;;  %v10686_v33 = vld [vmem:[#allocation13 + $0x288] sm:$0xf] }
 0x6cb   : > { %7998 = vmatpush.bf16.msrb.mxu0 %v10447_v15  ;;  %v11424_v15 = vld [vmem:[#allocation13 + $0xcc] sm:$0xf] }
 0x6cc   : > { %v13392_v46 = vpop.f32.mrf.mxu0  ;;  %7983 = vmatpush.bf16.msrb.mxu2 %v10859_v55  ;;  %v10467_v24 = vor.u32 %v11424_v15, %v10464_v22  ;;  %v11499_v55 = vld [vmem:[#allocation13 + $0x324] sm:$0xf]  ;;  %v11404_v15 = vld [vmem:[#allocation13 + $0x2c] sm:$0xf]  ;;  %v10384_v22 = vld [vmem:[#allocation13 + $0x38] sm:$0xf0] }
 0x6cd   : > { %v10387_v35 = vor.u32 %v11404_v15, %v10384_v22 }
 0x6cf   : > { %7999 = vmatpush.bf16.msrb.mxu0 %v10431_v2  ;;  %v10591_v2 = vor.u32 %v11458_v3, %v10590_v5  ;;  %v11438_v5 = vld [vmem:[#allocation13 + $0x134] sm:$0xf0] }
 0x6d0   : > { %7984 = vmatpush.bf16.msrb.mxu2 %v10843_v25  ;;  %v11416_v25 = vld [vmem:[#allocation13 + $0x8c] sm:$0xf] }
 0x6d2   : > { %7952 = vmatmul.bf16.vlgmr.msra.gmra.mxu0 %v13389_v60 }
 0x6d3   : > { %v6993_v36 = vpop.f32.mrf.mxu1  ;;  %v7019_v50 = vpop.f32.mrf.mxu3  ;;  %8000 = vmatpush.bf16.msrb.mxu0 %v10415_v6  ;;  %v10760_v6 = vld [vmem:[#allocation13 + $0x330] sm:$0xf0] }
 0x6d4   : > { %v7034_v49 = vpop.f32.mrf.mxu0  ;;  %v6980_v38 = vpop.f32.mrf.mxu2  ;;  %7985 = vmatpush.bf16.msrb.mxu2 %v10827_v14  ;;  %v7033_v57 = vadd.f32 %v13392_v46, %v7019_v50  ;;  %v10763_v46 = vor.u32 %v11499_v55, %v10760_v6  ;;  %v11450_v50 = vld [vmem:[#allocation13 + $0x194] sm:$0xf0]  ;;  %v10608_v55 = vld [vmem:[#allocation13 + $0x1f8] sm:$0xf0]  ;;  %v10371_v6 = vor.u32 %v11400_v56, %v10368_v54 }
 0x6d5   : > { %v6994_v51 = vadd.f32 %v6993_v36, %v6980_v38  ;;  %v10432_v36 = vld [vmem:[#allocation13 + $0x98] sm:$0xf0]  ;;  %v10558_v38 = vld [vmem:[#allocation13 + $0x188] sm:$0xf] }
 0x6d6   : > { %v10559_v14 = vor.u32 %v11450_v50, %v10558_v38  ;;  %v11474_v38 = vld [vmem:[#allocation13 + $0x254] sm:$0xf0] }
 0x6d7   : > { %v7007_v9 = vadd.f32 %v13378_v43, %v6994_v51  ;;  %8001 = vmatpush.bf16.msrb.mxu0 %v10399_v13  ;;  %v11495_v13 = vld [vmem:[#allocation13 + $0x304] sm:$0xf]  ;;  %v10435_v51 = vor.u32 %v11416_v25, %v10432_v36  ;;  %v11456_v36 = vld [vmem:[#allocation13 + $0x1cc] sm:$0xf] }
 0x6d8   : > { %7986 = vmatpush.bf16.msrb.mxu2 %v10811_v28 }
 0x6d9   : > { %v7089_v59 = vadd.f32 %v7007_v9, %v13369_v40  ;;  %v10607_v40 = vor.u32 %v11462_v26, %v10606_v37  ;;  %v11412_v9 = vld [vmem:[#allocation13 + $0x6c] sm:$0xf]  ;;  %v10400_v26 = vld [vmem:[#allocation13 + $0x58] sm:$0xf0] }
 0x6da   : > { %v11408_v37 = vld [vmem:[#allocation13 + $0x4c] sm:$0xf] }
 0x6db   : > { %v7103_v1 = vadd.f32 %v7095_v20, %v7089_v59  ;;  %v6995_v16 = vpop.f32.mrf.mxu1  ;;  %v7021_v43 = vpop.f32.mrf.mxu3  ;;  %8002 = vmatpush.bf16.msrb.mxu0 %v10383_v4  ;;  %v10416_v20 = vld [vmem:[#allocation13 + $0x78] sm:$0xf0]  ;;  %v10747_v4 = vor.u32 %v11495_v13, %v10744_v19  ;;  %v11446_v59 = vld [vmem:[#allocation13 + $0x174] sm:$0xf0]  ;;  %v10403_v62 = vor.u32 %v11408_v37, %v10400_v26 }
 0x6dc   : > { %v6982_v0 = vpop.f32.mrf.mxu2  ;;  %7987 = vmatpush.bf16.msrb.mxu2 %v10795_v17  ;;  %v10419_v31 = vor.u32 %v11412_v9, %v10416_v20  ;;  %v10543_v16 = vor.u32 %v11446_v59, %v10542_v21  ;;  %v11442_v43 = vld [vmem:[#allocation13 + $0x154] sm:$0xf0]  ;;  %v10510_v17 = vld [vmem:[#allocation13 + $0x128] sm:$0xf]  ;;  %v11448_v59 = vld [vmem:[#allocation13 + $0x18c] sm:$0xf] }
 0x6dd   : > { %v7107_v8 = vmax.f32 %v7103_v1, 0.0  ;;  %v11490_v1 = vld [vmem:[#allocation13 + $0x2d4] sm:$0xf0]  ;;  %v10526_v0 = vld [vmem:[#allocation13 + $0x148] sm:$0xf] }
 0x6de   : > { %v10719_v48 = vor.u32 %v11490_v1, %v10718_v12  ;;  %v10638_v9 = vld [vmem:[#allocation13 + $0x228] sm:$0xf]  ;;  %v11470_v20 = vld [vmem:[#allocation13 + $0x234] sm:$0xf0]  ;;  %v11492_v1 = vld [vmem:[#allocation13 + $0x2ec] sm:$0xf] }
 0x6df   : > { %v13398_v61 = vpack.c.bf16 %v7107_v8, %v7107_v8  ;;  %8003 = vmatpush.bf16.msrb.mxu0 %v10367_v63  ;;  %v10702_v8 = vld [vmem:[#allocation13 + $0x2a8] sm:$0xf]  ;;  %v10639_v21 = vor.u32 %v11470_v20, %v10638_v9  ;;  %v11526_v12 = vld [vmem:[#allocation13 + $0x3f4] sm:$0xf0] }
 0x6e0   : > { %7988 = vmatpush.bf16.msrb.mxu2 %v10779_v53  ;;  %v10494_v53 = vld [vmem:[#allocation13 + $0x108] sm:$0xf] }
 0x6e1   : > { %7913 = vmatmul.bf16.vlgmr.msrb.gmra.mxu3 %v13398_v61  ;;  %v10766_v20 = vld [vmem:[#allocation13 + $0x328] sm:$0xf] }
 0x6e2   : > { %8009 = vmatpush.bf16.msrb.mxu3 %v10607_v40  ;;  %8004 = vmatmul.bf16.vlgmr.msrb.gmra.mxu0 %v13389_v60  ;;  %v10527_v40 = vor.u32 %v11442_v43, %v10526_v0  ;;  %v11444_v0 = vld [vmem:[#allocation13 + $0x16c] sm:$0xf]  ;;  %v10544_v43 = vld [vmem:[#allocation13 + $0x178] sm:$0xf0] }
 0x6e3   : > { %8048 = vmatpush.bf16.msra.mxu0 %v10483_v18  ;;  %v13403_v52 = vpop.f32.mrf.mxu3  ;;  %v11486_v18 = vld [vmem:[#allocation13 + $0x2b4] sm:$0xf0]  ;;  %v10547_v15 = vor.u32 %v11444_v0, %v10544_v43  ;;  %v10832_v0 = vld [vmem:[#allocation13 + $0x3b8] sm:$0xf0] }
 0x6e4   : > { %v7045_v32 = vpop.f32.mrf.mxu2  ;;  %7989 = vmatpush.bf16.msrb.mxu2 %v10763_v46  ;;  %v10703_v3 = vor.u32 %v11486_v18, %v10702_v8  ;;  %v10592_v46 = vld [vmem:[#allocation13 + $0x1d8] sm:$0xf0]  ;;  %v11522_v8 = vld [vmem:[#allocation13 + $0x3d4] sm:$0xf0]  ;;  %v11488_v18 = vld [vmem:[#allocation13 + $0x2cc] sm:$0xf] }
 0x6e5   : > { %v7046_v39 = vadd.f32 %v7045_v32, %v7033_v57  ;;  %v11434_v57 = vld [vmem:[#allocation13 + $0x114] sm:$0xf0]  ;;  %v11460_v32 = vld [vmem:[#allocation13 + $0x1ec] sm:$0xf]  ;;  %v10595_v19 = vor.u32 %v11456_v36, %v10592_v46  ;;  %v10798_v36 = vld [vmem:[#allocation13 + $0x368] sm:$0xf] }
 0x6e6   : > { %8010 = vmatpush.bf16.msrb.mxu3 %v10591_v2  ;;  %v10511_v2 = vor.u32 %v11438_v5, %v10510_v17  ;;  %v11440_v17 = vld [vmem:[#allocation13 + $0x14c] sm:$0xf]  ;;  %v10528_v5 = vld [vmem:[#allocation13 + $0x158] sm:$0xf0]  ;;  %v11510_v46 = vld [vmem:[#allocation13 + $0x374] sm:$0xf0] }
 0x6e7   : > { %8049 = vmatpush.bf16.msra.mxu0 %v10467_v24  ;;  %v7090_v49 = vadd.f32 %v7046_v39, %v13374_v44  ;;  %v11482_v24 = vld [vmem:[#allocation13 + $0x294] sm:$0xf0]  ;;  %v10670_v39 = vld [vmem:[#allocation13 + $0x268] sm:$0xf]  ;;  %v10531_v56 = vor.u32 %v11440_v17, %v10528_v5  ;;  %v10784_v17 = vld [vmem:[#allocation13 + $0x358] sm:$0xf0] }
 0x6e8   : > { %7990 = vmatpush.bf16.msrb.mxu2 %v10747_v4  ;;  %v10687_v30 = vor.u32 %v11482_v24, %v10686_v33  ;;  %v11518_v33 = vld [vmem:[#allocation13 + $0x3b4] sm:$0xf0]  ;;  %v11484_v24 = vld [vmem:[#allocation13 + $0x2ac] sm:$0xf] }
 0x6e9   : > { %v7104_v7 = vadd.f32 %v7096_v47, %v7090_v49  ;;  %v11478_v47 = vld [vmem:[#allocation13 + $0x274] sm:$0xf0]  ;;  %v10654_v49 = vld [vmem:[#allocation13 + $0x248] sm:$0xf] }
 0x6ea   : > { %8011 = vmatpush.bf16.msrb.mxu3 %v10575_v41  ;;  %v10611_v41 = vor.u32 %v11460_v32, %v10608_v55  ;;  %v10671_v25 = vor.u32 %v11478_v47, %v10670_v39  ;;  %v11514_v32 = vld [vmem:[#allocation13 + $0x394] sm:$0xf0]  ;;  %v11480_v55 = vld [vmem:[#allocation13 + $0x28c] sm:$0xf] }
 0x6eb   : > { %8050 = vmatpush.bf16.msra.mxu0 %v10451_v11  ;;  %v7108_v34 = vmax.f32 %v7104_v7, 0.0  ;;  %v7086_v44 = vpop.f32.mrf.mxu3  ;;  %v10495_v11 = vor.u32 %v11434_v57, %v10494_v53  ;;  %v10655_v7 = vor.u32 %v11474_v38, %v10654_v49  ;;  %v11436_v53 = vld [vmem:[#allocation13 + $0x12c] sm:$0xf]  ;;  %v10512_v57 = vld [vmem:[#allocation13 + $0x138] sm:$0xf0] }
 0x6ec   : > { %v7047_v42 = vpop.f32.mrf.mxu2  ;;  %v10515_v39 = vor.u32 %v11436_v53, %v10512_v57  ;;  %v11476_v49 = vld [vmem:[#allocation13 + $0x26c] sm:$0xf]  ;;  %v10672_v38 = vld [vmem:[#allocation13 + $0x278] sm:$0xf0] }
 0x6ed   : > { %v13407_v28 = vpack.c.bf16 %v7108_v34, %v7108_v34  ;;  %v10560_v42 = vld [vmem:[#allocation13 + $0x198] sm:$0xf0]  ;;  %v11534_v57 = vld [vmem:[%s13581_s9 + $0x38] sm:$0xff] }
 0x6ee   : > { %8012 = vmatpush.bf16.msrb.mxu3 %v10559_v14  ;;  %v7097_v14 = vperm.slane %v13380_v23, 3  ;;  %v10736_v23 = vld [vmem:[#allocation13 + $0x2f8] sm:$0xf0]  ;;  %v10563_v37 = vor.u32 %v11448_v59, %v10560_v42 }
 0x6ef   : > { %8051 = vmatpush.bf16.msra.mxu0 %v10435_v51  ;;  %7926 = vmatmul.bf16.vlgmr.msra.gmra.mxu1 %v13407_v28  ;;  %v11452_v51 = vld [vmem:[#allocation13 + $0x1ac] sm:$0xf] }
 0x6f0   : > { %8022 = vmatpush.bf16.msra.mxu1 %v10735_v45  ;;  %v10579_v34 = vor.u32 %v11452_v51, %v10576_v58  ;;  %v11466_v45 = vld [vmem:[#allocation13 + $0x214] sm:$0xf0]  ;;  %v11472_v58 = vld [vmem:[#allocation13 + $0x24c] sm:$0xf] }
 0x6f1   : > { %7965 = vmatmul.bf16.vlgmr.msra.gmra.mxu3 %v13398_v61  ;;  %v11506_v51 = vld [vmem:[#allocation13 + $0x354] sm:$0xf0] }
 0x6f2   : > { %8013 = vmatpush.bf16.msrb.mxu3 %v10543_v16 }
 0x6f3   : > { %v7058_v63 = vpop.f32.mrf.mxu1  ;;  %8052 = vmatpush.bf16.msra.mxu0 %v10419_v31  ;;  %v10862_v31 = vld [vmem:[#allocation13 + $0x3e8] sm:$0xf] }
 0x6f4   : > { %8023 = vmatpush.bf16.msra.mxu1 %v10719_v48  ;;  %v10739_v48 = vor.u32 %v11492_v1, %v10736_v23 }
 0x6f6   : > { %8014 = vmatpush.bf16.msrb.mxu3 %v10527_v40  ;;  %v10720_v40 = vld [vmem:[#allocation13 + $0x2d8] sm:$0xf0] }
 0x6f7   : > { %8053 = vmatpush.bf16.msra.mxu0 %v10403_v62  ;;  %v10846_v62 = vld [vmem:[#allocation13 + $0x3c8] sm:$0xf] }
 0x6f8   : > { %8024 = vmatpush.bf16.msra.mxu1 %v10703_v3  ;;  %v10847_v22 = vor.u32 %v11522_v8, %v10846_v62  ;;  %v10723_v3 = vor.u32 %v11488_v18, %v10720_v40  ;;  %v10816_v62 = vld [vmem:[#allocation13 + $0x398] sm:$0xf0]  ;;  %v11508_v18 = vld [vmem:[#allocation13 + $0x36c] sm:$0xf] }
 0x6f9   : > { %v10800_v40 = vld [vmem:[#allocation13 + $0x378] sm:$0xf0] }
 0x6fa   : > { %8015 = vmatpush.bf16.msrb.mxu3 %v10511_v2  ;;  %v10704_v2 = vld [vmem:[#allocation13 + $0x2b8] sm:$0xf0] }
 0x6fb   : > { %v7060_v29 = vpop.f32.mrf.mxu1  ;;  %8054 = vmatpush.bf16.msra.mxu0 %v10387_v35  ;;  %v10830_v35 = vld [vmem:[#allocation13 + $0x3a8] sm:$0xf] }
 0x6fc   : > { %8025 = vmatpush.bf16.msra.mxu1 %v10687_v30  ;;  %v10831_v54 = vor.u32 %v11518_v33, %v10830_v35  ;;  %v10707_v29 = vor.u32 %v11484_v24, %v10704_v2  ;;  %v10814_v30 = vld [vmem:[#allocation13 + $0x388] sm:$0xf]  ;;  %v10768_v35 = vld [vmem:[#allocation13 + $0x338] sm:$0xf0]  ;;  %v11496_v24 = vld [vmem:[#allocation13 + $0x30c] sm:$0xf] }
 0x6fd   : > { %v10815_v47 = vor.u32 %v11514_v32, %v10814_v30  ;;  %v11532_v32 = vld [vmem:[%s13581_s9 + $0x28] sm:$0xff] }
 0x6fe   : > { %8016 = vmatpush.bf16.msrb.mxu3 %v10495_v11  ;;  %v11432_v11 = vld [vmem:[#allocation13 + $0x10c] sm:$0xf] }
 0x6ff   : > { %8055 = vmatpush.bf16.msra.mxu0 %v10371_v6  ;;  %7978 = vmatmul.bf16.vlgmr.msrb.gmra.mxu1 %v13407_v28  ;;  %v10688_v6 = vld [vmem:[#allocation13 + $0x298] sm:$0xf0] }
 0x700   : > { %8026 = vmatpush.bf16.msra.mxu1 %v10671_v25  ;;  %v10691_v25 = vor.u32 %v11480_v55, %v10688_v6 }
 0x701   : > { %8017 = vmatmul.bf16.vlgmr.msrb.gmra.mxu3 %v13398_v61 }
 0x702   : > { %v7071_v50 = vpop.f32.mrf.mxu2  ;;  %8061 = vmatpush.bf16.msra.mxu3 %v10611_v41  ;;  %8056 = vmatmul.bf16.vlgmr.msra.gmra.mxu0 %v13389_v60  ;;  %v10622_v60 = vld [vmem:[#allocation13 + $0x208] sm:$0xf]  ;;  %v10496_v41 = vld [vmem:[#allocation13 + $0x118] sm:$0xf0] }
 0x703   : > { %v7072_v13 = vadd.f32 %v7071_v50, %v7058_v63  ;;  %v10623_v26 = vor.u32 %v11466_v45, %v10622_v60  ;;  %v10499_v50 = vor.u32 %v11432_v11, %v10496_v41  ;;  %v10750_v60 = vld [vmem:[#allocation13 + $0x308] sm:$0xf]  ;;  %v11464_v45 = vld [vmem:[#allocation13 + $0x20c] sm:$0xf]  ;;  %8365 = vmatpush.bf16.msrb.mxu0 %v11534_v57  ;;  %v11529_v11 = vld [vmem:[%s13581_s9 + $0x10] sm:$0xff] }
 0x704   : > { %8027 = vmatpush.bf16.msra.mxu1 %v10655_v7  ;;  %v10782_v7 = vld [vmem:[#allocation13 + $0x348] sm:$0xf]  ;;  %v11541_v41 = vld [vmem:[%s13581_s9 + $0x70] sm:$0xff] }
 0x705   : > { %v7085_v27 = vadd.f32 %v13403_v52, %v7072_v13  ;;  %v10799_v13 = vor.u32 %v11510_v46, %v10798_v36 }
 0x706   : > { %8062 = vmatpush.bf16.msra.mxu3 %v10595_v19  ;;  %v10675_v19 = vor.u32 %v11476_v49, %v10672_v38  ;;  %v11528_v49 = vld [vmem:[%s13581_s9 + $0x8] sm:$0xff] }
 0x707   : > { %v7091_v4 = vadd.f32 %v7085_v27, %v13386_v10  ;;  %v10863_v10 = vor.u32 %v11526_v12, %v10862_v31  ;;  %v10656_v27 = vld [vmem:[#allocation13 + $0x258] sm:$0xf0]  ;;  %v11524_v12 = vld [vmem:[#allocation13 + $0x3ec] sm:$0xf] }
 0x708   : > { %8028 = vmatpush.bf16.msra.mxu1 %v10639_v21  ;;  %v10659_v9 = vor.u32 %v11472_v58, %v10656_v27  ;;  %v10640_v21 = vld [vmem:[#allocation13 + $0x238] sm:$0xf0]  ;;  %v11550_v58 = vld [vmem:[%s13581_s9 + $0xb8] sm:$0xff]  ;;  %v11537_v27 = vld [vmem:[%s13581_s9 + $0x50] sm:$0xff] }
 0x709   : > { %v7105_v44 = vadd.f32 %v7097_v14, %v7091_v4  ;;  %v10783_v14 = vor.u32 %v11506_v51, %v10782_v7  ;;  %v11502_v4 = vld [vmem:[#allocation13 + $0x334] sm:$0xf0]  ;;  %v10624_v31 = vld [vmem:[#allocation13 + $0x218] sm:$0xf0]  ;;  %v11538_v51 = vld [vmem:[%s13581_s9 + $0x58] sm:$0xff] }
 0x70a   : > { %v7073_v52 = vpop.f32.mrf.mxu2  ;;  %8063 = vmatpush.bf16.msra.mxu3 %v10579_v34  ;;  %v11468_v34 = vld [vmem:[#allocation13 + $0x22c] sm:$0xf]  ;;  %v10767_v59 = vor.u32 %v11502_v4, %v10766_v20  ;;  %v10627_v23 = vor.u32 %v11464_v45, %v10624_v31  ;;  %v11540_v38 = vld [vmem:[%s13581_s9 + $0x68] sm:$0xff] }
 0x70b   : > { %v7109_v16 = vmax.f32 %v7105_v44, 0.0  ;;  %v10643_v42 = vor.u32 %v11468_v34, %v10640_v21  ;;  %v11498_v44 = vld [vmem:[#allocation13 + $0x314] sm:$0xf0]  ;;  %v10864_v52 = vld [vmem:[#allocation13 + $0x3f8] sm:$0xf0] }
 0x70c   : > { %8029 = vmatpush.bf16.msra.mxu1 %v10623_v26  ;;  %v10751_v1 = vor.u32 %v11498_v44, %v10750_v60  ;;  %v10848_v26 = vld [vmem:[#allocation13 + $0x3d8] sm:$0xf0]  ;;  %v13494_v60 = vld [vmem:[#allocation14] sm:$0xf] }
 0x70d   : > { %v13417_v63 = vpack.c.bf16 %v7109_v16, %v7109_v16  ;;  %v10867_v16 = vor.u32 %v11524_v12, %v10864_v52  ;;  %v11536_v34 = vld [vmem:[%s13581_s9 + $0x48] sm:$0xff]  ;;  %v7884_v31 = vperm.slane %v13494_v60, 0  ;;  %v11546_v52 = vld [vmem:[%s13581_s9 + $0x98] sm:$0xff] }
 0x70e   : > { %8064 = vmatpush.bf16.msra.mxu3 %v10563_v37  ;;  %v11520_v37 = vld [vmem:[#allocation13 + $0x3cc] sm:$0xf]  ;;  %v11548_v21 = vld [vmem:[%s13581_s9 + $0xa8] sm:$0xff] }
 0x70f   : > { %7939 = vmatmul.bf16.vlgmr.msra.gmra.mxu2 %v13417_v63  ;;  %8030 = vmatmul.bf16.vlgmr.msra.gmra.mxu1 %v13407_v28 }
 0x710   : > { %8035 = vmatpush.bf16.msra.mxu2 %v10863_v10  ;;  %8074 = vmatpush.bf16.msrb.mxu1 %v10739_v48  ;;  %v11516_v10 = vld [vmem:[#allocation13 + $0x3ac] sm:$0xf] }
 0x711   : > { %v10835_v43 = vor.u32 %v11516_v10, %v10832_v0  ;;  %v11512_v48 = vld [vmem:[#allocation13 + $0x38c] sm:$0xf]  ;;  %v11544_v10 = vld [vmem:[%s13581_s9 + $0x88] sm:$0xff] }
 0x712   : > { %8065 = vmatpush.bf16.msra.mxu3 %v10547_v15  ;;  %v10819_v8 = vor.u32 %v11512_v48, %v10816_v62  ;;  %v10803_v15 = vor.u32 %v11508_v18, %v10800_v40  ;;  %v11543_v62 = vld [vmem:[%s13581_s9 + $0x80] sm:$0xff] }
 0x714   : > { %8036 = vmatpush.bf16.msra.mxu2 %v10847_v22  ;;  %8075 = vmatpush.bf16.msrb.mxu1 %v10723_v3  ;;  %v11504_v22 = vld [vmem:[#allocation13 + $0x34c] sm:$0xf] }
 0x715   : > { %v10787_v5 = vor.u32 %v11504_v22, %v10784_v17  ;;  %v11500_v3 = vld [vmem:[#allocation13 + $0x32c] sm:$0xf]  ;;  %v11557_v22 = vld [vmem:[%s13581_s9 + $0xf0] sm:$0xff] }
 0x716   : > { %8066 = vmatpush.bf16.msra.mxu3 %v10531_v56  ;;  %v10771_v33 = vor.u32 %v11500_v3, %v10768_v35 }
 0x718   : > { %8037 = vmatpush.bf16.msra.mxu2 %v10831_v54  ;;  %8076 = vmatpush.bf16.msrb.mxu1 %v10707_v29  ;;  %v11533_v29 = vld [vmem:[%s13581_s9 + $0x30] sm:$0xff] }
 0x719   : > { %8366 = vmatpush.bf16.msrb.mxu0 %v11533_v29 }
 0x71a   : > { %8067 = vmatpush.bf16.msra.mxu3 %v10515_v39  ;;  %v11530_v39 = vld [vmem:[%s13581_s9 + $0x18] sm:$0xff] }
 0x71c   : > { %8038 = vmatpush.bf16.msra.mxu2 %v10815_v47  ;;  %8077 = vmatpush.bf16.msrb.mxu1 %v10691_v25  ;;  %v11542_v47 = vld [vmem:[%s13581_s9 + $0x78] sm:$0xff] }
 0x71d   : > { %8367 = vmatpush.bf16.msrb.mxu0 %v11532_v32 }
 0x71e   : > { %8068 = vmatpush.bf16.msra.mxu3 %v10499_v50  ;;  %v11527_v50 = vld [vmem:[%s13581_s9] sm:$0xff] }
 0x71f   : > { %7991 = vmatmul.bf16.vlgmr.msrb.gmra.mxu2 %v13417_v63 }
 0x720   : > { %8039 = vmatpush.bf16.msra.mxu2 %v10799_v13  ;;  %8078 = vmatpush.bf16.msrb.mxu1 %v10675_v19  ;;  %v11539_v13 = vld [vmem:[%s13581_s9 + $0x60] sm:$0xff] }
 0x721   : > { %8069 = vmatmul.bf16.vlgmr.msra.gmra.mxu3 %v13398_v61  ;;  %v10851_v61 = vor.u32 %v11520_v37, %v10848_v26 }
 0x722   : > { %8378 = vmatpush.bf16.msrb.mxu3 %v11542_v47  ;;  %v11552_v47 = vld [vmem:[%s13581_s9 + $0xc8] sm:$0xff] }
 0x724   : > { %8040 = vmatpush.bf16.msra.mxu2 %v10783_v14  ;;  %8079 = vmatpush.bf16.msrb.mxu1 %v10659_v9  ;;  %v11549_v14 = vld [vmem:[%s13581_s9 + $0xb0] sm:$0xff] }
 0x726   : > { %8379 = vmatpush.bf16.msrb.mxu3 %v11541_v41 }
 0x728   : > { %8041 = vmatpush.bf16.msra.mxu2 %v10767_v59  ;;  %8080 = vmatpush.bf16.msrb.mxu1 %v10643_v42  ;;  %v11535_v59 = vld [vmem:[%s13581_s9 + $0x40] sm:$0xff] }
 0x729   : > { %v11547_v42 = vld [vmem:[%s13581_s9 + $0xa0] sm:$0xff] }
 0x72a   : > { %8380 = vmatpush.bf16.msrb.mxu3 %v11540_v38 }
 0x72c   : > { %8042 = vmatpush.bf16.msra.mxu2 %v10751_v1  ;;  %8081 = vmatpush.bf16.msrb.mxu1 %v10627_v23  ;;  %v11545_v23 = vld [vmem:[%s13581_s9 + $0x90] sm:$0xff] }
 0x72e   : > { %8381 = vmatpush.bf16.msrb.mxu3 %v11539_v13  ;;  %v7887_v13 = vperm.slane %v13494_v60, 3 }
 0x72f   : > { %8043 = vmatmul.bf16.vlgmr.msra.gmra.mxu2 %v13417_v63  ;;  %8082 = vmatmul.bf16.vlgmr.msrb.gmra.mxu1 %v13407_v28  ;;  %v10752_v28 = vld [vmem:[#allocation13 + $0x318] sm:$0xf0] }
 0x730   : > { %8087 = vmatpush.bf16.msrb.mxu2 %v10867_v16  ;;  %v10755_v56 = vor.u32 %v11496_v24, %v10752_v28  ;;  %8391 = vmatpush.bf16.msra.mxu1 %v11550_v58 }
 0x732   : > { %8382 = vmatpush.bf16.msrb.mxu3 %v11538_v51 }
 0x734   : > { %8088 = vmatpush.bf16.msrb.mxu2 %v10851_v61  ;;  %8392 = vmatpush.bf16.msra.mxu1 %v11549_v14 }
 0x736   : > { %8383 = vmatpush.bf16.msrb.mxu3 %v11537_v27 }
 0x738   : > { %8089 = vmatpush.bf16.msrb.mxu2 %v10835_v43  ;;  %8393 = vmatpush.bf16.msra.mxu1 %v11548_v21 }
 0x73a   : > { %8384 = vmatpush.bf16.msrb.mxu3 %v11536_v34 }
 0x73c   : > { %8090 = vmatpush.bf16.msrb.mxu2 %v10819_v8  ;;  %8394 = vmatpush.bf16.msra.mxu1 %v11547_v42  ;;  %v11558_v8 = vld [vmem:[%s13581_s9 + $0xf8] sm:$0xff] }
 0x73e   : > { %8385 = vmatpush.bf16.msrb.mxu3 %v11535_v59 }
 0x73f   : > { %v13425_v2 = vpop.f32.mrf.mxu0 }
 0x740   : > { %8091 = vmatpush.bf16.msrb.mxu2 %v10803_v15  ;;  %8395 = vmatpush.bf16.msra.mxu1 %v11546_v52  ;;  %v7902_v1 = vadd.f32 %v13425_v2, %v7884_v31  ;;  %v7885_v15 = vperm.slane %v13494_v60, 1  ;;  %v8172_v31 = vld [vmem:[#allocation16] sm:$0x1] }
 0x744   : > { %8092 = vmatpush.bf16.msrb.mxu2 %v10787_v5  ;;  %8396 = vmatpush.bf16.msra.mxu1 %v11545_v23  ;;  %v11556_v5 = vld [vmem:[%s13581_s9 + $0xe8] sm:$0xff] }
 0x747   : > { %v7903_v54 = vpop.f32.mrf.mxu0 }
 0x748   : > { %8093 = vmatpush.bf16.msrb.mxu2 %v10771_v33  ;;  %8397 = vmatpush.bf16.msra.mxu1 %v11544_v10  ;;  %v11555_v33 = vld [vmem:[%s13581_s9 + $0xe0] sm:$0xff] }
 0x74c   : > { %8094 = vmatpush.bf16.msrb.mxu2 %v10755_v56  ;;  %8398 = vmatpush.bf16.msra.mxu1 %v11543_v62  ;;  %v11554_v56 = vld [vmem:[%s13581_s9 + $0xd8] sm:$0xff] }
 0x74f   : > { %8095 = vmatmul.bf16.vlgmr.msrb.gmra.mxu2 %v13417_v63  ;;  %v13428_v53 = vpop.f32.mrf.mxu0  ;;  %v11531_v63 = vld [vmem:[%s13581_s9 + $0x20] sm:$0xff] }
 0x750   : > { %8368 = vmatpush.bf16.msrb.mxu0 %v11531_v63  ;;  %8404 = vmatpush.bf16.msra.mxu2 %v11558_v8  ;;  %v7954_v3 = vadd.f32 %v13428_v53, %v7885_v15  ;;  %v11553_v53 = vld [vmem:[%s13581_s9 + $0xd0] sm:$0xff] }
 0x754   : > { %8369 = vmatpush.bf16.msrb.mxu0 %v11530_v39  ;;  %8405 = vmatpush.bf16.msra.mxu2 %v11557_v22 }
 0x757   : > { %v7955_v30 = vpop.f32.mrf.mxu0 }
 0x758   : > { %8370 = vmatpush.bf16.msrb.mxu0 %v11529_v11  ;;  %8406 = vmatpush.bf16.msra.mxu2 %v11556_v5  ;;  %v7886_v30 = vperm.slane %v13494_v60, 2 }
 0x75c   : > { %8371 = vmatpush.bf16.msrb.mxu0 %v11528_v49  ;;  %8407 = vmatpush.bf16.msra.mxu2 %v11555_v33 }
 0x75f   : > { %v13442_v55 = vpop.f32.mrf.mxu0 }
 0x760   : > { %8372 = vmatpush.bf16.msrb.mxu0 %v11527_v50  ;;  %8408 = vmatpush.bf16.msra.mxu2 %v11554_v56  ;;  %v8006_v63 = vadd.f32 %v13442_v55, %v7886_v30 }
 0x764   : > { %v7914_v6 = vpop.f32.mrf.mxu3  ;;  %8409 = vmatpush.bf16.msra.mxu2 %v11553_v53 }
 0x765   : > { %v7915_v16 = vadd.f32 %v7914_v6, %v7902_v1 }
 0x767   : > { %v8007_v25 = vpop.f32.mrf.mxu0 }
 0x768   : > { %8410 = vmatpush.bf16.msra.mxu2 %v11552_v47  ;;  %v11551_v25 = vld [vmem:[%s13581_s9 + $0xc0] sm:$0xff] }
 0x76c   : > { %v7916_v36 = vpop.f32.mrf.mxu3  ;;  %v7927_v46 = vpop.f32.mrf.mxu1  ;;  %8411 = vmatpush.bf16.msra.mxu2 %v11551_v25 }
 0x76d   : > { %v7928_v61 = vadd.f32 %v7927_v46, %v7915_v16 }
 0x774   : > { %v7929_v19 = vpop.f32.mrf.mxu1  ;;  %v7966_v7 = vpop.f32.mrf.mxu3 }
 0x775   : > { %v7967_v35 = vadd.f32 %v7966_v7, %v7954_v3 }
 0x77c   : > { %v7968_v9 = vpop.f32.mrf.mxu3  ;;  %v7979_v20 = vpop.f32.mrf.mxu1 }
 0x77d   : > { %v7980_v24 = vadd.f32 %v7979_v20, %v7967_v35 }
 0x77f   : > { %v13480_v4 = vpop.f32.mrf.mxu0 }
 0x780   : > { %v8058_v19 = vadd.f32 %v13480_v4, %v7887_v13 }
 0x784   : > { %v7981_v44 = vpop.f32.mrf.mxu1  ;;  %v8018_v45 = vpop.f32.mrf.mxu3 }
 0x785   : > { %v8019_v11 = vadd.f32 %v8018_v45, %v8006_v63 }
 0x787   : > { %v8059_v12 = vpop.f32.mrf.mxu0 }
 0x78c   : > { %v8020_v37 = vpop.f32.mrf.mxu3  ;;  %v8031_v26 = vpop.f32.mrf.mxu1 }
 0x78d   : > { %v8032_v41 = vadd.f32 %v8031_v26, %v8019_v11 }
 0x792   : > { %v7940_v0 = vpop.f32.mrf.mxu2 }
 0x793   : > { %v7941_v43 = vadd.f32 %v7940_v0, %v7928_v61 }
 0x794   : > { %v8033_v40 = vpop.f32.mrf.mxu1 }
 0x795   : > { %v8100_v48 = vmax.f32 %v7941_v43, 0.0 }
 0x797   : > { %v8104_v18 = vpack.c.bf16 %v8100_v48, %v8100_v48 }
 0x799   : > { %8373 = vmatmul.bf16.vlgmr.msrb.gmra.mxu0 %v8104_v18 }
 0x79a   : > { %v7942_v17 = vpop.f32.mrf.mxu2 }
 0x7a2   : > { %v7992_v28 = vpop.f32.mrf.mxu2 }
 0x7a3   : > { %v7993_v2 = vadd.f32 %v7992_v28, %v7980_v24 }
 0x7a4   : > { %v8070_v57 = vpop.f32.mrf.mxu3 }
 0x7a5   : > { %v8101_v54 = vmax.f32 %v7993_v2, 0.0  ;;  %v8071_v7 = vadd.f32 %v8070_v57, %v8058_v19 }
 0x7a7   : > { %v8105_v29 = vpack.c.bf16 %v8101_v54, %v8101_v54 }
 0x7a9   : > { %8386 = vmatmul.bf16.vlgmr.msrb.gmra.mxu3 %v8105_v29 }
 0x7aa   : > { %v7994_v32 = vpop.f32.mrf.mxu2 }
 0x7ac   : > { %v8072_v6 = vpop.f32.mrf.mxu3  ;;  %v8083_v39 = vpop.f32.mrf.mxu1 }
 0x7ad   : > { %v8084_v51 = vadd.f32 %v8083_v39, %v8071_v7 }
 0x7b2   : > { %v8044_v36 = vpop.f32.mrf.mxu2 }
 0x7b3   : > { %v8045_v46 = vadd.f32 %v8044_v36, %v8032_v41 }
 0x7b4   : > { %v8085_v38 = vpop.f32.mrf.mxu1 }
 0x7b5   : > { %v8102_v49 = vmax.f32 %v8045_v46, 0.0 }
 0x7b7   : > { %v8106_v50 = vpack.c.bf16 %v8102_v49, %v8102_v49 }
 0x7b9   : > { %8399 = vmatmul.bf16.vlgmr.msra.gmra.mxu1 %v8106_v50 }
 0x7ba   : > { %v8046_v55 = vpop.f32.mrf.mxu2 }
 0x7d2   : > { %v8096_v58 = vpop.f32.mrf.mxu2 }
 0x7d3   : > { %v8097_v27 = vadd.f32 %v8096_v58, %v8084_v51 }
 0x7d5   : > { %v8103_v14 = vmax.f32 %v8097_v27, 0.0 }
 0x7d7   : > { %v8107_v9 = vpack.c.bf16 %v8103_v14, %v8103_v14 }
 0x7d9   : > { %8412 = vmatmul.bf16.vlgmr.msra.gmra.mxu2 %v8107_v9 }
 0x7da   : > { %v8098_v20 = vpop.f32.mrf.mxu2 }
 0x816   : > { %v8374_v34 = vpop.f32.mrf.mxu0 }
 0x817   : > { %v8375_v60 = vadd.f32 %v8374_v34, %v8172_v31 }
 0x81e   : > { %v8376_v21 = vpop.f32.mrf.mxu0 }
 0x82c   : > { %v8387_v59 = vpop.f32.mrf.mxu3 }
 0x82d   : > { %v8388_v4 = vadd.f32 %v8387_v59, %v8375_v60 }
 0x834   : > { %v8389_v42 = vpop.f32.mrf.mxu3 }
 0x836   : > { %v8400_v44 = vpop.f32.mrf.mxu1 }
 0x837   : > { %v8401_v12 = vadd.f32 %v8400_v44, %v8388_v4 }
 0x83e   : > { %v8402_v45 = vpop.f32.mrf.mxu1 }
 0x85c   : > { %v8413_v52 = vpop.f32.mrf.mxu2 }
 0x85d   : > { %v8414_v1 = vadd.f32 %v8413_v52, %v8401_v12 }
 0x85f   : > { %8418 = vst.msk [vmem:[%s517_s13] sm:$0x1] %vm8417_vm11, %v8414_v1 }
 0x860   : > { %12003 = shalt.err (!%p12000_p8)
}
 0x861   : > { %11599 = dma.vmem_to_hbm [thread:$0]  (%p12175_p5), %s8431_s24, 16, %s8433_s22, %s8420_s2  }
 0x864   : > { %v8415_v23 = vpop.f32.mrf.mxu2 }
 0x865 PF: > { %p11651_p9 = scmp.ge.s32.totalorder %s12058_s20, 2  ;;  %s8444_s26 = sand.u32 1, %s12046_s17  }
 0x866   : > { %s8445_s1 = scalar_lea.sflag [#allocation4], %s8444_s26 }
 0x867   : > { %p11630_p10 = pnand %p11651_p9, %p12179_p6 }
 0x869   : > { %p11631_p11 = pneg %p11630_p10 }
 0x86b   : > { %12041 = dma.done.wait (%p11631_p11), %s8445_s1, 16  }
 0x86c   : > { %12043 = vsyncadd (%p11631_p11), %s8445_s1, 4294967280  ;;  %s13652_s20 = sld [smem:[#allocation25_spill]]  ;;  %s13655_s17 = smov %s12050_s18 }
 0x86d   : > { %s13653_s29 = sld [smem:[#allocation24_spill]] }
 0x86e   : > { %s13654_s19 = sld [smem:[#allocation26_spill]] }
 0x872   : > { %p26_p12 = scmp.ge.s32.totalorder %s13652_s20, 4  }
 0x873   : > { %s13656_s18 = smov %s13653_s29 }
 0x874   :  { %28 = sbr.rel (!%p26_p12) target bundleno = 13 (0xd), region = 146 }
 0x879   :  { %8450 = vsyncpa [#allocation3], 1 }
 0x87a   :  { %8452 = vsyncpa [#allocation3 + $0x1], 1 }
 0x87b   :  { %8453 = vsyncpa [#allocation6], 1 }
 0x87c   :  { %8454 = vsyncpa [#allocation9], 1 }
 0x87d   :  { %8455 = vsyncpa [#allocation12], 1 }
 0x87e   :  { %8456 = vsyncpa [#allocation15], 1 }
 0x87f   :  { %8457 = vsyncpa [#allocation4], 1 }
 0x880   :  { %8459 = vsyncpa [#allocation4 + $0x1], 1 }

</bundles_post_ra>
